<compile_context>
chip_gen: v7x
topology: tpu7x:2x2x1
jax: 0.10.0
libtpu: 0.0.40
codegen_flags: <defaults>
</compile_context>

<pallas_src>
import functools

import numpy as np
import jax
import jax.numpy as jnp
from jax import lax
from jax.experimental import pallas as pl
from jax.experimental.pallas import tpu as pltpu

# ---- model hyper-parameters (from the PyTorch script) ----
n_embd = 64
block_size = 32
n_head = 4
n_layer = 4
vocab_size = 65                    # len(sorted(set(text))) -- synthetic choice
head_size = n_embd // n_head
VPAD = 128                         # lane-dense padded lm_head / one-hot width
LN_EPS = 1e-5
NEG_INF = -1e30


def _layernorm(x, gamma, beta):
    mu = jnp.mean(x, axis=-1, keepdims=True)
    var = jnp.mean((x - mu) ** 2, axis=-1, keepdims=True)
    return (x - mu) * lax.rsqrt(var + LN_EPS) * gamma + beta


# ---------------------------------------------------------------------------
# Fused kernel:
#   x = onehot(idx) @ tok_emb + pos_emb
#   4x [x + SA(LN1(x)); x + FF(LN2(x))]  ->  LN_f  ->  lm_head (padded to 128)
# ---------------------------------------------------------------------------
def gpt_kernel(idx_ref, tokemb_ref, posemb_ref, bias_ref, lnv_ref, bf1_ref,
               wqkv_ref, wo_ref, w1_ref, w2_ref, lnf_ref, lmw_ref, lmb_ref,
               o_ref, *, batch, seq_len):
    BT = batch * seq_len
    C = n_embd
    bf16 = jnp.bfloat16

    # ---- token + position embeddings (one-hot matmul; no gather needed) ----
    cols = lax.broadcasted_iota(jnp.int32, (BT, VPAD), 1)
    onehot = jnp.where(cols == idx_ref[...], 1.0, 0.0).astype(bf16)   # (BT, VPAD)
    x = jnp.dot(onehot, tokemb_ref[...],
                preferred_element_type=jnp.float32)                   # (BT, C) f32
    pos = posemb_ref[0:seq_len, :]                                    # (T, C) f32
    x = x + jnp.concatenate([pos] * batch, axis=0)                    # (BT, C)

    bias = bias_ref[...]                                              # (BT, BT) f32

    for l in range(n_layer):                       # static unroll; weights in VMEM
        lnv = lnv_ref[l]                           # (6, C): ln1_g, ln1_b, bo, ln2_g, ln2_b, bf2

        # ---- LayerNorm 1 + multi-head causal self-attention ----
        h = _layernorm(x, lnv[0:1], lnv[1:2]).astype(bf16)
        # fused QKV; wq was pre-scaled by n_embd**-0.5 (exact power of 2)
        qkv = jnp.dot(h, wqkv_ref[l],
                      preferred_element_type=jnp.float32).astype(bf16)  # (BT, 3C)
        wo_l = wo_ref[l]                                                # (C, C) bf16

        sa = None
        for hh in range(n_head):
            lo, hi = hh * head_size, (hh + 1) * head_size
            q_h = qkv[:, lo:hi]
            k_h = qkv[:, C + lo:C + hi]
            v_h = qkv[:, 2 * C + lo:2 * C + hi]
            # q @ k^T without an XLU transpose: contract dim 1 of both operands.
            wei = lax.dot_general(q_h, k_h, (((1,), (1,)), ((), ())),
                                  preferred_element_type=jnp.float32) + bias
            # No row-max subtraction: scores are bounded here and masked entries
            # (-1e30) underflow exp() cleanly to 0.  Re-add the max if this
            # kernel is generalized to unbounded activations.
            e = jnp.exp(wei)
            p = (e * pl.reciprocal(jnp.sum(e, axis=-1, keepdims=True),
                                   approx=True)).astype(bf16)
            ho = jnp.dot(p, v_h, preferred_element_type=jnp.float32).astype(bf16)
            # Fold the head-concatenation directly into the Wo contraction.
            contrib = jnp.dot(ho, wo_l[lo:hi, :],
                              preferred_element_type=jnp.float32)
            sa = contrib if sa is None else sa + contrib
        x = x + sa + lnv[2:3]                      # + attention proj bias

        # ---- LayerNorm 2 + feed-forward ----
        h2 = _layernorm(x, lnv[3:4], lnv[4:5]).astype(bf16)
        ff = jnp.maximum(
            jnp.dot(h2, w1_ref[l], preferred_element_type=jnp.float32)
            + bf1_ref[l], 0.0).astype(bf16)
        x = x + jnp.dot(ff, w2_ref[l], preferred_element_type=jnp.float32) + lnv[5:6]
        # dropout(p=0.0) is an identity -> omitted.

    # ---- final LayerNorm + lm_head (lane-dense, padded to VPAD) ----
    lnf = lnf_ref[...]
    h = _layernorm(x, lnf[0:1], lnf[1:2]).astype(bf16)
    o_ref[...] = (jnp.dot(h, lmw_ref[...], preferred_element_type=jnp.float32)
                  + lmb_ref[...])


def gpt_forward(idx, params):
    B, T = idx.shape
    BT = B * T
    idx_flat = idx.reshape(BT, 1).astype(jnp.int32)

    # Host-built additive attention bias (constant-folded under jit; B,T static):
    # same-batch block-diagonal AND causal within each block.
    r = np.arange(BT)
    ok = ((r[:, None] // T) == (r[None, :] // T)) & ((r[None, :] % T) <= (r[:, None] % T))
    bias = jnp.asarray(np.where(ok, 0.0, NEG_INF).astype(np.float32))

    vmem = pl.BlockSpec(memory_space=pltpu.MemorySpace.VMEM)
    args = (idx_flat, params["tok_emb"], params["pos_emb"], bias,
            params["ln_vecs"], params["bf1"], params["wqkv"], params["wo"],
            params["w1"], params["w2"], params["lnf"], params["lm_w"],
            params["lm_b"])
    logits_pad = pl.pallas_call(
        functools.partial(gpt_kernel, batch=B, seq_len=T),
        out_shape=jax.ShapeDtypeStruct((BT, VPAD), jnp.float32),
        in_specs=[vmem] * len(args),
        out_specs=vmem,
    )(*args)

    logits = logits_pad[:, :vocab_size].reshape(B, T, vocab_size)
    # TODO(synk): cross-entropy loss path (targets is not None) not implemented.
    return logits, None


# ---------------------------------------------------------------------------
# Parameter init (deterministic, synthetic).  Per-layer weights are stacked
# along a leading layer axis; matmul weights are stored bf16; small per-layer
# vectors are packed into one tensor to cut input DMA count.
# ---------------------------------------------------------------------------
def init_params(key):
    ks = jax.random.split(key, 12)
    init = lambda k, shape: (0.02 * jax.random.normal(k, shape)).astype(jnp.float32)
    L, C, H4 = n_layer, n_embd, 4 * n_embd
    scale = float(n_embd) ** -0.5          # 1/8, exactly representable

    tok = init(ks[0], (vocab_size, C))
    tok_pad = jnp.zeros((VPAD, C), jnp.float32).at[:vocab_size].set(tok)

    wq = init(ks[3], (L, C, C)) * scale    # fold attention scale into wq
    wk = init(ks[4], (L, C, C))
    wv = init(ks[5], (L, C, C))
    wqkv = jnp.concatenate([wq, wk, wv], axis=-1)            # (L, C, 3C)

    lm_w = jnp.zeros((C, VPAD), jnp.float32).at[:, :vocab_size].set(
        init(ks[2], (C, vocab_size)))
    lm_b = jnp.zeros((1, VPAD), jnp.float32).at[0, :vocab_size].set(
        init(ks[11], (vocab_size,)))

    # packed per-layer vectors: [ln1_g, ln1_b, bo, ln2_g, ln2_b, bf2]
    ln_vecs = jnp.stack([
        jnp.ones((L, C), jnp.float32),
        jnp.zeros((L, C), jnp.float32),
        init(ks[9], (L, C)),
        jnp.ones((L, C), jnp.float32),
        jnp.zeros((L, C), jnp.float32),
        init(ks[10], (L, C)),
    ], axis=1)                                               # (L, 6, C)

    return {
        "tok_emb": tok_pad.astype(jnp.bfloat16),             # (VPAD, C)
        "pos_emb": init(ks[1], (block_size, C)),             # f32
        "wqkv": wqkv.astype(jnp.bfloat16),
        "wo": init(ks[6], (L, C, C)).astype(jnp.bfloat16),
        "w1": init(ks[7], (L, C, H4)).astype(jnp.bfloat16),
        "w2": init(ks[8], (L, H4, C)).astype(jnp.bfloat16),
        "bf1": init(ks[9], (L, 1, H4)),                      # f32 bias
        "ln_vecs": ln_vecs,                                  # f32
        "lnf": jnp.stack([jnp.ones((C,), jnp.float32),
                          jnp.zeros((C,), jnp.float32)]),    # (2, C)
        "lm_w": lm_w.astype(jnp.bfloat16),
        "lm_b": lm_b,                                        # f32
    }


# ---------------------------------------------------------------------------
# Pure-JAX reference (f32 math, same bf16-stored weights) for verification
# ---------------------------------------------------------------------------
def gpt_forward_ref(idx, params):
    T = idx.shape[1]
    f32 = lambda a: a.astype(jnp.float32)
    x = f32(params["tok_emb"])[:vocab_size][idx] + params["pos_emb"][:T]
    causal = jnp.tril(jnp.ones((T, T), bool))
    for l in range(n_layer):
        lnv = params["ln_vecs"][l]
        h = _layernorm(x, lnv[0], lnv[1])
        qkv = h @ f32(params["wqkv"][l])        # wq already carries 1/sqrt(C)
        q, k, v = jnp.split(qkv, 3, axis=-1)
        outs = []
        for hh in range(n_head):
            sl = slice(hh * head_size, (hh + 1) * head_size)
            wei = q[..., sl] @ jnp.swapaxes(k[..., sl], -1, -2)
            wei = jnp.where(causal, wei, -jnp.inf)
            wei = jax.nn.softmax(wei, axis=-1)
            outs.append(wei @ v[..., sl])
        sa = jnp.concatenate(outs, -1) @ f32(params["wo"][l]) + lnv[2]
        x = x + sa
        h2 = _layernorm(x, lnv[3], lnv[4])
        ff = jnp.maximum(h2 @ f32(params["w1"][l]) + params["bf1"][l][0], 0.0)
        x = x + ff @ f32(params["w2"][l]) + lnv[5]
    h = _layernorm(x, params["lnf"][0], params["lnf"][1])
    return h @ f32(params["lm_w"])[:, :vocab_size] + params["lm_b"][0, :vocab_size]


if __name__ == "__main__":
    key = jax.random.PRNGKey(0)
    pkey, ikey = jax.random.split(key)
    params = init_params(pkey)

    B, T = 2, block_size
    idx = jax.random.randint(ikey, (B, T), 0, vocab_size, dtype=jnp.int32)

    logits, loss = jax.jit(gpt_forward)(idx, params)
    logits = jax.block_until_ready(logits)
    assert logits.shape == (B, T, vocab_size)

    ref = gpt_forward_ref(idx, params)
    max_err = float(jnp.max(jnp.abs(logits - ref)))
    assert jnp.allclose(logits, ref, atol=1e-2, rtol=1e-2), (
        "mismatch vs reference, max abs diff = %e" % max_err)

    print("KERNEL_OK")
</pallas_src>

<mosaic_0001>
module attributes {stable_mosaic.version = 11 : i64} {
  func.func @gpt_kernel(%arg0: memref<64x1xi32, #tpu.memory_space<vmem>>, %arg1: memref<128x64xbf16, #tpu.memory_space<vmem>>, %arg2: memref<32x64xf32, #tpu.memory_space<vmem>>, %arg3: memref<64x64xf32, #tpu.memory_space<vmem>>, %arg4: memref<4x6x64xf32, #tpu.memory_space<vmem>>, %arg5: memref<4x1x256xf32, #tpu.memory_space<vmem>>, %arg6: memref<4x64x192xbf16, #tpu.memory_space<vmem>>, %arg7: memref<4x64x64xbf16, #tpu.memory_space<vmem>>, %arg8: memref<4x64x256xbf16, #tpu.memory_space<vmem>>, %arg9: memref<4x256x64xbf16, #tpu.memory_space<vmem>>, %arg10: memref<2x64xf32, #tpu.memory_space<vmem>>, %arg11: memref<64x128xbf16, #tpu.memory_space<vmem>>, %arg12: memref<1x128xf32, #tpu.memory_space<vmem>>, %arg13: memref<64x128xf32, #tpu.memory_space<vmem>>) attributes {dimension_semantics = [], scalar_prefetch = 0 : i64, scratch_operands = 0 : i64, tpu.core_type = #tpu.core_type<tc>} {
    %0 = tpu.iota {dimensions = array<i32: 1>} : vector<64x128xi32>
    %c0 = arith.constant 0 : index
    %c0_0 = arith.constant 0 : index
    %1 = vector.load %arg0[%c0, %c0_0] : memref<64x1xi32, #tpu.memory_space<vmem>>, vector<64x1xi32>
    %2 = vector.broadcast %1 : vector<64x1xi32> to vector<64x128xi32>
    %3 = arith.cmpi eq, %0, %2 : vector<64x128xi32>
    %cst = arith.constant 1.000000e+00 : f32
    %cst_1 = arith.constant 0.000000e+00 : f32
    %4 = vector.broadcast %cst : f32 to vector<64x128xf32>
    %5 = vector.broadcast %cst_1 : f32 to vector<64x128xf32>
    %6 = arith.select %3, %4, %5 : vector<64x128xi1>, vector<64x128xf32>
    %7 = arith.truncf %6 : vector<64x128xf32> to vector<64x128xbf16>
    %c0_2 = arith.constant 0 : index
    %c0_3 = arith.constant 0 : index
    %8 = vector.load %arg1[%c0_2, %c0_3] : memref<128x64xbf16, #tpu.memory_space<vmem>>, vector<128x64xbf16>
    %cst_4 = arith.constant dense<0.000000e+00> : vector<64x64xf32>
    %9 = tpu.matmul %7, %8, %cst_4 {dimension_numbers = #tpu.dot_dimension_numbers<[1], [0], [0], [1], [0, 0, 1, 1], [], []>} : vector<64x128xbf16>, vector<128x64xbf16>, vector<64x64xf32> -> vector<64x64xf32>
    %c0_5 = arith.constant 0 : index
    %c0_6 = arith.constant 0 : index
    %10 = vector.load %arg2[%c0_5, %c0_6] : memref<32x64xf32, #tpu.memory_space<vmem>>, vector<32x64xf32>
    %11 = tpu.concatenate %10, %10 in 0 : vector<32x64xf32>, vector<32x64xf32> -> vector<64x64xf32>
    %12 = arith.addf %9, %11 : vector<64x64xf32>
    %c0_7 = arith.constant 0 : index
    %c0_8 = arith.constant 0 : index
    %13 = vector.load %arg3[%c0_7, %c0_8] : memref<64x64xf32, #tpu.memory_space<vmem>>, vector<64x64xf32>
    %c0_9 = arith.constant 0 : index
    %c0_10 = arith.constant 0 : index
    %c0_11 = arith.constant 0 : index
    %14 = vector.load %arg4[%c0_9, %c0_10, %c0_11] : memref<4x6x64xf32, #tpu.memory_space<vmem>>, vector<1x6x64xf32>
    %15 = vector.shape_cast %14 : vector<1x6x64xf32> to vector<6x64xf32>
    %16 = vector.extract_strided_slice %15 {offsets = [0, 0], sizes = [1, 64], strides = [1, 1]} : vector<6x64xf32> to vector<1x64xf32>
    %17 = vector.extract_strided_slice %15 {offsets = [1, 0], sizes = [1, 64], strides = [1, 1]} : vector<6x64xf32> to vector<1x64xf32>
    %cst_12 = arith.constant dense<0.000000e+00> : vector<64xf32>
    %18 = vector.multi_reduction <add>, %12, %cst_12 [1] : vector<64x64xf32> to vector<64xf32>
    %19 = vector.shape_cast %18 : vector<64xf32> to vector<64x1xf32>
    %cst_13 = arith.constant 6.400000e+01 : f32
    %20 = vector.broadcast %cst_13 : f32 to vector<64x1xf32>
    %21 = arith.divf %19, %20 : vector<64x1xf32>
    %22 = vector.broadcast %21 : vector<64x1xf32> to vector<64x64xf32>
    %23 = arith.subf %12, %22 : vector<64x64xf32>
    %24 = arith.mulf %23, %23 : vector<64x64xf32>
    %cst_14 = arith.constant dense<0.000000e+00> : vector<64xf32>
    %25 = vector.multi_reduction <add>, %24, %cst_14 [1] : vector<64x64xf32> to vector<64xf32>
    %26 = vector.shape_cast %25 : vector<64xf32> to vector<64x1xf32>
    %cst_15 = arith.constant 6.400000e+01 : f32
    %27 = vector.broadcast %cst_15 : f32 to vector<64x1xf32>
    %28 = arith.divf %26, %27 : vector<64x1xf32>
    %29 = vector.broadcast %21 : vector<64x1xf32> to vector<64x64xf32>
    %30 = arith.subf %12, %29 : vector<64x64xf32>
    %cst_16 = arith.constant 9.99999974E-6 : f32
    %31 = vector.broadcast %cst_16 : f32 to vector<64x1xf32>
    %32 = arith.addf %28, %31 : vector<64x1xf32>
    %33 = math.rsqrt %32 : vector<64x1xf32>
    %34 = vector.broadcast %33 : vector<64x1xf32> to vector<64x64xf32>
    %35 = arith.mulf %30, %34 : vector<64x64xf32>
    %36 = vector.broadcast %16 : vector<1x64xf32> to vector<64x64xf32>
    %37 = arith.mulf %35, %36 : vector<64x64xf32>
    %38 = vector.broadcast %17 : vector<1x64xf32> to vector<64x64xf32>
    %39 = arith.addf %37, %38 : vector<64x64xf32>
    %40 = arith.truncf %39 : vector<64x64xf32> to vector<64x64xbf16>
    %c0_17 = arith.constant 0 : index
    %c0_18 = arith.constant 0 : index
    %c0_19 = arith.constant 0 : index
    %41 = vector.load %arg6[%c0_17, %c0_18, %c0_19] : memref<4x64x192xbf16, #tpu.memory_space<vmem>>, vector<1x64x192xbf16>
    %42 = vector.shape_cast %41 : vector<1x64x192xbf16> to vector<64x192xbf16>
    %cst_20 = arith.constant dense<0.000000e+00> : vector<64x192xf32>
    %43 = tpu.matmul %40, %42, %cst_20 {dimension_numbers = #tpu.dot_dimension_numbers<[1], [0], [0], [1], [0, 0, 1, 1], [], []>} : vector<64x64xbf16>, vector<64x192xbf16>, vector<64x192xf32> -> vector<64x192xf32>
    %44 = arith.truncf %43 : vector<64x192xf32> to vector<64x192xbf16>
    %c0_21 = arith.constant 0 : index
    %c0_22 = arith.constant 0 : index
    %c0_23 = arith.constant 0 : index
    %45 = vector.load %arg7[%c0_21, %c0_22, %c0_23] : memref<4x64x64xbf16, #tpu.memory_space<vmem>>, vector<1x64x64xbf16>
    %46 = vector.shape_cast %45 : vector<1x64x64xbf16> to vector<64x64xbf16>
    %47 = vector.extract_strided_slice %44 {offsets = [0, 0], sizes = [64, 16], strides = [1, 1]} : vector<64x192xbf16> to vector<64x16xbf16>
    %48 = vector.extract_strided_slice %44 {offsets = [0, 64], sizes = [64, 16], strides = [1, 1]} : vector<64x192xbf16> to vector<64x16xbf16>
    %49 = vector.extract_strided_slice %44 {offsets = [0, 128], sizes = [64, 16], strides = [1, 1]} : vector<64x192xbf16> to vector<64x16xbf16>
    %cst_24 = arith.constant dense<0.000000e+00> : vector<64x64xf32>
    %50 = tpu.matmul %47, %48, %cst_24 {dimension_numbers = #tpu.dot_dimension_numbers<[1], [1], [0], [0], [0, 0, 1, 0], [], []>} : vector<64x16xbf16>, vector<64x16xbf16>, vector<64x64xf32> -> vector<64x64xf32>
    %51 = arith.addf %50, %13 : vector<64x64xf32>
    %52 = math.exp %51 : vector<64x64xf32>
    %cst_25 = arith.constant dense<0.000000e+00> : vector<64xf32>
    %53 = vector.multi_reduction <add>, %52, %cst_25 [1] : vector<64x64xf32> to vector<64xf32>
    %54 = vector.shape_cast %53 : vector<64xf32> to vector<64x1xf32>
    %55 = tpu.reciprocal %54 {approx = true} : vector<64x1xf32> -> vector<64x1xf32>
    %56 = vector.broadcast %55 : vector<64x1xf32> to vector<64x64xf32>
    %57 = arith.mulf %52, %56 : vector<64x64xf32>
    %58 = arith.truncf %57 : vector<64x64xf32> to vector<64x64xbf16>
    %cst_26 = arith.constant dense<0.000000e+00> : vector<64x16xf32>
    %59 = tpu.matmul %58, %49, %cst_26 {dimension_numbers = #tpu.dot_dimension_numbers<[1], [0], [0], [1], [0, 0, 1, 1], [], []>} : vector<64x64xbf16>, vector<64x16xbf16>, vector<64x16xf32> -> vector<64x16xf32>
    %60 = arith.truncf %59 : vector<64x16xf32> to vector<64x16xbf16>
    %61 = vector.extract_strided_slice %46 {offsets = [0, 0], sizes = [16, 64], strides = [1, 1]} : vector<64x64xbf16> to vector<16x64xbf16>
    %cst_27 = arith.constant dense<0.000000e+00> : vector<64x64xf32>
    %62 = tpu.matmul %60, %61, %cst_27 {dimension_numbers = #tpu.dot_dimension_numbers<[1], [0], [0], [1], [0, 0, 1, 1], [], []>} : vector<64x16xbf16>, vector<16x64xbf16>, vector<64x64xf32> -> vector<64x64xf32>
    %63 = vector.extract_strided_slice %44 {offsets = [0, 16], sizes = [64, 16], strides = [1, 1]} : vector<64x192xbf16> to vector<64x16xbf16>
    %64 = vector.extract_strided_slice %44 {offsets = [0, 80], sizes = [64, 16], strides = [1, 1]} : vector<64x192xbf16> to vector<64x16xbf16>
    %65 = vector.extract_strided_slice %44 {offsets = [0, 144], sizes = [64, 16], strides = [1, 1]} : vector<64x192xbf16> to vector<64x16xbf16>
    %cst_28 = arith.constant dense<0.000000e+00> : vector<64x64xf32>
    %66 = tpu.matmul %63, %64, %cst_28 {dimension_numbers = #tpu.dot_dimension_numbers<[1], [1], [0], [0], [0, 0, 1, 0], [], []>} : vector<64x16xbf16>, vector<64x16xbf16>, vector<64x64xf32> -> vector<64x64xf32>
    %67 = arith.addf %66, %13 : vector<64x64xf32>
    %68 = math.exp %67 : vector<64x64xf32>
    %cst_29 = arith.constant dense<0.000000e+00> : vector<64xf32>
    %69 = vector.multi_reduction <add>, %68, %cst_29 [1] : vector<64x64xf32> to vector<64xf32>
    %70 = vector.shape_cast %69 : vector<64xf32> to vector<64x1xf32>
    %71 = tpu.reciprocal %70 {approx = true} : vector<64x1xf32> -> vector<64x1xf32>
    %72 = vector.broadcast %71 : vector<64x1xf32> to vector<64x64xf32>
    %73 = arith.mulf %68, %72 : vector<64x64xf32>
    %74 = arith.truncf %73 : vector<64x64xf32> to vector<64x64xbf16>
    %cst_30 = arith.constant dense<0.000000e+00> : vector<64x16xf32>
    %75 = tpu.matmul %74, %65, %cst_30 {dimension_numbers = #tpu.dot_dimension_numbers<[1], [0], [0], [1], [0, 0, 1, 1], [], []>} : vector<64x64xbf16>, vector<64x16xbf16>, vector<64x16xf32> -> vector<64x16xf32>
    %76 = arith.truncf %75 : vector<64x16xf32> to vector<64x16xbf16>
    %77 = vector.extract_strided_slice %46 {offsets = [16, 0], sizes = [16, 64], strides = [1, 1]} : vector<64x64xbf16> to vector<16x64xbf16>
    %cst_31 = arith.constant dense<0.000000e+00> : vector<64x64xf32>
    %78 = tpu.matmul %76, %77, %cst_31 {dimension_numbers = #tpu.dot_dimension_numbers<[1], [0], [0], [1], [0, 0, 1, 1], [], []>} : vector<64x16xbf16>, vector<16x64xbf16>, vector<64x64xf32> -> vector<64x64xf32>
    %79 = arith.addf %62, %78 : vector<64x64xf32>
    %80 = vector.extract_strided_slice %44 {offsets = [0, 32], sizes = [64, 16], strides = [1, 1]} : vector<64x192xbf16> to vector<64x16xbf16>
    %81 = vector.extract_strided_slice %44 {offsets = [0, 96], sizes = [64, 16], strides = [1, 1]} : vector<64x192xbf16> to vector<64x16xbf16>
    %82 = vector.extract_strided_slice %44 {offsets = [0, 160], sizes = [64, 16], strides = [1, 1]} : vector<64x192xbf16> to vector<64x16xbf16>
    %cst_32 = arith.constant dense<0.000000e+00> : vector<64x64xf32>
    %83 = tpu.matmul %80, %81, %cst_32 {dimension_numbers = #tpu.dot_dimension_numbers<[1], [1], [0], [0], [0, 0, 1, 0], [], []>} : vector<64x16xbf16>, vector<64x16xbf16>, vector<64x64xf32> -> vector<64x64xf32>
    %84 = arith.addf %83, %13 : vector<64x64xf32>
    %85 = math.exp %84 : vector<64x64xf32>
    %cst_33 = arith.constant dense<0.000000e+00> : vector<64xf32>
    %86 = vector.multi_reduction <add>, %85, %cst_33 [1] : vector<64x64xf32> to vector<64xf32>
    %87 = vector.shape_cast %86 : vector<64xf32> to vector<64x1xf32>
    %88 = tpu.reciprocal %87 {approx = true} : vector<64x1xf32> -> vector<64x1xf32>
    %89 = vector.broadcast %88 : vector<64x1xf32> to vector<64x64xf32>
    %90 = arith.mulf %85, %89 : vector<64x64xf32>
    %91 = arith.truncf %90 : vector<64x64xf32> to vector<64x64xbf16>
    %cst_34 = arith.constant dense<0.000000e+00> : vector<64x16xf32>
    %92 = tpu.matmul %91, %82, %cst_34 {dimension_numbers = #tpu.dot_dimension_numbers<[1], [0], [0], [1], [0, 0, 1, 1], [], []>} : vector<64x64xbf16>, vector<64x16xbf16>, vector<64x16xf32> -> vector<64x16xf32>
    %93 = arith.truncf %92 : vector<64x16xf32> to vector<64x16xbf16>
    %94 = vector.extract_strided_slice %46 {offsets = [32, 0], sizes = [16, 64], strides = [1, 1]} : vector<64x64xbf16> to vector<16x64xbf16>
    %cst_35 = arith.constant dense<0.000000e+00> : vector<64x64xf32>
    %95 = tpu.matmul %93, %94, %cst_35 {dimension_numbers = #tpu.dot_dimension_numbers<[1], [0], [0], [1], [0, 0, 1, 1], [], []>} : vector<64x16xbf16>, vector<16x64xbf16>, vector<64x64xf32> -> vector<64x64xf32>
    %96 = arith.addf %79, %95 : vector<64x64xf32>
    %97 = vector.extract_strided_slice %44 {offsets = [0, 48], sizes = [64, 16], strides = [1, 1]} : vector<64x192xbf16> to vector<64x16xbf16>
    %98 = vector.extract_strided_slice %44 {offsets = [0, 112], sizes = [64, 16], strides = [1, 1]} : vector<64x192xbf16> to vector<64x16xbf16>
    %99 = vector.extract_strided_slice %44 {offsets = [0, 176], sizes = [64, 16], strides = [1, 1]} : vector<64x192xbf16> to vector<64x16xbf16>
    %cst_36 = arith.constant dense<0.000000e+00> : vector<64x64xf32>
    %100 = tpu.matmul %97, %98, %cst_36 {dimension_numbers = #tpu.dot_dimension_numbers<[1], [1], [0], [0], [0, 0, 1, 0], [], []>} : vector<64x16xbf16>, vector<64x16xbf16>, vector<64x64xf32> -> vector<64x64xf32>
    %101 = arith.addf %100, %13 : vector<64x64xf32>
    %102 = math.exp %101 : vector<64x64xf32>
    %cst_37 = arith.constant dense<0.000000e+00> : vector<64xf32>
    %103 = vector.multi_reduction <add>, %102, %cst_37 [1] : vector<64x64xf32> to vector<64xf32>
    %104 = vector.shape_cast %103 : vector<64xf32> to vector<64x1xf32>
    %105 = tpu.reciprocal %104 {approx = true} : vector<64x1xf32> -> vector<64x1xf32>
    %106 = vector.broadcast %105 : vector<64x1xf32> to vector<64x64xf32>
    %107 = arith.mulf %102, %106 : vector<64x64xf32>
    %108 = arith.truncf %107 : vector<64x64xf32> to vector<64x64xbf16>
    %cst_38 = arith.constant dense<0.000000e+00> : vector<64x16xf32>
    %109 = tpu.matmul %108, %99, %cst_38 {dimension_numbers = #tpu.dot_dimension_numbers<[1], [0], [0], [1], [0, 0, 1, 1], [], []>} : vector<64x64xbf16>, vector<64x16xbf16>, vector<64x16xf32> -> vector<64x16xf32>
    %110 = arith.truncf %109 : vector<64x16xf32> to vector<64x16xbf16>
    %111 = vector.extract_strided_slice %46 {offsets = [48, 0], sizes = [16, 64], strides = [1, 1]} : vector<64x64xbf16> to vector<16x64xbf16>
    %cst_39 = arith.constant dense<0.000000e+00> : vector<64x64xf32>
    %112 = tpu.matmul %110, %111, %cst_39 {dimension_numbers = #tpu.dot_dimension_numbers<[1], [0], [0], [1], [0, 0, 1, 1], [], []>} : vector<64x16xbf16>, vector<16x64xbf16>, vector<64x64xf32> -> vector<64x64xf32>
    %113 = arith.addf %96, %112 : vector<64x64xf32>
    %114 = arith.addf %12, %113 : vector<64x64xf32>
    %115 = vector.extract_strided_slice %15 {offsets = [2, 0], sizes = [1, 64], strides = [1, 1]} : vector<6x64xf32> to vector<1x64xf32>
    %116 = vector.broadcast %115 : vector<1x64xf32> to vector<64x64xf32>
    %117 = arith.addf %114, %116 : vector<64x64xf32>
    %118 = vector.extract_strided_slice %15 {offsets = [3, 0], sizes = [1, 64], strides = [1, 1]} : vector<6x64xf32> to vector<1x64xf32>
    %119 = vector.extract_strided_slice %15 {offsets = [4, 0], sizes = [1, 64], strides = [1, 1]} : vector<6x64xf32> to vector<1x64xf32>
    %cst_40 = arith.constant dense<0.000000e+00> : vector<64xf32>
    %120 = vector.multi_reduction <add>, %117, %cst_40 [1] : vector<64x64xf32> to vector<64xf32>
    %121 = vector.shape_cast %120 : vector<64xf32> to vector<64x1xf32>
    %cst_41 = arith.constant 6.400000e+01 : f32
    %122 = vector.broadcast %cst_41 : f32 to vector<64x1xf32>
    %123 = arith.divf %121, %122 : vector<64x1xf32>
    %124 = vector.broadcast %123 : vector<64x1xf32> to vector<64x64xf32>
    %125 = arith.subf %117, %124 : vector<64x64xf32>
    %126 = arith.mulf %125, %125 : vector<64x64xf32>
    %cst_42 = arith.constant dense<0.000000e+00> : vector<64xf32>
    %127 = vector.multi_reduction <add>, %126, %cst_42 [1] : vector<64x64xf32> to vector<64xf32>
    %128 = vector.shape_cast %127 : vector<64xf32> to vector<64x1xf32>
    %cst_43 = arith.constant 6.400000e+01 : f32
    %129 = vector.broadcast %cst_43 : f32 to vector<64x1xf32>
    %130 = arith.divf %128, %129 : vector<64x1xf32>
    %131 = vector.broadcast %123 : vector<64x1xf32> to vector<64x64xf32>
    %132 = arith.subf %117, %131 : vector<64x64xf32>
    %cst_44 = arith.constant 9.99999974E-6 : f32
    %133 = vector.broadcast %cst_44 : f32 to vector<64x1xf32>
    %134 = arith.addf %130, %133 : vector<64x1xf32>
    %135 = math.rsqrt %134 : vector<64x1xf32>
    %136 = vector.broadcast %135 : vector<64x1xf32> to vector<64x64xf32>
    %137 = arith.mulf %132, %136 : vector<64x64xf32>
    %138 = vector.broadcast %118 : vector<1x64xf32> to vector<64x64xf32>
    %139 = arith.mulf %137, %138 : vector<64x64xf32>
    %140 = vector.broadcast %119 : vector<1x64xf32> to vector<64x64xf32>
    %141 = arith.addf %139, %140 : vector<64x64xf32>
    %142 = arith.truncf %141 : vector<64x64xf32> to vector<64x64xbf16>
    %c0_45 = arith.constant 0 : index
    %c0_46 = arith.constant 0 : index
    %c0_47 = arith.constant 0 : index
    %143 = vector.load %arg8[%c0_45, %c0_46, %c0_47] : memref<4x64x256xbf16, #tpu.memory_space<vmem>>, vector<1x64x256xbf16>
    %144 = vector.shape_cast %143 : vector<1x64x256xbf16> to vector<64x256xbf16>
    %cst_48 = arith.constant dense<0.000000e+00> : vector<64x256xf32>
    %145 = tpu.matmul %142, %144, %cst_48 {dimension_numbers = #tpu.dot_dimension_numbers<[1], [0], [0], [1], [0, 0, 1, 1], [], []>} : vector<64x64xbf16>, vector<64x256xbf16>, vector<64x256xf32> -> vector<64x256xf32>
    %c0_49 = arith.constant 0 : index
    %c0_50 = arith.constant 0 : index
    %c0_51 = arith.constant 0 : index
    %146 = vector.load %arg5[%c0_49, %c0_50, %c0_51] : memref<4x1x256xf32, #tpu.memory_space<vmem>>, vector<1x1x256xf32>
    %147 = vector.shape_cast %146 : vector<1x1x256xf32> to vector<1x256xf32>
    %148 = vector.broadcast %147 : vector<1x256xf32> to vector<64x256xf32>
    %149 = arith.addf %145, %148 : vector<64x256xf32>
    %cst_52 = arith.constant 0.000000e+00 : f32
    %150 = vector.broadcast %cst_52 : f32 to vector<64x256xf32>
    %151 = arith.maximumf %149, %150 : vector<64x256xf32>
    %152 = arith.truncf %151 : vector<64x256xf32> to vector<64x256xbf16>
    %c0_53 = arith.constant 0 : index
    %c0_54 = arith.constant 0 : index
    %c0_55 = arith.constant 0 : index
    %153 = vector.load %arg9[%c0_53, %c0_54, %c0_55] : memref<4x256x64xbf16, #tpu.memory_space<vmem>>, vector<1x256x64xbf16>
    %154 = vector.shape_cast %153 : vector<1x256x64xbf16> to vector<256x64xbf16>
    %cst_56 = arith.constant dense<0.000000e+00> : vector<64x64xf32>
    %155 = tpu.matmul %152, %154, %cst_56 {dimension_numbers = #tpu.dot_dimension_numbers<[1], [0], [0], [1], [0, 0, 1, 1], [], []>} : vector<64x256xbf16>, vector<256x64xbf16>, vector<64x64xf32> -> vector<64x64xf32>
    %156 = arith.addf %117, %155 : vector<64x64xf32>
    %157 = vector.extract_strided_slice %15 {offsets = [5, 0], sizes = [1, 64], strides = [1, 1]} : vector<6x64xf32> to vector<1x64xf32>
    %158 = vector.broadcast %157 : vector<1x64xf32> to vector<64x64xf32>
    %159 = arith.addf %156, %158 : vector<64x64xf32>
    %c1 = arith.constant 1 : index
    %c0_57 = arith.constant 0 : index
    %c0_58 = arith.constant 0 : index
    %160 = vector.load %arg4[%c1, %c0_57, %c0_58] : memref<4x6x64xf32, #tpu.memory_space<vmem>>, vector<1x6x64xf32>
    %161 = vector.shape_cast %160 : vector<1x6x64xf32> to vector<6x64xf32>
    %162 = vector.extract_strided_slice %161 {offsets = [0, 0], sizes = [1, 64], strides = [1, 1]} : vector<6x64xf32> to vector<1x64xf32>
    %163 = vector.extract_strided_slice %161 {offsets = [1, 0], sizes = [1, 64], strides = [1, 1]} : vector<6x64xf32> to vector<1x64xf32>
    %cst_59 = arith.constant dense<0.000000e+00> : vector<64xf32>
    %164 = vector.multi_reduction <add>, %159, %cst_59 [1] : vector<64x64xf32> to vector<64xf32>
    %165 = vector.shape_cast %164 : vector<64xf32> to vector<64x1xf32>
    %cst_60 = arith.constant 6.400000e+01 : f32
    %166 = vector.broadcast %cst_60 : f32 to vector<64x1xf32>
    %167 = arith.divf %165, %166 : vector<64x1xf32>
    %168 = vector.broadcast %167 : vector<64x1xf32> to vector<64x64xf32>
    %169 = arith.subf %159, %168 : vector<64x64xf32>
    %170 = arith.mulf %169, %169 : vector<64x64xf32>
    %cst_61 = arith.constant dense<0.000000e+00> : vector<64xf32>
    %171 = vector.multi_reduction <add>, %170, %cst_61 [1] : vector<64x64xf32> to vector<64xf32>
    %172 = vector.shape_cast %171 : vector<64xf32> to vector<64x1xf32>
    %cst_62 = arith.constant 6.400000e+01 : f32
    %173 = vector.broadcast %cst_62 : f32 to vector<64x1xf32>
    %174 = arith.divf %172, %173 : vector<64x1xf32>
    %175 = vector.broadcast %167 : vector<64x1xf32> to vector<64x64xf32>
    %176 = arith.subf %159, %175 : vector<64x64xf32>
    %cst_63 = arith.constant 9.99999974E-6 : f32
    %177 = vector.broadcast %cst_63 : f32 to vector<64x1xf32>
    %178 = arith.addf %174, %177 : vector<64x1xf32>
    %179 = math.rsqrt %178 : vector<64x1xf32>
    %180 = vector.broadcast %179 : vector<64x1xf32> to vector<64x64xf32>
    %181 = arith.mulf %176, %180 : vector<64x64xf32>
    %182 = vector.broadcast %162 : vector<1x64xf32> to vector<64x64xf32>
    %183 = arith.mulf %181, %182 : vector<64x64xf32>
    %184 = vector.broadcast %163 : vector<1x64xf32> to vector<64x64xf32>
    %185 = arith.addf %183, %184 : vector<64x64xf32>
    %186 = arith.truncf %185 : vector<64x64xf32> to vector<64x64xbf16>
    %c1_64 = arith.constant 1 : index
    %c0_65 = arith.constant 0 : index
    %c0_66 = arith.constant 0 : index
    %187 = vector.load %arg6[%c1_64, %c0_65, %c0_66] : memref<4x64x192xbf16, #tpu.memory_space<vmem>>, vector<1x64x192xbf16>
    %188 = vector.shape_cast %187 : vector<1x64x192xbf16> to vector<64x192xbf16>
    %cst_67 = arith.constant dense<0.000000e+00> : vector<64x192xf32>
    %189 = tpu.matmul %186, %188, %cst_67 {dimension_numbers = #tpu.dot_dimension_numbers<[1], [0], [0], [1], [0, 0, 1, 1], [], []>} : vector<64x64xbf16>, vector<64x192xbf16>, vector<64x192xf32> -> vector<64x192xf32>
    %190 = arith.truncf %189 : vector<64x192xf32> to vector<64x192xbf16>
    %c1_68 = arith.constant 1 : index
    %c0_69 = arith.constant 0 : index
    %c0_70 = arith.constant 0 : index
    %191 = vector.load %arg7[%c1_68, %c0_69, %c0_70] : memref<4x64x64xbf16, #tpu.memory_space<vmem>>, vector<1x64x64xbf16>
    %192 = vector.shape_cast %191 : vector<1x64x64xbf16> to vector<64x64xbf16>
    %193 = vector.extract_strided_slice %190 {offsets = [0, 0], sizes = [64, 16], strides = [1, 1]} : vector<64x192xbf16> to vector<64x16xbf16>
    %194 = vector.extract_strided_slice %190 {offsets = [0, 64], sizes = [64, 16], strides = [1, 1]} : vector<64x192xbf16> to vector<64x16xbf16>
    %195 = vector.extract_strided_slice %190 {offsets = [0, 128], sizes = [64, 16], strides = [1, 1]} : vector<64x192xbf16> to vector<64x16xbf16>
    %cst_71 = arith.constant dense<0.000000e+00> : vector<64x64xf32>
    %196 = tpu.matmul %193, %194, %cst_71 {dimension_numbers = #tpu.dot_dimension_numbers<[1], [1], [0], [0], [0, 0, 1, 0], [], []>} : vector<64x16xbf16>, vector<64x16xbf16>, vector<64x64xf32> -> vector<64x64xf32>
    %197 = arith.addf %196, %13 : vector<64x64xf32>
    %198 = math.exp %197 : vector<64x64xf32>
    %cst_72 = arith.constant dense<0.000000e+00> : vector<64xf32>
    %199 = vector.multi_reduction <add>, %198, %cst_72 [1] : vector<64x64xf32> to vector<64xf32>
    %200 = vector.shape_cast %199 : vector<64xf32> to vector<64x1xf32>
    %201 = tpu.reciprocal %200 {approx = true} : vector<64x1xf32> -> vector<64x1xf32>
    %202 = vector.broadcast %201 : vector<64x1xf32> to vector<64x64xf32>
    %203 = arith.mulf %198, %202 : vector<64x64xf32>
    %204 = arith.truncf %203 : vector<64x64xf32> to vector<64x64xbf16>
    %cst_73 = arith.constant dense<0.000000e+00> : vector<64x16xf32>
    %205 = tpu.matmul %204, %195, %cst_73 {dimension_numbers = #tpu.dot_dimension_numbers<[1], [0], [0], [1], [0, 0, 1, 1], [], []>} : vector<64x64xbf16>, vector<64x16xbf16>, vector<64x16xf32> -> vector<64x16xf32>
    %206 = arith.truncf %205 : vector<64x16xf32> to vector<64x16xbf16>
    %207 = vector.extract_strided_slice %192 {offsets = [0, 0], sizes = [16, 64], strides = [1, 1]} : vector<64x64xbf16> to vector<16x64xbf16>
    %cst_74 = arith.constant dense<0.000000e+00> : vector<64x64xf32>
    %208 = tpu.matmul %206, %207, %cst_74 {dimension_numbers = #tpu.dot_dimension_numbers<[1], [0], [0], [1], [0, 0, 1, 1], [], []>} : vector<64x16xbf16>, vector<16x64xbf16>, vector<64x64xf32> -> vector<64x64xf32>
    %209 = vector.extract_strided_slice %190 {offsets = [0, 16], sizes = [64, 16], strides = [1, 1]} : vector<64x192xbf16> to vector<64x16xbf16>
    %210 = vector.extract_strided_slice %190 {offsets = [0, 80], sizes = [64, 16], strides = [1, 1]} : vector<64x192xbf16> to vector<64x16xbf16>
    %211 = vector.extract_strided_slice %190 {offsets = [0, 144], sizes = [64, 16], strides = [1, 1]} : vector<64x192xbf16> to vector<64x16xbf16>
    %cst_75 = arith.constant dense<0.000000e+00> : vector<64x64xf32>
    %212 = tpu.matmul %209, %210, %cst_75 {dimension_numbers = #tpu.dot_dimension_numbers<[1], [1], [0], [0], [0, 0, 1, 0], [], []>} : vector<64x16xbf16>, vector<64x16xbf16>, vector<64x64xf32> -> vector<64x64xf32>
    %213 = arith.addf %212, %13 : vector<64x64xf32>
    %214 = math.exp %213 : vector<64x64xf32>
    %cst_76 = arith.constant dense<0.000000e+00> : vector<64xf32>
    %215 = vector.multi_reduction <add>, %214, %cst_76 [1] : vector<64x64xf32> to vector<64xf32>
    %216 = vector.shape_cast %215 : vector<64xf32> to vector<64x1xf32>
    %217 = tpu.reciprocal %216 {approx = true} : vector<64x1xf32> -> vector<64x1xf32>
    %218 = vector.broadcast %217 : vector<64x1xf32> to vector<64x64xf32>
    %219 = arith.mulf %214, %218 : vector<64x64xf32>
    %220 = arith.truncf %219 : vector<64x64xf32> to vector<64x64xbf16>
    %cst_77 = arith.constant dense<0.000000e+00> : vector<64x16xf32>
    %221 = tpu.matmul %220, %211, %cst_77 {dimension_numbers = #tpu.dot_dimension_numbers<[1], [0], [0], [1], [0, 0, 1, 1], [], []>} : vector<64x64xbf16>, vector<64x16xbf16>, vector<64x16xf32> -> vector<64x16xf32>
    %222 = arith.truncf %221 : vector<64x16xf32> to vector<64x16xbf16>
    %223 = vector.extract_strided_slice %192 {offsets = [16, 0], sizes = [16, 64], strides = [1, 1]} : vector<64x64xbf16> to vector<16x64xbf16>
    %cst_78 = arith.constant dense<0.000000e+00> : vector<64x64xf32>
    %224 = tpu.matmul %222, %223, %cst_78 {dimension_numbers = #tpu.dot_dimension_numbers<[1], [0], [0], [1], [0, 0, 1, 1], [], []>} : vector<64x16xbf16>, vector<16x64xbf16>, vector<64x64xf32> -> vector<64x64xf32>
    %225 = arith.addf %208, %224 : vector<64x64xf32>
    %226 = vector.extract_strided_slice %190 {offsets = [0, 32], sizes = [64, 16], strides = [1, 1]} : vector<64x192xbf16> to vector<64x16xbf16>
    %227 = vector.extract_strided_slice %190 {offsets = [0, 96], sizes = [64, 16], strides = [1, 1]} : vector<64x192xbf16> to vector<64x16xbf16>
    %228 = vector.extract_strided_slice %190 {offsets = [0, 160], sizes = [64, 16], strides = [1, 1]} : vector<64x192xbf16> to vector<64x16xbf16>
    %cst_79 = arith.constant dense<0.000000e+00> : vector<64x64xf32>
    %229 = tpu.matmul %226, %227, %cst_79 {dimension_numbers = #tpu.dot_dimension_numbers<[1], [1], [0], [0], [0, 0, 1, 0], [], []>} : vector<64x16xbf16>, vector<64x16xbf16>, vector<64x64xf32> -> vector<64x64xf32>
    %230 = arith.addf %229, %13 : vector<64x64xf32>
    %231 = math.exp %230 : vector<64x64xf32>
    %cst_80 = arith.constant dense<0.000000e+00> : vector<64xf32>
    %232 = vector.multi_reduction <add>, %231, %cst_80 [1] : vector<64x64xf32> to vector<64xf32>
    %233 = vector.shape_cast %232 : vector<64xf32> to vector<64x1xf32>
    %234 = tpu.reciprocal %233 {approx = true} : vector<64x1xf32> -> vector<64x1xf32>
    %235 = vector.broadcast %234 : vector<64x1xf32> to vector<64x64xf32>
    %236 = arith.mulf %231, %235 : vector<64x64xf32>
    %237 = arith.truncf %236 : vector<64x64xf32> to vector<64x64xbf16>
    %cst_81 = arith.constant dense<0.000000e+00> : vector<64x16xf32>
    %238 = tpu.matmul %237, %228, %cst_81 {dimension_numbers = #tpu.dot_dimension_numbers<[1], [0], [0], [1], [0, 0, 1, 1], [], []>} : vector<64x64xbf16>, vector<64x16xbf16>, vector<64x16xf32> -> vector<64x16xf32>
    %239 = arith.truncf %238 : vector<64x16xf32> to vector<64x16xbf16>
    %240 = vector.extract_strided_slice %192 {offsets = [32, 0], sizes = [16, 64], strides = [1, 1]} : vector<64x64xbf16> to vector<16x64xbf16>
    %cst_82 = arith.constant dense<0.000000e+00> : vector<64x64xf32>
    %241 = tpu.matmul %239, %240, %cst_82 {dimension_numbers = #tpu.dot_dimension_numbers<[1], [0], [0], [1], [0, 0, 1, 1], [], []>} : vector<64x16xbf16>, vector<16x64xbf16>, vector<64x64xf32> -> vector<64x64xf32>
    %242 = arith.addf %225, %241 : vector<64x64xf32>
    %243 = vector.extract_strided_slice %190 {offsets = [0, 48], sizes = [64, 16], strides = [1, 1]} : vector<64x192xbf16> to vector<64x16xbf16>
    %244 = vector.extract_strided_slice %190 {offsets = [0, 112], sizes = [64, 16], strides = [1, 1]} : vector<64x192xbf16> to vector<64x16xbf16>
    %245 = vector.extract_strided_slice %190 {offsets = [0, 176], sizes = [64, 16], strides = [1, 1]} : vector<64x192xbf16> to vector<64x16xbf16>
    %cst_83 = arith.constant dense<0.000000e+00> : vector<64x64xf32>
    %246 = tpu.matmul %243, %244, %cst_83 {dimension_numbers = #tpu.dot_dimension_numbers<[1], [1], [0], [0], [0, 0, 1, 0], [], []>} : vector<64x16xbf16>, vector<64x16xbf16>, vector<64x64xf32> -> vector<64x64xf32>
    %247 = arith.addf %246, %13 : vector<64x64xf32>
    %248 = math.exp %247 : vector<64x64xf32>
    %cst_84 = arith.constant dense<0.000000e+00> : vector<64xf32>
    %249 = vector.multi_reduction <add>, %248, %cst_84 [1] : vector<64x64xf32> to vector<64xf32>
    %250 = vector.shape_cast %249 : vector<64xf32> to vector<64x1xf32>
    %251 = tpu.reciprocal %250 {approx = true} : vector<64x1xf32> -> vector<64x1xf32>
    %252 = vector.broadcast %251 : vector<64x1xf32> to vector<64x64xf32>
    %253 = arith.mulf %248, %252 : vector<64x64xf32>
    %254 = arith.truncf %253 : vector<64x64xf32> to vector<64x64xbf16>
    %cst_85 = arith.constant dense<0.000000e+00> : vector<64x16xf32>
    %255 = tpu.matmul %254, %245, %cst_85 {dimension_numbers = #tpu.dot_dimension_numbers<[1], [0], [0], [1], [0, 0, 1, 1], [], []>} : vector<64x64xbf16>, vector<64x16xbf16>, vector<64x16xf32> -> vector<64x16xf32>
    %256 = arith.truncf %255 : vector<64x16xf32> to vector<64x16xbf16>
    %257 = vector.extract_strided_slice %192 {offsets = [48, 0], sizes = [16, 64], strides = [1, 1]} : vector<64x64xbf16> to vector<16x64xbf16>
    %cst_86 = arith.constant dense<0.000000e+00> : vector<64x64xf32>
    %258 = tpu.matmul %256, %257, %cst_86 {dimension_numbers = #tpu.dot_dimension_numbers<[1], [0], [0], [1], [0, 0, 1, 1], [], []>} : vector<64x16xbf16>, vector<16x64xbf16>, vector<64x64xf32> -> vector<64x64xf32>
    %259 = arith.addf %242, %258 : vector<64x64xf32>
    %260 = arith.addf %159, %259 : vector<64x64xf32>
    %261 = vector.extract_strided_slice %161 {offsets = [2, 0], sizes = [1, 64], strides = [1, 1]} : vector<6x64xf32> to vector<1x64xf32>
    %262 = vector.broadcast %261 : vector<1x64xf32> to vector<64x64xf32>
    %263 = arith.addf %260, %262 : vector<64x64xf32>
    %264 = vector.extract_strided_slice %161 {offsets = [3, 0], sizes = [1, 64], strides = [1, 1]} : vector<6x64xf32> to vector<1x64xf32>
    %265 = vector.extract_strided_slice %161 {offsets = [4, 0], sizes = [1, 64], strides = [1, 1]} : vector<6x64xf32> to vector<1x64xf32>
    %cst_87 = arith.constant dense<0.000000e+00> : vector<64xf32>
    %266 = vector.multi_reduction <add>, %263, %cst_87 [1] : vector<64x64xf32> to vector<64xf32>
    %267 = vector.shape_cast %266 : vector<64xf32> to vector<64x1xf32>
    %cst_88 = arith.constant 6.400000e+01 : f32
    %268 = vector.broadcast %cst_88 : f32 to vector<64x1xf32>
    %269 = arith.divf %267, %268 : vector<64x1xf32>
    %270 = vector.broadcast %269 : vector<64x1xf32> to vector<64x64xf32>
    %271 = arith.subf %263, %270 : vector<64x64xf32>
    %272 = arith.mulf %271, %271 : vector<64x64xf32>
    %cst_89 = arith.constant dense<0.000000e+00> : vector<64xf32>
    %273 = vector.multi_reduction <add>, %272, %cst_89 [1] : vector<64x64xf32> to vector<64xf32>
    %274 = vector.shape_cast %273 : vector<64xf32> to vector<64x1xf32>
    %cst_90 = arith.constant 6.400000e+01 : f32
    %275 = vector.broadcast %cst_90 : f32 to vector<64x1xf32>
    %276 = arith.divf %274, %275 : vector<64x1xf32>
    %277 = vector.broadcast %269 : vector<64x1xf32> to vector<64x64xf32>
    %278 = arith.subf %263, %277 : vector<64x64xf32>
    %cst_91 = arith.constant 9.99999974E-6 : f32
    %279 = vector.broadcast %cst_91 : f32 to vector<64x1xf32>
    %280 = arith.addf %276, %279 : vector<64x1xf32>
    %281 = math.rsqrt %280 : vector<64x1xf32>
    %282 = vector.broadcast %281 : vector<64x1xf32> to vector<64x64xf32>
    %283 = arith.mulf %278, %282 : vector<64x64xf32>
    %284 = vector.broadcast %264 : vector<1x64xf32> to vector<64x64xf32>
    %285 = arith.mulf %283, %284 : vector<64x64xf32>
    %286 = vector.broadcast %265 : vector<1x64xf32> to vector<64x64xf32>
    %287 = arith.addf %285, %286 : vector<64x64xf32>
    %288 = arith.truncf %287 : vector<64x64xf32> to vector<64x64xbf16>
    %c1_92 = arith.constant 1 : index
    %c0_93 = arith.constant 0 : index
    %c0_94 = arith.constant 0 : index
    %289 = vector.load %arg8[%c1_92, %c0_93, %c0_94] : memref<4x64x256xbf16, #tpu.memory_space<vmem>>, vector<1x64x256xbf16>
    %290 = vector.shape_cast %289 : vector<1x64x256xbf16> to vector<64x256xbf16>
    %cst_95 = arith.constant dense<0.000000e+00> : vector<64x256xf32>
    %291 = tpu.matmul %288, %290, %cst_95 {dimension_numbers = #tpu.dot_dimension_numbers<[1], [0], [0], [1], [0, 0, 1, 1], [], []>} : vector<64x64xbf16>, vector<64x256xbf16>, vector<64x256xf32> -> vector<64x256xf32>
    %c1_96 = arith.constant 1 : index
    %c0_97 = arith.constant 0 : index
    %c0_98 = arith.constant 0 : index
    %292 = vector.load %arg5[%c1_96, %c0_97, %c0_98] : memref<4x1x256xf32, #tpu.memory_space<vmem>>, vector<1x1x256xf32>
    %293 = vector.shape_cast %292 : vector<1x1x256xf32> to vector<1x256xf32>
    %294 = vector.broadcast %293 : vector<1x256xf32> to vector<64x256xf32>
    %295 = arith.addf %291, %294 : vector<64x256xf32>
    %cst_99 = arith.constant 0.000000e+00 : f32
    %296 = vector.broadcast %cst_99 : f32 to vector<64x256xf32>
    %297 = arith.maximumf %295, %296 : vector<64x256xf32>
    %298 = arith.truncf %297 : vector<64x256xf32> to vector<64x256xbf16>
    %c1_100 = arith.constant 1 : index
    %c0_101 = arith.constant 0 : index
    %c0_102 = arith.constant 0 : index
    %299 = vector.load %arg9[%c1_100, %c0_101, %c0_102] : memref<4x256x64xbf16, #tpu.memory_space<vmem>>, vector<1x256x64xbf16>
    %300 = vector.shape_cast %299 : vector<1x256x64xbf16> to vector<256x64xbf16>
    %cst_103 = arith.constant dense<0.000000e+00> : vector<64x64xf32>
    %301 = tpu.matmul %298, %300, %cst_103 {dimension_numbers = #tpu.dot_dimension_numbers<[1], [0], [0], [1], [0, 0, 1, 1], [], []>} : vector<64x256xbf16>, vector<256x64xbf16>, vector<64x64xf32> -> vector<64x64xf32>
    %302 = arith.addf %263, %301 : vector<64x64xf32>
    %303 = vector.extract_strided_slice %161 {offsets = [5, 0], sizes = [1, 64], strides = [1, 1]} : vector<6x64xf32> to vector<1x64xf32>
    %304 = vector.broadcast %303 : vector<1x64xf32> to vector<64x64xf32>
    %305 = arith.addf %302, %304 : vector<64x64xf32>
    %c2 = arith.constant 2 : index
    %c0_104 = arith.constant 0 : index
    %c0_105 = arith.constant 0 : index
    %306 = vector.load %arg4[%c2, %c0_104, %c0_105] : memref<4x6x64xf32, #tpu.memory_space<vmem>>, vector<1x6x64xf32>
    %307 = vector.shape_cast %306 : vector<1x6x64xf32> to vector<6x64xf32>
    %308 = vector.extract_strided_slice %307 {offsets = [0, 0], sizes = [1, 64], strides = [1, 1]} : vector<6x64xf32> to vector<1x64xf32>
    %309 = vector.extract_strided_slice %307 {offsets = [1, 0], sizes = [1, 64], strides = [1, 1]} : vector<6x64xf32> to vector<1x64xf32>
    %cst_106 = arith.constant dense<0.000000e+00> : vector<64xf32>
    %310 = vector.multi_reduction <add>, %305, %cst_106 [1] : vector<64x64xf32> to vector<64xf32>
    %311 = vector.shape_cast %310 : vector<64xf32> to vector<64x1xf32>
    %cst_107 = arith.constant 6.400000e+01 : f32
    %312 = vector.broadcast %cst_107 : f32 to vector<64x1xf32>
    %313 = arith.divf %311, %312 : vector<64x1xf32>
    %314 = vector.broadcast %313 : vector<64x1xf32> to vector<64x64xf32>
    %315 = arith.subf %305, %314 : vector<64x64xf32>
    %316 = arith.mulf %315, %315 : vector<64x64xf32>
    %cst_108 = arith.constant dense<0.000000e+00> : vector<64xf32>
    %317 = vector.multi_reduction <add>, %316, %cst_108 [1] : vector<64x64xf32> to vector<64xf32>
    %318 = vector.shape_cast %317 : vector<64xf32> to vector<64x1xf32>
    %cst_109 = arith.constant 6.400000e+01 : f32
    %319 = vector.broadcast %cst_109 : f32 to vector<64x1xf32>
    %320 = arith.divf %318, %319 : vector<64x1xf32>
    %321 = vector.broadcast %313 : vector<64x1xf32> to vector<64x64xf32>
    %322 = arith.subf %305, %321 : vector<64x64xf32>
    %cst_110 = arith.constant 9.99999974E-6 : f32
    %323 = vector.broadcast %cst_110 : f32 to vector<64x1xf32>
    %324 = arith.addf %320, %323 : vector<64x1xf32>
    %325 = math.rsqrt %324 : vector<64x1xf32>
    %326 = vector.broadcast %325 : vector<64x1xf32> to vector<64x64xf32>
    %327 = arith.mulf %322, %326 : vector<64x64xf32>
    %328 = vector.broadcast %308 : vector<1x64xf32> to vector<64x64xf32>
    %329 = arith.mulf %327, %328 : vector<64x64xf32>
    %330 = vector.broadcast %309 : vector<1x64xf32> to vector<64x64xf32>
    %331 = arith.addf %329, %330 : vector<64x64xf32>
    %332 = arith.truncf %331 : vector<64x64xf32> to vector<64x64xbf16>
    %c2_111 = arith.constant 2 : index
    %c0_112 = arith.constant 0 : index
    %c0_113 = arith.constant 0 : index
    %333 = vector.load %arg6[%c2_111, %c0_112, %c0_113] : memref<4x64x192xbf16, #tpu.memory_space<vmem>>, vector<1x64x192xbf16>
    %334 = vector.shape_cast %333 : vector<1x64x192xbf16> to vector<64x192xbf16>
    %cst_114 = arith.constant dense<0.000000e+00> : vector<64x192xf32>
    %335 = tpu.matmul %332, %334, %cst_114 {dimension_numbers = #tpu.dot_dimension_numbers<[1], [0], [0], [1], [0, 0, 1, 1], [], []>} : vector<64x64xbf16>, vector<64x192xbf16>, vector<64x192xf32> -> vector<64x192xf32>
    %336 = arith.truncf %335 : vector<64x192xf32> to vector<64x192xbf16>
    %c2_115 = arith.constant 2 : index
    %c0_116 = arith.constant 0 : index
    %c0_117 = arith.constant 0 : index
    %337 = vector.load %arg7[%c2_115, %c0_116, %c0_117] : memref<4x64x64xbf16, #tpu.memory_space<vmem>>, vector<1x64x64xbf16>
    %338 = vector.shape_cast %337 : vector<1x64x64xbf16> to vector<64x64xbf16>
    %339 = vector.extract_strided_slice %336 {offsets = [0, 0], sizes = [64, 16], strides = [1, 1]} : vector<64x192xbf16> to vector<64x16xbf16>
    %340 = vector.extract_strided_slice %336 {offsets = [0, 64], sizes = [64, 16], strides = [1, 1]} : vector<64x192xbf16> to vector<64x16xbf16>
    %341 = vector.extract_strided_slice %336 {offsets = [0, 128], sizes = [64, 16], strides = [1, 1]} : vector<64x192xbf16> to vector<64x16xbf16>
    %cst_118 = arith.constant dense<0.000000e+00> : vector<64x64xf32>
    %342 = tpu.matmul %339, %340, %cst_118 {dimension_numbers = #tpu.dot_dimension_numbers<[1], [1], [0], [0], [0, 0, 1, 0], [], []>} : vector<64x16xbf16>, vector<64x16xbf16>, vector<64x64xf32> -> vector<64x64xf32>
    %343 = arith.addf %342, %13 : vector<64x64xf32>
    %344 = math.exp %343 : vector<64x64xf32>
    %cst_119 = arith.constant dense<0.000000e+00> : vector<64xf32>
    %345 = vector.multi_reduction <add>, %344, %cst_119 [1] : vector<64x64xf32> to vector<64xf32>
    %346 = vector.shape_cast %345 : vector<64xf32> to vector<64x1xf32>
    %347 = tpu.reciprocal %346 {approx = true} : vector<64x1xf32> -> vector<64x1xf32>
    %348 = vector.broadcast %347 : vector<64x1xf32> to vector<64x64xf32>
    %349 = arith.mulf %344, %348 : vector<64x64xf32>
    %350 = arith.truncf %349 : vector<64x64xf32> to vector<64x64xbf16>
    %cst_120 = arith.constant dense<0.000000e+00> : vector<64x16xf32>
    %351 = tpu.matmul %350, %341, %cst_120 {dimension_numbers = #tpu.dot_dimension_numbers<[1], [0], [0], [1], [0, 0, 1, 1], [], []>} : vector<64x64xbf16>, vector<64x16xbf16>, vector<64x16xf32> -> vector<64x16xf32>
    %352 = arith.truncf %351 : vector<64x16xf32> to vector<64x16xbf16>
    %353 = vector.extract_strided_slice %338 {offsets = [0, 0], sizes = [16, 64], strides = [1, 1]} : vector<64x64xbf16> to vector<16x64xbf16>
    %cst_121 = arith.constant dense<0.000000e+00> : vector<64x64xf32>
    %354 = tpu.matmul %352, %353, %cst_121 {dimension_numbers = #tpu.dot_dimension_numbers<[1], [0], [0], [1], [0, 0, 1, 1], [], []>} : vector<64x16xbf16>, vector<16x64xbf16>, vector<64x64xf32> -> vector<64x64xf32>
    %355 = vector.extract_strided_slice %336 {offsets = [0, 16], sizes = [64, 16], strides = [1, 1]} : vector<64x192xbf16> to vector<64x16xbf16>
    %356 = vector.extract_strided_slice %336 {offsets = [0, 80], sizes = [64, 16], strides = [1, 1]} : vector<64x192xbf16> to vector<64x16xbf16>
    %357 = vector.extract_strided_slice %336 {offsets = [0, 144], sizes = [64, 16], strides = [1, 1]} : vector<64x192xbf16> to vector<64x16xbf16>
    %cst_122 = arith.constant dense<0.000000e+00> : vector<64x64xf32>
    %358 = tpu.matmul %355, %356, %cst_122 {dimension_numbers = #tpu.dot_dimension_numbers<[1], [1], [0], [0], [0, 0, 1, 0], [], []>} : vector<64x16xbf16>, vector<64x16xbf16>, vector<64x64xf32> -> vector<64x64xf32>
    %359 = arith.addf %358, %13 : vector<64x64xf32>
    %360 = math.exp %359 : vector<64x64xf32>
    %cst_123 = arith.constant dense<0.000000e+00> : vector<64xf32>
    %361 = vector.multi_reduction <add>, %360, %cst_123 [1] : vector<64x64xf32> to vector<64xf32>
    %362 = vector.shape_cast %361 : vector<64xf32> to vector<64x1xf32>
    %363 = tpu.reciprocal %362 {approx = true} : vector<64x1xf32> -> vector<64x1xf32>
    %364 = vector.broadcast %363 : vector<64x1xf32> to vector<64x64xf32>
    %365 = arith.mulf %360, %364 : vector<64x64xf32>
    %366 = arith.truncf %365 : vector<64x64xf32> to vector<64x64xbf16>
    %cst_124 = arith.constant dense<0.000000e+00> : vector<64x16xf32>
    %367 = tpu.matmul %366, %357, %cst_124 {dimension_numbers = #tpu.dot_dimension_numbers<[1], [0], [0], [1], [0, 0, 1, 1], [], []>} : vector<64x64xbf16>, vector<64x16xbf16>, vector<64x16xf32> -> vector<64x16xf32>
    %368 = arith.truncf %367 : vector<64x16xf32> to vector<64x16xbf16>
    %369 = vector.extract_strided_slice %338 {offsets = [16, 0], sizes = [16, 64], strides = [1, 1]} : vector<64x64xbf16> to vector<16x64xbf16>
    %cst_125 = arith.constant dense<0.000000e+00> : vector<64x64xf32>
    %370 = tpu.matmul %368, %369, %cst_125 {dimension_numbers = #tpu.dot_dimension_numbers<[1], [0], [0], [1], [0, 0, 1, 1], [], []>} : vector<64x16xbf16>, vector<16x64xbf16>, vector<64x64xf32> -> vector<64x64xf32>
    %371 = arith.addf %354, %370 : vector<64x64xf32>
    %372 = vector.extract_strided_slice %336 {offsets = [0, 32], sizes = [64, 16], strides = [1, 1]} : vector<64x192xbf16> to vector<64x16xbf16>
    %373 = vector.extract_strided_slice %336 {offsets = [0, 96], sizes = [64, 16], strides = [1, 1]} : vector<64x192xbf16> to vector<64x16xbf16>
    %374 = vector.extract_strided_slice %336 {offsets = [0, 160], sizes = [64, 16], strides = [1, 1]} : vector<64x192xbf16> to vector<64x16xbf16>
    %cst_126 = arith.constant dense<0.000000e+00> : vector<64x64xf32>
    %375 = tpu.matmul %372, %373, %cst_126 {dimension_numbers = #tpu.dot_dimension_numbers<[1], [1], [0], [0], [0, 0, 1, 0], [], []>} : vector<64x16xbf16>, vector<64x16xbf16>, vector<64x64xf32> -> vector<64x64xf32>
    %376 = arith.addf %375, %13 : vector<64x64xf32>
    %377 = math.exp %376 : vector<64x64xf32>
    %cst_127 = arith.constant dense<0.000000e+00> : vector<64xf32>
    %378 = vector.multi_reduction <add>, %377, %cst_127 [1] : vector<64x64xf32> to vector<64xf32>
    %379 = vector.shape_cast %378 : vector<64xf32> to vector<64x1xf32>
    %380 = tpu.reciprocal %379 {approx = true} : vector<64x1xf32> -> vector<64x1xf32>
    %381 = vector.broadcast %380 : vector<64x1xf32> to vector<64x64xf32>
    %382 = arith.mulf %377, %381 : vector<64x64xf32>
    %383 = arith.truncf %382 : vector<64x64xf32> to vector<64x64xbf16>
    %cst_128 = arith.constant dense<0.000000e+00> : vector<64x16xf32>
    %384 = tpu.matmul %383, %374, %cst_128 {dimension_numbers = #tpu.dot_dimension_numbers<[1], [0], [0], [1], [0, 0, 1, 1], [], []>} : vector<64x64xbf16>, vector<64x16xbf16>, vector<64x16xf32> -> vector<64x16xf32>
    %385 = arith.truncf %384 : vector<64x16xf32> to vector<64x16xbf16>
    %386 = vector.extract_strided_slice %338 {offsets = [32, 0], sizes = [16, 64], strides = [1, 1]} : vector<64x64xbf16> to vector<16x64xbf16>
    %cst_129 = arith.constant dense<0.000000e+00> : vector<64x64xf32>
    %387 = tpu.matmul %385, %386, %cst_129 {dimension_numbers = #tpu.dot_dimension_numbers<[1], [0], [0], [1], [0, 0, 1, 1], [], []>} : vector<64x16xbf16>, vector<16x64xbf16>, vector<64x64xf32> -> vector<64x64xf32>
    %388 = arith.addf %371, %387 : vector<64x64xf32>
    %389 = vector.extract_strided_slice %336 {offsets = [0, 48], sizes = [64, 16], strides = [1, 1]} : vector<64x192xbf16> to vector<64x16xbf16>
    %390 = vector.extract_strided_slice %336 {offsets = [0, 112], sizes = [64, 16], strides = [1, 1]} : vector<64x192xbf16> to vector<64x16xbf16>
    %391 = vector.extract_strided_slice %336 {offsets = [0, 176], sizes = [64, 16], strides = [1, 1]} : vector<64x192xbf16> to vector<64x16xbf16>
    %cst_130 = arith.constant dense<0.000000e+00> : vector<64x64xf32>
    %392 = tpu.matmul %389, %390, %cst_130 {dimension_numbers = #tpu.dot_dimension_numbers<[1], [1], [0], [0], [0, 0, 1, 0], [], []>} : vector<64x16xbf16>, vector<64x16xbf16>, vector<64x64xf32> -> vector<64x64xf32>
    %393 = arith.addf %392, %13 : vector<64x64xf32>
    %394 = math.exp %393 : vector<64x64xf32>
    %cst_131 = arith.constant dense<0.000000e+00> : vector<64xf32>
    %395 = vector.multi_reduction <add>, %394, %cst_131 [1] : vector<64x64xf32> to vector<64xf32>
    %396 = vector.shape_cast %395 : vector<64xf32> to vector<64x1xf32>
    %397 = tpu.reciprocal %396 {approx = true} : vector<64x1xf32> -> vector<64x1xf32>
    %398 = vector.broadcast %397 : vector<64x1xf32> to vector<64x64xf32>
    %399 = arith.mulf %394, %398 : vector<64x64xf32>
    %400 = arith.truncf %399 : vector<64x64xf32> to vector<64x64xbf16>
    %cst_132 = arith.constant dense<0.000000e+00> : vector<64x16xf32>
    %401 = tpu.matmul %400, %391, %cst_132 {dimension_numbers = #tpu.dot_dimension_numbers<[1], [0], [0], [1], [0, 0, 1, 1], [], []>} : vector<64x64xbf16>, vector<64x16xbf16>, vector<64x16xf32> -> vector<64x16xf32>
    %402 = arith.truncf %401 : vector<64x16xf32> to vector<64x16xbf16>
    %403 = vector.extract_strided_slice %338 {offsets = [48, 0], sizes = [16, 64], strides = [1, 1]} : vector<64x64xbf16> to vector<16x64xbf16>
    %cst_133 = arith.constant dense<0.000000e+00> : vector<64x64xf32>
    %404 = tpu.matmul %402, %403, %cst_133 {dimension_numbers = #tpu.dot_dimension_numbers<[1], [0], [0], [1], [0, 0, 1, 1], [], []>} : vector<64x16xbf16>, vector<16x64xbf16>, vector<64x64xf32> -> vector<64x64xf32>
    %405 = arith.addf %388, %404 : vector<64x64xf32>
    %406 = arith.addf %305, %405 : vector<64x64xf32>
    %407 = vector.extract_strided_slice %307 {offsets = [2, 0], sizes = [1, 64], strides = [1, 1]} : vector<6x64xf32> to vector<1x64xf32>
    %408 = vector.broadcast %407 : vector<1x64xf32> to vector<64x64xf32>
    %409 = arith.addf %406, %408 : vector<64x64xf32>
    %410 = vector.extract_strided_slice %307 {offsets = [3, 0], sizes = [1, 64], strides = [1, 1]} : vector<6x64xf32> to vector<1x64xf32>
    %411 = vector.extract_strided_slice %307 {offsets = [4, 0], sizes = [1, 64], strides = [1, 1]} : vector<6x64xf32> to vector<1x64xf32>
    %cst_134 = arith.constant dense<0.000000e+00> : vector<64xf32>
    %412 = vector.multi_reduction <add>, %409, %cst_134 [1] : vector<64x64xf32> to vector<64xf32>
    %413 = vector.shape_cast %412 : vector<64xf32> to vector<64x1xf32>
    %cst_135 = arith.constant 6.400000e+01 : f32
    %414 = vector.broadcast %cst_135 : f32 to vector<64x1xf32>
    %415 = arith.divf %413, %414 : vector<64x1xf32>
    %416 = vector.broadcast %415 : vector<64x1xf32> to vector<64x64xf32>
    %417 = arith.subf %409, %416 : vector<64x64xf32>
    %418 = arith.mulf %417, %417 : vector<64x64xf32>
    %cst_136 = arith.constant dense<0.000000e+00> : vector<64xf32>
    %419 = vector.multi_reduction <add>, %418, %cst_136 [1] : vector<64x64xf32> to vector<64xf32>
    %420 = vector.shape_cast %419 : vector<64xf32> to vector<64x1xf32>
    %cst_137 = arith.constant 6.400000e+01 : f32
    %421 = vector.broadcast %cst_137 : f32 to vector<64x1xf32>
    %422 = arith.divf %420, %421 : vector<64x1xf32>
    %423 = vector.broadcast %415 : vector<64x1xf32> to vector<64x64xf32>
    %424 = arith.subf %409, %423 : vector<64x64xf32>
    %cst_138 = arith.constant 9.99999974E-6 : f32
    %425 = vector.broadcast %cst_138 : f32 to vector<64x1xf32>
    %426 = arith.addf %422, %425 : vector<64x1xf32>
    %427 = math.rsqrt %426 : vector<64x1xf32>
    %428 = vector.broadcast %427 : vector<64x1xf32> to vector<64x64xf32>
    %429 = arith.mulf %424, %428 : vector<64x64xf32>
    %430 = vector.broadcast %410 : vector<1x64xf32> to vector<64x64xf32>
    %431 = arith.mulf %429, %430 : vector<64x64xf32>
    %432 = vector.broadcast %411 : vector<1x64xf32> to vector<64x64xf32>
    %433 = arith.addf %431, %432 : vector<64x64xf32>
    %434 = arith.truncf %433 : vector<64x64xf32> to vector<64x64xbf16>
    %c2_139 = arith.constant 2 : index
    %c0_140 = arith.constant 0 : index
    %c0_141 = arith.constant 0 : index
    %435 = vector.load %arg8[%c2_139, %c0_140, %c0_141] : memref<4x64x256xbf16, #tpu.memory_space<vmem>>, vector<1x64x256xbf16>
    %436 = vector.shape_cast %435 : vector<1x64x256xbf16> to vector<64x256xbf16>
    %cst_142 = arith.constant dense<0.000000e+00> : vector<64x256xf32>
    %437 = tpu.matmul %434, %436, %cst_142 {dimension_numbers = #tpu.dot_dimension_numbers<[1], [0], [0], [1], [0, 0, 1, 1], [], []>} : vector<64x64xbf16>, vector<64x256xbf16>, vector<64x256xf32> -> vector<64x256xf32>
    %c2_143 = arith.constant 2 : index
    %c0_144 = arith.constant 0 : index
    %c0_145 = arith.constant 0 : index
    %438 = vector.load %arg5[%c2_143, %c0_144, %c0_145] : memref<4x1x256xf32, #tpu.memory_space<vmem>>, vector<1x1x256xf32>
    %439 = vector.shape_cast %438 : vector<1x1x256xf32> to vector<1x256xf32>
    %440 = vector.broadcast %439 : vector<1x256xf32> to vector<64x256xf32>
    %441 = arith.addf %437, %440 : vector<64x256xf32>
    %cst_146 = arith.constant 0.000000e+00 : f32
    %442 = vector.broadcast %cst_146 : f32 to vector<64x256xf32>
    %443 = arith.maximumf %441, %442 : vector<64x256xf32>
    %444 = arith.truncf %443 : vector<64x256xf32> to vector<64x256xbf16>
    %c2_147 = arith.constant 2 : index
    %c0_148 = arith.constant 0 : index
    %c0_149 = arith.constant 0 : index
    %445 = vector.load %arg9[%c2_147, %c0_148, %c0_149] : memref<4x256x64xbf16, #tpu.memory_space<vmem>>, vector<1x256x64xbf16>
    %446 = vector.shape_cast %445 : vector<1x256x64xbf16> to vector<256x64xbf16>
    %cst_150 = arith.constant dense<0.000000e+00> : vector<64x64xf32>
    %447 = tpu.matmul %444, %446, %cst_150 {dimension_numbers = #tpu.dot_dimension_numbers<[1], [0], [0], [1], [0, 0, 1, 1], [], []>} : vector<64x256xbf16>, vector<256x64xbf16>, vector<64x64xf32> -> vector<64x64xf32>
    %448 = arith.addf %409, %447 : vector<64x64xf32>
    %449 = vector.extract_strided_slice %307 {offsets = [5, 0], sizes = [1, 64], strides = [1, 1]} : vector<6x64xf32> to vector<1x64xf32>
    %450 = vector.broadcast %449 : vector<1x64xf32> to vector<64x64xf32>
    %451 = arith.addf %448, %450 : vector<64x64xf32>
    %c3 = arith.constant 3 : index
    %c0_151 = arith.constant 0 : index
    %c0_152 = arith.constant 0 : index
    %452 = vector.load %arg4[%c3, %c0_151, %c0_152] : memref<4x6x64xf32, #tpu.memory_space<vmem>>, vector<1x6x64xf32>
    %453 = vector.shape_cast %452 : vector<1x6x64xf32> to vector<6x64xf32>
    %454 = vector.extract_strided_slice %453 {offsets = [0, 0], sizes = [1, 64], strides = [1, 1]} : vector<6x64xf32> to vector<1x64xf32>
    %455 = vector.extract_strided_slice %453 {offsets = [1, 0], sizes = [1, 64], strides = [1, 1]} : vector<6x64xf32> to vector<1x64xf32>
    %cst_153 = arith.constant dense<0.000000e+00> : vector<64xf32>
    %456 = vector.multi_reduction <add>, %451, %cst_153 [1] : vector<64x64xf32> to vector<64xf32>
    %457 = vector.shape_cast %456 : vector<64xf32> to vector<64x1xf32>
    %cst_154 = arith.constant 6.400000e+01 : f32
    %458 = vector.broadcast %cst_154 : f32 to vector<64x1xf32>
    %459 = arith.divf %457, %458 : vector<64x1xf32>
    %460 = vector.broadcast %459 : vector<64x1xf32> to vector<64x64xf32>
    %461 = arith.subf %451, %460 : vector<64x64xf32>
    %462 = arith.mulf %461, %461 : vector<64x64xf32>
    %cst_155 = arith.constant dense<0.000000e+00> : vector<64xf32>
    %463 = vector.multi_reduction <add>, %462, %cst_155 [1] : vector<64x64xf32> to vector<64xf32>
    %464 = vector.shape_cast %463 : vector<64xf32> to vector<64x1xf32>
    %cst_156 = arith.constant 6.400000e+01 : f32
    %465 = vector.broadcast %cst_156 : f32 to vector<64x1xf32>
    %466 = arith.divf %464, %465 : vector<64x1xf32>
    %467 = vector.broadcast %459 : vector<64x1xf32> to vector<64x64xf32>
    %468 = arith.subf %451, %467 : vector<64x64xf32>
    %cst_157 = arith.constant 9.99999974E-6 : f32
    %469 = vector.broadcast %cst_157 : f32 to vector<64x1xf32>
    %470 = arith.addf %466, %469 : vector<64x1xf32>
    %471 = math.rsqrt %470 : vector<64x1xf32>
    %472 = vector.broadcast %471 : vector<64x1xf32> to vector<64x64xf32>
    %473 = arith.mulf %468, %472 : vector<64x64xf32>
    %474 = vector.broadcast %454 : vector<1x64xf32> to vector<64x64xf32>
    %475 = arith.mulf %473, %474 : vector<64x64xf32>
    %476 = vector.broadcast %455 : vector<1x64xf32> to vector<64x64xf32>
    %477 = arith.addf %475, %476 : vector<64x64xf32>
    %478 = arith.truncf %477 : vector<64x64xf32> to vector<64x64xbf16>
    %c3_158 = arith.constant 3 : index
    %c0_159 = arith.constant 0 : index
    %c0_160 = arith.constant 0 : index
    %479 = vector.load %arg6[%c3_158, %c0_159, %c0_160] : memref<4x64x192xbf16, #tpu.memory_space<vmem>>, vector<1x64x192xbf16>
    %480 = vector.shape_cast %479 : vector<1x64x192xbf16> to vector<64x192xbf16>
    %cst_161 = arith.constant dense<0.000000e+00> : vector<64x192xf32>
    %481 = tpu.matmul %478, %480, %cst_161 {dimension_numbers = #tpu.dot_dimension_numbers<[1], [0], [0], [1], [0, 0, 1, 1], [], []>} : vector<64x64xbf16>, vector<64x192xbf16>, vector<64x192xf32> -> vector<64x192xf32>
    %482 = arith.truncf %481 : vector<64x192xf32> to vector<64x192xbf16>
    %c3_162 = arith.constant 3 : index
    %c0_163 = arith.constant 0 : index
    %c0_164 = arith.constant 0 : index
    %483 = vector.load %arg7[%c3_162, %c0_163, %c0_164] : memref<4x64x64xbf16, #tpu.memory_space<vmem>>, vector<1x64x64xbf16>
    %484 = vector.shape_cast %483 : vector<1x64x64xbf16> to vector<64x64xbf16>
    %485 = vector.extract_strided_slice %482 {offsets = [0, 0], sizes = [64, 16], strides = [1, 1]} : vector<64x192xbf16> to vector<64x16xbf16>
    %486 = vector.extract_strided_slice %482 {offsets = [0, 64], sizes = [64, 16], strides = [1, 1]} : vector<64x192xbf16> to vector<64x16xbf16>
    %487 = vector.extract_strided_slice %482 {offsets = [0, 128], sizes = [64, 16], strides = [1, 1]} : vector<64x192xbf16> to vector<64x16xbf16>
    %cst_165 = arith.constant dense<0.000000e+00> : vector<64x64xf32>
    %488 = tpu.matmul %485, %486, %cst_165 {dimension_numbers = #tpu.dot_dimension_numbers<[1], [1], [0], [0], [0, 0, 1, 0], [], []>} : vector<64x16xbf16>, vector<64x16xbf16>, vector<64x64xf32> -> vector<64x64xf32>
    %489 = arith.addf %488, %13 : vector<64x64xf32>
    %490 = math.exp %489 : vector<64x64xf32>
    %cst_166 = arith.constant dense<0.000000e+00> : vector<64xf32>
    %491 = vector.multi_reduction <add>, %490, %cst_166 [1] : vector<64x64xf32> to vector<64xf32>
    %492 = vector.shape_cast %491 : vector<64xf32> to vector<64x1xf32>
    %493 = tpu.reciprocal %492 {approx = true} : vector<64x1xf32> -> vector<64x1xf32>
    %494 = vector.broadcast %493 : vector<64x1xf32> to vector<64x64xf32>
    %495 = arith.mulf %490, %494 : vector<64x64xf32>
    %496 = arith.truncf %495 : vector<64x64xf32> to vector<64x64xbf16>
    %cst_167 = arith.constant dense<0.000000e+00> : vector<64x16xf32>
    %497 = tpu.matmul %496, %487, %cst_167 {dimension_numbers = #tpu.dot_dimension_numbers<[1], [0], [0], [1], [0, 0, 1, 1], [], []>} : vector<64x64xbf16>, vector<64x16xbf16>, vector<64x16xf32> -> vector<64x16xf32>
    %498 = arith.truncf %497 : vector<64x16xf32> to vector<64x16xbf16>
    %499 = vector.extract_strided_slice %484 {offsets = [0, 0], sizes = [16, 64], strides = [1, 1]} : vector<64x64xbf16> to vector<16x64xbf16>
    %cst_168 = arith.constant dense<0.000000e+00> : vector<64x64xf32>
    %500 = tpu.matmul %498, %499, %cst_168 {dimension_numbers = #tpu.dot_dimension_numbers<[1], [0], [0], [1], [0, 0, 1, 1], [], []>} : vector<64x16xbf16>, vector<16x64xbf16>, vector<64x64xf32> -> vector<64x64xf32>
    %501 = vector.extract_strided_slice %482 {offsets = [0, 16], sizes = [64, 16], strides = [1, 1]} : vector<64x192xbf16> to vector<64x16xbf16>
    %502 = vector.extract_strided_slice %482 {offsets = [0, 80], sizes = [64, 16], strides = [1, 1]} : vector<64x192xbf16> to vector<64x16xbf16>
    %503 = vector.extract_strided_slice %482 {offsets = [0, 144], sizes = [64, 16], strides = [1, 1]} : vector<64x192xbf16> to vector<64x16xbf16>
    %cst_169 = arith.constant dense<0.000000e+00> : vector<64x64xf32>
    %504 = tpu.matmul %501, %502, %cst_169 {dimension_numbers = #tpu.dot_dimension_numbers<[1], [1], [0], [0], [0, 0, 1, 0], [], []>} : vector<64x16xbf16>, vector<64x16xbf16>, vector<64x64xf32> -> vector<64x64xf32>
    %505 = arith.addf %504, %13 : vector<64x64xf32>
    %506 = math.exp %505 : vector<64x64xf32>
    %cst_170 = arith.constant dense<0.000000e+00> : vector<64xf32>
    %507 = vector.multi_reduction <add>, %506, %cst_170 [1] : vector<64x64xf32> to vector<64xf32>
    %508 = vector.shape_cast %507 : vector<64xf32> to vector<64x1xf32>
    %509 = tpu.reciprocal %508 {approx = true} : vector<64x1xf32> -> vector<64x1xf32>
    %510 = vector.broadcast %509 : vector<64x1xf32> to vector<64x64xf32>
    %511 = arith.mulf %506, %510 : vector<64x64xf32>
    %512 = arith.truncf %511 : vector<64x64xf32> to vector<64x64xbf16>
    %cst_171 = arith.constant dense<0.000000e+00> : vector<64x16xf32>
    %513 = tpu.matmul %512, %503, %cst_171 {dimension_numbers = #tpu.dot_dimension_numbers<[1], [0], [0], [1], [0, 0, 1, 1], [], []>} : vector<64x64xbf16>, vector<64x16xbf16>, vector<64x16xf32> -> vector<64x16xf32>
    %514 = arith.truncf %513 : vector<64x16xf32> to vector<64x16xbf16>
    %515 = vector.extract_strided_slice %484 {offsets = [16, 0], sizes = [16, 64], strides = [1, 1]} : vector<64x64xbf16> to vector<16x64xbf16>
    %cst_172 = arith.constant dense<0.000000e+00> : vector<64x64xf32>
    %516 = tpu.matmul %514, %515, %cst_172 {dimension_numbers = #tpu.dot_dimension_numbers<[1], [0], [0], [1], [0, 0, 1, 1], [], []>} : vector<64x16xbf16>, vector<16x64xbf16>, vector<64x64xf32> -> vector<64x64xf32>
    %517 = arith.addf %500, %516 : vector<64x64xf32>
    %518 = vector.extract_strided_slice %482 {offsets = [0, 32], sizes = [64, 16], strides = [1, 1]} : vector<64x192xbf16> to vector<64x16xbf16>
    %519 = vector.extract_strided_slice %482 {offsets = [0, 96], sizes = [64, 16], strides = [1, 1]} : vector<64x192xbf16> to vector<64x16xbf16>
    %520 = vector.extract_strided_slice %482 {offsets = [0, 160], sizes = [64, 16], strides = [1, 1]} : vector<64x192xbf16> to vector<64x16xbf16>
    %cst_173 = arith.constant dense<0.000000e+00> : vector<64x64xf32>
    %521 = tpu.matmul %518, %519, %cst_173 {dimension_numbers = #tpu.dot_dimension_numbers<[1], [1], [0], [0], [0, 0, 1, 0], [], []>} : vector<64x16xbf16>, vector<64x16xbf16>, vector<64x64xf32> -> vector<64x64xf32>
    %522 = arith.addf %521, %13 : vector<64x64xf32>
    %523 = math.exp %522 : vector<64x64xf32>
    %cst_174 = arith.constant dense<0.000000e+00> : vector<64xf32>
    %524 = vector.multi_reduction <add>, %523, %cst_174 [1] : vector<64x64xf32> to vector<64xf32>
    %525 = vector.shape_cast %524 : vector<64xf32> to vector<64x1xf32>
    %526 = tpu.reciprocal %525 {approx = true} : vector<64x1xf32> -> vector<64x1xf32>
    %527 = vector.broadcast %526 : vector<64x1xf32> to vector<64x64xf32>
    %528 = arith.mulf %523, %527 : vector<64x64xf32>
    %529 = arith.truncf %528 : vector<64x64xf32> to vector<64x64xbf16>
    %cst_175 = arith.constant dense<0.000000e+00> : vector<64x16xf32>
    %530 = tpu.matmul %529, %520, %cst_175 {dimension_numbers = #tpu.dot_dimension_numbers<[1], [0], [0], [1], [0, 0, 1, 1], [], []>} : vector<64x64xbf16>, vector<64x16xbf16>, vector<64x16xf32> -> vector<64x16xf32>
    %531 = arith.truncf %530 : vector<64x16xf32> to vector<64x16xbf16>
    %532 = vector.extract_strided_slice %484 {offsets = [32, 0], sizes = [16, 64], strides = [1, 1]} : vector<64x64xbf16> to vector<16x64xbf16>
    %cst_176 = arith.constant dense<0.000000e+00> : vector<64x64xf32>
    %533 = tpu.matmul %531, %532, %cst_176 {dimension_numbers = #tpu.dot_dimension_numbers<[1], [0], [0], [1], [0, 0, 1, 1], [], []>} : vector<64x16xbf16>, vector<16x64xbf16>, vector<64x64xf32> -> vector<64x64xf32>
    %534 = arith.addf %517, %533 : vector<64x64xf32>
    %535 = vector.extract_strided_slice %482 {offsets = [0, 48], sizes = [64, 16], strides = [1, 1]} : vector<64x192xbf16> to vector<64x16xbf16>
    %536 = vector.extract_strided_slice %482 {offsets = [0, 112], sizes = [64, 16], strides = [1, 1]} : vector<64x192xbf16> to vector<64x16xbf16>
    %537 = vector.extract_strided_slice %482 {offsets = [0, 176], sizes = [64, 16], strides = [1, 1]} : vector<64x192xbf16> to vector<64x16xbf16>
    %cst_177 = arith.constant dense<0.000000e+00> : vector<64x64xf32>
    %538 = tpu.matmul %535, %536, %cst_177 {dimension_numbers = #tpu.dot_dimension_numbers<[1], [1], [0], [0], [0, 0, 1, 0], [], []>} : vector<64x16xbf16>, vector<64x16xbf16>, vector<64x64xf32> -> vector<64x64xf32>
    %539 = arith.addf %538, %13 : vector<64x64xf32>
    %540 = math.exp %539 : vector<64x64xf32>
    %cst_178 = arith.constant dense<0.000000e+00> : vector<64xf32>
    %541 = vector.multi_reduction <add>, %540, %cst_178 [1] : vector<64x64xf32> to vector<64xf32>
    %542 = vector.shape_cast %541 : vector<64xf32> to vector<64x1xf32>
    %543 = tpu.reciprocal %542 {approx = true} : vector<64x1xf32> -> vector<64x1xf32>
    %544 = vector.broadcast %543 : vector<64x1xf32> to vector<64x64xf32>
    %545 = arith.mulf %540, %544 : vector<64x64xf32>
    %546 = arith.truncf %545 : vector<64x64xf32> to vector<64x64xbf16>
    %cst_179 = arith.constant dense<0.000000e+00> : vector<64x16xf32>
    %547 = tpu.matmul %546, %537, %cst_179 {dimension_numbers = #tpu.dot_dimension_numbers<[1], [0], [0], [1], [0, 0, 1, 1], [], []>} : vector<64x64xbf16>, vector<64x16xbf16>, vector<64x16xf32> -> vector<64x16xf32>
    %548 = arith.truncf %547 : vector<64x16xf32> to vector<64x16xbf16>
    %549 = vector.extract_strided_slice %484 {offsets = [48, 0], sizes = [16, 64], strides = [1, 1]} : vector<64x64xbf16> to vector<16x64xbf16>
    %cst_180 = arith.constant dense<0.000000e+00> : vector<64x64xf32>
    %550 = tpu.matmul %548, %549, %cst_180 {dimension_numbers = #tpu.dot_dimension_numbers<[1], [0], [0], [1], [0, 0, 1, 1], [], []>} : vector<64x16xbf16>, vector<16x64xbf16>, vector<64x64xf32> -> vector<64x64xf32>
    %551 = arith.addf %534, %550 : vector<64x64xf32>
    %552 = arith.addf %451, %551 : vector<64x64xf32>
    %553 = vector.extract_strided_slice %453 {offsets = [2, 0], sizes = [1, 64], strides = [1, 1]} : vector<6x64xf32> to vector<1x64xf32>
    %554 = vector.broadcast %553 : vector<1x64xf32> to vector<64x64xf32>
    %555 = arith.addf %552, %554 : vector<64x64xf32>
    %556 = vector.extract_strided_slice %453 {offsets = [3, 0], sizes = [1, 64], strides = [1, 1]} : vector<6x64xf32> to vector<1x64xf32>
    %557 = vector.extract_strided_slice %453 {offsets = [4, 0], sizes = [1, 64], strides = [1, 1]} : vector<6x64xf32> to vector<1x64xf32>
    %cst_181 = arith.constant dense<0.000000e+00> : vector<64xf32>
    %558 = vector.multi_reduction <add>, %555, %cst_181 [1] : vector<64x64xf32> to vector<64xf32>
    %559 = vector.shape_cast %558 : vector<64xf32> to vector<64x1xf32>
    %cst_182 = arith.constant 6.400000e+01 : f32
    %560 = vector.broadcast %cst_182 : f32 to vector<64x1xf32>
    %561 = arith.divf %559, %560 : vector<64x1xf32>
    %562 = vector.broadcast %561 : vector<64x1xf32> to vector<64x64xf32>
    %563 = arith.subf %555, %562 : vector<64x64xf32>
    %564 = arith.mulf %563, %563 : vector<64x64xf32>
    %cst_183 = arith.constant dense<0.000000e+00> : vector<64xf32>
    %565 = vector.multi_reduction <add>, %564, %cst_183 [1] : vector<64x64xf32> to vector<64xf32>
    %566 = vector.shape_cast %565 : vector<64xf32> to vector<64x1xf32>
    %cst_184 = arith.constant 6.400000e+01 : f32
    %567 = vector.broadcast %cst_184 : f32 to vector<64x1xf32>
    %568 = arith.divf %566, %567 : vector<64x1xf32>
    %569 = vector.broadcast %561 : vector<64x1xf32> to vector<64x64xf32>
    %570 = arith.subf %555, %569 : vector<64x64xf32>
    %cst_185 = arith.constant 9.99999974E-6 : f32
    %571 = vector.broadcast %cst_185 : f32 to vector<64x1xf32>
    %572 = arith.addf %568, %571 : vector<64x1xf32>
    %573 = math.rsqrt %572 : vector<64x1xf32>
    %574 = vector.broadcast %573 : vector<64x1xf32> to vector<64x64xf32>
    %575 = arith.mulf %570, %574 : vector<64x64xf32>
    %576 = vector.broadcast %556 : vector<1x64xf32> to vector<64x64xf32>
    %577 = arith.mulf %575, %576 : vector<64x64xf32>
    %578 = vector.broadcast %557 : vector<1x64xf32> to vector<64x64xf32>
    %579 = arith.addf %577, %578 : vector<64x64xf32>
    %580 = arith.truncf %579 : vector<64x64xf32> to vector<64x64xbf16>
    %c3_186 = arith.constant 3 : index
    %c0_187 = arith.constant 0 : index
    %c0_188 = arith.constant 0 : index
    %581 = vector.load %arg8[%c3_186, %c0_187, %c0_188] : memref<4x64x256xbf16, #tpu.memory_space<vmem>>, vector<1x64x256xbf16>
    %582 = vector.shape_cast %581 : vector<1x64x256xbf16> to vector<64x256xbf16>
    %cst_189 = arith.constant dense<0.000000e+00> : vector<64x256xf32>
    %583 = tpu.matmul %580, %582, %cst_189 {dimension_numbers = #tpu.dot_dimension_numbers<[1], [0], [0], [1], [0, 0, 1, 1], [], []>} : vector<64x64xbf16>, vector<64x256xbf16>, vector<64x256xf32> -> vector<64x256xf32>
    %c3_190 = arith.constant 3 : index
    %c0_191 = arith.constant 0 : index
    %c0_192 = arith.constant 0 : index
    %584 = vector.load %arg5[%c3_190, %c0_191, %c0_192] : memref<4x1x256xf32, #tpu.memory_space<vmem>>, vector<1x1x256xf32>
    %585 = vector.shape_cast %584 : vector<1x1x256xf32> to vector<1x256xf32>
    %586 = vector.broadcast %585 : vector<1x256xf32> to vector<64x256xf32>
    %587 = arith.addf %583, %586 : vector<64x256xf32>
    %cst_193 = arith.constant 0.000000e+00 : f32
    %588 = vector.broadcast %cst_193 : f32 to vector<64x256xf32>
    %589 = arith.maximumf %587, %588 : vector<64x256xf32>
    %590 = arith.truncf %589 : vector<64x256xf32> to vector<64x256xbf16>
    %c3_194 = arith.constant 3 : index
    %c0_195 = arith.constant 0 : index
    %c0_196 = arith.constant 0 : index
    %591 = vector.load %arg9[%c3_194, %c0_195, %c0_196] : memref<4x256x64xbf16, #tpu.memory_space<vmem>>, vector<1x256x64xbf16>
    %592 = vector.shape_cast %591 : vector<1x256x64xbf16> to vector<256x64xbf16>
    %cst_197 = arith.constant dense<0.000000e+00> : vector<64x64xf32>
    %593 = tpu.matmul %590, %592, %cst_197 {dimension_numbers = #tpu.dot_dimension_numbers<[1], [0], [0], [1], [0, 0, 1, 1], [], []>} : vector<64x256xbf16>, vector<256x64xbf16>, vector<64x64xf32> -> vector<64x64xf32>
    %594 = arith.addf %555, %593 : vector<64x64xf32>
    %595 = vector.extract_strided_slice %453 {offsets = [5, 0], sizes = [1, 64], strides = [1, 1]} : vector<6x64xf32> to vector<1x64xf32>
    %596 = vector.broadcast %595 : vector<1x64xf32> to vector<64x64xf32>
    %597 = arith.addf %594, %596 : vector<64x64xf32>
    %c0_198 = arith.constant 0 : index
    %c0_199 = arith.constant 0 : index
    %598 = vector.load %arg10[%c0_198, %c0_199] : memref<2x64xf32, #tpu.memory_space<vmem>>, vector<2x64xf32>
    %599 = vector.extract_strided_slice %598 {offsets = [0, 0], sizes = [1, 64], strides = [1, 1]} : vector<2x64xf32> to vector<1x64xf32>
    %600 = vector.extract_strided_slice %598 {offsets = [1, 0], sizes = [1, 64], strides = [1, 1]} : vector<2x64xf32> to vector<1x64xf32>
    %cst_200 = arith.constant dense<0.000000e+00> : vector<64xf32>
    %601 = vector.multi_reduction <add>, %597, %cst_200 [1] : vector<64x64xf32> to vector<64xf32>
    %602 = vector.shape_cast %601 : vector<64xf32> to vector<64x1xf32>
    %cst_201 = arith.constant 6.400000e+01 : f32
    %603 = vector.broadcast %cst_201 : f32 to vector<64x1xf32>
    %604 = arith.divf %602, %603 : vector<64x1xf32>
    %605 = vector.broadcast %604 : vector<64x1xf32> to vector<64x64xf32>
    %606 = arith.subf %597, %605 : vector<64x64xf32>
    %607 = arith.mulf %606, %606 : vector<64x64xf32>
    %cst_202 = arith.constant dense<0.000000e+00> : vector<64xf32>
    %608 = vector.multi_reduction <add>, %607, %cst_202 [1] : vector<64x64xf32> to vector<64xf32>
    %609 = vector.shape_cast %608 : vector<64xf32> to vector<64x1xf32>
    %cst_203 = arith.constant 6.400000e+01 : f32
    %610 = vector.broadcast %cst_203 : f32 to vector<64x1xf32>
    %611 = arith.divf %609, %610 : vector<64x1xf32>
    %612 = vector.broadcast %604 : vector<64x1xf32> to vector<64x64xf32>
    %613 = arith.subf %597, %612 : vector<64x64xf32>
    %cst_204 = arith.constant 9.99999974E-6 : f32
    %614 = vector.broadcast %cst_204 : f32 to vector<64x1xf32>
    %615 = arith.addf %611, %614 : vector<64x1xf32>
    %616 = math.rsqrt %615 : vector<64x1xf32>
    %617 = vector.broadcast %616 : vector<64x1xf32> to vector<64x64xf32>
    %618 = arith.mulf %613, %617 : vector<64x64xf32>
    %619 = vector.broadcast %599 : vector<1x64xf32> to vector<64x64xf32>
    %620 = arith.mulf %618, %619 : vector<64x64xf32>
    %621 = vector.broadcast %600 : vector<1x64xf32> to vector<64x64xf32>
    %622 = arith.addf %620, %621 : vector<64x64xf32>
    %623 = arith.truncf %622 : vector<64x64xf32> to vector<64x64xbf16>
    %c0_205 = arith.constant 0 : index
    %c0_206 = arith.constant 0 : index
    %624 = vector.load %arg11[%c0_205, %c0_206] : memref<64x128xbf16, #tpu.memory_space<vmem>>, vector<64x128xbf16>
    %cst_207 = arith.constant dense<0.000000e+00> : vector<64x128xf32>
    %625 = tpu.matmul %623, %624, %cst_207 {dimension_numbers = #tpu.dot_dimension_numbers<[1], [0], [0], [1], [0, 0, 1, 1], [], []>} : vector<64x64xbf16>, vector<64x128xbf16>, vector<64x128xf32> -> vector<64x128xf32>
    %c0_208 = arith.constant 0 : index
    %c0_209 = arith.constant 0 : index
    %626 = vector.load %arg12[%c0_208, %c0_209] : memref<1x128xf32, #tpu.memory_space<vmem>>, vector<1x128xf32>
    %627 = vector.broadcast %626 : vector<1x128xf32> to vector<64x128xf32>
    %628 = arith.addf %625, %627 : vector<64x128xf32>
    %c0_210 = arith.constant 0 : index
    %c0_211 = arith.constant 0 : index
    %629 = vector.load %arg13[%c0_210, %c0_211] : memref<64x128xf32, #tpu.memory_space<vmem>>, vector<64x128xf32>
    tpu.vector_store %arg13[%c0_210, %c0_211], %628 {strides = array<i32>} : memref<64x128xf32, #tpu.memory_space<vmem>>, vector<64x128xf32>,
    return
  }
}

</mosaic_0001>

<bundles_post_ra>
// kernel: gpt_forward.1
= control target key start
LH: loop header
LB: loop body
LE: loop exit
PB: predicated region body
PF: predicated region fallthrough
CT: control target
= control target key end

     0   :  { %v12136_v2 = vmov 0   ;;  %s15529_s0 = inlined_call_operand.vmem [shape: s32[64,1], index: 0, kind: input, shape index: {}]   ;;  %s15530_s1 = inlined_call_operand.vmem [shape: bf16[128,64], index: 1, kind: input, shape index: {}]   ;;  %s15531_s2 = inlined_call_operand.vmem [shape: f32[32,64], index: 2, kind: input, shape index: {}]   ;;  %s15532_s3 = inlined_call_operand.vmem [shape: f32[64,64], index: 3, kind: input, shape index: {}]   ;;  %s15533_s4 = inlined_call_operand.vmem [shape: f32[4,6,64], index: 4, kind: input, shape index: {}]   ;;  %s15534_s5 = inlined_call_operand.vmem [shape: f32[4,1,256], index: 5, kind: input, shape index: {}]   ;;  %s15535_s6 = inlined_call_operand.vmem [shape: bf16[4,64,192], index: 6, kind: input, shape index: {}]   ;;  %s15536_s7 = inlined_call_operand.vmem [shape: bf16[4,64,64], index: 7, kind: input, shape index: {}]   ;;  %s15537_s8 = inlined_call_operand.vmem [shape: bf16[4,64,256], index: 8, kind: input, shape index: {}]   ;;  %s15538_s9 = inlined_call_operand.vmem [shape: bf16[4,256,64], index: 9, kind: input, shape index: {}]   ;;  %s15539_s10 = inlined_call_operand.vmem [shape: f32[2,64], index: 10, kind: input, shape index: {}]   ;;  %s15540_s11 = inlined_call_operand.vmem [shape: bf16[64,128], index: 11, kind: input, shape index: {}]   ;;  %s15541_s12 = inlined_call_operand.vmem [shape: f32[1,128], index: 12, kind: input, shape index: {}]   ;;  %s15542_s13 = inlined_call_operand.hbm [shape: f32[64,128], index: 13, kind: output, shape index: {}]  }
   0x1   :  { %v50_v0 = vld [vmem:[%s15529_s0 + $0x10] sm:$0xff]  ;;  %v48_v1 = vld [vmem:[%s15529_s0] sm:$0xff]  ;;  %11239 = vset.pattern.permute.xlu1 %v12136_v2  ;;  %11238 = vset.pattern.permute.xlu0 %v12136_v2  ;;  %v51_v3 = vld [vmem:[%s15529_s0 + $0x18] sm:$0xff] }
   0x2   :  { %63 = vperm.xlu1 %11239, %v50_v0   ;;  %57 = vperm.xlu0 %11238, %v48_v1   ;;  %v49_v4 = vld [vmem:[%s15529_s0 + $0x8] sm:$0xff]  ;;  %v11240_v5 = vld [vmem:[%s15530_s1] sm:$0xff]   ;;  %v11242_v9 = vld [vmem:[%s15530_s1 + $0x10] sm:$0xff]  }
   0x3   :  { %468 = vmatprep.mubr.bf16.mxu1 %v12136_v2  ;;  %v11241_v6 = vld [vmem:[%s15530_s1 + $0x8] sm:$0xff]   ;;  %10354 = vmatprep.subr.bf16.mxu0 %v11240_v5  ;;  %v52_v8 = vld [vmem:[%s15529_s0 + $0x20] sm:$0xff]  ;;  %v55_v10 = vld [vmem:[%s15529_s0 + $0x38] sm:$0xff] }
   0x4   :  { %v53_v7 = vld [vmem:[%s15529_s0 + $0x28] sm:$0xff]  ;;  %10355 = vmatpush3.bf16.msra.mxu0 %v11240_v5  ;;  %v54_v11 = vld [vmem:[%s15529_s0 + $0x30] sm:$0xff]  ;;  %v11243_v12 = vld [vmem:[%s15530_s1 + $0x18] sm:$0xff]  }
   0x5   :  { %10356 = vmatprep.subr.bf16.mxu0 %v11241_v6  ;;  %v11244_v13 = vld [vmem:[%s15530_s1 + $0x20] sm:$0xff]   ;;  %v11245_v14 = vld [vmem:[%s15530_s1 + $0x28] sm:$0xff]   ;;  %v11246_v15 = vld [vmem:[%s15530_s1 + $0x30] sm:$0xff]  }
   0x6   :  { %66 = vperm.xlu1 %11239, %v51_v3   ;;  %60 = vperm.xlu0 %11238, %v49_v4   ;;  %v11247_v16 = vld [vmem:[%s15530_s1 + $0x38] sm:$0xff]  }
   0x8   :  { %10357 = vmatpush3.bf16.msra.mxu0 %v11241_v6 }
   0x9   :  { %10358 = vmatprep.subr.bf16.mxu0 %v11242_v9 }
   0xa   :  { %72 = vperm.xlu1 %11239, %v53_v7   ;;  %69 = vperm.xlu0 %11238, %v52_v8  }
   0xc   :  { %10359 = vmatpush3.bf16.msra.mxu0 %v11242_v9 }
   0xd   :  { %10360 = vmatprep.subr.bf16.mxu0 %v11243_v12 }
   0xe   :  { %78 = vperm.xlu1 %11239, %v55_v10   ;;  %75 = vperm.xlu0 %11238, %v54_v11  }
  0x10   :  { %10361 = vmatpush3.bf16.msra.mxu0 %v11243_v12 }
  0x11   :  { %10362 = vmatprep.subr.bf16.mxu0 %v11244_v13 }
  0x14   :  { %10363 = vmatpush3.bf16.msra.mxu0 %v11244_v13 }
  0x15   :  { %10364 = vmatprep.subr.bf16.mxu0 %v11245_v14 }
  0x18   :  { %10365 = vmatpush3.bf16.msra.mxu0 %v11245_v14 }
  0x19   :  { %10366 = vmatprep.subr.bf16.mxu0 %v11246_v15 }
  0x1c   :  { %10367 = vmatpush3.bf16.msra.mxu0 %v11246_v15 }
  0x1d   :  { %10368 = vmatprep.subr.bf16.mxu0 %v11247_v16 }
  0x20   :  { %10369 = vmatpush3.bf16.msra.mxu0 %v11247_v16 }
  0x21   :  { %18 = vsyncpa [#allocation3], 0  ;;  %v46_v17 = vlaneseq  ;;  %v12137_v23 = vmov 1.0|1.0   ;;  %v116_v28 = vld [vmem:[%s15531_s2] sm:$0xff]  ;;  %v118_v30 = vld [vmem:[%s15531_s2 + $0x10] sm:$0xff] }
  0x22   :  { %v117_v32 = vld [vmem:[%s15531_s2 + $0x8] sm:$0xff]  ;;  %vm242_vm12 = vcmask 523264   ;;  %v119_v39 = vld [vmem:[%s15531_s2 + $0x18] sm:$0xff]  ;;  %vm537_vm13 = vcmask 130048   ;;  %s12138_s27 = smov 64   ;;  %s12139_s21 = smov 48  }
  0x23   :  { %v47_v20 = vand.u32 127, %v46_v17  ;;  %s12140_s25 = smov 112   ;;  %s12141_s26 = smov 32  }
  0x24   :  { %s12142_s28 = smov 96   ;;  %s12143_s2 = smov 16  }
  0x25   :  { %s12144_s29 = smov 80   ;;  %s12145_s24 = smov [#allocation2]  }
  0x26   :  { %s9260_s30 = sshll.u32 %s12145_s24, 4  ;;  %s9261_s30 = int_to_ptr.vmem [resolvable:$true] %s9260_s30 }
  0x27   :  { %p12117_p1 = scmp.lt.s32.totalorder %s9261_s30, %s9261_s30 }
  0x81   :  { %v64_v18 = vpop.permute.xlu1 %63  ;;  %v58_v19 = vpop.permute.xlu0 %57 }
  0x82   :  { %vm82_vm0 = vcmp.eq.s32.totalorder %v47_v20, %v64_v18  ;;  %vm80_vm4 = vcmp.eq.s32.totalorder %v47_v20, %v58_v19 }
  0x85   :  { %v67_v21 = vpop.permute.xlu1 %66  ;;  %v61_v22 = vpop.permute.xlu0 %60 }
  0x86   :  { %vm83_vm1 = vcmp.eq.s32.totalorder %v47_v20, %v67_v21  ;;  %vm81_vm2 = vcmp.eq.s32.totalorder %v47_v20, %v61_v22 }
  0x87   :  { %vm9281_vm3 = vmpackc.low %vm83_vm1, %vm82_vm0 }
  0x88   :  { %vm9279_vm5 = vmpackc.low %vm81_vm2, %vm80_vm4 }
  0x89   :  { %10370 = vmatprep.mubr.msk.bf16.mxu0 %vm9279_vm5, %v12137_v23  ;;  %v73_v24 = vpop.permute.xlu1 %72  ;;  %v70_v25 = vpop.permute.xlu0 %69 }
  0x8a   :  { %vm85_vm6 = vcmp.eq.s32.totalorder %v47_v20, %v73_v24  ;;  %vm84_vm7 = vcmp.eq.s32.totalorder %v47_v20, %v70_v25  ;;  %10371 = vmatmul.mubr.msk.bf16.vlgmr.msra.gmra.mrb[0].mxu0 %vm9281_vm3, %v12137_v23 }
  0x8b   :  { %vm9283_vm8 = vmpackc.low %vm85_vm6, %vm84_vm7 }
  0x8c   :  { %10374 = vmatprep.mubr.msk.bf16.mxu0 %vm9283_vm8, %v12137_v23 }
  0x8d   :  { %v79_v26 = vpop.permute.xlu1 %78  ;;  %v76_v27 = vpop.permute.xlu0 %75 }
  0x8e   :  { %vm87_vm9 = vcmp.eq.s32.totalorder %v47_v20, %v79_v26  ;;  %vm86_vm10 = vcmp.eq.s32.totalorder %v47_v20, %v76_v27 }
  0x8f   :  { %vm9285_vm11 = vmpackc.low %vm87_vm9, %vm86_vm10 }
  0x92   :  { %10375 = vmatmul.mubr.msk.bf16.gmra.mrb[4].mxu0 %vm9285_vm11, %v12137_v23 }
 0x15d   :  { %v10372_v29 = vpop.f32.mrb[0].mxu0 }
 0x15e   :  { %v202_v31 = vpop.f32.mrb[1].mxu0  ;;  %v12281_v36 = vadd.f32 %v10372_v29, %v118_v30 }
 0x15f   :  { %v12279_v33 = vadd.f32 %v202_v31, %v116_v28  ;;  %v10373_v34 = vpop.f32.mrb[2].mxu0 }
 0x160   :  { %v205_v35 = vpop.f32.mrb[3].mxu0  ;;  %v12292_v41 = vadd.f32 %v10373_v34, %v119_v39  ;;  %v249_v43 = vsel %vm242_vm12, %v12281_v36, 0.0 }
 0x161   :  { %v12283_v37 = vadd.f32 %v205_v35, %v117_v32  ;;  %v243_v38 = vsel %vm242_vm12, %v12279_v33, 0.0  ;;  %v11248_v35 = vld [vmem:[%s15535_s6 + $0x4] ss:$8 sps:$4 sm:$0xff]  }
 0x162   :  { %244 = vadd.xlane.f32.xlu0 %v243_v38  ;;  %v252_v51 = vsel %vm242_vm12, %v12292_v41, 0.0  ;;  %v11250_v38 = vld [vmem:[%s15535_s6] ss:$8 sps:$4 sm:$0xff]   ;;  %436 = vmatprep.subr.bf16.mxu1 %v11248_v35 }
 0x163   :  { %v246_v40 = vsel %vm242_vm12, %v12283_v37, 0.0  ;;  %437 = vmatpush1.bf16.msra.mxu1 %v11250_v38 }
 0x164   :  { %247 = vadd.xlane.f32.xlu1 %v246_v40  ;;  %v11253_v40 = vld [vmem:[%s15535_s6 + $0x10] ss:$8 sps:$4 sm:$0xff]  }
 0x165   :  { %v10376_v42 = vpop.f32.mrb[4].mxu0 }
 0x166   :  { %v218_v44 = vpop.f32.mrb[5].mxu0  ;;  %250 = vadd.xlane.f32.xlu0 %v249_v43  ;;  %v12298_v48 = vadd.f32 %v10376_v42, %v118_v30  ;;  %v11254_v42 = vld [vmem:[%s15535_s6 + $0x24] ss:$8 sps:$4 sm:$0xff]   ;;  %v11256_v43 = vld [vmem:[%s15535_s6 + $0x20] ss:$8 sps:$4 sm:$0xff]  }
 0x167   :  { %v12296_v45 = vadd.f32 %v218_v44, %v116_v28  ;;  %v10377_v46 = vpop.f32.mrb[6].mxu0  ;;  %v11257_v44 = vld [vmem:[%s15535_s6 + $0x34] ss:$8 sps:$4 sm:$0xff]  }
 0x168   :  { %v221_v47 = vpop.f32.mrb[7].mxu0  ;;  %v12306_v52 = vadd.f32 %v10377_v46, %v119_v39  ;;  %v261_v53 = vsel %vm242_vm12, %v12298_v48, 0.0  ;;  %v11251_v39 = vld [vmem:[%s15535_s6 + $0x14] ss:$8 sps:$4 sm:$0xff]   ;;  %v11259_v46 = vld [vmem:[%s15535_s6 + $0x30] ss:$8 sps:$4 sm:$0xff]  }
 0x169   :  { %v12300_v49 = vadd.f32 %v221_v47, %v117_v32  ;;  %v255_v50 = vsel %vm242_vm12, %v12296_v45, 0.0  ;;  %438 = vmatprep.subr.bf16.mxu1 %v11251_v39 }
 0x16a   :  { %256 = vadd.xlane.f32.xlu1 %v255_v50  ;;  %253 = vadd.xlane.f32.xlu0 %v252_v51  ;;  %v264_v55 = vsel %vm242_vm12, %v12306_v52, 0.0 }
 0x16b   :  { %v258_v54 = vsel %vm242_vm12, %v12300_v49, 0.0  ;;  %439 = vmatpush1.bf16.msra.mxu1 %v11253_v40 }
 0x16c   :  { %440 = vmatprep.subr.bf16.mxu1 %v11254_v42 }
 0x16e   :  { %262 = vadd.xlane.f32.xlu1 %v261_v53  ;;  %259 = vadd.xlane.f32.xlu0 %v258_v54 }
 0x16f   :  { %441 = vmatpush1.bf16.msra.mxu1 %v11256_v43 }
 0x170   :  { %442 = vmatprep.subr.bf16.mxu1 %v11257_v44 }
 0x172   :  { %265 = vadd.xlane.f32.xlu0 %v264_v55 }
 0x173   :  { %443 = vmatpush1.bf16.msra.mxu1 %v11259_v46 }
 0x1ef   :  { %v245_v56 = vpop.xlane.xlu0 %244 }
 0x1f0   :  { %v268_v57 = vmul.f32 0.015625, %v245_v56 }
 0x1f1   :  { %v248_v58 = vpop.xlane.xlu1 %247 }
 0x1f2   :  { %v12315_v59 = vsub.f32 %v12279_v33, %v268_v57  ;;  %v269_v60 = vmul.f32 0.015625, %v248_v58  ;;  %v12387_v58 = vshrl.u32 %v46_v17, 7 }
 0x1f3   :  { %v251_v61 = vpop.xlane.xlu0 %250 }
 0x1f4   :  { %v12318_v62 = vsub.f32 %v12283_v37, %v269_v60  ;;  %v270_v63 = vmul.f32 0.015625, %v251_v61  ;;  %v284_v0 = vmul.f32 %v12315_v59, %v12315_v59  ;;  %v12396_v17 = vsub.s32 1, %v12387_v58 }
 0x1f6   :  { %v12323_v1 = vsub.f32 %v12281_v36, %v270_v63  ;;  %v292_v3 = vsel %vm242_vm12, %v284_v0, 0.0  ;;  %v285_v4 = vmul.f32 %v12318_v62, %v12318_v62 }
 0x1f7   :  { %v257_v5 = vpop.xlane.xlu1 %256  ;;  %293 = vadd.xlane.f32.xlu1 %v292_v3  ;;  %v254_v6 = vpop.xlane.xlu0 %253 }
 0x1f8   :  { %v272_v7 = vmul.f32 0.015625, %v257_v5  ;;  %v271_v8 = vmul.f32 0.015625, %v254_v6  ;;  %v295_v9 = vsel %vm242_vm12, %v285_v4, 0.0  ;;  %v286_v10 = vmul.f32 %v12323_v1, %v12323_v1  ;;  %v241_v6 = vld [vmem:[%s15533_s4] sm:$0x3f] }
 0x1f9   :  { %296 = vadd.xlane.f32.xlu0 %v295_v9  ;;  %v12390_v4 = vsub.s32 0, %v12387_v58 }
 0x1fa   :  { %v12332_v11 = vsub.f32 %v12296_v45, %v272_v7  ;;  %v12335_v12 = vsub.f32 %v12292_v41, %v271_v8  ;;  %v298_v13 = vsel %vm242_vm12, %v286_v10, 0.0 }
 0x1fb   :  { %v263_v14 = vpop.xlane.xlu1 %262  ;;  %299 = vadd.xlane.f32.xlu1 %v298_v13  ;;  %v260_v15 = vpop.xlane.xlu0 %259  ;;  %v351_v13 = vrot.slane %v241_v6, %v12390_v4 }
 0x1fc   :  { %v274_v16 = vmul.f32 0.015625, %v263_v14  ;;  %v273_v18 = vmul.f32 0.015625, %v260_v15  ;;  %v288_v19 = vmul.f32 %v12332_v11, %v12332_v11  ;;  %v287_v20 = vmul.f32 %v12335_v12, %v12335_v12 }
 0x1fe   :  { %v12343_v21 = vsub.f32 %v12298_v48, %v274_v16  ;;  %v12346_v22 = vsub.f32 %v12300_v49, %v273_v18  ;;  %v304_v23 = vsel %vm242_vm12, %v288_v19, 0.0  ;;  %v301_v24 = vsel %vm242_vm12, %v287_v20, 0.0 }
 0x1ff   :  { %305 = vadd.xlane.f32.xlu1 %v304_v23  ;;  %302 = vadd.xlane.f32.xlu0 %v301_v24  ;;  %v266_v25 = vpop.xlane.xlu0 %265 }
 0x200   :  { %v275_v26 = vmul.f32 0.015625, %v266_v25  ;;  %v290_v27 = vmul.f32 %v12343_v21, %v12343_v21  ;;  %v289_v28 = vmul.f32 %v12346_v22, %v12346_v22 }
 0x202   :  { %v12355_v29 = vsub.f32 %v12306_v52, %v275_v26  ;;  %v310_v30 = vsel %vm242_vm12, %v290_v27, 0.0  ;;  %v307_v31 = vsel %vm242_vm12, %v289_v28, 0.0  ;;  %v363_v26 = vrot.slane %v241_v6, %v12396_v17 }
 0x203   :  { %311 = vadd.xlane.f32.xlu1 %v310_v30  ;;  %308 = vadd.xlane.f32.xlu0 %v307_v31 }
 0x204   :  { %v291_v32 = vmul.f32 %v12355_v29, %v12355_v29 }
 0x206   :  { %v313_v34 = vsel %vm242_vm12, %v291_v32, 0.0 }
 0x207   :  { %314 = vadd.xlane.f32.xlu0 %v313_v34 }
 0x284   :  { %v294_v47 = vpop.xlane.xlu1 %293 }
 0x285   :  { %v316_v50 = vmul.f32 0.015625, %v294_v47 }
 0x286   :  { %v297_v51 = vpop.xlane.xlu0 %296 }
 0x287   :  { %v324_v53 = vadd.f32 1e-05, %v316_v50  ;;  %v317_v54 = vmul.f32 0.015625, %v297_v51 }
 0x288   :  { %v300_v55 = vpop.xlane.xlu1 %299 }
 0x289   :  { %11428 = vrsqrt.f32 %v324_v53  ;;  %v325_v56 = vadd.f32 1e-05, %v317_v54  ;;  %v318_v57 = vmul.f32 0.015625, %v300_v55 }
 0x28b   :  { %11430 = vrsqrt.f32 %v325_v56  ;;  %v326_v60 = vadd.f32 1e-05, %v318_v57 }
 0x28c   :  { %v306_v61 = vpop.xlane.xlu1 %305  ;;  %v303_v63 = vpop.xlane.xlu0 %302 }
 0x28d   :  { %11432 = vrsqrt.f32 %v326_v60  ;;  %v320_v0 = vmul.f32 0.015625, %v306_v61  ;;  %v319_v3 = vmul.f32 0.015625, %v303_v63 }
 0x28f   :  { %v327_v5 = vadd.f32 1e-05, %v319_v3  ;;  %v328_v8 = vadd.f32 1e-05, %v320_v0 }
 0x290   :  { %v309_v7 = vpop.xlane.xlu0 %308  ;;  %v312_v10 = vpop.xlane.xlu1 %311 }
 0x291   :  { %v321_v9 = vmul.f32 0.015625, %v309_v7  ;;  %11434 = vrsqrt.f32 %v327_v5  ;;  %v322_v20 = vmul.f32 0.015625, %v312_v10 }
 0x292   :  { %11436 = vrsqrt.f32 %v328_v8 }
 0x293   :  { %v11429_v14 = vpop.eup %11428  ;;  %v329_v15 = vadd.f32 1e-05, %v321_v9  ;;  %v330_v31 = vadd.f32 1e-05, %v322_v20 }
 0x294   :  { %v315_v16 = vpop.xlane.xlu0 %314  ;;  %v340_v18 = vmul.f32 %v11429_v14, %v12315_v59 }
 0x295   :  { %v11431_v19 = vpop.eup %11430  ;;  %v323_v23 = vmul.f32 0.015625, %v315_v16  ;;  %11438 = vrsqrt.f32 %v329_v15 }
 0x296   :  { %v341_v24 = vmul.f32 %v11431_v19, %v12318_v62  ;;  %v352_v25 = vmul.f32 %v351_v13, %v340_v18 }
 0x297   :  { %v11433_v27 = vpop.eup %11432  ;;  %v331_v28 = vadd.f32 1e-05, %v323_v23 }
 0x298   :  { %v353_v30 = vmul.f32 %v351_v13, %v341_v24  ;;  %v364_v32 = vadd.f32 %v363_v26, %v352_v25  ;;  %v342_v35 = vmul.f32 %v11433_v27, %v12323_v1 }
 0x299   :  { %11440 = vrsqrt.f32 %v331_v28 }
 0x29a   :  { %v365_v34 = vadd.f32 %v363_v26, %v353_v30  ;;  %11442 = vrsqrt.f32 %v330_v31  ;;  %v354_v62 = vmul.f32 %v351_v13, %v342_v35 }
 0x29b   :  { %v11435_v59 = vpop.eup %11434 }
 0x29c   :  { %v372_v38 = vpack.c.bf16 %v365_v34, %v364_v32  ;;  %v343_v39 = vmul.f32 %v11435_v59, %v12335_v12  ;;  %v11437_v40 = vpop.eup %11436  ;;  %v366_v47 = vadd.f32 %v363_v26, %v354_v62 }
 0x29d   :  { %v344_v1 = vmul.f32 %v11437_v40, %v12332_v11 }
 0x29e   :  { %9295 = vmatmul.mubr.msk.bf16.vlgmr.msra.gmra.mrb[0].mxu1 %vm242_vm12, %v372_v38  ;;  %v355_v42 = vmul.f32 %v351_v13, %v343_v39 }
 0x29f   :  { %478 = vmatprep.mubr.bf16.mxu1 %v12136_v2  ;;  %v11439_v43 = vpop.eup %11438  ;;  %v356_v12 = vmul.f32 %v351_v13, %v344_v1 }
 0x2a0   :  { %v367_v44 = vadd.f32 %v363_v26, %v355_v42  ;;  %v345_v46 = vmul.f32 %v11439_v43, %v12346_v22  ;;  %v12466_v43 = vld [vmem:[%s15532_s3 + $0x10] sm:$0xff] }
 0x2a1   :  { %v368_v57 = vadd.f32 %v363_v26, %v356_v12 }
 0x2a2   :  { %v373_v50 = vpack.c.bf16 %v367_v44, %v366_v47  ;;  %v357_v51 = vmul.f32 %v351_v13, %v345_v46  ;;  %v12471_v44 = vld [vmem:[%s15532_s3] sm:$0xff]  ;;  %v12476_v47 = vld [vmem:[%s15532_s3 + $0x18] sm:$0xff] }
 0x2a3   :  { %v11441_v53 = vpop.eup %11440 }
 0x2a4   :  { %v11443_v54 = vpop.eup %11442  ;;  %v369_v55 = vadd.f32 %v363_v26, %v357_v51  ;;  %v347_v56 = vmul.f32 %v11441_v53, %v12355_v29  ;;  %v12482_v51 = vld [vmem:[%s15532_s3 + $0x8] sm:$0xff] }
 0x2a5   :  { %v346_v60 = vmul.f32 %v11443_v54, %v12343_v21 }
 0x2a6   :  { %9296 = vmatmul.mubr.msk.bf16.gmra.mrb[4].mxu1 %vm242_vm12, %v373_v50  ;;  %v374_v61 = vpack.c.bf16 %v369_v55, %v368_v57  ;;  %v359_v22 = vmul.f32 %v351_v13, %v347_v56 }
 0x2a7   :  { %488 = vmatprep.mubr.bf16.mxu1 %v12136_v2  ;;  %v358_v11 = vmul.f32 %v351_v13, %v346_v60 }
 0x2a8   :  { %v371_v63 = vadd.f32 %v363_v26, %v359_v22 }
 0x2a9   :  { %v370_v0 = vadd.f32 %v363_v26, %v358_v11 }
 0x2ab   :  { %v375_v3 = vpack.c.bf16 %v371_v63, %v370_v0  ;;  %v12490_v63 = vld [vmem:[%s15532_s3 + $0x38] sm:$0xff] }
 0x2ae   :  { %9297 = vmatmul.mubr.msk.bf16.gmra.mrb[8].mxu1 %vm242_vm12, %v374_v61 }
 0x2af   :  { %498 = vmatprep.mubr.bf16.mxu1 %v12136_v2 }
 0x2b6   :  { %9298 = vmatmul.mubr.msk.bf16.gmra.mrb[12].mxu1 %vm242_vm12, %v375_v3  ;;  %v12495_v3 = vld [vmem:[%s15532_s3 + $0x28] sm:$0xff] }
 0x371   :  { %v470_v5 = vpop.f32.mrb[0].mxu1 }
 0x372   :  { %v472_v6 = vpop.f32.mrb[1].mxu1 }
 0x373   :  { %v474_v7 = vpop.f32.mrb[2].mxu1 }
 0x374   :  { %v12415_v29 = vpack.c.bf16 %v474_v7, %v470_v5  ;;  %v476_v8 = vpop.f32.mrb[3].mxu1 }
 0x375   :  { %v12417_v21 = vpack.c.bf16 %v476_v8, %v472_v6 }
 0x376   :  { %529 = vrot.lane.b32.xlu1 %v12415_v29, %s12138_s27  ;;  %10386 = vmatprep.mubr.msk.bf16.mxu1 %vm537_vm13, %v12415_v29 }
 0x377   :  { %10394 = vmatprep.subr.bf16.mxu0 %v12417_v21 }
 0x378   :  { %10395 = vmatpush3.bf16.msra.mxu0 %v12417_v21 }
 0x379   :  { %v480_v9 = vpop.f32.mrb[4].mxu1 }
 0x37a   :  { %v482_v10 = vpop.f32.mrb[5].mxu1 }
 0x37b   :  { %v484_v13 = vpop.f32.mrb[6].mxu1 }
 0x37c   :  { %v12425_v14 = vpack.c.bf16 %v484_v13, %v480_v9  ;;  %v486_v15 = vpop.f32.mrb[7].mxu1 }
 0x37d   :  { %v12427_v16 = vpack.c.bf16 %v486_v15, %v482_v10 }
 0x37e   :  { %531 = vrot.lane.b32.xlu0 %v12425_v14, %s12138_s27 }
 0x37f   :  { %10396 = vmatprep.subr.bf16.mxu0 %v12427_v16 }
 0x380   :  { %10397 = vmatpush3.bf16.msra.mxu0 %v12427_v16 }
 0x381   :  { %v490_v18 = vpop.f32.mrb[8].mxu1 }
 0x382   :  { %v492_v19 = vpop.f32.mrb[9].mxu1 }
 0x383   :  { %v494_v20 = vpop.f32.mrb[10].mxu1 }
 0x384   :  { %v12433_v23 = vpack.c.bf16 %v494_v20, %v490_v18  ;;  %v496_v24 = vpop.f32.mrb[11].mxu1 }
 0x385   :  { %v12435_v25 = vpack.c.bf16 %v496_v24, %v492_v19 }
 0x386   :  { %533 = vrot.lane.b32.xlu1 %v12433_v23, %s12138_s27 }
 0x387   :  { %10398 = vmatprep.subr.bf16.mxu0 %v12435_v25 }
 0x388   :  { %10399 = vmatpush3.bf16.msra.mxu0 %v12435_v25 }
 0x389   :  { %v500_v26 = vpop.f32.mrb[12].mxu1 }
 0x38a   :  { %v502_v27 = vpop.f32.mrb[13].mxu1 }
 0x38b   :  { %v504_v28 = vpop.f32.mrb[14].mxu1 }
 0x38c   :  { %v12441_v30 = vpack.c.bf16 %v504_v28, %v500_v26  ;;  %v506_v31 = vpop.f32.mrb[15].mxu1 }
 0x38d   :  { %v12443_v32 = vpack.c.bf16 %v506_v31, %v502_v27 }
 0x38e   :  { %535 = vrot.lane.b32.xlu1 %v12441_v30, %s12138_s27 }
 0x38f   :  { %10400 = vmatprep.subr.bf16.mxu0 %v12443_v32 }
 0x390   :  { %10401 = vmatpush3.bf16.msra.mxu0 %v12443_v32 }
 0x3e8   :  { %v530_v34 = vpop.permute.xlu1 %529 }
 0x3e9   :  { %11162 = vmatprep.subr.msk.bf16.mxu1 %vm537_vm13, %v530_v34  ;;  %v551_v35 = vsel %vm537_vm13, %v530_v34, 0 }
 0x3ea   :  { %10379 = vmatpush3.bf16.xpose.msra.mxu1 %v551_v35 }
 0x3f0   :  { %v532_v59 = vpop.permute.xlu0 %531 }
 0x3f1   :  { %11163 = vmatprep.subr.msk.bf16.mxu1 %vm537_vm13, %v532_v59  ;;  %v554_v38 = vsel %vm537_vm13, %v532_v59, 0  ;;  %v12528_v59 = vld [vmem:[%s15532_s3 + $0x30] sm:$0xff] }
 0x3f2   :  { %10381 = vmatpush3.bf16.xpose.msra.mxu1 %v554_v38 }
 0x3f8   :  { %v534_v39 = vpop.permute.xlu1 %533 }
 0x3f9   :  { %11164 = vmatprep.subr.msk.bf16.mxu1 %vm537_vm13, %v534_v39  ;;  %v557_v62 = vsel %vm537_vm13, %v534_v39, 0  ;;  %v12534_v39 = vld [vmem:[%s15532_s3 + $0x20] sm:$0xff] }
 0x3fa   :  { %10383 = vmatpush3.bf16.xpose.msra.mxu1 %v557_v62 }
 0x400   :  { %v536_v40 = vpop.permute.xlu1 %535 }
 0x401   :  { %11165 = vmatprep.subr.msk.bf16.mxu1 %vm537_vm13, %v536_v40  ;;  %v560_v42 = vsel %vm537_vm13, %v536_v40, 0 }
 0x402   :  { %10385 = vmatpush3.bf16.xpose.msra.mxu1 %v560_v42 }
 0x409   :  { %10387 = vmatmul.mubr.msk.bf16.vlgmr.msra.gmra.mrb[16].mxu1 %vm537_vm13, %v12425_v14 }
 0x40a   :  { %10390 = vmatprep.mubr.msk.bf16.mxu1 %vm537_vm13, %v12433_v23 }
 0x411   :  { %10391 = vmatmul.mubr.msk.bf16.gmra.mrb[20].mxu1 %vm537_vm13, %v12441_v30 }
 0x4dc   :  { %v10388_v46 = vpop.f32.mrb[16].mxu1 }
 0x4dd   :  { %v605_v1 = vadd.f32 %v10388_v46, %v12466_v43  ;;  %v596_v50 = vpop.f32.mrb[17].mxu1 }
 0x4de   :  { %v597_v53 = vadd.f32 %v596_v50, %v12471_v44  ;;  %v10389_v12 = vpop.f32.mrb[18].mxu1 }
 0x4df   :  { %v631_v54 = vmul.f32 1.442695, %v605_v1  ;;  %v608_v55 = vadd.f32 %v10389_v12, %v12476_v47  ;;  %v599_v56 = vpop.f32.mrb[19].mxu1 }
 0x4e0   :  { %v627_v57 = vmul.f32 1.442695, %v597_v53  ;;  %v600_v60 = vadd.f32 %v599_v56, %v12482_v51 }
 0x4e1   :  { %11444 = vpow2.f32 %v631_v54  ;;  %v633_v22 = vmul.f32 1.442695, %v608_v55 }
 0x4e2   :  { %v629_v61 = vmul.f32 1.442695, %v600_v60  ;;  %11446 = vpow2.f32 %v627_v57 }
 0x4e4   :  { %11448 = vpow2.f32 %v629_v61  ;;  %v10392_v11 = vpop.f32.mrb[20].mxu1 }
 0x4e5   :  { %v612_v0 = vpop.f32.mrb[21].mxu1  ;;  %11450 = vpow2.f32 %v633_v22  ;;  %v621_v38 = vadd.f32 %v10392_v11, %v12528_v59 }
 0x4e6   :  { %v10393_v5 = vpop.f32.mrb[22].mxu1  ;;  %v613_v40 = vadd.f32 %v612_v0, %v12534_v39 }
 0x4e7   :  { %v624_v6 = vadd.f32 %v10393_v5, %v12490_v63  ;;  %v615_v7 = vpop.f32.mrb[23].mxu1  ;;  %v639_v62 = vmul.f32 1.442695, %v621_v38 }
 0x4e8   :  { %v616_v8 = vadd.f32 %v615_v7, %v12495_v3  ;;  %v635_v42 = vmul.f32 1.442695, %v613_v40 }
 0x4e9   :  { %v641_v9 = vmul.f32 1.442695, %v624_v6 }
 0x4ea   :  { %v637_v13 = vmul.f32 1.442695, %v616_v8 }
 0x4eb   :  { %v12499_v10 = vpop.eup %11444  ;;  %11452 = vpow2.f32 %v641_v9 }
 0x4ec   :  { %v649_v15 = vsel %vm242_vm12, %v12499_v10, 0.0  ;;  %v12503_v18 = vpop.eup %11446  ;;  %11454 = vpow2.f32 %v637_v13 }
 0x4ed   :  { %650 = vadd.xlane.f32.xlu0 %v649_v15  ;;  %v643_v24 = vsel %vm242_vm12, %v12503_v18, 0.0  ;;  %11456 = vpow2.f32 %v639_v62 }
 0x4ee   :  { %v12505_v19 = vpop.eup %11448  ;;  %11458 = vpow2.f32 %v635_v42 }
 0x4ef   :  { %v646_v20 = vsel %vm242_vm12, %v12505_v19, 0.0  ;;  %v12511_v26 = vpop.eup %11450 }
 0x4f0   :  { %647 = vadd.xlane.f32.xlu1 %v646_v20  ;;  %v652_v27 = vsel %vm242_vm12, %v12511_v26, 0.0 }
 0x4f1   :  { %644 = vadd.xlane.f32.xlu0 %v643_v24 }
 0x4f5   :  { %v12515_v28 = vpop.eup %11452  ;;  %653 = vadd.xlane.f32.xlu0 %v652_v27 }
 0x4f6   :  { %v664_v31 = vsel %vm242_vm12, %v12515_v28, 0.0  ;;  %v12519_v34 = vpop.eup %11454 }
 0x4f7   :  { %v658_v35 = vsel %vm242_vm12, %v12519_v34, 0.0  ;;  %v12545_v46 = vpop.eup %11456 }
 0x4f8   :  { %v661_v1 = vsel %vm242_vm12, %v12545_v46, 0.0  ;;  %v12551_v50 = vpop.eup %11458 }
 0x4f9   :  { %665 = vadd.xlane.f32.xlu0 %v664_v31  ;;  %v655_v53 = vsel %vm242_vm12, %v12551_v50, 0.0 }
 0x4fd   :  { %659 = vadd.xlane.f32.xlu0 %v658_v35 }
 0x501   :  { %776 = vrot.lane.b32.xlu1 %v12415_v29, %s12139_s21 }
 0x513   :  { %778 = vrot.lane.b32.xlu0 %v12425_v14, %s12139_s21 }
 0x517   :  { %768 = vrot.lane.b32.xlu0 %v12415_v29, %s12140_s25 }
 0x51b   :  { %772 = vrot.lane.b32.xlu0 %v12433_v23, %s12140_s25 }
 0x51f   :  { %1204 = vrot.lane.b32.xlu0 %v12415_v29, %s12141_s26 }
 0x523   :  { %1208 = vrot.lane.b32.xlu0 %v12433_v23, %s12141_s26 }
 0x525   :  { %662 = vadd.xlane.f32.xlu1 %v661_v1 }
 0x527   :  { %1196 = vrot.lane.b32.xlu0 %v12415_v29, %s12142_s28 }
 0x529   :  { %656 = vadd.xlane.f32.xlu1 %v655_v53 }
 0x52b   :  { %1200 = vrot.lane.b32.xlu0 %v12433_v23, %s12142_s28 }
 0x53a   :  { %780 = vrot.lane.b32.xlu1 %v12433_v23, %s12139_s21 }
 0x53e   :  { %782 = vrot.lane.b32.xlu1 %v12441_v30, %s12139_s21 }
 0x542   :  { %770 = vrot.lane.b32.xlu1 %v12425_v14, %s12140_s25 }
 0x546   :  { %774 = vrot.lane.b32.xlu1 %v12441_v30, %s12140_s25 }
 0x54a   :  { %1206 = vrot.lane.b32.xlu1 %v12425_v14, %s12141_s26 }
 0x54e   :  { %1210 = vrot.lane.b32.xlu1 %v12441_v30, %s12141_s26 }
 0x552   :  { %1198 = vrot.lane.b32.xlu1 %v12425_v14, %s12142_s28 }
 0x556   :  { %1202 = vrot.lane.b32.xlu1 %v12441_v30, %s12142_s28 }
 0x55a   :  { %937 = vrot.lane.b32.xlu1 %v12417_v21, %s12140_s25 }
 0x57a   :  { %v651_v12 = vpop.xlane.xlu0 %650 }
 0x57d   :  { %v648_v54 = vpop.xlane.xlu1 %647 }
 0x57e   :  { %11460 = vrcp.f32 %v648_v54  ;;  %v645_v55 = vpop.xlane.xlu0 %644 }
 0x57f   :  { %11462 = vrcp.f32 %v645_v55 }
 0x580   :  { %11464 = vrcp.f32 %v651_v12 }
 0x581   :  { %v777_v56 = vpop.permute.xlu1 %776 }
 0x582   :  { %11166 = vmatprep.subr.msk.bf16.mxu0 %vm537_vm13, %v777_v56  ;;  %v654_v57 = vpop.xlane.xlu0 %653  ;;  %v797_v20 = vsel %vm537_vm13, %v777_v56, 0 }
 0x583   :  { %11466 = vrcp.f32 %v654_v57 }
 0x586   :  { %v666_v60 = vpop.xlane.xlu0 %665 }
 0x588   :  { %v11461_v61 = vpop.eup %11460 }
 0x589   :  { %v11463_v22 = vpop.eup %11462  ;;  %v676_v11 = vmul.f32 %v11461_v61, %v12505_v19 }
 0x58a   :  { %v675_v0 = vmul.f32 %v11463_v22, %v12503_v18  ;;  %v11465_v5 = vpop.eup %11464  ;;  %v660_v8 = vpop.xlane.xlu0 %659 }
 0x58b   :  { %v677_v9 = vmul.f32 %v11465_v5, %v12499_v10 }
 0x58c   :  { %v683_v6 = vpack.c.bf16 %v676_v11, %v675_v0 }
 0x58d   :  { %v11467_v7 = vpop.eup %11466 }
 0x58e   :  { %v678_v13 = vmul.f32 %v11467_v7, %v12511_v26  ;;  %10402 = vmatprep.mubr.msk.bf16.mxu0 %vm242_vm12, %v683_v6  ;;  %v779_v24 = vpop.permute.xlu0 %778 }
 0x58f   :  { %v800_v18 = vsel %vm537_vm13, %v779_v24, 0 }
 0x590   :  { %v684_v15 = vpack.c.bf16 %v678_v13, %v677_v9 }
 0x592   :  { %10403 = vmatmul.mubr.msk.bf16.vlgmr.msra.gmra.mrb[8].mxu0 %vm242_vm12, %v684_v15  ;;  %v769_v26 = vpop.permute.xlu0 %768 }
 0x593   :  { %10411 = vmatpush3.bf16.xpose.msra.mxu0 %v797_v20 }
 0x594   :  { %11167 = vmatprep.subr.msk.bf16.mxu0 %vm537_vm13, %v779_v24 }
 0x596   :  { %v773_v38 = vpop.permute.xlu0 %772 }
 0x59b   :  { %10413 = vmatpush3.bf16.xpose.msra.mxu0 %v800_v18 }
 0x5b2   :  { %v663_v19 = vpop.xlane.xlu1 %662 }
 0x5b3   :  { %11468 = vrcp.f32 %v663_v19 }
 0x5b4   :  { %11470 = vrcp.f32 %v660_v8 }
 0x5b5   :  { %11472 = vrcp.f32 %v666_v60  ;;  %v1205_v60 = vpop.permute.xlu0 %1204 }
 0x5b6   :  { %v657_v10 = vpop.xlane.xlu1 %656 }
 0x5b7   :  { %11474 = vrcp.f32 %v657_v10 }
 0x5ba   :  { %v781_v27 = vpop.permute.xlu1 %780 }
 0x5bb   :  { %11168 = vmatprep.subr.msk.bf16.mxu0 %vm537_vm13, %v781_v27  ;;  %v803_v31 = vsel %vm537_vm13, %v781_v27, 0 }
 0x5bc   :  { %10415 = vmatpush3.bf16.xpose.msra.mxu0 %v803_v31 }
 0x5bd   :  { %v11469_v35 = vpop.eup %11468 }
 0x5be   :  { %v783_v62 = vpop.permute.xlu1 %782  ;;  %v11471_v40 = vpop.eup %11470  ;;  %v681_v53 = vmul.f32 %v11469_v35, %v12545_v46 }
 0x5bf   :  { %11169 = vmatprep.subr.msk.bf16.mxu0 %vm537_vm13, %v783_v62  ;;  %v11473_v42 = vpop.eup %11472  ;;  %v680_v55 = vmul.f32 %v11471_v40, %v12519_v34  ;;  %v806_v56 = vsel %vm537_vm13, %v783_v62, 0  ;;  %v1225_v34 = vsel %vm537_vm13, %v1205_v60, 0 }
 0x5c0   :  { %v682_v57 = vmul.f32 %v11473_v42, %v12515_v28  ;;  %v1209_v28 = vpop.permute.xlu0 %1208 }
 0x5c1   :  { %v11475_v1 = vpop.eup %11474  ;;  %v1231_v9 = vsel %vm537_vm13, %v1209_v28, 0 }
 0x5c2   :  { %v771_v12 = vpop.permute.xlu1 %770  ;;  %v679_v54 = vmul.f32 %v11475_v1, %v12551_v50  ;;  %v686_v22 = vpack.c.bf16 %v682_v57, %v681_v53 }
 0x5c4   :  { %10417 = vmatpush3.bf16.xpose.msra.mxu0 %v806_v56  ;;  %v685_v61 = vpack.c.bf16 %v680_v55, %v679_v54  ;;  %v1197_v6 = vpop.permute.xlu0 %1196 }
 0x5c5   :  { %11170 = vmatprep.subr.msk.bf16.mxu0 %vm537_vm13, %v1205_v60 }
 0x5c6   :  { %v775_v11 = vpop.permute.xlu1 %774  ;;  %10406 = vmatprep.mubr.msk.bf16.mxu0 %vm242_vm12, %v685_v61 }
 0x5c7   :  { %10407 = vmatmul.mubr.msk.bf16.gmra.mrb[12].mxu0 %vm242_vm12, %v686_v22 }
 0x5c8   :  { %10418 = vmatprep.mubr.msk.bf16.mxu0 %vm537_vm13, %v769_v26  ;;  %v1201_v15 = vpop.permute.xlu0 %1200 }
 0x5ca   :  { %v1207_v46 = vpop.permute.xlu1 %1206 }
 0x5cb   :  { %v1228_v7 = vsel %vm537_vm13, %v1207_v46, 0 }
 0x5ce   :  { %v1211_v50 = vpop.permute.xlu1 %1210 }
 0x5cf   :  { %10419 = vmatmul.mubr.msk.bf16.vlgmr.msra.gmra.mrb[16].mxu0 %vm537_vm13, %v771_v12  ;;  %v1234_v13 = vsel %vm537_vm13, %v1211_v50, 0 }
 0x5d0   :  { %10463 = vmatpush3.bf16.xpose.msra.mxu0 %v1225_v34  ;;  %10422 = vmatprep.mubr.msk.bf16.mxu0 %vm537_vm13, %v773_v38 }
 0x5d1   :  { %11171 = vmatprep.subr.msk.bf16.mxu0 %vm537_vm13, %v1207_v46 }
 0x5d2   :  { %v1199_v0 = vpop.permute.xlu1 %1198 }
 0x5d6   :  { %v1203_v5 = vpop.permute.xlu1 %1202 }
 0x5d7   :  { %10423 = vmatmul.mubr.msk.bf16.gmra.mrb[20].mxu0 %vm537_vm13, %v775_v11 }
 0x5d8   :  { %10465 = vmatpush3.bf16.xpose.msra.mxu0 %v1228_v7  ;;  %10470 = vmatprep.mubr.msk.bf16.mxu0 %vm537_vm13, %v1197_v6 }
 0x5d9   :  { %11172 = vmatprep.subr.msk.bf16.mxu0 %vm537_vm13, %v1209_v28 }
 0x5da   :  { %v938_v8 = vpop.permute.xlu1 %937 }
 0x5db   :  { %10426 = vmatprep.subr.bf16.mxu1 %v938_v8 }
 0x5dc   :  { %10427 = vmatpush3.bf16.msra.mxu1 %v938_v8 }
 0x5e0   :  { %10467 = vmatpush3.bf16.xpose.msra.mxu0 %v1231_v9 }
 0x5e1   :  { %11173 = vmatprep.subr.msk.bf16.mxu0 %vm537_vm13, %v1211_v50 }
 0x5e8   :  { %10469 = vmatpush3.bf16.xpose.msra.mxu0 %v1234_v13 }
 0x5ef   :  { %10471 = vmatmul.mubr.msk.bf16.vlgmr.msra.gmra.mrb[24].mxu0 %vm537_vm13, %v1199_v0 }
 0x5f0   :  { %10474 = vmatprep.mubr.msk.bf16.mxu0 %vm537_vm13, %v1201_v15 }
 0x5f7   :  { %10475 = vmatmul.mubr.msk.bf16.gmra.mrb[28].mxu0 %vm537_vm13, %v1203_v5 }
 0x665   :  { %v12613_v20 = vpop.f32.mrb[8].mxu0 }
 0x666   :  { %v12615_v24 = vpop.f32.mrb[9].mxu0 }
 0x667   :  { %v12617_v18 = vpop.f32.mrb[10].mxu0 }
 0x668   :  { %v765_v19 = vpack.c.bf16 %v12617_v18, %v12613_v20  ;;  %v12621_v10 = vpop.f32.mrb[11].mxu0 }
 0x669   :  { %v764_v26 = vpack.c.bf16 %v12621_v10, %v12615_v24 }
 0x69a   :  { %v12625_v27 = vpop.f32.mrb[12].mxu0 }
 0x69b   :  { %v12627_v31 = vpop.f32.mrb[13].mxu0 }
 0x69c   :  { %v12629_v35 = vpop.f32.mrb[14].mxu0 }
 0x69d   :  { %v12633_v62 = vpop.f32.mrb[15].mxu0 }
 0x69e   :  { %v766_v40 = vpack.c.bf16 %v12633_v62, %v12627_v31 }
 0x6a2   :  { %v10420_v42 = vpop.f32.mrb[16].mxu0 }
 0x6a3   :  { %v851_v1 = vadd.f32 %v10420_v42, %v12466_v43  ;;  %v842_v53 = vpop.f32.mrb[17].mxu0 }
 0x6a4   :  { %v843_v12 = vadd.f32 %v842_v53, %v12471_v44  ;;  %v10421_v54 = vpop.f32.mrb[18].mxu0 }
 0x6a5   :  { %v877_v55 = vmul.f32 1.442695, %v851_v1  ;;  %v854_v56 = vadd.f32 %v10421_v54, %v12476_v47  ;;  %v845_v57 = vpop.f32.mrb[19].mxu0 }
 0x6a6   :  { %v873_v60 = vmul.f32 1.442695, %v843_v12  ;;  %v846_v61 = vadd.f32 %v845_v57, %v12482_v51 }
 0x6a7   :  { %11476 = vpow2.f32 %v877_v55  ;;  %v879_v11 = vmul.f32 1.442695, %v854_v56 }
 0x6a8   :  { %v875_v22 = vmul.f32 1.442695, %v846_v61  ;;  %11478 = vpow2.f32 %v873_v60 }
 0x6aa   :  { %11480 = vpow2.f32 %v875_v22  ;;  %v10424_v46 = vpop.f32.mrb[20].mxu0 }
 0x6ab   :  { %v867_v50 = vadd.f32 %v10424_v46, %v12528_v59  ;;  %v858_v34 = vpop.f32.mrb[21].mxu0  ;;  %11482 = vpow2.f32 %v879_v11 }
 0x6ac   :  { %v859_v28 = vadd.f32 %v858_v34, %v12534_v39  ;;  %v10425_v0 = vpop.f32.mrb[22].mxu0 }
 0x6ad   :  { %v885_v5 = vmul.f32 1.442695, %v867_v50  ;;  %v870_v6 = vadd.f32 %v10425_v0, %v12490_v63  ;;  %v861_v7 = vpop.f32.mrb[23].mxu0 }
 0x6ae   :  { %v881_v8 = vmul.f32 1.442695, %v859_v28  ;;  %v862_v9 = vadd.f32 %v861_v7, %v12495_v3 }
 0x6af   :  { %11484 = vpow2.f32 %v885_v5  ;;  %v887_v13 = vmul.f32 1.442695, %v870_v6 }
 0x6b0   :  { %11486 = vpow2.f32 %v881_v8  ;;  %v883_v42 = vmul.f32 1.442695, %v862_v9 }
 0x6b1   :  { %v12645_v15 = vpop.eup %11476  ;;  %11488 = vpow2.f32 %v887_v13 }
 0x6b2   :  { %v895_v1 = vsel %vm242_vm12, %v12645_v15, 0.0  ;;  %v12649_v53 = vpop.eup %11478  ;;  %11490 = vpow2.f32 %v883_v42 }
 0x6b3   :  { %896 = vadd.xlane.f32.xlu0 %v895_v1  ;;  %v889_v55 = vsel %vm242_vm12, %v12649_v53, 0.0 }
 0x6b4   :  { %v12651_v12 = vpop.eup %11480 }
 0x6b5   :  { %v892_v54 = vsel %vm242_vm12, %v12651_v12, 0.0  ;;  %v12657_v56 = vpop.eup %11482 }
 0x6b6   :  { %893 = vadd.xlane.f32.xlu1 %v892_v54  ;;  %v898_v61 = vsel %vm242_vm12, %v12657_v56, 0.0 }
 0x6b7   :  { %890 = vadd.xlane.f32.xlu0 %v889_v55 }
 0x6b9   :  { %v12659_v57 = vpop.eup %11484 }
 0x6ba   :  { %v12661_v60 = vpop.eup %11486  ;;  %v907_v22 = vsel %vm242_vm12, %v12659_v57, 0.0 }
 0x6bb   :  { %v12667_v11 = vpop.eup %11488  ;;  %899 = vadd.xlane.f32.xlu0 %v898_v61  ;;  %908 = vadd.xlane.f32.xlu1 %v907_v22  ;;  %v901_v50 = vsel %vm242_vm12, %v12661_v60, 0.0 }
 0x6bc   :  { %v910_v46 = vsel %vm242_vm12, %v12667_v11, 0.0  ;;  %v12673_v34 = vpop.eup %11490 }
 0x6bd   :  { %v904_v0 = vsel %vm242_vm12, %v12673_v34, 0.0 }
 0x6bf   :  { %911 = vadd.xlane.f32.xlu0 %v910_v46  ;;  %902 = vadd.xlane.f32.xlu1 %v901_v50 }
 0x6c2   :  { %v10472_v28 = vpop.f32.mrb[24].mxu0 }
 0x6c3   :  { %v1270_v5 = vpop.f32.mrb[25].mxu0  ;;  %905 = vadd.xlane.f32.xlu0 %v904_v0  ;;  %v1279_v1 = vadd.f32 %v10472_v28, %v12466_v43 }
 0x6c4   :  { %v10473_v6 = vpop.f32.mrb[26].mxu0  ;;  %v1271_v54 = vadd.f32 %v1270_v5, %v12471_v44 }
 0x6c5   :  { %v1273_v7 = vpop.f32.mrb[27].mxu0  ;;  %v1282_v22 = vadd.f32 %v10473_v6, %v12476_v47 }
 0x6c6   :  { %v1274_v55 = vadd.f32 %v1273_v7, %v12482_v51  ;;  %v1301_v61 = vmul.f32 1.442695, %v1271_v54 }
 0x6c7   :  { %v1307_v46 = vmul.f32 1.442695, %v1282_v22 }
 0x6ca   :  { %v10476_v8 = vpop.f32.mrb[28].mxu0 }
 0x6cb   :  { %v1286_v9 = vpop.f32.mrb[29].mxu0 }
 0x6cc   :  { %v10477_v13 = vpop.f32.mrb[30].mxu0  ;;  %v1287_v50 = vadd.f32 %v1286_v9, %v12534_v39 }
 0x6cd   :  { %v1289_v42 = vpop.f32.mrb[31].mxu0  ;;  %v1298_v28 = vadd.f32 %v10477_v13, %v12490_v63 }
 0x6ce   :  { %v1309_v0 = vmul.f32 1.442695, %v1287_v50  ;;  %v1290_v7 = vadd.f32 %v1289_v42, %v12495_v3 }
 0x6cf   :  { %v1315_v5 = vmul.f32 1.442695, %v1298_v28 }
 0x6d0   :  { %941 = vrot.lane.b32.xlu1 %v12435_v25, %s12140_s25  ;;  %v1311_v6 = vmul.f32 1.442695, %v1290_v7 }
 0x6d4   :  { %943 = vrot.lane.b32.xlu1 %v12443_v32, %s12140_s25 }
 0x6d8   :  { %1555 = vrot.lane.b32.xlu1 %v12425_v14, %s12143_s2 }
 0x6d9   :  { %939 = vrot.lane.b32.xlu0 %v12427_v16, %s12140_s25 }
 0x6dc   :  { %1559 = vrot.lane.b32.xlu1 %v12441_v30, %s12143_s2 }
 0x6dd   :  { %1553 = vrot.lane.b32.xlu0 %v12415_v29, %s12143_s2 }
 0x6e0   :  { %1547 = vrot.lane.b32.xlu1 %v12425_v14, %s12144_s29  ;;  %v1305_v14 = vmul.f32 1.442695, %v1279_v1 }
 0x6e1   :  { %1557 = vrot.lane.b32.xlu0 %v12433_v23, %s12143_s2 }
 0x6e2   :  { %11492 = vpow2.f32 %v1305_v14 }
 0x6e3   :  { %11494 = vpow2.f32 %v1301_v61 }
 0x6e4   :  { %1551 = vrot.lane.b32.xlu1 %v12441_v30, %s12144_s29  ;;  %v1303_v30 = vmul.f32 1.442695, %v1274_v55 }
 0x6e5   :  { %1545 = vrot.lane.b32.xlu0 %v12415_v29, %s12144_s29  ;;  %v1295_v29 = vadd.f32 %v10476_v8, %v12528_v59 }
 0x6e6   :  { %11496 = vpow2.f32 %v1303_v30 }
 0x6e7   :  { %11498 = vpow2.f32 %v1307_v46 }
 0x6e8   :  { %1361 = vrot.lane.b32.xlu1 %v12417_v21, %s12142_s28 }
 0x6e9   :  { %1549 = vrot.lane.b32.xlu0 %v12433_v23, %s12144_s29  ;;  %v1313_v23 = vmul.f32 1.442695, %v1295_v29 }
 0x6eb   :  { %11500 = vpow2.f32 %v1313_v23 }
 0x6ec   :  { %v12709_v1 = vpop.eup %11492  ;;  %11502 = vpow2.f32 %v1309_v0 }
 0x6ed   :  { %11504 = vpow2.f32 %v1315_v5  ;;  %v12711_v8 = vpop.eup %11494  ;;  %v1323_v9 = vsel %vm242_vm12, %v12709_v1, 0.0 }
 0x6ee   :  { %11506 = vpow2.f32 %v1311_v6  ;;  %v1317_v42 = vsel %vm242_vm12, %v12711_v8, 0.0 }
 0x6f0   :  { %v12715_v54 = vpop.eup %11496 }
 0x6f1   :  { %v12717_v13 = vpop.eup %11498  ;;  %v1320_v14 = vsel %vm242_vm12, %v12715_v54, 0.0 }
 0x6f2   :  { %v1326_v22 = vsel %vm242_vm12, %v12717_v13, 0.0 }
 0x6f5   :  { %v12723_v55 = vpop.eup %11500 }
 0x6f6   :  { %v12725_v61 = vpop.eup %11502  ;;  %v1335_v30 = vsel %vm242_vm12, %v12723_v55, 0.0 }
 0x6f7   :  { %v12731_v29 = vpop.eup %11504  ;;  %v1329_v50 = vsel %vm242_vm12, %v12725_v61, 0.0 }
 0x6f8   :  { %v1338_v46 = vsel %vm242_vm12, %v12731_v29, 0.0  ;;  %v12737_v23 = vpop.eup %11506 }
 0x6f9   :  { %v1332_v28 = vsel %vm242_vm12, %v12737_v23, 0.0 }
 0x708   :  { %1324 = vadd.xlane.f32.xlu0 %v1323_v9 }
 0x70c   :  { %1321 = vadd.xlane.f32.xlu1 %v1320_v14  ;;  %1318 = vadd.xlane.f32.xlu0 %v1317_v42 }
 0x710   :  { %1327 = vadd.xlane.f32.xlu0 %v1326_v22  ;;  %1336 = vadd.xlane.f32.xlu1 %v1335_v30 }
 0x714   :  { %1339 = vadd.xlane.f32.xlu0 %v1338_v46  ;;  %1330 = vadd.xlane.f32.xlu1 %v1329_v50 }
 0x718   :  { %1333 = vadd.xlane.f32.xlu0 %v1332_v28 }
 0x725   :  { %1365 = vrot.lane.b32.xlu1 %v12435_v25, %s12142_s28 }
 0x729   :  { %1367 = vrot.lane.b32.xlu1 %v12443_v32, %s12142_s28 }
 0x72d   :  { %1710 = vrot.lane.b32.xlu1 %v12417_v21, %s12144_s29 }
 0x72e   :  { %1363 = vrot.lane.b32.xlu0 %v12427_v16, %s12142_s28 }
 0x731   :  { %1712 = vrot.lane.b32.xlu1 %v12427_v16, %s12144_s29 }
 0x740   :  { %v897_v0 = vpop.xlane.xlu0 %896 }
 0x743   :  { %v894_v5 = vpop.xlane.xlu1 %893 }
 0x744   :  { %11508 = vrcp.f32 %v894_v5  ;;  %v891_v7 = vpop.xlane.xlu0 %890 }
 0x745   :  { %11510 = vrcp.f32 %v891_v7 }
 0x748   :  { %v909_v6 = vpop.xlane.xlu1 %908  ;;  %v900_v9 = vpop.xlane.xlu0 %899 }
 0x749   :  { %11512 = vrcp.f32 %v900_v9 }
 0x74a   :  { %11514 = vrcp.f32 %v897_v0 }
 0x74c   :  { %v903_v14 = vpop.xlane.xlu1 %902  ;;  %v912_v42 = vpop.xlane.xlu0 %911 }
 0x74d   :  { %11516 = vrcp.f32 %v903_v14 }
 0x74e   :  { %v11509_v22 = vpop.eup %11508 }
 0x74f   :  { %v11511_v30 = vpop.eup %11510  ;;  %v922_v21 = vmul.f32 %v11509_v22, %v12651_v12 }
 0x750   :  { %v942_v46 = vpop.permute.xlu1 %941  ;;  %v906_v50 = vpop.xlane.xlu0 %905  ;;  %v921_v16 = vmul.f32 %v11511_v30, %v12649_v53 }
 0x751   :  { %11518 = vrcp.f32 %v906_v50 }
 0x752   :  { %v929_v28 = vpack.c.bf16 %v922_v21, %v921_v16  ;;  %11520 = vrcp.f32 %v912_v42 }
 0x753   :  { %v11513_v9 = vpop.eup %11512  ;;  %11522 = vrcp.f32 %v909_v6  ;;  %v11260_v6 = vld [vmem:[%s15536_s7 + $0x8] sm:$0xff]  }
 0x754   :  { %v944_v5 = vpop.permute.xlu1 %943  ;;  %10434 = vmatprep.mubr.msk.bf16.mxu1 %vm242_vm12, %v929_v28  ;;  %v940_v7 = vpop.permute.xlu0 %939  ;;  %v924_v30 = vmul.f32 %v11513_v9, %v12657_v56 }
 0x755   :  { %10428 = vmatprep.subr.bf16.mxu1 %v940_v7  ;;  %v11515_v38 = vpop.eup %11514 }
 0x756   :  { %10429 = vmatpush3.bf16.msra.mxu1 %v940_v7  ;;  %v923_v50 = vmul.f32 %v11515_v38, %v12645_v15 }
 0x757   :  { %10430 = vmatprep.subr.bf16.mxu1 %v942_v46  ;;  %v11517_v14 = vpop.eup %11516 }
 0x758   :  { %v1554_v0 = vpop.permute.xlu0 %1553  ;;  %v1556_v53 = vpop.permute.xlu1 %1555  ;;  %v925_v16 = vmul.f32 %v11517_v14, %v12661_v60 }
 0x759   :  { %11174 = vmatprep.subr.msk.bf16.mxu0 %vm537_vm13, %v1554_v0  ;;  %v1574_v12 = vsel %vm537_vm13, %v1554_v0, 0  ;;  %v1577_v9 = vsel %vm537_vm13, %v1556_v53, 0 }
 0x75a   :  { %10431 = vmatpush3.bf16.msra.mxu1 %v942_v46  ;;  %10505 = vmatpush3.bf16.xpose.msra.mxu0 %v1574_v12  ;;  %v930_v46 = vpack.c.bf16 %v924_v30, %v923_v50 }
 0x75b   :  { %v11519_v22 = vpop.eup %11518  ;;  %10432 = vmatprep.subr.bf16.mxu1 %v944_v5  ;;  %11175 = vmatprep.subr.msk.bf16.mxu0 %vm537_vm13, %v1556_v53 }
 0x75c   :  { %v1558_v42 = vpop.permute.xlu0 %1557  ;;  %v926_v21 = vmul.f32 %v11519_v22, %v12673_v34  ;;  %v11521_v28 = vpop.eup %11520 }
 0x75d   :  { %v11523_v0 = vpop.eup %11522  ;;  %v928_v38 = vmul.f32 %v11521_v28, %v12667_v11  ;;  %v1580_v34 = vsel %vm537_vm13, %v1558_v42, 0 }
 0x75e   :  { %10433 = vmatpush3.bf16.msra.mxu1 %v944_v5  ;;  %v931_v56 = vpack.c.bf16 %v926_v21, %v925_v16  ;;  %v927_v15 = vmul.f32 %v11523_v0, %v12659_v57  ;;  %v1560_v5 = vpop.permute.xlu1 %1559  ;;  %v11261_v57 = vld [vmem:[%s15536_s7] sm:$0xff]  }
 0x75f   :  { %10442 = vmatprep.subr.bf16.mxu1 %v11260_v6  ;;  %v1583_v12 = vsel %vm537_vm13, %v1560_v5, 0 }
 0x760   :  { %v1546_v7 = vpop.permute.xlu0 %1545  ;;  %v932_v60 = vpack.c.bf16 %v928_v38, %v927_v15 }
 0x761   :  { %10435 = vmatmul.mubr.msk.bf16.vlgmr.msra.gmra.mrb[24].mxu1 %vm242_vm12, %v930_v46  ;;  %10512 = vmatprep.mubr.msk.bf16.mxu0 %vm537_vm13, %v1546_v7 }
 0x762   :  { %10438 = vmatprep.mubr.msk.bf16.mxu1 %vm242_vm12, %v931_v56  ;;  %10507 = vmatpush3.bf16.xpose.msra.mxu0 %v1577_v9  ;;  %v1548_v14 = vpop.permute.xlu1 %1547 }
 0x763   :  { %11176 = vmatprep.subr.msk.bf16.mxu0 %vm537_vm13, %v1558_v42  ;;  %10443 = vmatpush3.bf16.msra.mxu1 %v11260_v6 }
 0x764   :  { %v1550_v53 = vpop.permute.xlu0 %1549  ;;  %10452 = vmatprep.subr.bf16.mxu1 %v11261_v57 }
 0x766   :  { %v1552_v11 = vpop.permute.xlu1 %1551 }
 0x769   :  { %10439 = vmatmul.mubr.msk.bf16.gmra.mrb[28].mxu1 %vm242_vm12, %v932_v60 }
 0x76a   :  { %10509 = vmatpush3.bf16.xpose.msra.mxu0 %v1580_v34  ;;  %v1362_v46 = vpop.permute.xlu1 %1361 }
 0x76b   :  { %11177 = vmatprep.subr.msk.bf16.mxu0 %vm537_vm13, %v1560_v5 }
 0x772   :  { %10511 = vmatpush3.bf16.xpose.msra.mxu0 %v1583_v12 }
 0x779   :  { %10513 = vmatmul.mubr.msk.bf16.vlgmr.msra.gmra.mrb[32].mxu0 %vm537_vm13, %v1548_v14 }
 0x77a   :  { %10516 = vmatprep.mubr.msk.bf16.mxu0 %vm537_vm13, %v1550_v53 }
 0x781   :  { %10517 = vmatmul.mubr.msk.bf16.gmra.mrb[36].mxu0 %vm537_vm13, %v1552_v11 }
 0x782   :  { %2150 = vmatprep.mubr.bf16.mxu0 %v12136_v2 }
 0x795   :  { %v1325_v22 = vpop.xlane.xlu0 %1324 }
 0x799   :  { %v1319_v30 = vpop.xlane.xlu0 %1318  ;;  %v1322_v56 = vpop.xlane.xlu1 %1321 }
 0x79a   :  { %11524 = vrcp.f32 %v1322_v56 }
 0x79b   :  { %11526 = vrcp.f32 %v1319_v30 }
 0x79d   :  { %v1328_v7 = vpop.xlane.xlu0 %1327  ;;  %v1337_v12 = vpop.xlane.xlu1 %1336 }
 0x79e   :  { %11528 = vrcp.f32 %v1328_v7 }
 0x7a1   :  { %v1340_v34 = vpop.xlane.xlu0 %1339  ;;  %v1331_v53 = vpop.xlane.xlu1 %1330 }
 0x7a4   :  { %v11525_v11 = vpop.eup %11524 }
 0x7a5   :  { %v1334_v14 = vpop.xlane.xlu0 %1333  ;;  %v1350_v18 = vmul.f32 %v11525_v11, %v12715_v54  ;;  %v15543_v54 = vpack.c.bf16 %v12629_v35, %v12625_v27  ;;  %v11262_v27 = vld [vmem:[%s15536_s7 + $0x10] sm:$0xff]  }
 0x7a6   :  { %11530 = vrcp.f32 %v1334_v14 }
 0x7a7   :  { %11532 = vrcp.f32 %v1325_v22  ;;  %v1366_v22 = vpop.permute.xlu1 %1365 }
 0x7a8   :  { %11534 = vrcp.f32 %v1331_v53 }
 0x7a9   :  { %v1364_v30 = vpop.permute.xlu0 %1363  ;;  %11536 = vrcp.f32 %v1337_v12 }
 0x7aa   :  { %11538 = vrcp.f32 %v1340_v34 }
 0x834   :  { %v10436_v6 = vpop.f32.mrb[24].mxu1 }
 0x835   :  { %v995_v42 = vpop.f32.mrb[25].mxu1 }
 0x836   :  { %v10437_v21 = vpop.f32.mrb[26].mxu1 }
 0x837   :  { %v1027_v50 = vpack.c.bf16 %v10437_v21, %v10436_v6  ;;  %v998_v16 = vpop.f32.mrb[27].mxu1 }
 0x838   :  { %v1026_v28 = vpack.c.bf16 %v998_v16, %v995_v42 }
 0x83a   :  { %10444 = vmatprep.mubr.msk.bf16.mxu1 %vm537_vm13, %v1026_v28 }
 0x83b   :  { %10445 = vmatmul.mubr.msk.bf16.vlgmr.msra.gmra.mrb[32].mxu1 %vm537_vm13, %v1027_v50 }
 0x83c   :  { %10453 = vmatpush3.bf16.msra.mxu1 %v11261_v57  ;;  %v10440_v9 = vpop.f32.mrb[28].mxu1  ;;  %v11527_v57 = vpop.eup %11526 }
 0x83d   :  { %10478 = vmatprep.subr.bf16.mxu1 %v1362_v46  ;;  %v1011_v0 = vpop.f32.mrb[29].mxu1  ;;  %v1349_v20 = vmul.f32 %v11527_v57, %v12711_v8 }
 0x83e   :  { %v10441_v38 = vpop.f32.mrb[30].mxu1 }
 0x83f   :  { %v1029_v15 = vpack.c.bf16 %v10441_v38, %v10440_v9  ;;  %v1014_v60 = vpop.f32.mrb[31].mxu1 }
 0x840   :  { %v1028_v5 = vpack.c.bf16 %v1014_v60, %v1011_v0 }
 0x842   :  { %10448 = vmatprep.mubr.msk.bf16.mxu1 %vm537_vm13, %v1028_v5 }
 0x843   :  { %10449 = vmatmul.mubr.msk.bf16.gmra.mrb[36].mxu1 %vm537_vm13, %v1029_v15 }
 0x844   :  { %10454 = vmatprep.mubr.msk.bf16.mxu1 %vm537_vm13, %v764_v26 }
 0x84b   :  { %10455 = vmatmul.mubr.msk.bf16.vlgmr.msra.gmra.mrb[32].mxu1 %vm537_vm13, %v765_v19 }
 0x84c   :  { %10479 = vmatpush3.bf16.msra.mxu1 %v1362_v46  ;;  %10458 = vmatprep.mubr.msk.bf16.mxu1 %vm537_vm13, %v766_v40  ;;  %v10514_v24 = vpop.f32.mrb[32].mxu0  ;;  %v1368_v46 = vpop.permute.xlu1 %1367 }
 0x84d   :  { %10480 = vmatprep.subr.bf16.mxu1 %v1364_v30  ;;  %v1628_v10 = vadd.f32 %v10514_v24, %v12466_v43  ;;  %v1619_v26 = vpop.f32.mrb[33].mxu0  ;;  %v11529_v43 = vpop.eup %11528 }
 0x84e   :  { %v1620_v6 = vadd.f32 %v1619_v26, %v12471_v44  ;;  %v10515_v42 = vpop.f32.mrb[34].mxu0  ;;  %v1357_v44 = vpack.c.bf16 %v1350_v18, %v1349_v20  ;;  %v11531_v16 = vpop.eup %11530  ;;  %v1352_v7 = vmul.f32 %v11529_v43, %v12717_v13 }
 0x84f   :  { %v1654_v19 = vmul.f32 1.442695, %v1628_v10  ;;  %v1631_v21 = vadd.f32 %v10515_v42, %v12476_v47  ;;  %v1622_v31 = vpop.f32.mrb[35].mxu0  ;;  %v11533_v47 = vpop.eup %11532  ;;  %v1354_v0 = vmul.f32 %v11531_v16, %v12737_v23 }
 0x850   :  { %v1650_v62 = vmul.f32 1.442695, %v1620_v6  ;;  %10481 = vmatpush3.bf16.msra.mxu1 %v1364_v30  ;;  %v1623_v40 = vadd.f32 %v1622_v31, %v12482_v51  ;;  %v11535_v28 = vpop.eup %11534  ;;  %v1351_v38 = vmul.f32 %v11533_v47, %v12709_v1  ;;  %v12822_v1 = vpop.permute.xlu1 %1710 }
 0x851   :  { %11540 = vpow2.f32 %v1654_v19  ;;  %10482 = vmatprep.subr.bf16.mxu1 %v1366_v22  ;;  %v1656_v8 = vmul.f32 1.442695, %v1631_v21  ;;  %v1353_v13 = vmul.f32 %v11535_v28, %v12725_v61  ;;  %v11537_v5 = vpop.eup %11536 }
 0x852   :  { %v1652_v50 = vmul.f32 1.442695, %v1623_v40  ;;  %11542 = vpow2.f32 %v1650_v62  ;;  %v11539_v12 = vpop.eup %11538 }
 0x853   :  { %10459 = vmatmul.mubr.msk.bf16.gmra.mrb[36].mxu1 %vm537_vm13, %v15543_v54  ;;  %v1359_v14 = vpack.c.bf16 %v1354_v0, %v1353_v13  ;;  %v1356_v57 = vmul.f32 %v11539_v12, %v12731_v29 }
 0x854   :  { %11544 = vpow2.f32 %v1652_v50  ;;  %10483 = vmatpush3.bf16.msra.mxu1 %v1366_v22  ;;  %10486 = vmatprep.mubr.msk.bf16.mxu1 %vm242_vm12, %v1357_v44  ;;  %v10518_v51 = vpop.f32.mrb[36].mxu0 }
 0x855   :  { %10484 = vmatprep.subr.bf16.mxu1 %v1368_v46  ;;  %v1644_v56 = vadd.f32 %v10518_v51, %v12528_v59  ;;  %v1635_v9 = vpop.f32.mrb[37].mxu0  ;;  %11546 = vpow2.f32 %v1656_v8  ;;  %v1358_v59 = vpack.c.bf16 %v1352_v7, %v1351_v38  ;;  %v1713_v8 = vpop.permute.xlu1 %1712 }
 0x856   :  { %v10519_v35 = vpop.f32.mrb[38].mxu0  ;;  %v1636_v60 = vadd.f32 %v1635_v9, %v12534_v39 }
 0x857   :  { %v1662_v15 = vmul.f32 1.442695, %v1644_v56  ;;  %v1638_v34 = vpop.f32.mrb[39].mxu0  ;;  %v1647_v23 = vadd.f32 %v10519_v35, %v12490_v63  ;;  %v1355_v63 = vmul.f32 %v11537_v5, %v12723_v55 }
 0x858   :  { %10485 = vmatpush3.bf16.msra.mxu1 %v1368_v46  ;;  %v1658_v11 = vmul.f32 1.442695, %v1636_v60  ;;  %v1639_v10 = vadd.f32 %v1638_v34, %v12495_v3 }
 0x859   :  { %10494 = vmatprep.subr.bf16.mxu1 %v11262_v27  ;;  %11548 = vpow2.f32 %v1662_v15  ;;  %v1664_v24 = vmul.f32 1.442695, %v1647_v23  ;;  %v1360_v42 = vpack.c.bf16 %v1356_v57, %v1355_v63 }
 0x85a   :  { %11550 = vpow2.f32 %v1658_v11  ;;  %v1660_v20 = vmul.f32 1.442695, %v1639_v10 }
 0x85b   :  { %v12818_v53 = vpop.eup %11540  ;;  %10487 = vmatmul.mubr.msk.bf16.vlgmr.msra.gmra.mrb[40].mxu1 %vm242_vm12, %v1358_v59  ;;  %11552 = vpow2.f32 %v1664_v24 }
 0x85c   :  { %10495 = vmatpush3.bf16.msra.mxu1 %v11262_v27  ;;  %10490 = vmatprep.mubr.msk.bf16.mxu1 %vm242_vm12, %v1359_v14  ;;  %v1672_v39 = vsel %vm242_vm12, %v12818_v53, 0.0  ;;  %v12827_v61 = vpop.eup %11542  ;;  %11554 = vpow2.f32 %v1660_v20 }
 0x85d   :  { %10520 = vmatprep.subr.bf16.mxu1 %v12822_v1  ;;  %1673 = vadd.xlane.f32.xlu0 %v1672_v39  ;;  %v1666_v22 = vsel %vm242_vm12, %v12827_v61, 0.0 }
 0x85e   :  { %v11545_v30 = vpop.eup %11544 }
 0x85f   :  { %v1669_v26 = vsel %vm242_vm12, %v11545_v30, 0.0  ;;  %v12836_v6 = vpop.eup %11546 }
 0x860   :  { %1670 = vadd.xlane.f32.xlu1 %v1669_v26  ;;  %v1675_v55 = vsel %vm242_vm12, %v12836_v6, 0.0 }
 0x861   :  { %1667 = vadd.xlane.f32.xlu0 %v1666_v22 }
 0x863   :  { %10491 = vmatmul.mubr.msk.bf16.gmra.mrb[44].mxu1 %vm242_vm12, %v1360_v42  ;;  %v12841_v29 = vpop.eup %11548 }
 0x864   :  { %v1684_v3 = vsel %vm242_vm12, %v12841_v29, 0.0  ;;  %v12845_v18 = vpop.eup %11550 }
 0x865   :  { %1676 = vadd.xlane.f32.xlu0 %v1675_v55  ;;  %v1678_v19 = vsel %vm242_vm12, %v12845_v18, 0.0  ;;  %v12849_v21 = vpop.eup %11552 }
 0x866   :  { %v1687_v31 = vsel %vm242_vm12, %v12849_v21, 0.0  ;;  %v11555_v62 = vpop.eup %11554 }
 0x867   :  { %v1681_v40 = vsel %vm242_vm12, %v11555_v62, 0.0 }
 0x869   :  { %1685 = vadd.xlane.f32.xlu0 %v1684_v3 }
 0x86d   :  { %1679 = vadd.xlane.f32.xlu0 %v1678_v19 }
 0x871   :  { %1716 = vrot.lane.b32.xlu1 %v12443_v32, %s12144_s29  ;;  %1688 = vadd.xlane.f32.xlu0 %v1687_v31 }
 0x875   :  { %1682 = vadd.xlane.f32.xlu0 %v1681_v40 }
 0x88b   :  { %1714 = vrot.lane.b32.xlu0 %v12435_v25, %s12144_s29 }
 0x8ea   :  { %v1674_v43 = vpop.xlane.xlu0 %1673 }
 0x8ed   :  { %v1671_v47 = vpop.xlane.xlu1 %1670 }
 0x8ee   :  { %v1668_v50 = vpop.xlane.xlu0 %1667  ;;  %11556 = vrcp.f32 %v1671_v47  ;;  %v12887_v47 = vld [vmem:[%s15533_s4] sm:$0x3f] }
 0x8ef   :  { %11558 = vrcp.f32 %v1668_v50 }
 0x8f1   :  { %v1717_v39 = vpop.permute.xlu1 %1716 }
 0x8f2   :  { %v1677_v44 = vpop.xlane.xlu0 %1676 }
 0x8f3   :  { %11560 = vrcp.f32 %v1677_v44 }
 0x8f6   :  { %v1686_v16 = vpop.xlane.xlu0 %1685 }
 0x8f8   :  { %v11557_v25 = vpop.eup %11556 }
 0x8f9   :  { %v11559_v35 = vpop.eup %11558  ;;  %v1699_v34 = vmul.f32 %v11557_v25, %v11545_v30  ;;  %v11263_v30 = vld [vmem:[%s15536_s7 + $0x18] sm:$0xff]  }
 0x8fa   :  { %v1680_v54 = vpop.xlane.xlu0 %1679  ;;  %v1698_v60 = vmul.f32 %v11559_v35, %v12827_v61 }
 0x8fc   :  { %v1706_v11 = vpack.c.bf16 %v1699_v34, %v1698_v60 }
 0x8fd   :  { %v11561_v14 = vpop.eup %11560 }
 0x8fe   :  { %v1689_v46 = vpop.xlane.xlu0 %1688  ;;  %v1701_v57 = vmul.f32 %v11561_v14, %v12836_v6 }
 0x902   :  { %v1683_v32 = vpop.xlane.xlu0 %1682 }
 0x903   :  { %11562 = vrcp.f32 %v1683_v32 }
 0x904   :  { %11564 = vrcp.f32 %v1674_v43 }
 0x905   :  { %11566 = vrcp.f32 %v1680_v54 }
 0x906   :  { %11568 = vrcp.f32 %v1689_v46  ;;  %v1715_v59 = vpop.permute.xlu0 %1714 }
 0x907   :  { %11570 = vrcp.f32 %v1686_v16 }
 0x90d   :  { %v11563_v23 = vpop.eup %11562 }
 0x90e   :  { %v1703_v63 = vmul.f32 %v11563_v23, %v11555_v62 }
 0x92e   :  { %v10488_v51 = vpop.f32.mrb[40].mxu1 }
 0x92f   :  { %v1419_v28 = vpop.f32.mrb[41].mxu1 }
 0x930   :  { %v10489_v7 = vpop.f32.mrb[42].mxu1 }
 0x931   :  { %v1451_v56 = vpack.c.bf16 %v10489_v7, %v10488_v51  ;;  %v1422_v9 = vpop.f32.mrb[43].mxu1 }
 0x932   :  { %v1450_v27 = vpack.c.bf16 %v1422_v9, %v1419_v28 }
 0x934   :  { %10496 = vmatprep.mubr.msk.bf16.mxu1 %vm537_vm13, %v1450_v27 }
 0x935   :  { %10497 = vmatmul.mubr.msk.bf16.vlgmr.msra.gmra.mrb[32].mxu1 %vm537_vm13, %v1451_v56 }
 0x936   :  { %10521 = vmatpush3.bf16.msra.mxu1 %v12822_v1  ;;  %v10492_v0 = vpop.f32.mrb[44].mxu1  ;;  %v11565_v1 = vpop.eup %11564 }
 0x937   :  { %10522 = vmatprep.subr.bf16.mxu1 %v1713_v8  ;;  %v1435_v38 = vpop.f32.mrb[45].mxu1  ;;  %v11567_v61 = vpop.eup %11566  ;;  %v1700_v24 = vmul.f32 %v11565_v1, %v12818_v53 }
 0x938   :  { %v10493_v15 = vpop.f32.mrb[46].mxu1  ;;  %v1702_v10 = vmul.f32 %v11567_v61, %v12845_v18  ;;  %v11569_v22 = vpop.eup %11568 }
 0x939   :  { %v1453_v13 = vpack.c.bf16 %v10493_v15, %v10492_v0  ;;  %v1438_v5 = vpop.f32.mrb[47].mxu1  ;;  %v1707_v26 = vpack.c.bf16 %v1701_v57, %v1700_v24  ;;  %v11571_v20 = vpop.eup %11570  ;;  %v1705_v6 = vmul.f32 %v11569_v22, %v12849_v21 }
 0x93a   :  { %v1452_v12 = vpack.c.bf16 %v1438_v5, %v1435_v38  ;;  %10523 = vmatpush3.bf16.msra.mxu1 %v1713_v8  ;;  %v1708_v42 = vpack.c.bf16 %v1703_v63, %v1702_v10  ;;  %v1704_v55 = vmul.f32 %v11571_v20, %v12841_v29  ;;  %v12882_v29 = vsub.s32 2, %v12387_v58 }
 0x93b   :  { %10524 = vmatprep.subr.bf16.mxu1 %v1715_v59 }
 0x93c   :  { %10500 = vmatprep.mubr.msk.bf16.mxu1 %vm537_vm13, %v1452_v12  ;;  %v1709_v3 = vpack.c.bf16 %v1705_v6, %v1704_v55  ;;  %v1905_v46 = vrot.slane %v12887_v47, %v12882_v29 }
 0x93d   :  { %10501 = vmatmul.mubr.msk.bf16.gmra.mrb[36].mxu1 %vm537_vm13, %v1453_v13 }
 0x93e   :  { %10525 = vmatpush3.bf16.msra.mxu1 %v1715_v59  ;;  %10528 = vmatprep.mubr.msk.bf16.mxu1 %vm242_vm12, %v1706_v11 }
 0x93f   :  { %10526 = vmatprep.subr.bf16.mxu1 %v1717_v39 }
 0x942   :  { %10527 = vmatpush3.bf16.msra.mxu1 %v1717_v39 }
 0x943   :  { %10536 = vmatprep.subr.bf16.mxu1 %v11263_v30 }
 0x945   :  { %10529 = vmatmul.mubr.msk.bf16.vlgmr.msra.gmra.mrb[48].mxu1 %vm242_vm12, %v1707_v26 }
 0x946   :  { %10532 = vmatprep.mubr.msk.bf16.mxu1 %vm242_vm12, %v1708_v42  ;;  %10537 = vmatpush3.bf16.msra.mxu1 %v11263_v30 }
 0x94d   :  { %10533 = vmatmul.mubr.msk.bf16.gmra.mrb[52].mxu1 %vm242_vm12, %v1709_v3 }
 0xa18   :  { %v10530_v53 = vpop.f32.mrb[48].mxu1 }
 0xa19   :  { %v1768_v19 = vpop.f32.mrb[49].mxu1 }
 0xa1a   :  { %v10531_v18 = vpop.f32.mrb[50].mxu1 }
 0xa1b   :  { %v1800_v31 = vpack.c.bf16 %v10531_v18, %v10530_v53  ;;  %v1771_v62 = vpop.f32.mrb[51].mxu1 }
 0xa1c   :  { %v1799_v40 = vpack.c.bf16 %v1771_v62, %v1768_v19 }
 0xa1e   :  { %10538 = vmatprep.mubr.msk.bf16.mxu1 %vm537_vm13, %v1799_v40 }
 0xa1f   :  { %10539 = vmatmul.mubr.msk.bf16.vlgmr.msra.gmra.mrb[32].mxu1 %vm537_vm13, %v1800_v31 }
 0xa20   :  { %v10534_v43 = vpop.f32.mrb[52].mxu1 }
 0xa21   :  { %v1784_v50 = vpop.f32.mrb[53].mxu1 }
 0xa22   :  { %v10535_v44 = vpop.f32.mrb[54].mxu1 }
 0xa23   :  { %v1802_v16 = vpack.c.bf16 %v10535_v44, %v10534_v43  ;;  %v1787_v21 = vpop.f32.mrb[55].mxu1 }
 0xa24   :  { %v1801_v8 = vpack.c.bf16 %v1787_v21, %v1784_v50 }
 0xa26   :  { %10542 = vmatprep.mubr.msk.bf16.mxu1 %vm537_vm13, %v1801_v8 }
 0xa27   :  { %10543 = vmatmul.mubr.msk.bf16.gmra.mrb[36].mxu1 %vm537_vm13, %v1802_v16 }
 0xa28   :  { %2655 = vmatprep.mubr.bf16.mxu1 %v12136_v2 }
 0xaf2   :  { %v10540_v54 = vpop.f32.mrb[32].mxu1 }
 0xaf3   :  { %v1855_v51 = vpop.f32.mrb[33].mxu1  ;;  %v1896_v28 = vadd.f32 %v10540_v54, %v12281_v36 }
 0xaf4   :  { %v1894_v32 = vadd.f32 %v1855_v51, %v12279_v33  ;;  %v10541_v7 = vpop.f32.mrb[34].mxu1 }
 0xaf5   :  { %v1858_v56 = vpop.f32.mrb[35].mxu1  ;;  %v12896_v25 = vadd.f32 %v1905_v46, %v1896_v28  ;;  %v1897_v35 = vadd.f32 %v10541_v7, %v12292_v41 }
 0xaf6   :  { %v12893_v9 = vadd.f32 %v1905_v46, %v1894_v32  ;;  %v1895_v27 = vadd.f32 %v1858_v56, %v12283_v37 }
 0xaf7   :  { %v12905_v60 = vadd.f32 %v1905_v46, %v1897_v35  ;;  %v1920_v41 = vsel %vm242_vm12, %v12896_v25, 0.0 }
 0xaf8   :  { %v12899_v0 = vadd.f32 %v1905_v46, %v1895_v27  ;;  %v1914_v38 = vsel %vm242_vm12, %v12893_v9, 0.0 }
 0xaf9   :  { %1915 = vadd.xlane.f32.xlu1 %v1914_v38  ;;  %v1923_v23 = vsel %vm242_vm12, %v12905_v60, 0.0 }
 0xafa   :  { %v10544_v15 = vpop.f32.mrb[36].mxu1  ;;  %v1917_v33 = vsel %vm242_vm12, %v12899_v0, 0.0 }
 0xafb   :  { %1918 = vadd.xlane.f32.xlu0 %v1917_v33  ;;  %v1871_v36 = vpop.f32.mrb[37].mxu1  ;;  %v1900_v12 = vadd.f32 %v10544_v15, %v12298_v48 }
 0xafc   :  { %v1898_v37 = vadd.f32 %v1871_v36, %v12296_v45  ;;  %v10545_v34 = vpop.f32.mrb[38].mxu1 }
 0xafd   :  { %1921 = vadd.xlane.f32.xlu1 %v1920_v41  ;;  %v1874_v13 = vpop.f32.mrb[39].mxu1  ;;  %v1901_v5 = vadd.f32 %v10545_v34, %v12306_v52  ;;  %v12923_v39 = vadd.f32 %v1905_v46, %v1900_v12  ;;  %v11266_v41 = vld [vmem:[%s15537_s8 + $0x4] ss:$8 sps:$4 sm:$0xff]  }
 0xafe   :  { %v1899_v59 = vadd.f32 %v1874_v13, %v12300_v49  ;;  %v12913_v14 = vadd.f32 %v1905_v46, %v1898_v37  ;;  %v11264_v13 = vld [vmem:[%s15537_s8] ss:$8 sps:$4 sm:$0xff]   ;;  %2118 = vmatprep.subr.bf16.mxu0 %v11266_v41  ;;  %v11272_v12 = vld [vmem:[%s15537_s8 + $0x24] ss:$8 sps:$4 sm:$0xff]  }
 0xaff   :  { %v12919_v45 = vadd.f32 %v1905_v46, %v1901_v5  ;;  %v1932_v52 = vsel %vm242_vm12, %v12923_v39, 0.0  ;;  %2119 = vmatpush1.bf16.msra.mxu0 %v11264_v13  ;;  %v11269_v5 = vld [vmem:[%s15537_s8 + $0x14] ss:$8 sps:$4 sm:$0xff]  }
 0xb00   :  { %v12915_v11 = vadd.f32 %v1905_v46, %v1899_v59  ;;  %v1926_v49 = vsel %vm242_vm12, %v12913_v14, 0.0  ;;  %v11267_v59 = vld [vmem:[%s15537_s8 + $0x10] ss:$8 sps:$4 sm:$0xff]   ;;  %2120 = vmatprep.subr.bf16.mxu0 %v11269_v5 }
 0xb01   :  { %1924 = vadd.xlane.f32.xlu1 %v1923_v23  ;;  %v1935_v48 = vsel %vm242_vm12, %v12919_v45, 0.0  ;;  %v11270_v23 = vld [vmem:[%s15537_s8 + $0x20] ss:$8 sps:$4 sm:$0xff]  }
 0xb02   :  { %v1929_v1 = vsel %vm242_vm12, %v12915_v11, 0.0 }
 0xb03   :  { %1930 = vadd.xlane.f32.xlu0 %v1929_v1  ;;  %2121 = vmatpush1.bf16.msra.mxu0 %v11267_v59  ;;  %v11275_v1 = vld [vmem:[%s15537_s8 + $0x34] ss:$8 sps:$4 sm:$0xff]  }
 0xb04   :  { %2122 = vmatprep.subr.bf16.mxu0 %v11272_v12 }
 0xb05   :  { %1927 = vadd.xlane.f32.xlu1 %v1926_v49  ;;  %v11273_v49 = vld [vmem:[%s15537_s8 + $0x30] ss:$8 sps:$4 sm:$0xff]  }
 0xb07   :  { %1936 = vadd.xlane.f32.xlu0 %v1935_v48  ;;  %2123 = vmatpush1.bf16.msra.mxu0 %v11270_v23  ;;  %v11276_v48 = vld [vmem:[%s15538_s9 + $0x40] sm:$0xff]  }
 0xb08   :  { %2124 = vmatprep.subr.bf16.mxu0 %v11275_v1  ;;  %v11277_v23 = vld [vmem:[%s15538_s9] sm:$0xff]  }
 0xb09   :  { %1933 = vadd.xlane.f32.xlu1 %v1932_v52 }
 0xb0b   :  { %2125 = vmatpush1.bf16.msra.mxu0 %v11273_v49  ;;  %v11278_v49 = vld [vmem:[%s15538_s9 + $0x48] sm:$0xff]  }
 0xb0c   :  { %9934 = vmatprep.subr.bf16.mxu0 %v11276_v48 }
 0xb86   :  { %v1916_v61 = vpop.xlane.xlu1 %1915 }
 0xb87   :  { %v1938_v57 = vmul.f32 0.015625, %v1916_v61 }
 0xb88   :  { %v1919_v30 = vpop.xlane.xlu0 %1918 }
 0xb89   :  { %v12932_v63 = vsub.f32 %v12893_v9, %v1938_v57  ;;  %v1939_v24 = vmul.f32 0.015625, %v1919_v30 }
 0xb8a   :  { %v1922_v10 = vpop.xlane.xlu1 %1921 }
 0xb8b   :  { %v12935_v26 = vsub.f32 %v12899_v0, %v1939_v24  ;;  %v1940_v22 = vmul.f32 0.015625, %v1922_v10  ;;  %v1954_v42 = vmul.f32 %v12932_v63, %v12932_v63 }
 0xb8d   :  { %v12940_v20 = vsub.f32 %v12896_v25, %v1940_v22  ;;  %v1962_v6 = vsel %vm242_vm12, %v1954_v42, 0.0  ;;  %v1955_v55 = vmul.f32 %v12935_v26, %v12935_v26 }
 0xb8e   :  { %v1925_v3 = vpop.xlane.xlu1 %1924  ;;  %1963 = vadd.xlane.f32.xlu1 %v1962_v6 }
 0xb8f   :  { %v1941_v53 = vmul.f32 0.015625, %v1925_v3  ;;  %v1965_v19 = vsel %vm242_vm12, %v1955_v55, 0.0  ;;  %v1956_v18 = vmul.f32 %v12940_v20, %v12940_v20 }
 0xb90   :  { %1966 = vadd.xlane.f32.xlu0 %v1965_v19  ;;  %v1931_v31 = vpop.xlane.xlu0 %1930 }
 0xb91   :  { %v12949_v62 = vsub.f32 %v12905_v60, %v1941_v53  ;;  %v1943_v40 = vmul.f32 0.015625, %v1931_v31  ;;  %v1968_v43 = vsel %vm242_vm12, %v1956_v18, 0.0  ;;  %v13007_v53 = vsub.s32 3, %v12387_v58 }
 0xb92   :  { %1969 = vadd.xlane.f32.xlu1 %v1968_v43  ;;  %v1928_v50 = vpop.xlane.xlu1 %1927 }
 0xb93   :  { %v12953_v44 = vsub.f32 %v12915_v11, %v1943_v40  ;;  %v1942_v16 = vmul.f32 0.015625, %v1928_v50  ;;  %v1957_v21 = vmul.f32 %v12949_v62, %v12949_v62  ;;  %v13010_v50 = vsub.s32 4, %v12387_v58 }
 0xb94   :  { %v1937_v8 = vpop.xlane.xlu0 %1936 }
 0xb95   :  { %v12958_v54 = vsub.f32 %v12913_v14, %v1942_v16  ;;  %v1945_v46 = vmul.f32 0.015625, %v1937_v8  ;;  %v1971_v51 = vsel %vm242_vm12, %v1957_v21, 0.0  ;;  %v1959_v28 = vmul.f32 %v12953_v44, %v12953_v44 }
 0xb96   :  { %v1934_v32 = vpop.xlane.xlu1 %1933  ;;  %1972 = vadd.xlane.f32.xlu0 %v1971_v51  ;;  %v13014_v16 = vrot.slane %v12887_v47, %v13007_v53 }
 0xb97   :  { %v12964_v7 = vsub.f32 %v12919_v45, %v1945_v46  ;;  %v1944_v56 = vmul.f32 0.015625, %v1934_v32  ;;  %v1958_v27 = vmul.f32 %v12958_v54, %v12958_v54  ;;  %v1977_v15 = vsel %vm242_vm12, %v1959_v28, 0.0 }
 0xb99   :  { %v12969_v35 = vsub.f32 %v12923_v39, %v1944_v56  ;;  %v1974_v38 = vsel %vm242_vm12, %v1958_v27, 0.0  ;;  %v1961_v33 = vmul.f32 %v12964_v7, %v12964_v7 }
 0xb9a   :  { %1975 = vadd.xlane.f32.xlu1 %v1974_v38  ;;  %1978 = vadd.xlane.f32.xlu0 %v1977_v15  ;;  %v2033_v15 = vrot.slane %v12887_v47, %v13010_v50 }
 0xb9b   :  { %v1960_v36 = vmul.f32 %v12969_v35, %v12969_v35  ;;  %v1983_v34 = vsel %vm242_vm12, %v1961_v33, 0.0 }
 0xb9d   :  { %v1980_v37 = vsel %vm242_vm12, %v1960_v36, 0.0 }
 0xb9e   :  { %1981 = vadd.xlane.f32.xlu1 %v1980_v37  ;;  %1984 = vadd.xlane.f32.xlu0 %v1983_v34 }
 0xc1b   :  { %v1964_v52 = vpop.xlane.xlu1 %1963 }
 0xc1c   :  { %v1986_v61 = vmul.f32 0.015625, %v1964_v52 }
 0xc1d   :  { %v1967_v57 = vpop.xlane.xlu0 %1966 }
 0xc1e   :  { %v1994_v30 = vadd.f32 1e-05, %v1986_v61  ;;  %v1987_v24 = vmul.f32 0.015625, %v1967_v57  ;;  %v11279_v61 = vld [vmem:[%s15538_s9 + $0x8] sm:$0xff]  }
 0xc1f   :  { %v1970_v10 = vpop.xlane.xlu1 %1969 }
 0xc20   :  { %11572 = vrsqrt.f32 %v1994_v30  ;;  %v1995_v22 = vadd.f32 1e-05, %v1987_v24  ;;  %v1988_v42 = vmul.f32 0.015625, %v1970_v10  ;;  %v11280_v24 = vld [vmem:[%s15538_s9 + $0x50] sm:$0xff]  }
 0xc22   :  { %11574 = vrsqrt.f32 %v1995_v22  ;;  %v1996_v6 = vadd.f32 1e-05, %v1988_v42  ;;  %v11281_v42 = vld [vmem:[%s15538_s9 + $0x10] sm:$0xff]  }
 0xc23   :  { %v1973_v55 = vpop.xlane.xlu0 %1972 }
 0xc24   :  { %11576 = vrsqrt.f32 %v1996_v6  ;;  %v1989_v3 = vmul.f32 0.015625, %v1973_v55 }
 0xc26   :  { %v1997_v19 = vadd.f32 1e-05, %v1989_v3 }
 0xc27   :  { %v1976_v18 = vpop.xlane.xlu1 %1975  ;;  %v1979_v31 = vpop.xlane.xlu0 %1978 }
 0xc28   :  { %11578 = vrsqrt.f32 %v1997_v19  ;;  %v1990_v40 = vmul.f32 0.015625, %v1976_v18  ;;  %v1991_v43 = vmul.f32 0.015625, %v1979_v31 }
 0xc2a   :  { %v11573_v21 = vpop.eup %11572  ;;  %v1998_v8 = vadd.f32 1e-05, %v1990_v40  ;;  %v1999_v46 = vadd.f32 1e-05, %v1991_v43 }
 0xc2b   :  { %v2010_v51 = vmul.f32 %v11573_v21, %v12932_v63  ;;  %v1982_v28 = vpop.xlane.xlu1 %1981  ;;  %v1985_v32 = vpop.xlane.xlu0 %1984 }
 0xc2c   :  { %v11575_v56 = vpop.eup %11574  ;;  %11580 = vrsqrt.f32 %v1998_v8  ;;  %v1992_v27 = vmul.f32 0.015625, %v1982_v28  ;;  %v1993_v38 = vmul.f32 0.015625, %v1985_v32  ;;  %v11284_v8 = vld [vmem:[%s15538_s9 + $0x60] sm:$0xff]  }
 0xc2d   :  { %v2022_v33 = vmul.f32 %v13014_v16, %v2010_v51  ;;  %v2011_v36 = vmul.f32 %v11575_v56, %v12935_v26  ;;  %11582 = vrsqrt.f32 %v1999_v46  ;;  %v11285_v46 = vld [vmem:[%s15538_s9 + $0x20] sm:$0xff]  }
 0xc2e   :  { %v11577_v37 = vpop.eup %11576  ;;  %v2000_v34 = vadd.f32 1e-05, %v1992_v27  ;;  %v2001_v41 = vadd.f32 1e-05, %v1993_v38  ;;  %v11288_v38 = vld [vmem:[%s15538_s9 + $0x70] sm:$0xff]  }
 0xc2f   :  { %v2023_v13 = vmul.f32 %v13014_v16, %v2011_v36  ;;  %v2034_v63 = vadd.f32 %v2033_v15, %v2022_v33  ;;  %v2012_v59 = vmul.f32 %v11577_v37, %v12940_v20  ;;  %v11289_v33 = vld [vmem:[%s15538_s9 + $0x30] sm:$0xff]   ;;  %v11291_v36 = vld [vmem:[%s15538_s9 + $0x38] sm:$0xff]   ;;  %v2054_v37 = vld [vmem:[%s15534_s5] sm:$0x3] }
 0xc30   :  { %11584 = vrsqrt.f32 %v2000_v34  ;;  %v2059_v34 = vrot.slane %v2054_v37, %v12390_v4 }
 0xc31   :  { %v2035_v5 = vadd.f32 %v2033_v15, %v2023_v13  ;;  %11586 = vrsqrt.f32 %v2001_v41  ;;  %v2024_v48 = vmul.f32 %v13014_v16, %v2012_v59  ;;  %v2063_v41 = vrot.slane %v2054_v37, %v12396_v17 }
 0xc32   :  { %v11579_v12 = vpop.eup %11578 }
 0xc33   :  { %v2042_v1 = vpack.c.bf16 %v2035_v5, %v2034_v63  ;;  %v2013_v26 = vmul.f32 %v11579_v12, %v12949_v62  ;;  %v2036_v22 = vadd.f32 %v2033_v15, %v2024_v48 }
 0xc35   :  { %9359 = vmatmul.mubr.msk.bf16.vlgmr.msra.gmra.mrb[40].mxu0 %vm242_vm12, %v2042_v1  ;;  %v2025_v52 = vmul.f32 %v13014_v16, %v2013_v26 }
 0xc36   :  { %v11581_v20 = vpop.eup %11580  ;;  %2160 = vmatprep.mubr.bf16.mxu0 %v12136_v2  ;;  %9935 = vmatpush3.bf16.msra.mxu0 %v11277_v23 }
 0xc37   :  { %v11583_v57 = vpop.eup %11582  ;;  %v2037_v62 = vadd.f32 %v2033_v15, %v2025_v52  ;;  %v2014_v30 = vmul.f32 %v11581_v20, %v12958_v54  ;;  %9936 = vmatprep.subr.bf16.mxu0 %v11278_v49  ;;  %v11282_v54 = vld [vmem:[%s15538_s9 + $0x58] sm:$0xff]  }
 0xc38   :  { %v2015_v10 = vmul.f32 %v11583_v57, %v12953_v44  ;;  %v11283_v44 = vld [vmem:[%s15538_s9 + $0x18] sm:$0xff]  }
 0xc39   :  { %v2043_v55 = vpack.c.bf16 %v2037_v62, %v2036_v22  ;;  %v2026_v3 = vmul.f32 %v13014_v16, %v2014_v30 }
 0xc3a   :  { %9937 = vmatpush3.bf16.msra.mxu0 %v11279_v61  ;;  %v11585_v6 = vpop.eup %11584  ;;  %v2027_v19 = vmul.f32 %v13014_v16, %v2015_v10 }
 0xc3b   :  { %9938 = vmatprep.subr.bf16.mxu0 %v11280_v24  ;;  %v11587_v18 = vpop.eup %11586  ;;  %v2038_v31 = vadd.f32 %v2033_v15, %v2026_v3  ;;  %v2016_v43 = vmul.f32 %v11585_v6, %v12969_v35 }
 0xc3c   :  { %v2039_v40 = vadd.f32 %v2033_v15, %v2027_v19  ;;  %v2017_v21 = vmul.f32 %v11587_v18, %v12964_v7  ;;  %v11286_v7 = vld [vmem:[%s15538_s9 + $0x68] sm:$0xff]  }
 0xc3d   :  { %9360 = vmatmul.mubr.msk.bf16.gmra.mrb[44].mxu0 %vm242_vm12, %v2043_v55  ;;  %v2028_v28 = vmul.f32 %v13014_v16, %v2016_v43 }
 0xc3e   :  { %2170 = vmatprep.mubr.bf16.mxu0 %v12136_v2  ;;  %9939 = vmatpush3.bf16.msra.mxu0 %v11281_v42  ;;  %v2044_v51 = vpack.c.bf16 %v2039_v40, %v2038_v31  ;;  %v2029_v32 = vmul.f32 %v13014_v16, %v2017_v21  ;;  %v11287_v16 = vld [vmem:[%s15538_s9 + $0x28] sm:$0xff]  }
 0xc3f   :  { %9940 = vmatprep.subr.bf16.mxu0 %v11282_v54  ;;  %v2040_v35 = vadd.f32 %v2033_v15, %v2028_v28 }
 0xc40   :  { %v2041_v56 = vadd.f32 %v2033_v15, %v2029_v32  ;;  %v11290_v15 = vld [vmem:[%s15538_s9 + $0x78] sm:$0xff]  }
 0xc42   :  { %9941 = vmatpush3.bf16.msra.mxu0 %v11283_v44  ;;  %v2045_v27 = vpack.c.bf16 %v2041_v56, %v2040_v35 }
 0xc43   :  { %9942 = vmatprep.subr.bf16.mxu0 %v11284_v8 }
 0xc45   :  { %9361 = vmatmul.mubr.msk.bf16.gmra.mrb[48].mxu0 %vm242_vm12, %v2044_v51 }
 0xc46   :  { %2180 = vmatprep.mubr.bf16.mxu0 %v12136_v2  ;;  %9943 = vmatpush3.bf16.msra.mxu0 %v11285_v46 }
 0xc47   :  { %9944 = vmatprep.subr.bf16.mxu0 %v11286_v7 }
 0xc4a   :  { %9945 = vmatpush3.bf16.msra.mxu0 %v11287_v16 }
 0xc4b   :  { %9946 = vmatprep.subr.bf16.mxu0 %v11288_v38 }
 0xc4d   :  { %9362 = vmatmul.mubr.msk.bf16.gmra.mrb[52].mxu0 %vm242_vm12, %v2045_v27 }
 0xc4e   :  { %9947 = vmatpush3.bf16.msra.mxu0 %v11289_v33 }
 0xc4f   :  { %9948 = vmatprep.subr.bf16.mxu0 %v11290_v15 }
 0xc52   :  { %9949 = vmatpush3.bf16.msra.mxu0 %v11291_v36 }
 0xd08   :  { %v2152_v13 = vpop.f32.mrb[40].mxu0 }
 0xd09   :  { %v2153_v63 = vadd.f32 %v2152_v13, %v2059_v34  ;;  %v2154_v5 = vpop.f32.mrb[41].mxu0 }
 0xd0a   :  { %v2155_v59 = vadd.f32 %v2154_v5, %v2063_v41  ;;  %v2156_v12 = vpop.f32.mrb[42].mxu0 }
 0xd0b   :  { %v2157_v23 = vadd.f32 %v2156_v12, %v2059_v34  ;;  %v2158_v1 = vpop.f32.mrb[43].mxu0  ;;  %v2191_v49 = vmax.f32 %v2153_v63, 0.0 }
 0xd0c   :  { %v2159_v26 = vadd.f32 %v2158_v1, %v2063_v41  ;;  %v2192_v52 = vmax.f32 %v2155_v59, 0.0 }
 0xd0d   :  { %v2193_v48 = vmax.f32 %v2157_v23, 0.0 }
 0xd0e   :  { %v2194_v20 = vmax.f32 %v2159_v26, 0.0 }
 0xd0f   :  { %v2207_v61 = vpack.c.bf16 %v2193_v48, %v2191_v49 }
 0xd10   :  { %v2208_v57 = vpack.c.bf16 %v2194_v20, %v2192_v52  ;;  %v2162_v62 = vpop.f32.mrb[44].mxu0  ;;  %v13092_v52 = vsub.s32 5, %v12387_v58 }
 0xd11   :  { %v2163_v30 = vadd.f32 %v2162_v62, %v2059_v34  ;;  %v2164_v24 = vpop.f32.mrb[45].mxu0 }
 0xd12   :  { %v2165_v10 = vadd.f32 %v2164_v24, %v2063_v41  ;;  %v2166_v22 = vpop.f32.mrb[46].mxu0  ;;  %2375 = vmatprep.mubr.bf16.mxu0 %v2208_v57 }
 0xd13   :  { %v2167_v42 = vadd.f32 %v2166_v22, %v2059_v34  ;;  %v2168_v6 = vpop.f32.mrb[47].mxu0  ;;  %2376 = vmatmul.mubr.bf16.vlgmr.msra.gmra.mrb[56].mxu0 %v2207_v61  ;;  %v2195_v3 = vmax.f32 %v2163_v30, 0.0 }
 0xd14   :  { %v2169_v55 = vadd.f32 %v2168_v6, %v2063_v41  ;;  %v2196_v54 = vmax.f32 %v2165_v10, 0.0 }
 0xd15   :  { %v2197_v19 = vmax.f32 %v2167_v42, 0.0 }
 0xd16   :  { %v2198_v18 = vmax.f32 %v2169_v55, 0.0 }
 0xd17   :  { %v2209_v44 = vpack.c.bf16 %v2197_v19, %v2195_v3 }
 0xd18   :  { %v2210_v31 = vpack.c.bf16 %v2198_v18, %v2196_v54  ;;  %v2172_v40 = vpop.f32.mrb[48].mxu0 }
 0xd19   :  { %v2173_v43 = vadd.f32 %v2172_v40, %v2059_v34  ;;  %v2174_v21 = vpop.f32.mrb[49].mxu0 }
 0xd1a   :  { %v2175_v8 = vadd.f32 %v2174_v21, %v2063_v41  ;;  %v2176_v46 = vpop.f32.mrb[50].mxu0  ;;  %2383 = vmatprep.mubr.bf16.mxu0 %v2210_v31 }
 0xd1b   :  { %v2177_v51 = vadd.f32 %v2176_v46, %v2059_v34  ;;  %v2178_v28 = vpop.f32.mrb[51].mxu0  ;;  %2384 = vmatmul.mubr.bf16.gmra.mrb[60].mxu0 %v2209_v44  ;;  %v2199_v7 = vmax.f32 %v2173_v43, 0.0 }
 0xd1c   :  { %v2179_v32 = vadd.f32 %v2178_v28, %v2063_v41  ;;  %v2200_v56 = vmax.f32 %v2175_v8, 0.0 }
 0xd1d   :  { %v2201_v35 = vmax.f32 %v2177_v51, 0.0 }
 0xd1e   :  { %v2202_v27 = vmax.f32 %v2179_v32, 0.0 }
 0xd1f   :  { %v2211_v16 = vpack.c.bf16 %v2201_v35, %v2199_v7 }
 0xd20   :  { %v2212_v38 = vpack.c.bf16 %v2202_v27, %v2200_v56  ;;  %v2182_v33 = vpop.f32.mrb[52].mxu0 }
 0xd21   :  { %v2183_v15 = vadd.f32 %v2182_v33, %v2059_v34  ;;  %v2184_v36 = vpop.f32.mrb[53].mxu0 }
 0xd22   :  { %v2185_v37 = vadd.f32 %v2184_v36, %v2063_v41  ;;  %v2186_v13 = vpop.f32.mrb[54].mxu0  ;;  %2391 = vmatprep.mubr.bf16.mxu0 %v2212_v38 }
 0xd23   :  { %v2187_v63 = vadd.f32 %v2186_v13, %v2059_v34  ;;  %v2188_v5 = vpop.f32.mrb[55].mxu0  ;;  %2392 = vmatmul.mubr.bf16.gmra.mrb[64].mxu0 %v2211_v16  ;;  %v2203_v12 = vmax.f32 %v2183_v15, 0.0  ;;  %v2419_v34 = vrot.slane %v12887_v47, %v13092_v52 }
 0xd24   :  { %v2189_v59 = vadd.f32 %v2188_v5, %v2063_v41  ;;  %v2204_v1 = vmax.f32 %v2185_v37, 0.0 }
 0xd25   :  { %v2205_v23 = vmax.f32 %v2187_v63, 0.0 }
 0xd26   :  { %v2206_v26 = vmax.f32 %v2189_v59, 0.0 }
 0xd27   :  { %v2213_v49 = vpack.c.bf16 %v2205_v23, %v2203_v12 }
 0xd28   :  { %v2214_v48 = vpack.c.bf16 %v2206_v26, %v2204_v1 }
 0xd2a   :  { %2399 = vmatprep.mubr.bf16.mxu0 %v2214_v48 }
 0xd2b   :  { %2400 = vmatmul.mubr.bf16.gmra.mrb[68].mxu0 %v2213_v49 }
 0xde6   :  { %v9950_v20 = vpop.f32.mrb[56].mxu0 }
 0xde7   :  { %v9951_v61 = vpop.f32.mrb[57].mxu0 }
 0xde8   :  { %v9952_v57 = vadd.f32 %v9951_v61, %v9950_v20  ;;  %v9953_v62 = vpop.f32.mrb[58].mxu0 }
 0xde9   :  { %v9954_v30 = vpop.f32.mrb[59].mxu0 }
 0xdea   :  { %v2408_v41 = vadd.f32 %v9952_v57, %v12893_v9  ;;  %v9955_v24 = vadd.f32 %v9954_v30, %v9953_v62 }
 0xdec   :  { %v13097_v10 = vadd.f32 %v2419_v34, %v2408_v41  ;;  %v2409_v22 = vadd.f32 %v9955_v24, %v12899_v0 }
 0xdee   :  { %v13100_v42 = vadd.f32 %v2419_v34, %v2409_v22  ;;  %v9956_v6 = vpop.f32.mrb[60].mxu0  ;;  %v2430_v58 = vsel %vm242_vm12, %v13097_v10, 0.0 }
 0xdef   :  { %v9957_v55 = vpop.f32.mrb[61].mxu0  ;;  %2431 = vadd.xlane.f32.xlu1 %v2430_v58 }
 0xdf0   :  { %v9958_v3 = vadd.f32 %v9957_v55, %v9956_v6  ;;  %v9959_v19 = vpop.f32.mrb[62].mxu0  ;;  %v2433_v47 = vsel %vm242_vm12, %v13100_v42, 0.0 }
 0xdf1   :  { %v9960_v54 = vpop.f32.mrb[63].mxu0  ;;  %2434 = vadd.xlane.f32.xlu0 %v2433_v47 }
 0xdf2   :  { %v2410_v9 = vadd.f32 %v9958_v3, %v12896_v25  ;;  %v9961_v18 = vadd.f32 %v9960_v54, %v9959_v19 }
 0xdf4   :  { %v13107_v44 = vadd.f32 %v2419_v34, %v2410_v9  ;;  %v2411_v0 = vadd.f32 %v9961_v18, %v12905_v60 }
 0xdf6   :  { %v13110_v31 = vadd.f32 %v2419_v34, %v2411_v0  ;;  %v9962_v40 = vpop.f32.mrb[64].mxu0  ;;  %v2436_v43 = vsel %vm242_vm12, %v13107_v44, 0.0 }
 0xdf7   :  { %v9963_v21 = vpop.f32.mrb[65].mxu0  ;;  %2437 = vadd.xlane.f32.xlu1 %v2436_v43 }
 0xdf8   :  { %v9964_v8 = vadd.f32 %v9963_v21, %v9962_v40  ;;  %v9965_v46 = vpop.f32.mrb[66].mxu0  ;;  %v2439_v51 = vsel %vm242_vm12, %v13110_v31, 0.0 }
 0xdf9   :  { %v9966_v28 = vpop.f32.mrb[67].mxu0  ;;  %2440 = vadd.xlane.f32.xlu0 %v2439_v51 }
 0xdfa   :  { %v2412_v25 = vadd.f32 %v9964_v8, %v12913_v14  ;;  %v9967_v32 = vadd.f32 %v9966_v28, %v9965_v46 }
 0xdfc   :  { %v13117_v7 = vadd.f32 %v2419_v34, %v2412_v25  ;;  %v2413_v60 = vadd.f32 %v9967_v32, %v12915_v11 }
 0xdfe   :  { %v13120_v35 = vadd.f32 %v2419_v34, %v2413_v60  ;;  %v9968_v56 = vpop.f32.mrb[68].mxu0  ;;  %v2442_v27 = vsel %vm242_vm12, %v13117_v7, 0.0 }
 0xdff   :  { %2443 = vadd.xlane.f32.xlu1 %v2442_v27  ;;  %v9969_v16 = vpop.f32.mrb[69].mxu0 }
 0xe00   :  { %v9970_v38 = vadd.f32 %v9969_v16, %v9968_v56  ;;  %v9971_v33 = vpop.f32.mrb[70].mxu0  ;;  %v2445_v15 = vsel %vm242_vm12, %v13120_v35, 0.0  ;;  %v11294_v56 = vld [vmem:[%s15535_s6 + $0x44] ss:$8 sps:$4 sm:$0xff]  }
 0xe01   :  { %2446 = vadd.xlane.f32.xlu0 %v2445_v15  ;;  %v9972_v14 = vpop.f32.mrb[71].mxu0  ;;  %2623 = vmatprep.subr.bf16.mxu1 %v11294_v56  ;;  %v11297_v15 = vld [vmem:[%s15535_s6 + $0x54] ss:$8 sps:$4 sm:$0xff]  }
 0xe02   :  { %v2414_v36 = vadd.f32 %v9970_v38, %v12923_v39  ;;  %v9973_v37 = vadd.f32 %v9972_v14, %v9971_v33  ;;  %v11292_v38 = vld [vmem:[%s15535_s6 + $0x40] ss:$8 sps:$4 sm:$0xff]   ;;  %v11295_v14 = vld [vmem:[%s15535_s6 + $0x50] ss:$8 sps:$4 sm:$0xff]  }
 0xe03   :  { %2624 = vmatpush1.bf16.msra.mxu1 %v11292_v38 }
 0xe04   :  { %v13127_v13 = vadd.f32 %v2419_v34, %v2414_v36  ;;  %v2415_v11 = vadd.f32 %v9973_v37, %v12919_v45  ;;  %2625 = vmatprep.subr.bf16.mxu1 %v11297_v15  ;;  %v11300_v36 = vld [vmem:[%s15535_s6 + $0x64] ss:$8 sps:$4 sm:$0xff]   ;;  %v11298_v37 = vld [vmem:[%s15535_s6 + $0x60] ss:$8 sps:$4 sm:$0xff]  }
 0xe06   :  { %v13130_v63 = vadd.f32 %v2419_v34, %v2415_v11  ;;  %v2448_v5 = vsel %vm242_vm12, %v13127_v13, 0.0  ;;  %v11303_v11 = vld [vmem:[%s15535_s6 + $0x74] ss:$8 sps:$4 sm:$0xff]  }
 0xe07   :  { %2449 = vadd.xlane.f32.xlu1 %v2448_v5  ;;  %2626 = vmatpush1.bf16.msra.mxu1 %v11295_v14  ;;  %v11301_v5 = vld [vmem:[%s15535_s6 + $0x70] ss:$8 sps:$4 sm:$0xff]  }
 0xe08   :  { %v2451_v59 = vsel %vm242_vm12, %v13130_v63, 0.0  ;;  %2627 = vmatprep.subr.bf16.mxu1 %v11300_v36 }
 0xe09   :  { %2452 = vadd.xlane.f32.xlu0 %v2451_v59 }
 0xe0b   :  { %2628 = vmatpush1.bf16.msra.mxu1 %v11298_v37 }
 0xe0c   :  { %2629 = vmatprep.subr.bf16.mxu1 %v11303_v11 }
 0xe0f   :  { %2630 = vmatpush1.bf16.msra.mxu1 %v11301_v5 }
 0xe7c   :  { %v2432_v12 = vpop.xlane.xlu1 %2431 }
 0xe7d   :  { %v2454_v23 = vmul.f32 0.015625, %v2432_v12 }
 0xe7e   :  { %v2435_v1 = vpop.xlane.xlu0 %2434 }
 0xe7f   :  { %v13137_v39 = vsub.f32 %v13097_v10, %v2454_v23  ;;  %v2455_v26 = vmul.f32 0.015625, %v2435_v1 }
 0xe81   :  { %v13140_v49 = vsub.f32 %v13100_v42, %v2455_v26  ;;  %v2470_v45 = vmul.f32 %v13137_v39, %v13137_v39 }
 0xe83   :  { %v2478_v48 = vsel %vm242_vm12, %v2470_v45, 0.0  ;;  %v2471_v20 = vmul.f32 %v13140_v49, %v13140_v49 }
 0xe84   :  { %v2438_v61 = vpop.xlane.xlu1 %2437  ;;  %2479 = vadd.xlane.f32.xlu1 %v2478_v48 }
 0xe85   :  { %v2456_v57 = vmul.f32 0.015625, %v2438_v61  ;;  %v2481_v34 = vsel %vm242_vm12, %v2471_v20, 0.0 }
 0xe86   :  { %v2441_v62 = vpop.xlane.xlu0 %2440  ;;  %2482 = vadd.xlane.f32.xlu0 %v2481_v34 }
 0xe87   :  { %v13149_v30 = vsub.f32 %v13107_v44, %v2456_v57  ;;  %v2457_v41 = vmul.f32 0.015625, %v2441_v62  ;;  %v9379_v57 = vld [vmem:[%s15533_s4 + $0x8] sm:$0x3f] }
 0xe89   :  { %v13152_v24 = vsub.f32 %v13110_v31, %v2457_v41  ;;  %v2472_v22 = vmul.f32 %v13149_v30, %v13149_v30 }
 0xe8b   :  { %v2484_v6 = vsel %vm242_vm12, %v2472_v22, 0.0  ;;  %v2473_v58 = vmul.f32 %v13152_v24, %v13152_v24  ;;  %v2537_v22 = vrot.slane %v9379_v57, %v12390_v4 }
 0xe8c   :  { %v2444_v55 = vpop.xlane.xlu1 %2443  ;;  %2485 = vadd.xlane.f32.xlu1 %v2484_v6 }
 0xe8d   :  { %v2458_v3 = vmul.f32 0.015625, %v2444_v55  ;;  %v2487_v19 = vsel %vm242_vm12, %v2473_v58, 0.0 }
 0xe8e   :  { %v2447_v47 = vpop.xlane.xlu0 %2446  ;;  %2488 = vadd.xlane.f32.xlu0 %v2487_v19 }
 0xe8f   :  { %v13161_v54 = vsub.f32 %v13117_v7, %v2458_v3  ;;  %v2459_v9 = vmul.f32 0.015625, %v2447_v47  ;;  %v2549_v47 = vrot.slane %v9379_v57, %v12396_v17 }
 0xe91   :  { %v13164_v18 = vsub.f32 %v13120_v35, %v2459_v9  ;;  %v2474_v0 = vmul.f32 %v13161_v54, %v13161_v54 }
 0xe93   :  { %v2490_v40 = vsel %vm242_vm12, %v2474_v0, 0.0  ;;  %v2475_v43 = vmul.f32 %v13164_v18, %v13164_v18 }
 0xe94   :  { %2491 = vadd.xlane.f32.xlu1 %v2490_v40  ;;  %v2450_v21 = vpop.xlane.xlu1 %2449 }
 0xe95   :  { %v2460_v8 = vmul.f32 0.015625, %v2450_v21  ;;  %v2493_v46 = vsel %vm242_vm12, %v2475_v43, 0.0 }
 0xe96   :  { %2494 = vadd.xlane.f32.xlu0 %v2493_v46  ;;  %v2453_v51 = vpop.xlane.xlu0 %2452 }
 0xe97   :  { %v13173_v28 = vsub.f32 %v13127_v13, %v2460_v8  ;;  %v2461_v25 = vmul.f32 0.015625, %v2453_v51 }
 0xe99   :  { %v13176_v32 = vsub.f32 %v13130_v63, %v2461_v25  ;;  %v2476_v60 = vmul.f32 %v13173_v28, %v13173_v28 }
 0xe9b   :  { %v2496_v27 = vsel %vm242_vm12, %v2476_v60, 0.0  ;;  %v2477_v16 = vmul.f32 %v13176_v32, %v13176_v32 }
 0xe9c   :  { %2497 = vadd.xlane.f32.xlu1 %v2496_v27 }
 0xe9d   :  { %v2499_v33 = vsel %vm242_vm12, %v2477_v16, 0.0 }
 0xe9e   :  { %2500 = vadd.xlane.f32.xlu0 %v2499_v33 }
 0xf11   :  { %v2480_v59 = vpop.xlane.xlu1 %2479 }
 0xf12   :  { %v2502_v12 = vmul.f32 0.015625, %v2480_v59 }
 0xf13   :  { %v2483_v23 = vpop.xlane.xlu0 %2482 }
 0xf14   :  { %v2510_v1 = vadd.f32 1e-05, %v2502_v12  ;;  %v2503_v26 = vmul.f32 0.015625, %v2483_v23 }
 0xf16   :  { %11588 = vrsqrt.f32 %v2510_v1  ;;  %v2511_v45 = vadd.f32 1e-05, %v2503_v26 }
 0xf18   :  { %11590 = vrsqrt.f32 %v2511_v45 }
 0xf19   :  { %v2486_v48 = vpop.xlane.xlu1 %2485 }
 0xf1a   :  { %v2504_v20 = vmul.f32 0.015625, %v2486_v48 }
 0xf1b   :  { %v2489_v61 = vpop.xlane.xlu0 %2488 }
 0xf1c   :  { %v2512_v34 = vadd.f32 1e-05, %v2504_v20  ;;  %v2505_v62 = vmul.f32 0.015625, %v2489_v61 }
 0xf1e   :  { %11592 = vrsqrt.f32 %v2512_v34  ;;  %v2513_v41 = vadd.f32 1e-05, %v2505_v62 }
 0xf20   :  { %v11589_v6 = vpop.eup %11588  ;;  %11594 = vrsqrt.f32 %v2513_v41 }
 0xf21   :  { %v2526_v58 = vmul.f32 %v11589_v6, %v13137_v39  ;;  %v2492_v55 = vpop.xlane.xlu1 %2491 }
 0xf22   :  { %v11591_v3 = vpop.eup %11590  ;;  %v2506_v19 = vmul.f32 0.015625, %v2492_v55 }
 0xf23   :  { %v2538_v9 = vmul.f32 %v2537_v22, %v2526_v58  ;;  %v2527_v0 = vmul.f32 %v11591_v3, %v13140_v49  ;;  %v2495_v40 = vpop.xlane.xlu0 %2494 }
 0xf24   :  { %v2514_v43 = vadd.f32 1e-05, %v2506_v19  ;;  %v2507_v21 = vmul.f32 0.015625, %v2495_v40 }
 0xf25   :  { %v2539_v8 = vmul.f32 %v2537_v22, %v2527_v0  ;;  %v2550_v51 = vadd.f32 %v2549_v47, %v2538_v9 }
 0xf26   :  { %11596 = vrsqrt.f32 %v2514_v43  ;;  %v2515_v46 = vadd.f32 1e-05, %v2507_v21 }
 0xf27   :  { %v2551_v25 = vadd.f32 %v2549_v47, %v2539_v8 }
 0xf28   :  { %v11593_v60 = vpop.eup %11592  ;;  %11598 = vrsqrt.f32 %v2515_v46 }
 0xf29   :  { %v2498_v56 = vpop.xlane.xlu1 %2497  ;;  %v2558_v39 = vpack.c.bf16 %v2551_v25, %v2550_v51  ;;  %v2528_v27 = vmul.f32 %v11593_v60, %v13149_v30 }
 0xf2a   :  { %v11595_v16 = vpop.eup %11594  ;;  %v2508_v38 = vmul.f32 0.015625, %v2498_v56 }
 0xf2b   :  { %v2501_v33 = vpop.xlane.xlu0 %2500  ;;  %9396 = vmatmul.mubr.msk.bf16.vlgmr.msra.gmra.mrb[56].mxu1 %vm242_vm12, %v2558_v39  ;;  %v2529_v49 = vmul.f32 %v11595_v16, %v13152_v24  ;;  %v2540_v15 = vmul.f32 %v2537_v22, %v2528_v27 }
 0xf2c   :  { %v2516_v14 = vadd.f32 1e-05, %v2508_v38  ;;  %v2509_v36 = vmul.f32 0.015625, %v2501_v33  ;;  %2665 = vmatprep.mubr.bf16.mxu1 %v12136_v2 }
 0xf2d   :  { %v2541_v37 = vmul.f32 %v2537_v22, %v2529_v49  ;;  %v2552_v5 = vadd.f32 %v2549_v47, %v2540_v15 }
 0xf2e   :  { %11600 = vrsqrt.f32 %v2516_v14  ;;  %v2517_v11 = vadd.f32 1e-05, %v2509_v36 }
 0xf2f   :  { %v2553_v59 = vadd.f32 %v2549_v47, %v2541_v37 }
 0xf30   :  { %v11597_v12 = vpop.eup %11596  ;;  %11602 = vrsqrt.f32 %v2517_v11 }
 0xf31   :  { %v2559_v30 = vpack.c.bf16 %v2553_v59, %v2552_v5  ;;  %v2530_v23 = vmul.f32 %v11597_v12, %v13161_v54 }
 0xf32   :  { %v11599_v1 = vpop.eup %11598 }
 0xf33   :  { %9397 = vmatmul.mubr.msk.bf16.gmra.mrb[60].mxu1 %vm242_vm12, %v2559_v30  ;;  %v2531_v24 = vmul.f32 %v11599_v1, %v13164_v18  ;;  %v2542_v26 = vmul.f32 %v2537_v22, %v2530_v23 }
 0xf34   :  { %2675 = vmatprep.mubr.bf16.mxu1 %v12136_v2 }
 0xf35   :  { %v2543_v45 = vmul.f32 %v2537_v22, %v2531_v24  ;;  %v2554_v48 = vadd.f32 %v2549_v47, %v2542_v26 }
 0xf37   :  { %v2555_v20 = vadd.f32 %v2549_v47, %v2543_v45 }
 0xf38   :  { %v11601_v61 = vpop.eup %11600 }
 0xf39   :  { %v2560_v57 = vpack.c.bf16 %v2555_v20, %v2554_v48  ;;  %v2532_v34 = vmul.f32 %v11601_v61, %v13173_v28 }
 0xf3a   :  { %v11603_v62 = vpop.eup %11602 }
 0xf3b   :  { %9398 = vmatmul.mubr.msk.bf16.gmra.mrb[64].mxu1 %vm242_vm12, %v2560_v57  ;;  %v2533_v54 = vmul.f32 %v11603_v62, %v13176_v32  ;;  %v2544_v41 = vmul.f32 %v2537_v22, %v2532_v34 }
 0xf3c   :  { %2685 = vmatprep.mubr.bf16.mxu1 %v12136_v2 }
 0xf3d   :  { %v2545_v6 = vmul.f32 %v2537_v22, %v2533_v54  ;;  %v2556_v18 = vadd.f32 %v2549_v47, %v2544_v41 }
 0xf3f   :  { %v2557_v58 = vadd.f32 %v2549_v47, %v2545_v6 }
 0xf41   :  { %v2561_v55 = vpack.c.bf16 %v2557_v58, %v2556_v18 }
 0xf43   :  { %9399 = vmatmul.mubr.msk.bf16.gmra.mrb[68].mxu1 %vm242_vm12, %v2561_v55 }
 0xffe   :  { %v2657_v3 = vpop.f32.mrb[56].mxu1 }
 0xfff   :  { %v2659_v19 = vpop.f32.mrb[57].mxu1 }
0x1000   :  { %v2661_v9 = vpop.f32.mrb[58].mxu1 }
0x1001   :  { %v13228_v0 = vpack.c.bf16 %v2661_v9, %v2657_v3  ;;  %v2663_v28 = vpop.f32.mrb[59].mxu1 }
0x1002   :  { %v13230_v40 = vpack.c.bf16 %v2663_v28, %v2659_v19 }
0x1003   :  { %2717 = vrot.lane.b32.xlu1 %v13228_v0, %s12138_s27  ;;  %10554 = vmatprep.mubr.msk.bf16.mxu1 %vm537_vm13, %v13228_v0 }
0x1004   :  { %10562 = vmatprep.subr.bf16.mxu0 %v13230_v40 }
0x1005   :  { %10563 = vmatpush3.bf16.msra.mxu0 %v13230_v40 }
0x1006   :  { %v2667_v32 = vpop.f32.mrb[60].mxu1 }
0x1007   :  { %v2669_v22 = vpop.f32.mrb[61].mxu1 }
0x1008   :  { %v2671_v47 = vpop.f32.mrb[62].mxu1 }
0x1009   :  { %v13238_v43 = vpack.c.bf16 %v2671_v47, %v2667_v32  ;;  %v2673_v21 = vpop.f32.mrb[63].mxu1 }
0x100a   :  { %v13240_v8 = vpack.c.bf16 %v2673_v21, %v2669_v22 }
0x100b   :  { %2719 = vrot.lane.b32.xlu0 %v13238_v43, %s12138_s27 }
0x100c   :  { %10564 = vmatprep.subr.bf16.mxu0 %v13240_v8 }
0x100d   :  { %10565 = vmatpush3.bf16.msra.mxu0 %v13240_v8 }
0x100e   :  { %v2677_v46 = vpop.f32.mrb[64].mxu1 }
0x100f   :  { %2963 = vrot.lane.b32.xlu0 %v13228_v0, %s12139_s21  ;;  %v2679_v51 = vpop.f32.mrb[65].mxu1 }
0x1010   :  { %v2681_v25 = vpop.f32.mrb[66].mxu1 }
0x1011   :  { %v13248_v60 = vpack.c.bf16 %v2681_v25, %v2677_v46  ;;  %v2683_v56 = vpop.f32.mrb[67].mxu1 }
0x1012   :  { %v13250_v39 = vpack.c.bf16 %v2683_v56, %v2679_v51  ;;  %v13340_v51 = vld [vmem:[%s15532_s3 + $0x10] sm:$0xff] }
0x1013   :  { %2967 = vrot.lane.b32.xlu0 %v13248_v60, %s12139_s21  ;;  %2721 = vrot.lane.b32.xlu1 %v13248_v60, %s12138_s27 }
0x1014   :  { %10566 = vmatprep.subr.bf16.mxu0 %v13250_v39 }
0x1015   :  { %10567 = vmatpush3.bf16.msra.mxu0 %v13250_v39 }
0x1016   :  { %v2687_v27 = vpop.f32.mrb[68].mxu1 }
0x1017   :  { %2955 = vrot.lane.b32.xlu0 %v13228_v0, %s12140_s25  ;;  %v2689_v16 = vpop.f32.mrb[69].mxu1 }
0x1018   :  { %v2691_v38 = vpop.f32.mrb[70].mxu1 }
0x1019   :  { %v13260_v33 = vpack.c.bf16 %v2691_v38, %v2687_v27  ;;  %v2693_v49 = vpop.f32.mrb[71].mxu1  ;;  %v13346_v27 = vld [vmem:[%s15532_s3] sm:$0xff] }
0x101a   :  { %v13262_v15 = vpack.c.bf16 %v2693_v49, %v2689_v16 }
0x101b   :  { %2959 = vrot.lane.b32.xlu0 %v13248_v60, %s12140_s25  ;;  %2723 = vrot.lane.b32.xlu1 %v13260_v33, %s12138_s27 }
0x101c   :  { %10568 = vmatprep.subr.bf16.mxu0 %v13262_v15 }
0x101d   :  { %10569 = vmatpush3.bf16.msra.mxu0 %v13262_v15 }
0x101f   :  { %3391 = vrot.lane.b32.xlu0 %v13228_v0, %s12141_s26  ;;  %2965 = vrot.lane.b32.xlu1 %v13238_v43, %s12139_s21 }
0x1023   :  { %3395 = vrot.lane.b32.xlu0 %v13248_v60, %s12141_s26  ;;  %2969 = vrot.lane.b32.xlu1 %v13260_v33, %s12139_s21 }
0x1027   :  { %3383 = vrot.lane.b32.xlu0 %v13228_v0, %s12142_s28  ;;  %2957 = vrot.lane.b32.xlu1 %v13238_v43, %s12140_s25 }
0x102b   :  { %3387 = vrot.lane.b32.xlu0 %v13248_v60, %s12142_s28  ;;  %2961 = vrot.lane.b32.xlu1 %v13260_v33, %s12140_s25 }
0x102f   :  { %3393 = vrot.lane.b32.xlu1 %v13238_v43, %s12141_s26 }
0x1033   :  { %3385 = vrot.lane.b32.xlu1 %v13238_v43, %s12142_s28 }
0x1037   :  { %3124 = vrot.lane.b32.xlu1 %v13230_v40, %s12140_s25 }
0x103b   :  { %3397 = vrot.lane.b32.xlu1 %v13260_v33, %s12141_s26 }
0x103f   :  { %3389 = vrot.lane.b32.xlu1 %v13260_v33, %s12142_s28 }
0x1075   :  { %v2718_v14 = vpop.permute.xlu1 %2717 }
0x1076   :  { %11178 = vmatprep.subr.msk.bf16.mxu1 %vm537_vm13, %v2718_v14  ;;  %v2738_v36 = vsel %vm537_vm13, %v2718_v14, 0  ;;  %v13352_v14 = vld [vmem:[%s15532_s3 + $0x18] sm:$0xff] }
0x1077   :  { %10547 = vmatpush3.bf16.xpose.msra.mxu1 %v2738_v36 }
0x107d   :  { %v2720_v37 = vpop.permute.xlu0 %2719 }
0x107e   :  { %11179 = vmatprep.subr.msk.bf16.mxu1 %vm537_vm13, %v2720_v37  ;;  %v2741_v11 = vsel %vm537_vm13, %v2720_v37, 0 }
0x107f   :  { %10549 = vmatpush3.bf16.xpose.msra.mxu1 %v2741_v11 }
0x1081   :  { %v2964_v23 = vpop.permute.xlu0 %2963 }
0x1082   :  { %v2984_v26 = vsel %vm537_vm13, %v2964_v23, 0 }
0x1085   :  { %v2722_v5 = vpop.permute.xlu1 %2721  ;;  %v2968_v45 = vpop.permute.xlu0 %2967 }
0x1086   :  { %11180 = vmatprep.subr.msk.bf16.mxu1 %vm537_vm13, %v2722_v5  ;;  %v2744_v59 = vsel %vm537_vm13, %v2722_v5, 0  ;;  %v2990_v54 = vsel %vm537_vm13, %v2968_v45, 0  ;;  %v13358_v5 = vld [vmem:[%s15532_s3 + $0x8] sm:$0xff] }
0x1087   :  { %10551 = vmatpush3.bf16.xpose.msra.mxu1 %v2744_v59 }
0x1089   :  { %v2956_v61 = vpop.permute.xlu0 %2955 }
0x108d   :  { %v2724_v12 = vpop.permute.xlu1 %2723  ;;  %v2960_v41 = vpop.permute.xlu0 %2959 }
0x108e   :  { %11181 = vmatprep.subr.msk.bf16.mxu1 %vm537_vm13, %v2724_v12  ;;  %v2747_v30 = vsel %vm537_vm13, %v2724_v12, 0 }
0x108f   :  { %10553 = vmatpush3.bf16.xpose.msra.mxu1 %v2747_v30 }
0x1090   :  { %11182 = vmatprep.subr.msk.bf16.mxu1 %vm537_vm13, %v2964_v23 }
0x1091   :  { %v2966_v1 = vpop.permute.xlu1 %2965  ;;  %v3392_v58 = vpop.permute.xlu0 %3391 }
0x1092   :  { %v2987_v57 = vsel %vm537_vm13, %v2966_v1, 0  ;;  %v3412_v55 = vsel %vm537_vm13, %v3392_v58, 0 }
0x1095   :  { %v2970_v24 = vpop.permute.xlu1 %2969  ;;  %v3396_v3 = vpop.permute.xlu0 %3395 }
0x1096   :  { %10555 = vmatmul.mubr.msk.bf16.vlgmr.msra.gmra.mrb[72].mxu1 %vm537_vm13, %v13238_v43  ;;  %v2993_v18 = vsel %vm537_vm13, %v2970_v24, 0  ;;  %v3418_v28 = vsel %vm537_vm13, %v3396_v3, 0 }
0x1097   :  { %10558 = vmatprep.mubr.msk.bf16.mxu1 %vm537_vm13, %v13248_v60  ;;  %10579 = vmatpush3.bf16.xpose.msra.mxu1 %v2984_v26 }
0x1098   :  { %11183 = vmatprep.subr.msk.bf16.mxu1 %vm537_vm13, %v2966_v1  ;;  %v13364_v1 = vld [vmem:[%s15532_s3 + $0x30] sm:$0xff] }
0x1099   :  { %v2958_v48 = vpop.permute.xlu1 %2957  ;;  %v3384_v19 = vpop.permute.xlu0 %3383 }
0x109d   :  { %v2962_v20 = vpop.permute.xlu1 %2961  ;;  %v3388_v47 = vpop.permute.xlu0 %3387 }
0x109e   :  { %10559 = vmatmul.mubr.msk.bf16.gmra.mrb[76].mxu1 %vm537_vm13, %v13260_v33 }
0x109f   :  { %10581 = vmatpush3.bf16.xpose.msra.mxu1 %v2987_v57  ;;  %10586 = vmatprep.mubr.msk.bf16.mxu1 %vm537_vm13, %v2956_v61  ;;  %v13376_v57 = vld [vmem:[%s15532_s3 + $0x38] sm:$0xff] }
0x10a0   :  { %11184 = vmatprep.subr.msk.bf16.mxu1 %vm537_vm13, %v2968_v45  ;;  %v13370_v45 = vld [vmem:[%s15532_s3 + $0x20] sm:$0xff] }
0x10a1   :  { %v3394_v34 = vpop.permute.xlu1 %3393 }
0x10a2   :  { %v3415_v9 = vsel %vm537_vm13, %v3394_v34, 0 }
0x10a5   :  { %v3386_v62 = vpop.permute.xlu1 %3385 }
0x10a7   :  { %10583 = vmatpush3.bf16.xpose.msra.mxu1 %v2990_v54 }
0x10a8   :  { %11185 = vmatprep.subr.msk.bf16.mxu1 %vm537_vm13, %v2970_v24 }
0x10a9   :  { %v13318_v6 = vpop.permute.xlu1 %3124 }
0x10aa   :  { %10594 = vmatprep.subr.bf16.mxu0 %v13318_v6 }
0x10ad   :  { %v3398_v32 = vpop.permute.xlu1 %3397 }
0x10ae   :  { %v3421_v22 = vsel %vm537_vm13, %v3398_v32, 0 }
0x10af   :  { %10585 = vmatpush3.bf16.xpose.msra.mxu1 %v2993_v18 }
0x10b0   :  { %11186 = vmatprep.subr.msk.bf16.mxu1 %vm537_vm13, %v3392_v58 }
0x10b1   :  { %v3390_v21 = vpop.permute.xlu1 %3389 }
0x10b6   :  { %10587 = vmatmul.mubr.msk.bf16.vlgmr.msra.gmra.mrb[80].mxu1 %vm537_vm13, %v2958_v48 }
0x10b7   :  { %10590 = vmatprep.mubr.msk.bf16.mxu1 %vm537_vm13, %v2960_v41  ;;  %10631 = vmatpush3.bf16.xpose.msra.mxu1 %v3412_v55  ;;  %v13382_v41 = vld [vmem:[%s15532_s3 + $0x28] sm:$0xff] }
0x10b8   :  { %11187 = vmatprep.subr.msk.bf16.mxu1 %vm537_vm13, %v3394_v34 }
0x10be   :  { %10591 = vmatmul.mubr.msk.bf16.gmra.mrb[84].mxu1 %vm537_vm13, %v2962_v20 }
0x10bf   :  { %10633 = vmatpush3.bf16.xpose.msra.mxu1 %v3415_v9  ;;  %10638 = vmatprep.mubr.msk.bf16.mxu1 %vm537_vm13, %v3384_v19 }
0x10c0   :  { %11188 = vmatprep.subr.msk.bf16.mxu1 %vm537_vm13, %v3396_v3 }
0x10c7   :  { %10635 = vmatpush3.bf16.xpose.msra.mxu1 %v3418_v28 }
0x10c8   :  { %11189 = vmatprep.subr.msk.bf16.mxu1 %vm537_vm13, %v3398_v32 }
0x10cf   :  { %10637 = vmatpush3.bf16.xpose.msra.mxu1 %v3421_v22 }
0x10d6   :  { %10639 = vmatmul.mubr.msk.bf16.vlgmr.msra.gmra.mrb[88].mxu1 %vm537_vm13, %v3386_v62 }
0x10d7   :  { %10642 = vmatprep.mubr.msk.bf16.mxu1 %vm537_vm13, %v3388_v47 }
0x10de   :  { %10643 = vmatmul.mubr.msk.bf16.gmra.mrb[92].mxu1 %vm537_vm13, %v3390_v21 }
0x1169   :  { %v10556_v46 = vpop.f32.mrb[72].mxu1 }
0x116a   :  { %v2792_v25 = vadd.f32 %v13340_v51, %v10556_v46  ;;  %v2783_v56 = vpop.f32.mrb[73].mxu1 }
0x116b   :  { %v2784_v16 = vadd.f32 %v13346_v27, %v2783_v56  ;;  %v10557_v38 = vpop.f32.mrb[74].mxu1 }
0x116c   :  { %v2818_v49 = vmul.f32 1.442695, %v2792_v25  ;;  %v2795_v36 = vadd.f32 %v13352_v14, %v10557_v38  ;;  %v2786_v37 = vpop.f32.mrb[75].mxu1 }
0x116d   :  { %v2814_v11 = vmul.f32 1.442695, %v2784_v16  ;;  %v2787_v59 = vadd.f32 %v13358_v5, %v2786_v37 }
0x116e   :  { %11604 = vpow2.f32 %v2818_v49  ;;  %v2820_v30 = vmul.f32 1.442695, %v2795_v36 }
0x116f   :  { %v2816_v12 = vmul.f32 1.442695, %v2787_v59  ;;  %11606 = vpow2.f32 %v2814_v11 }
0x1171   :  { %11608 = vpow2.f32 %v2816_v12  ;;  %v10560_v23 = vpop.f32.mrb[76].mxu1 }
0x1172   :  { %v2808_v24 = vadd.f32 %v13364_v1, %v10560_v23  ;;  %v2799_v26 = vpop.f32.mrb[77].mxu1  ;;  %11610 = vpow2.f32 %v2820_v30 }
0x1173   :  { %v2800_v48 = vadd.f32 %v13370_v45, %v2799_v26  ;;  %v10561_v20 = vpop.f32.mrb[78].mxu1 }
0x1174   :  { %v2826_v61 = vmul.f32 1.442695, %v2808_v24  ;;  %v2811_v34 = vadd.f32 %v13376_v57, %v10561_v20  ;;  %v2802_v62 = vpop.f32.mrb[79].mxu1 }
0x1175   :  { %v2822_v54 = vmul.f32 1.442695, %v2800_v48  ;;  %v2803_v18 = vadd.f32 %v13382_v41, %v2802_v62 }
0x1176   :  { %11612 = vpow2.f32 %v2826_v61  ;;  %v2828_v58 = vmul.f32 1.442695, %v2811_v34 }
0x1177   :  { %11614 = vpow2.f32 %v2822_v54  ;;  %v2824_v3 = vmul.f32 1.442695, %v2803_v18 }
0x1178   :  { %v13385_v55 = vpop.eup %11604  ;;  %11616 = vpow2.f32 %v2828_v58 }
0x1179   :  { %v2836_v19 = vsel %vm242_vm12, %v13385_v55, 0.0  ;;  %v13389_v9 = vpop.eup %11606  ;;  %11618 = vpow2.f32 %v2824_v3 }
0x117a   :  { %2837 = vadd.xlane.f32.xlu0 %v2836_v19  ;;  %v2830_v22 = vsel %vm242_vm12, %v13389_v9, 0.0 }
0x117b   :  { %v13391_v28 = vpop.eup %11608 }
0x117c   :  { %v2833_v32 = vsel %vm242_vm12, %v13391_v28, 0.0  ;;  %v13397_v47 = vpop.eup %11610 }
0x117d   :  { %2834 = vadd.xlane.f32.xlu1 %v2833_v32  ;;  %v2839_v56 = vsel %vm242_vm12, %v13397_v47, 0.0 }
0x117e   :  { %2831 = vadd.xlane.f32.xlu0 %v2830_v22 }
0x1180   :  { %v13399_v21 = vpop.eup %11612 }
0x1181   :  { %v13401_v46 = vpop.eup %11614  ;;  %v2848_v25 = vsel %vm242_vm12, %v13399_v21, 0.0 }
0x1182   :  { %v13407_v16 = vpop.eup %11616  ;;  %2849 = vadd.xlane.f32.xlu1 %v2848_v25  ;;  %2840 = vadd.xlane.f32.xlu0 %v2839_v56  ;;  %v2842_v38 = vsel %vm242_vm12, %v13401_v46, 0.0 }
0x1183   :  { %v2851_v49 = vsel %vm242_vm12, %v13407_v16, 0.0  ;;  %v13413_v36 = vpop.eup %11618 }
0x1184   :  { %v2845_v11 = vsel %vm242_vm12, %v13413_v36, 0.0 }
0x1186   :  { %2843 = vadd.xlane.f32.xlu1 %v2842_v38  ;;  %2852 = vadd.xlane.f32.xlu0 %v2851_v49 }
0x1189   :  { %v10588_v37 = vpop.f32.mrb[80].mxu1 }
0x118a   :  { %v3038_v59 = vadd.f32 %v13340_v51, %v10588_v37  ;;  %2846 = vadd.xlane.f32.xlu0 %v2845_v11  ;;  %v3029_v12 = vpop.f32.mrb[81].mxu1 }
0x118b   :  { %v3030_v30 = vadd.f32 %v13346_v27, %v3029_v12  ;;  %v10589_v23 = vpop.f32.mrb[82].mxu1 }
0x118c   :  { %v3064_v24 = vmul.f32 1.442695, %v3038_v59  ;;  %v3041_v26 = vadd.f32 %v13352_v14, %v10589_v23  ;;  %v3032_v48 = vpop.f32.mrb[83].mxu1 }
0x118d   :  { %v3060_v20 = vmul.f32 1.442695, %v3030_v30  ;;  %v3033_v61 = vadd.f32 %v13358_v5, %v3032_v48 }
0x118e   :  { %11620 = vpow2.f32 %v3064_v24  ;;  %v3066_v34 = vmul.f32 1.442695, %v3041_v26 }
0x118f   :  { %11622 = vpow2.f32 %v3060_v20  ;;  %v3062_v62 = vmul.f32 1.442695, %v3033_v61 }
0x1190   :  { %11624 = vpow2.f32 %v3066_v34 }
0x1191   :  { %v10592_v54 = vpop.f32.mrb[84].mxu1  ;;  %11626 = vpow2.f32 %v3062_v62 }
0x1192   :  { %v3054_v18 = vadd.f32 %v13364_v1, %v10592_v54  ;;  %v3045_v58 = vpop.f32.mrb[85].mxu1 }
0x1193   :  { %v3046_v3 = vadd.f32 %v13370_v45, %v3045_v58  ;;  %v10593_v19 = vpop.f32.mrb[86].mxu1 }
0x1194   :  { %v3072_v32 = vmul.f32 1.442695, %v3054_v18  ;;  %v3057_v22 = vadd.f32 %v13376_v57, %v10593_v19  ;;  %v3048_v25 = vpop.f32.mrb[87].mxu1 }
0x1195   :  { %v3068_v56 = vmul.f32 1.442695, %v3046_v3  ;;  %v3049_v38 = vadd.f32 %v13382_v41, %v3048_v25 }
0x1196   :  { %11628 = vpow2.f32 %v3072_v32  ;;  %v3074_v49 = vmul.f32 1.442695, %v3057_v22 }
0x1197   :  { %11630 = vpow2.f32 %v3068_v56  ;;  %v3070_v37 = vmul.f32 1.442695, %v3049_v38 }
0x1198   :  { %v13425_v11 = vpop.eup %11620  ;;  %11632 = vpow2.f32 %v3074_v49 }
0x1199   :  { %v13427_v59 = vpop.eup %11622  ;;  %v3082_v12 = vsel %vm242_vm12, %v13425_v11, 0.0  ;;  %11634 = vpow2.f32 %v3070_v37 }
0x119a   :  { %v13431_v30 = vpop.eup %11624  ;;  %3083 = vadd.xlane.f32.xlu1 %v3082_v12  ;;  %v3076_v26 = vsel %vm242_vm12, %v13427_v59, 0.0 }
0x119b   :  { %v3085_v23 = vsel %vm242_vm12, %v13431_v30, 0.0  ;;  %v13435_v24 = vpop.eup %11626 }
0x119c   :  { %3086 = vadd.xlane.f32.xlu0 %v3085_v23  ;;  %v3079_v48 = vsel %vm242_vm12, %v13435_v24, 0.0 }
0x119e   :  { %3077 = vadd.xlane.f32.xlu1 %v3076_v26 }
0x11a0   :  { %v13441_v20 = vpop.eup %11628  ;;  %3080 = vadd.xlane.f32.xlu0 %v3079_v48 }
0x11a1   :  { %v13443_v61 = vpop.eup %11630  ;;  %v3094_v34 = vsel %vm242_vm12, %v13441_v20, 0.0 }
0x11a2   :  { %v13447_v62 = vpop.eup %11632  ;;  %3095 = vadd.xlane.f32.xlu1 %v3094_v34  ;;  %v3088_v58 = vsel %vm242_vm12, %v13443_v61, 0.0 }
0x11a3   :  { %v3097_v54 = vsel %vm242_vm12, %v13447_v62, 0.0  ;;  %v13451_v18 = vpop.eup %11634 }
0x11a4   :  { %3098 = vadd.xlane.f32.xlu0 %v3097_v54  ;;  %v3091_v3 = vsel %vm242_vm12, %v13451_v18, 0.0 }
0x11a6   :  { %3089 = vadd.xlane.f32.xlu1 %v3088_v58 }
0x11a8   :  { %3092 = vadd.xlane.f32.xlu0 %v3091_v3 }
0x11a9   :  { %v10640_v19 = vpop.f32.mrb[88].mxu1 }
0x11aa   :  { %v3457_v32 = vpop.f32.mrb[89].mxu1  ;;  %v3466_v12 = vadd.f32 %v13340_v51, %v10640_v19 }
0x11ab   :  { %v10641_v22 = vpop.f32.mrb[90].mxu1  ;;  %v3458_v26 = vadd.f32 %v13346_v27, %v3457_v32 }
0x11ac   :  { %v3460_v25 = vpop.f32.mrb[91].mxu1  ;;  %v3492_v23 = vmul.f32 1.442695, %v3466_v12 }
0x11ad   :  { %v3461_v48 = vadd.f32 %v13358_v5, %v3460_v25 }
0x11ae   :  { %11636 = vpow2.f32 %v3492_v23 }
0x11af   :  { %v3490_v34 = vmul.f32 1.442695, %v3461_v48 }
0x11b1   :  { %v10644_v56 = vpop.f32.mrb[92].mxu1 }
0x11b2   :  { %v3473_v38 = vpop.f32.mrb[93].mxu1 }
0x11b3   :  { %v10645_v49 = vpop.f32.mrb[94].mxu1  ;;  %v3474_v3 = vadd.f32 %v13370_v45, %v3473_v38 }
0x11b4   :  { %v3476_v37 = vpop.f32.mrb[95].mxu1 }
0x11b5   :  { %v3477_v32 = vadd.f32 %v13382_v41, %v3476_v37  ;;  %v3496_v12 = vmul.f32 1.442695, %v3474_v3 }
0x11b7   :  { %3128 = vrot.lane.b32.xlu1 %v13250_v39, %s12140_s25 }
0x11b8   :  { %v13489_v25 = vpop.eup %11636 }
0x11bb   :  { %3130 = vrot.lane.b32.xlu1 %v13262_v15, %s12140_s25 }
0x11be   :  { %3126 = vrot.lane.b32.xlu0 %v13240_v8, %s12140_s25 }
0x11bf   :  { %3742 = vrot.lane.b32.xlu1 %v13238_v43, %s12143_s2 }
0x11c2   :  { %3740 = vrot.lane.b32.xlu0 %v13228_v0, %s12143_s2 }
0x11c3   :  { %3746 = vrot.lane.b32.xlu1 %v13260_v33, %s12143_s2 }
0x11c6   :  { %3744 = vrot.lane.b32.xlu0 %v13248_v60, %s12143_s2 }
0x11c7   :  { %3734 = vrot.lane.b32.xlu1 %v13238_v43, %s12144_s29  ;;  %v3488_v43 = vmul.f32 1.442695, %v3458_v26 }
0x11c9   :  { %11638 = vpow2.f32 %v3488_v43 }
0x11ca   :  { %3732 = vrot.lane.b32.xlu0 %v13228_v0, %s12144_s29  ;;  %v3469_v0 = vadd.f32 %v13352_v14, %v10641_v22  ;;  %11640 = vpow2.f32 %v3490_v34  ;;  %v3498_v22 = vmul.f32 1.442695, %v3477_v32 }
0x11cb   :  { %3738 = vrot.lane.b32.xlu1 %v13260_v33, %s12144_s29  ;;  %v3482_v33 = vadd.f32 %v13364_v1, %v10644_v56  ;;  %v3510_v56 = vsel %vm242_vm12, %v13489_v25, 0.0 }
0x11cc   :  { %v3494_v54 = vmul.f32 1.442695, %v3469_v0 }
0x11cd   :  { %v3500_v58 = vmul.f32 1.442695, %v3482_v33 }
0x11ce   :  { %3736 = vrot.lane.b32.xlu0 %v13248_v60, %s12144_s29  ;;  %v3485_v60 = vadd.f32 %v13376_v57, %v10645_v49  ;;  %11642 = vpow2.f32 %v3494_v54 }
0x11cf   :  { %3548 = vrot.lane.b32.xlu1 %v13230_v40, %s12142_s28  ;;  %11644 = vpow2.f32 %v3500_v58 }
0x11d0   :  { %v3502_v19 = vmul.f32 1.442695, %v3485_v60 }
0x11d2   :  { %11646 = vpow2.f32 %v3502_v19 }
0x11d3   :  { %v13493_v23 = vpop.eup %11638  ;;  %11648 = vpow2.f32 %v3496_v12 }
0x11d4   :  { %v13495_v49 = vpop.eup %11640  ;;  %11650 = vpow2.f32 %v3498_v22  ;;  %v3504_v38 = vsel %vm242_vm12, %v13493_v23, 0.0 }
0x11d5   :  { %v3507_v26 = vsel %vm242_vm12, %v13495_v49, 0.0 }
0x11d8   :  { %v13499_v37 = vpop.eup %11642 }
0x11d9   :  { %v13503_v48 = vpop.eup %11644  ;;  %v3513_v43 = vsel %vm242_vm12, %v13499_v37, 0.0 }
0x11da   :  { %v3522_v34 = vsel %vm242_vm12, %v13503_v48, 0.0 }
0x11dc   :  { %v13507_v0 = vpop.eup %11646 }
0x11dd   :  { %v13511_v33 = vpop.eup %11648  ;;  %v3525_v54 = vsel %vm242_vm12, %v13507_v0, 0.0 }
0x11de   :  { %v13515_v60 = vpop.eup %11650  ;;  %v3516_v58 = vsel %vm242_vm12, %v13511_v33, 0.0 }
0x11df   :  { %v3519_v3 = vsel %vm242_vm12, %v13515_v60, 0.0 }
0x11ed   :  { %3511 = vadd.xlane.f32.xlu0 %v3510_v56 }
0x11f1   :  { %3505 = vadd.xlane.f32.xlu0 %v3504_v38 }
0x11f3   :  { %3508 = vadd.xlane.f32.xlu1 %v3507_v26 }
0x11f5   :  { %3514 = vadd.xlane.f32.xlu0 %v3513_v43 }
0x11f7   :  { %3523 = vadd.xlane.f32.xlu1 %v3522_v34 }
0x11f9   :  { %3526 = vadd.xlane.f32.xlu0 %v3525_v54 }
0x11fb   :  { %3517 = vadd.xlane.f32.xlu1 %v3516_v58 }
0x11fd   :  { %3520 = vadd.xlane.f32.xlu0 %v3519_v3 }
0x1207   :  { %v2838_v19 = vpop.xlane.xlu0 %2837 }
0x120a   :  { %v2835_v32 = vpop.xlane.xlu1 %2834 }
0x120b   :  { %11652 = vrcp.f32 %v2835_v32  ;;  %v2832_v12 = vpop.xlane.xlu0 %2831 }
0x120c   :  { %11654 = vrcp.f32 %v2832_v12  ;;  %3552 = vrot.lane.b32.xlu1 %v13250_v39, %s12142_s28 }
0x120d   :  { %11656 = vrcp.f32 %v2838_v19 }
0x120f   :  { %v2841_v22 = vpop.xlane.xlu0 %2840  ;;  %v2850_v56 = vpop.xlane.xlu1 %2849 }
0x1210   :  { %11658 = vrcp.f32 %v2841_v22  ;;  %3554 = vrot.lane.b32.xlu1 %v13262_v15, %s12142_s28 }
0x1213   :  { %v2853_v38 = vpop.xlane.xlu0 %2852  ;;  %3550 = vrot.lane.b32.xlu0 %v13240_v8, %s12142_s28  ;;  %v2844_v26 = vpop.xlane.xlu1 %2843 }
0x1214   :  { %3897 = vrot.lane.b32.xlu1 %v13230_v40, %s12144_s29  ;;  %11660 = vrcp.f32 %v2853_v38 }
0x1215   :  { %v11653_v43 = vpop.eup %11652  ;;  %11662 = vrcp.f32 %v2844_v26 }
0x1216   :  { %v11655_v34 = vpop.eup %11654  ;;  %v2863_v54 = vmul.f32 %v11653_v43, %v13391_v28  ;;  %11664 = vrcp.f32 %v2850_v56 }
0x1217   :  { %v2847_v58 = vpop.xlane.xlu0 %2846  ;;  %v2862_v3 = vmul.f32 %v11655_v34, %v13389_v9  ;;  %v11657_v19 = vpop.eup %11656 }
0x1218   :  { %11666 = vrcp.f32 %v2847_v58  ;;  %3899 = vrot.lane.b32.xlu1 %v13240_v8, %s12144_s29  ;;  %v2864_v22 = vmul.f32 %v11657_v19, %v13385_v55 }
0x1219   :  { %v2870_v32 = vpack.c.bf16 %v2863_v54, %v2862_v3 }
0x121a   :  { %v11659_v12 = vpop.eup %11658 }
0x121b   :  { %v2865_v40 = vmul.f32 %v11659_v12, %v13397_v47  ;;  %10570 = vmatprep.mubr.msk.bf16.mxu0 %vm242_vm12, %v2870_v32 }
0x121d   :  { %v2871_v38 = vpack.c.bf16 %v2865_v40, %v2864_v22 }
0x121e   :  { %v11661_v26 = vpop.eup %11660 }
0x121f   :  { %10571 = vmatmul.mubr.msk.bf16.vlgmr.msra.gmra.mrb[72].mxu0 %vm242_vm12, %v2871_v38  ;;  %v11663_v28 = vpop.eup %11662  ;;  %v2869_v43 = vmul.f32 %v11661_v26, %v13407_v16 }
0x1220   :  { %10595 = vmatpush3.bf16.msra.mxu0 %v13318_v6  ;;  %v11665_v9 = vpop.eup %11664  ;;  %v2866_v8 = vmul.f32 %v11663_v28, %v13401_v46 }
0x1221   :  { %v2868_v55 = vmul.f32 %v11665_v9, %v13399_v21 }
0x1222   :  { %v11667_v56 = vpop.eup %11666 }
0x1223   :  { %v2867_v34 = vmul.f32 %v11667_v56, %v13413_v36  ;;  %v2873_v54 = vpack.c.bf16 %v2869_v43, %v2868_v55 }
0x1225   :  { %v2872_v47 = vpack.c.bf16 %v2867_v34, %v2866_v8 }
0x1227   :  { %10574 = vmatprep.mubr.msk.bf16.mxu0 %vm242_vm12, %v2872_v47  ;;  %v3084_v58 = vpop.xlane.xlu1 %3083 }
0x1228   :  { %10575 = vmatmul.mubr.msk.bf16.gmra.mrb[76].mxu0 %vm242_vm12, %v2873_v54 }
0x1229   :  { %v3087_v3 = vpop.xlane.xlu0 %3086 }
0x122b   :  { %v3078_v19 = vpop.xlane.xlu1 %3077 }
0x122c   :  { %11668 = vrcp.f32 %v3078_v19 }
0x122d   :  { %v3081_v6 = vpop.xlane.xlu0 %3080 }
0x122e   :  { %11670 = vrcp.f32 %v3081_v6 }
0x122f   :  { %v3096_v32 = vpop.xlane.xlu1 %3095  ;;  %11672 = vrcp.f32 %v3087_v3 }
0x1230   :  { %11674 = vrcp.f32 %v3084_v58 }
0x1231   :  { %v3099_v16 = vpop.xlane.xlu0 %3098 }
0x1233   :  { %v3090_v46 = vpop.xlane.xlu1 %3089 }
0x1234   :  { %11676 = vrcp.f32 %v3090_v46 }
0x1235   :  { %v3093_v36 = vpop.xlane.xlu0 %3092 }
0x1236   :  { %v11669_v21 = vpop.eup %11668  ;;  %11678 = vrcp.f32 %v3093_v36 }
0x1237   :  { %v3129_v12 = vpop.permute.xlu1 %3128  ;;  %v3108_v38 = vmul.f32 %v11669_v21, %v13427_v59  ;;  %11680 = vrcp.f32 %v3099_v16 }
0x1238   :  { %v11671_v22 = vpop.eup %11670  ;;  %11682 = vrcp.f32 %v3096_v32 }
0x1239   :  { %v3127_v40 = vpop.permute.xlu0 %3126  ;;  %v3109_v26 = vmul.f32 %v11671_v22, %v13435_v24  ;;  %v11673_v56 = vpop.eup %11672 }
0x123a   :  { %10596 = vmatprep.subr.bf16.mxu0 %v3127_v40  ;;  %v11675_v8 = vpop.eup %11674  ;;  %v3111_v47 = vmul.f32 %v11673_v56, %v13431_v30 }
0x123b   :  { %10597 = vmatpush3.bf16.msra.mxu0 %v3127_v40  ;;  %v3131_v28 = vpop.permute.xlu1 %3130  ;;  %v3116_v9 = vpack.c.bf16 %v3109_v26, %v3108_v38  ;;  %v3110_v3 = vmul.f32 %v11675_v8, %v13425_v11  ;;  %v11305_v26 = vld [vmem:[%s15536_s7 + $0x20] sm:$0xff]  }
0x123c   :  { %10598 = vmatprep.subr.bf16.mxu0 %v3129_v12 }
0x123d   :  { %v3741_v43 = vpop.permute.xlu0 %3740  ;;  %10602 = vmatprep.mubr.msk.bf16.mxu0 %vm242_vm12, %v3116_v9  ;;  %v3117_v6 = vpack.c.bf16 %v3111_v47, %v3110_v3 }
0x123e   :  { %11190 = vmatprep.subr.msk.bf16.mxu1 %vm537_vm13, %v3741_v43  ;;  %v3761_v34 = vsel %vm537_vm13, %v3741_v43, 0  ;;  %v11677_v55 = vpop.eup %11676 }
0x123f   :  { %10599 = vmatpush3.bf16.msra.mxu0 %v3129_v12  ;;  %10673 = vmatpush3.bf16.xpose.msra.mxu1 %v3761_v34  ;;  %v3743_v59 = vpop.permute.xlu1 %3742  ;;  %v3112_v19 = vmul.f32 %v11677_v55, %v13443_v61 }
0x1240   :  { %v11679_v24 = vpop.eup %11678  ;;  %10600 = vmatprep.subr.bf16.mxu0 %v3131_v28  ;;  %11191 = vmatprep.subr.msk.bf16.mxu1 %vm537_vm13, %v3743_v59  ;;  %v3764_v30 = vsel %vm537_vm13, %v3743_v59, 0 }
0x1241   :  { %v3745_v54 = vpop.permute.xlu0 %3744  ;;  %v3113_v58 = vmul.f32 %v11679_v24, %v13451_v18  ;;  %v11681_v32 = vpop.eup %11680 }
0x1242   :  { %v11683_v36 = vpop.eup %11682  ;;  %v3115_v11 = vmul.f32 %v11681_v32, %v13447_v62  ;;  %v3767_v21 = vsel %vm537_vm13, %v3745_v54, 0 }
0x1243   :  { %10601 = vmatpush3.bf16.msra.mxu0 %v3131_v28  ;;  %v3118_v46 = vpack.c.bf16 %v3113_v58, %v3112_v19  ;;  %v3114_v61 = vmul.f32 %v11683_v36, %v13441_v20  ;;  %v3747_v12 = vpop.permute.xlu1 %3746  ;;  %v11304_v20 = vld [vmem:[%s15536_s7 + $0x28] sm:$0xff]  }
0x1244   :  { %v3770_v22 = vsel %vm537_vm13, %v3747_v12, 0  ;;  %10610 = vmatprep.subr.bf16.mxu0 %v11304_v20 }
0x1245   :  { %v3733_v16 = vpop.permute.xlu0 %3732  ;;  %v3119_v18 = vpack.c.bf16 %v3115_v11, %v3114_v61 }
0x1246   :  { %10603 = vmatmul.mubr.msk.bf16.vlgmr.msra.gmra.mrb[80].mxu0 %vm242_vm12, %v3117_v6  ;;  %10680 = vmatprep.mubr.msk.bf16.mxu1 %vm537_vm13, %v3733_v16 }
0x1247   :  { %10606 = vmatprep.mubr.msk.bf16.mxu0 %vm242_vm12, %v3118_v46  ;;  %10675 = vmatpush3.bf16.xpose.msra.mxu1 %v3764_v30  ;;  %v3735_v40 = vpop.permute.xlu1 %3734 }
0x1248   :  { %11192 = vmatprep.subr.msk.bf16.mxu1 %vm537_vm13, %v3745_v54  ;;  %10611 = vmatpush3.bf16.msra.mxu0 %v11304_v20 }
0x1249   :  { %v3737_v38 = vpop.permute.xlu0 %3736  ;;  %10620 = vmatprep.subr.bf16.mxu0 %v11305_v26 }
0x124b   :  { %v3739_v62 = vpop.permute.xlu1 %3738 }
0x124e   :  { %10607 = vmatmul.mubr.msk.bf16.gmra.mrb[84].mxu0 %vm242_vm12, %v3119_v18 }
0x124f   :  { %10677 = vmatpush3.bf16.xpose.msra.mxu1 %v3767_v21  ;;  %v3549_v36 = vpop.permute.xlu1 %3548 }
0x1250   :  { %11193 = vmatprep.subr.msk.bf16.mxu1 %vm537_vm13, %v3747_v12 }
0x1257   :  { %10679 = vmatpush3.bf16.xpose.msra.mxu1 %v3770_v22 }
0x125e   :  { %10681 = vmatmul.mubr.msk.bf16.vlgmr.msra.gmra.mrb[96].mxu1 %vm537_vm13, %v3735_v40 }
0x125f   :  { %10684 = vmatprep.mubr.msk.bf16.mxu1 %vm537_vm13, %v3737_v38 }
0x1266   :  { %10685 = vmatmul.mubr.msk.bf16.gmra.mrb[100].mxu1 %vm537_vm13, %v3739_v62 }
0x1267   :  { %4339 = vmatprep.mubr.bf16.mxu1 %v12136_v2 }
0x127a   :  { %v3512_v3 = vpop.xlane.xlu0 %3511 }
0x127e   :  { %v3506_v19 = vpop.xlane.xlu0 %3505 }
0x1280   :  { %v3509_v18 = vpop.xlane.xlu1 %3508 }
0x1281   :  { %11684 = vrcp.f32 %v3509_v18 }
0x1282   :  { %v3515_v61 = vpop.xlane.xlu0 %3514  ;;  %11686 = vrcp.f32 %v3506_v19 }
0x1283   :  { %11688 = vrcp.f32 %v3515_v61 }
0x1286   :  { %v3527_v62 = vpop.xlane.xlu0 %3526 }
0x12f2   :  { %v10572_v28 = vpop.f32.mrb[72].mxu0 }
0x12f3   :  { %v2920_v9 = vpop.f32.mrb[73].mxu0 }
0x12f4   :  { %v10573_v56 = vpop.f32.mrb[74].mxu0 }
0x12f5   :  { %v2952_v43 = vpack.c.bf16 %v10573_v56, %v10572_v28  ;;  %v2923_v8 = vpop.f32.mrb[75].mxu0  ;;  %v3524_v28 = vpop.xlane.xlu1 %3523 }
0x12f6   :  { %v2951_v34 = vpack.c.bf16 %v2923_v8, %v2920_v9  ;;  %v3521_v9 = vpop.xlane.xlu0 %3520  ;;  %v11685_v56 = vpop.eup %11684 }
0x12f7   :  { %11690 = vrcp.f32 %v3521_v9 }
0x12f8   :  { %11692 = vrcp.f32 %v3512_v3  ;;  %v3537_v3 = vmul.f32 %v11685_v56, %v13495_v49 }
0x12fa   :  { %v3551_v8 = vpop.permute.xlu0 %3550 }
0x12fb   :  { %v13575_v55 = vpop.f32.mrb[76].mxu0 }
0x12fc   :  { %v2936_v59 = vpop.f32.mrb[77].mxu0 }
0x12fd   :  { %v13577_v24 = vpop.f32.mrb[78].mxu0 }
0x12fe   :  { %v2954_v47 = vpack.c.bf16 %v13577_v24, %v13575_v55  ;;  %v2939_v54 = vpop.f32.mrb[79].mxu0  ;;  %v11306_v55 = vld [vmem:[%s15536_s7 + $0x30] sm:$0xff]  }
0x12ff   :  { %v2953_v58 = vpack.c.bf16 %v2939_v54, %v2936_v59  ;;  %v11687_v54 = vpop.eup %11686 }
0x1319   :  { %v10604_v6 = vpop.f32.mrb[80].mxu0 }
0x131a   :  { %v3182_v32 = vpop.f32.mrb[81].mxu0 }
0x131b   :  { %v10605_v16 = vpop.f32.mrb[82].mxu0 }
0x131c   :  { %v3214_v46 = vpack.c.bf16 %v10605_v16, %v10604_v6  ;;  %v3185_v30 = vpop.f32.mrb[83].mxu0 }
0x131d   :  { %v3213_v11 = vpack.c.bf16 %v3185_v30, %v3182_v32 }
0x131f   :  { %10612 = vmatprep.mubr.msk.bf16.mxu0 %vm537_vm13, %v3213_v11  ;;  %v3536_v11 = vmul.f32 %v11687_v54, %v13493_v23 }
0x1320   :  { %10613 = vmatmul.mubr.msk.bf16.vlgmr.msra.gmra.mrb[88].mxu0 %vm537_vm13, %v3214_v46 }
0x1321   :  { %10621 = vmatpush3.bf16.msra.mxu0 %v11305_v26  ;;  %v10608_v21 = vpop.f32.mrb[84].mxu0  ;;  %v3518_v26 = vpop.xlane.xlu1 %3517 }
0x1322   :  { %10646 = vmatprep.subr.bf16.mxu0 %v3549_v36  ;;  %v3198_v12 = vpop.f32.mrb[85].mxu0  ;;  %11694 = vrcp.f32 %v3518_v26 }
0x1323   :  { %v10609_v22 = vpop.f32.mrb[86].mxu0  ;;  %11696 = vrcp.f32 %v3524_v28 }
0x1324   :  { %v3216_v40 = vpack.c.bf16 %v10609_v22, %v10608_v21  ;;  %v3201_v38 = vpop.f32.mrb[87].mxu0  ;;  %11698 = vrcp.f32 %v3527_v62 }
0x1325   :  { %v3215_v20 = vpack.c.bf16 %v3201_v38, %v3198_v12 }
0x1327   :  { %10616 = vmatprep.mubr.msk.bf16.mxu0 %vm537_vm13, %v3215_v20 }
0x1328   :  { %10617 = vmatmul.mubr.msk.bf16.gmra.mrb[92].mxu0 %vm537_vm13, %v3216_v40 }
0x1329   :  { %10622 = vmatprep.mubr.msk.bf16.mxu0 %vm537_vm13, %v2951_v34  ;;  %v3553_v34 = vpop.permute.xlu1 %3552 }
0x132d   :  { %v3555_v21 = vpop.permute.xlu1 %3554 }
0x1330   :  { %10623 = vmatmul.mubr.msk.bf16.vlgmr.msra.gmra.mrb[88].mxu0 %vm537_vm13, %v2952_v43 }
0x1331   :  { %10647 = vmatpush3.bf16.msra.mxu0 %v3549_v36  ;;  %10626 = vmatprep.mubr.msk.bf16.mxu0 %vm537_vm13, %v2953_v58  ;;  %v10682_v59 = vpop.f32.mrb[96].mxu1 }
0x1332   :  { %10648 = vmatprep.subr.bf16.mxu0 %v3551_v8  ;;  %v3815_v19 = vadd.f32 %v13340_v51, %v10682_v59  ;;  %v3806_v6 = vpop.f32.mrb[97].mxu1  ;;  %v11689_v51 = vpop.eup %11688 }
0x1333   :  { %v3807_v32 = vadd.f32 %v13346_v27, %v3806_v6  ;;  %v10683_v16 = vpop.f32.mrb[98].mxu1  ;;  %v3544_v27 = vpack.c.bf16 %v3537_v3, %v3536_v11  ;;  %v11691_v18 = vpop.eup %11690  ;;  %v3539_v12 = vmul.f32 %v11689_v51, %v13499_v37 }
0x1334   :  { %v3841_v46 = vmul.f32 1.442695, %v3815_v19  ;;  %v3818_v43 = vadd.f32 %v13352_v14, %v10683_v16  ;;  %v3809_v30 = vpop.f32.mrb[99].mxu1  ;;  %v11693_v14 = vpop.eup %11692 }
0x1335   :  { %v3837_v36 = vmul.f32 1.442695, %v3807_v32  ;;  %10649 = vmatpush3.bf16.msra.mxu0 %v3551_v8  ;;  %v3810_v58 = vadd.f32 %v13358_v5, %v3809_v30  ;;  %v11695_v23 = vpop.eup %11694  ;;  %v3538_v38 = vmul.f32 %v11693_v14, %v13489_v25  ;;  %v13612_v25 = vpop.permute.xlu1 %3897 }
0x1336   :  { %11700 = vpow2.f32 %v3841_v46  ;;  %10650 = vmatprep.subr.bf16.mxu0 %v3553_v34  ;;  %v3843_v49 = vmul.f32 1.442695, %v3818_v43  ;;  %v3540_v37 = vmul.f32 %v11695_v23, %v13511_v33  ;;  %v11697_v9 = vpop.eup %11696 }
0x1337   :  { %v3839_v61 = vmul.f32 1.442695, %v3810_v58  ;;  %11702 = vpow2.f32 %v3837_v36  ;;  %v11699_v26 = vpop.eup %11698 }
0x1338   :  { %10627 = vmatmul.mubr.msk.bf16.gmra.mrb[92].mxu0 %vm537_vm13, %v2954_v47  ;;  %v3541_v47 = vmul.f32 %v11691_v18, %v13515_v60  ;;  %v3543_v54 = vmul.f32 %v11699_v26, %v13507_v0 }
0x1339   :  { %11704 = vpow2.f32 %v3839_v61  ;;  %10651 = vmatpush3.bf16.msra.mxu0 %v3553_v34  ;;  %10654 = vmatprep.mubr.msk.bf16.mxu0 %vm242_vm12, %v3544_v27  ;;  %v10686_v5 = vpop.f32.mrb[100].mxu1 }
0x133a   :  { %10652 = vmatprep.subr.bf16.mxu0 %v3555_v21  ;;  %v3831_v22 = vadd.f32 %v13364_v1, %v10686_v5  ;;  %v3822_v40 = vpop.f32.mrb[101].mxu1  ;;  %11706 = vpow2.f32 %v3843_v49  ;;  %v3545_v1 = vpack.c.bf16 %v3539_v12, %v3538_v38  ;;  %v3546_v56 = vpack.c.bf16 %v3541_v47, %v3540_v37 }
0x133b   :  { %v10687_v24 = vpop.f32.mrb[102].mxu1  ;;  %v3823_v20 = vadd.f32 %v13370_v45, %v3822_v40 }
0x133c   :  { %v3849_v62 = vmul.f32 1.442695, %v3831_v22  ;;  %v3825_v28 = vpop.f32.mrb[103].mxu1  ;;  %v3834_v60 = vadd.f32 %v13376_v57, %v10687_v24  ;;  %v3542_v57 = vmul.f32 %v11697_v9, %v13503_v48 }
0x133d   :  { %10653 = vmatpush3.bf16.msra.mxu0 %v3555_v21  ;;  %v3845_v59 = vmul.f32 1.442695, %v3823_v20  ;;  %v3826_v34 = vadd.f32 %v13382_v41, %v3825_v28  ;;  %v3900_v21 = vpop.permute.xlu1 %3899 }
0x133e   :  { %10662 = vmatprep.subr.bf16.mxu0 %v11306_v55  ;;  %11708 = vpow2.f32 %v3849_v62  ;;  %v3851_v6 = vmul.f32 1.442695, %v3834_v60  ;;  %v3547_v46 = vpack.c.bf16 %v3543_v54, %v3542_v57 }
0x133f   :  { %11710 = vpow2.f32 %v3845_v59  ;;  %v3847_v43 = vmul.f32 1.442695, %v3826_v34  ;;  %v11307_v34 = vld [vmem:[%s15536_s7 + $0x38] sm:$0xff]  }
0x1340   :  { %v13608_v8 = vpop.eup %11700  ;;  %10655 = vmatmul.mubr.msk.bf16.vlgmr.msra.gmra.mrb[96].mxu0 %vm242_vm12, %v3545_v1  ;;  %11712 = vpow2.f32 %v3851_v6 }
0x1341   :  { %10663 = vmatpush3.bf16.msra.mxu0 %v11306_v55  ;;  %10658 = vmatprep.mubr.msk.bf16.mxu0 %vm242_vm12, %v3546_v56  ;;  %v3859_v45 = vsel %vm242_vm12, %v13608_v8, 0.0  ;;  %v13617_v33 = vpop.eup %11702  ;;  %11714 = vpow2.f32 %v3847_v43 }
0x1342   :  { %10688 = vmatprep.subr.bf16.mxu0 %v13612_v25  ;;  %3860 = vadd.xlane.f32.xlu0 %v3859_v45  ;;  %v3853_v16 = vsel %vm242_vm12, %v13617_v33, 0.0 }
0x1343   :  { %v11705_v19 = vpop.eup %11704 }
0x1344   :  { %v3856_v32 = vsel %vm242_vm12, %v11705_v19, 0.0  ;;  %v13626_v3 = vpop.eup %11706 }
0x1345   :  { %3857 = vadd.xlane.f32.xlu1 %v3856_v32  ;;  %v3862_v48 = vsel %vm242_vm12, %v13626_v3, 0.0 }
0x1346   :  { %3854 = vadd.xlane.f32.xlu0 %v3853_v16 }
0x1348   :  { %10659 = vmatmul.mubr.msk.bf16.gmra.mrb[100].mxu0 %vm242_vm12, %v3547_v46  ;;  %v13631_v0 = vpop.eup %11708 }
0x1349   :  { %v3871_v41 = vsel %vm242_vm12, %v13631_v0, 0.0  ;;  %v13635_v30 = vpop.eup %11710 }
0x134a   :  { %3863 = vadd.xlane.f32.xlu0 %v3862_v48  ;;  %v3865_v36 = vsel %vm242_vm12, %v13635_v30, 0.0  ;;  %v13639_v58 = vpop.eup %11712 }
0x134b   :  { %v3874_v11 = vsel %vm242_vm12, %v13639_v58, 0.0  ;;  %v11715_v51 = vpop.eup %11714 }
0x134c   :  { %v3868_v61 = vsel %vm242_vm12, %v11715_v51, 0.0 }
0x134e   :  { %3872 = vadd.xlane.f32.xlu0 %v3871_v41 }
0x1352   :  { %3866 = vadd.xlane.f32.xlu0 %v3865_v36 }
0x1356   :  { %3903 = vrot.lane.b32.xlu1 %v13262_v15, %s12144_s29  ;;  %3875 = vadd.xlane.f32.xlu0 %v3874_v11 }
0x135a   :  { %3869 = vadd.xlane.f32.xlu0 %v3868_v61 }
0x1370   :  { %3901 = vrot.lane.b32.xlu0 %v13250_v39, %s12144_s29 }
0x13cf   :  { %v3861_v27 = vpop.xlane.xlu0 %3860 }
0x13d2   :  { %v3858_v23 = vpop.xlane.xlu1 %3857 }
0x13d3   :  { %v3855_v18 = vpop.xlane.xlu0 %3854  ;;  %11716 = vrcp.f32 %v3858_v23 }
0x13d4   :  { %11718 = vrcp.f32 %v3855_v18 }
0x13d6   :  { %v3904_v6 = vpop.permute.xlu1 %3903 }
0x13d7   :  { %v3864_v49 = vpop.xlane.xlu0 %3863 }
0x13d8   :  { %11720 = vrcp.f32 %v3864_v49 }
0x13db   :  { %v3873_v14 = vpop.xlane.xlu0 %3872 }
0x13dd   :  { %v11717_v39 = vpop.eup %11716 }
0x13de   :  { %v11719_v62 = vpop.eup %11718  ;;  %v3886_v1 = vmul.f32 %v11717_v39, %v11705_v19 }
0x13df   :  { %v3867_v5 = vpop.xlane.xlu0 %3866  ;;  %v3885_v9 = vmul.f32 %v11719_v62, %v13617_v33 }
0x13e1   :  { %v3893_v54 = vpack.c.bf16 %v3886_v1, %v3885_v9 }
0x13e2   :  { %v11721_v45 = vpop.eup %11720 }
0x13e3   :  { %v3876_v12 = vpop.xlane.xlu0 %3875  ;;  %v3888_v19 = vmul.f32 %v11721_v45, %v13626_v3 }
0x13e7   :  { %v3870_v15 = vpop.xlane.xlu0 %3869 }
0x13e8   :  { %11722 = vrcp.f32 %v3870_v15 }
0x13e9   :  { %11724 = vrcp.f32 %v3861_v27 }
0x13ea   :  { %11726 = vrcp.f32 %v3867_v5 }
0x13eb   :  { %11728 = vrcp.f32 %v3876_v12  ;;  %v3902_v59 = vpop.permute.xlu0 %3901 }
0x13ec   :  { %11730 = vrcp.f32 %v3873_v14 }
0x1413   :  { %v10656_v22 = vpop.f32.mrb[96].mxu0 }
0x1414   :  { %v3606_v40 = vpop.f32.mrb[97].mxu0 }
0x1415   :  { %v10657_v55 = vpop.f32.mrb[98].mxu0 }
0x1416   :  { %v3638_v24 = vpack.c.bf16 %v10657_v55, %v10656_v22  ;;  %v3609_v47 = vpop.f32.mrb[99].mxu0  ;;  %v13674_v22 = vld [vmem:[%s15533_s4 + $0x8] sm:$0x3f] }
0x1417   :  { %v3637_v38 = vpack.c.bf16 %v3609_v47, %v3606_v40  ;;  %v4092_v40 = vrot.slane %v13674_v22, %v12882_v29 }
0x1419   :  { %10664 = vmatprep.mubr.msk.bf16.mxu0 %vm537_vm13, %v3637_v38 }
0x141a   :  { %10665 = vmatmul.mubr.msk.bf16.vlgmr.msra.gmra.mrb[88].mxu0 %vm537_vm13, %v3638_v24 }
0x141b   :  { %10689 = vmatpush3.bf16.msra.mxu0 %v13612_v25  ;;  %v10660_v20 = vpop.f32.mrb[100].mxu0  ;;  %v11723_v25 = vpop.eup %11722 }
0x141c   :  { %10690 = vmatprep.subr.bf16.mxu0 %v3900_v21  ;;  %v3622_v28 = vpop.f32.mrb[101].mxu0  ;;  %v11725_v57 = vpop.eup %11724  ;;  %v3890_v32 = vmul.f32 %v11723_v25, %v11715_v51 }
0x141d   :  { %v10661_v37 = vpop.f32.mrb[102].mxu0  ;;  %v11727_v33 = vpop.eup %11726  ;;  %v3887_v16 = vmul.f32 %v11725_v57, %v13608_v8 }
0x141e   :  { %v3640_v26 = vpack.c.bf16 %v10661_v37, %v10660_v20  ;;  %v3625_v56 = vpop.f32.mrb[103].mxu0  ;;  %v3889_v46 = vmul.f32 %v11727_v33, %v13635_v30  ;;  %v11729_v48 = vpop.eup %11728 }
0x141f   :  { %v3639_v60 = vpack.c.bf16 %v3625_v56, %v3622_v28  ;;  %10691 = vmatpush3.bf16.msra.mxu0 %v3900_v21  ;;  %v3894_v43 = vpack.c.bf16 %v3888_v19, %v3887_v16  ;;  %v11731_v36 = vpop.eup %11730  ;;  %v3892_v3 = vmul.f32 %v11729_v48, %v13639_v58 }
0x1420   :  { %10692 = vmatprep.subr.bf16.mxu0 %v3902_v59  ;;  %v3895_v41 = vpack.c.bf16 %v3890_v32, %v3889_v46  ;;  %v3891_v11 = vmul.f32 %v11731_v36, %v13631_v0 }
0x1421   :  { %10668 = vmatprep.mubr.msk.bf16.mxu0 %vm537_vm13, %v3639_v60 }
0x1422   :  { %10669 = vmatmul.mubr.msk.bf16.gmra.mrb[92].mxu0 %vm537_vm13, %v3640_v26  ;;  %v3896_v51 = vpack.c.bf16 %v3892_v3, %v3891_v11 }
0x1423   :  { %10693 = vmatpush3.bf16.msra.mxu0 %v3902_v59  ;;  %10696 = vmatprep.mubr.msk.bf16.mxu0 %vm242_vm12, %v3893_v54 }
0x1424   :  { %10694 = vmatprep.subr.bf16.mxu0 %v3904_v6 }
0x1427   :  { %10695 = vmatpush3.bf16.msra.mxu0 %v3904_v6 }
0x1428   :  { %10704 = vmatprep.subr.bf16.mxu0 %v11307_v34 }
0x142a   :  { %10697 = vmatmul.mubr.msk.bf16.vlgmr.msra.gmra.mrb[104].mxu0 %vm242_vm12, %v3894_v43 }
0x142b   :  { %10700 = vmatprep.mubr.msk.bf16.mxu0 %vm242_vm12, %v3895_v41  ;;  %10705 = vmatpush3.bf16.msra.mxu0 %v11307_v34 }
0x1432   :  { %10701 = vmatmul.mubr.msk.bf16.gmra.mrb[108].mxu0 %vm242_vm12, %v3896_v51 }
0x14fd   :  { %v10698_v8 = vpop.f32.mrb[104].mxu0 }
0x14fe   :  { %v3955_v61 = vpop.f32.mrb[105].mxu0 }
0x14ff   :  { %v10699_v30 = vpop.f32.mrb[106].mxu0 }
0x1500   :  { %v3987_v27 = vpack.c.bf16 %v10699_v30, %v10698_v8  ;;  %v3958_v18 = vpop.f32.mrb[107].mxu0 }
0x1501   :  { %v3986_v49 = vpack.c.bf16 %v3958_v18, %v3955_v61 }
0x1503   :  { %10706 = vmatprep.mubr.msk.bf16.mxu0 %vm537_vm13, %v3986_v49 }
0x1504   :  { %10707 = vmatmul.mubr.msk.bf16.vlgmr.msra.gmra.mrb[88].mxu0 %vm537_vm13, %v3987_v27 }
0x1505   :  { %v10702_v14 = vpop.f32.mrb[108].mxu0 }
0x1506   :  { %v3971_v21 = vpop.f32.mrb[109].mxu0 }
0x1507   :  { %v10703_v5 = vpop.f32.mrb[110].mxu0 }
0x1508   :  { %v3989_v23 = vpack.c.bf16 %v10703_v5, %v10702_v14  ;;  %v3974_v58 = vpop.f32.mrb[111].mxu0 }
0x1509   :  { %v3988_v12 = vpack.c.bf16 %v3974_v58, %v3971_v21 }
0x150b   :  { %10710 = vmatprep.mubr.msk.bf16.mxu0 %vm537_vm13, %v3988_v12 }
0x150c   :  { %10711 = vmatmul.mubr.msk.bf16.gmra.mrb[92].mxu0 %vm537_vm13, %v3989_v23 }
0x150d   :  { %4845 = vmatprep.mubr.bf16.mxu0 %v12136_v2 }
0x15d7   :  { %v10708_v0 = vpop.f32.mrb[88].mxu0 }
0x15d8   :  { %v4042_v15 = vpop.f32.mrb[89].mxu0  ;;  %v4083_v55 = vadd.f32 %v10708_v0, %v13107_v44 }
0x15d9   :  { %v4081_v24 = vadd.f32 %v4042_v15, %v13097_v10  ;;  %v10709_v47 = vpop.f32.mrb[90].mxu0 }
0x15da   :  { %v4045_v38 = vpop.f32.mrb[91].mxu0  ;;  %v13683_v20 = vadd.f32 %v4092_v40, %v4083_v55  ;;  %v4084_v28 = vadd.f32 %v10709_v47, %v13110_v31 }
0x15db   :  { %v13680_v39 = vadd.f32 %v4092_v40, %v4081_v24  ;;  %v4082_v62 = vadd.f32 %v4045_v38, %v13100_v42 }
0x15dc   :  { %v13692_v26 = vadd.f32 %v4092_v40, %v4084_v28  ;;  %v4107_v31 = vsel %vm242_vm12, %v13683_v20, 0.0 }
0x15dd   :  { %v13686_v37 = vadd.f32 %v4092_v40, %v4082_v62  ;;  %v4101_v9 = vsel %vm242_vm12, %v13680_v39, 0.0 }
0x15de   :  { %4102 = vadd.xlane.f32.xlu1 %v4101_v9  ;;  %v4110_v6 = vsel %vm242_vm12, %v13692_v26, 0.0 }
0x15df   :  { %v10712_v1 = vpop.f32.mrb[92].mxu0  ;;  %v4104_v10 = vsel %vm242_vm12, %v13686_v37, 0.0 }
0x15e0   :  { %4105 = vadd.xlane.f32.xlu0 %v4104_v10  ;;  %v4058_v44 = vpop.f32.mrb[93].mxu0  ;;  %v4087_v54 = vadd.f32 %v10712_v1, %v13127_v13 }
0x15e1   :  { %v4085_v42 = vadd.f32 %v4058_v44, %v13117_v7  ;;  %v10713_v56 = vpop.f32.mrb[94].mxu0 }
0x15e2   :  { %4108 = vadd.xlane.f32.xlu1 %v4107_v31  ;;  %v4061_v59 = vpop.f32.mrb[95].mxu0  ;;  %v4088_v60 = vadd.f32 %v10713_v56, %v13130_v63  ;;  %v13710_v19 = vadd.f32 %v4092_v40, %v4087_v54  ;;  %v11313_v54 = vld [vmem:[%s15537_s8 + $0x54] ss:$8 sps:$4 sm:$0xff]  }
0x15e3   :  { %v4086_v45 = vadd.f32 %v4061_v59, %v13120_v35  ;;  %v13700_v25 = vadd.f32 %v4092_v40, %v4085_v42 }
0x15e4   :  { %v13706_v7 = vadd.f32 %v4092_v40, %v4088_v60  ;;  %v4119_v63 = vsel %vm242_vm12, %v13710_v19, 0.0  ;;  %v11310_v60 = vld [vmem:[%s15537_s8 + $0x44] ss:$8 sps:$4 sm:$0xff]  }
0x15e5   :  { %v13702_v57 = vadd.f32 %v4092_v40, %v4086_v45  ;;  %v4113_v35 = vsel %vm242_vm12, %v13700_v25, 0.0  ;;  %v11308_v45 = vld [vmem:[%s15537_s8 + $0x40] ss:$8 sps:$4 sm:$0xff]   ;;  %4307 = vmatprep.subr.bf16.mxu1 %v11310_v60 }
0x15e6   :  { %4111 = vadd.xlane.f32.xlu1 %v4110_v6  ;;  %v4122_v13 = vsel %vm242_vm12, %v13706_v7, 0.0  ;;  %4308 = vmatpush1.bf16.msra.mxu1 %v11308_v45  ;;  %v11311_v6 = vld [vmem:[%s15537_s8 + $0x50] ss:$8 sps:$4 sm:$0xff]  }
0x15e7   :  { %v4116_v33 = vsel %vm242_vm12, %v13702_v57, 0.0  ;;  %4309 = vmatprep.subr.bf16.mxu1 %v11313_v54 }
0x15e8   :  { %4117 = vadd.xlane.f32.xlu0 %v4116_v33  ;;  %v11316_v33 = vld [vmem:[%s15537_s8 + $0x64] ss:$8 sps:$4 sm:$0xff]  }
0x15ea   :  { %4114 = vadd.xlane.f32.xlu1 %v4113_v35  ;;  %4310 = vmatpush1.bf16.msra.mxu1 %v11311_v6  ;;  %v11314_v35 = vld [vmem:[%s15537_s8 + $0x60] ss:$8 sps:$4 sm:$0xff]  }
0x15eb   :  { %4311 = vmatprep.subr.bf16.mxu1 %v11316_v33 }
0x15ec   :  { %4123 = vadd.xlane.f32.xlu0 %v4122_v13  ;;  %v11319_v13 = vld [vmem:[%s15537_s8 + $0x74] ss:$8 sps:$4 sm:$0xff]  }
0x15ee   :  { %4120 = vadd.xlane.f32.xlu1 %v4119_v63  ;;  %4312 = vmatpush1.bf16.msra.mxu1 %v11314_v35  ;;  %v11317_v63 = vld [vmem:[%s15537_s8 + $0x70] ss:$8 sps:$4 sm:$0xff]   ;;  %v11321_v35 = vld [vmem:[%s15538_s9 + $0x80] sm:$0xff]  }
0x15ef   :  { %4313 = vmatprep.subr.bf16.mxu1 %v11319_v13 }
0x15f2   :  { %4314 = vmatpush1.bf16.msra.mxu1 %v11317_v63  ;;  %v11322_v63 = vld [vmem:[%s15538_s9 + $0xc8] sm:$0xff]  }
0x166b   :  { %v4103_v34 = vpop.xlane.xlu1 %4102 }
0x166c   :  { %v4125_v32 = vmul.f32 0.015625, %v4103_v34  ;;  %v11320_v34 = vld [vmem:[%s15538_s9 + $0xc0] sm:$0xff]  }
0x166d   :  { %v4106_v16 = vpop.xlane.xlu0 %4105  ;;  %10058 = vmatprep.subr.bf16.mxu1 %v11320_v34 }
0x166e   :  { %v13719_v46 = vsub.f32 %v13680_v39, %v4125_v32  ;;  %v4126_v43 = vmul.f32 0.015625, %v4106_v16 }
0x166f   :  { %v4109_v48 = vpop.xlane.xlu1 %4108 }
0x1670   :  { %v13722_v41 = vsub.f32 %v13686_v37, %v4126_v43  ;;  %v4127_v36 = vmul.f32 0.015625, %v4109_v48  ;;  %v4141_v3 = vmul.f32 %v13719_v46, %v13719_v46 }
0x1672   :  { %v13727_v11 = vsub.f32 %v13683_v20, %v4127_v36  ;;  %v4149_v51 = vsel %vm242_vm12, %v4141_v3, 0.0  ;;  %v4142_v8 = vmul.f32 %v13722_v41, %v13722_v41 }
0x1673   :  { %v4112_v61 = vpop.xlane.xlu1 %4111  ;;  %4150 = vadd.xlane.f32.xlu1 %v4149_v51 }
0x1674   :  { %v4128_v30 = vmul.f32 0.015625, %v4112_v61  ;;  %v4152_v27 = vsel %vm242_vm12, %v4142_v8, 0.0  ;;  %v4143_v18 = vmul.f32 %v13727_v11, %v13727_v11 }
0x1675   :  { %4153 = vadd.xlane.f32.xlu0 %v4152_v27  ;;  %v4118_v49 = vpop.xlane.xlu0 %4117 }
0x1676   :  { %v13736_v14 = vsub.f32 %v13692_v26, %v4128_v30  ;;  %v4130_v21 = vmul.f32 0.015625, %v4118_v49  ;;  %v4155_v5 = vsel %vm242_vm12, %v4143_v18, 0.0 }
0x1677   :  { %4156 = vadd.xlane.f32.xlu1 %v4155_v5  ;;  %v4115_v23 = vpop.xlane.xlu1 %4114 }
0x1678   :  { %v13740_v58 = vsub.f32 %v13702_v57, %v4130_v21  ;;  %v4129_v12 = vmul.f32 0.015625, %v4115_v23  ;;  %v4144_v0 = vmul.f32 %v13736_v14, %v13736_v14 }
0x1679   :  { %v4124_v40 = vpop.xlane.xlu0 %4123 }
0x167a   :  { %v13745_v15 = vsub.f32 %v13700_v25, %v4129_v12  ;;  %v4132_v55 = vmul.f32 0.015625, %v4124_v40  ;;  %v4158_v24 = vsel %vm242_vm12, %v4144_v0, 0.0  ;;  %v4146_v47 = vmul.f32 %v13740_v58, %v13740_v58 }
0x167b   :  { %v4121_v38 = vpop.xlane.xlu1 %4120  ;;  %4159 = vadd.xlane.f32.xlu0 %v4158_v24  ;;  %v13795_v12 = vrot.slane %v13674_v22, %v13007_v53 }
0x167c   :  { %v13751_v62 = vsub.f32 %v13706_v7, %v4132_v55  ;;  %v4131_v28 = vmul.f32 0.015625, %v4121_v38  ;;  %v4145_v9 = vmul.f32 %v13745_v15, %v13745_v15  ;;  %v4164_v44 = vsel %vm242_vm12, %v4146_v47, 0.0 }
0x167e   :  { %v13756_v1 = vsub.f32 %v13710_v19, %v4131_v28  ;;  %v4161_v10 = vsel %vm242_vm12, %v4145_v9, 0.0  ;;  %v4148_v42 = vmul.f32 %v13751_v62, %v13751_v62 }
0x167f   :  { %4162 = vadd.xlane.f32.xlu1 %v4161_v10  ;;  %4165 = vadd.xlane.f32.xlu0 %v4164_v44  ;;  %v4220_v44 = vrot.slane %v13674_v22, %v13010_v50 }
0x1680   :  { %v4147_v56 = vmul.f32 %v13756_v1, %v13756_v1  ;;  %v4170_v59 = vsel %vm242_vm12, %v4148_v42, 0.0 }
0x1682   :  { %v4167_v31 = vsel %vm242_vm12, %v4147_v56, 0.0 }
0x1683   :  { %4168 = vadd.xlane.f32.xlu1 %v4167_v31  ;;  %4171 = vadd.xlane.f32.xlu0 %v4170_v59 }
0x1700   :  { %v4151_v32 = vpop.xlane.xlu1 %4150 }
0x1701   :  { %v4173_v16 = vmul.f32 0.015625, %v4151_v32 }
0x1702   :  { %v4154_v43 = vpop.xlane.xlu0 %4153 }
0x1703   :  { %v4181_v48 = vadd.f32 1e-05, %v4173_v16  ;;  %v4174_v36 = vmul.f32 0.015625, %v4154_v43  ;;  %v11323_v16 = vld [vmem:[%s15538_s9 + $0x88] sm:$0xff]  }
0x1704   :  { %v4157_v3 = vpop.xlane.xlu1 %4156 }
0x1705   :  { %11732 = vrsqrt.f32 %v4181_v48  ;;  %v4182_v51 = vadd.f32 1e-05, %v4174_v36  ;;  %v4175_v8 = vmul.f32 0.015625, %v4157_v3  ;;  %v11324_v36 = vld [vmem:[%s15538_s9 + $0xd0] sm:$0xff]  }
0x1707   :  { %11734 = vrsqrt.f32 %v4182_v51  ;;  %v4183_v61 = vadd.f32 1e-05, %v4175_v8  ;;  %v11325_v8 = vld [vmem:[%s15538_s9 + $0x90] sm:$0xff]  }
0x1708   :  { %v4160_v30 = vpop.xlane.xlu0 %4159 }
0x1709   :  { %11736 = vrsqrt.f32 %v4183_v61  ;;  %v4176_v27 = vmul.f32 0.015625, %v4160_v30 }
0x170b   :  { %v4184_v18 = vadd.f32 1e-05, %v4176_v27 }
0x170c   :  { %v4163_v49 = vpop.xlane.xlu1 %4162  ;;  %v4166_v21 = vpop.xlane.xlu0 %4165 }
0x170d   :  { %11738 = vrsqrt.f32 %v4184_v18  ;;  %v4177_v5 = vmul.f32 0.015625, %v4163_v49  ;;  %v4178_v23 = vmul.f32 0.015625, %v4166_v21 }
0x170f   :  { %v11733_v0 = vpop.eup %11732  ;;  %v4185_v40 = vadd.f32 1e-05, %v4177_v5  ;;  %v4186_v55 = vadd.f32 1e-05, %v4178_v23 }
0x1710   :  { %v4197_v24 = vmul.f32 %v11733_v0, %v13719_v46  ;;  %v4169_v47 = vpop.xlane.xlu1 %4168  ;;  %v4172_v38 = vpop.xlane.xlu0 %4171 }
0x1711   :  { %v11735_v28 = vpop.eup %11734  ;;  %11740 = vrsqrt.f32 %v4185_v40  ;;  %v4179_v9 = vmul.f32 0.015625, %v4169_v47  ;;  %v4180_v10 = vmul.f32 0.015625, %v4172_v38  ;;  %v11328_v40 = vld [vmem:[%s15538_s9 + $0xe0] sm:$0xff]  }
0x1712   :  { %v4209_v42 = vmul.f32 %v13795_v12, %v4197_v24  ;;  %v4198_v56 = vmul.f32 %v11735_v28, %v13722_v41  ;;  %11742 = vrsqrt.f32 %v4186_v55  ;;  %v11329_v55 = vld [vmem:[%s15538_s9 + $0xa0] sm:$0xff]  }
0x1713   :  { %v11737_v31 = vpop.eup %11736  ;;  %v4187_v59 = vadd.f32 1e-05, %v4179_v9  ;;  %v4188_v60 = vadd.f32 1e-05, %v4180_v10  ;;  %v11332_v10 = vld [vmem:[%s15538_s9 + $0xf0] sm:$0xff]  }
0x1714   :  { %v4210_v45 = vmul.f32 %v13795_v12, %v4198_v56  ;;  %v4221_v46 = vadd.f32 %v4220_v44, %v4209_v42  ;;  %v4199_v6 = vmul.f32 %v11737_v31, %v13727_v11  ;;  %v11333_v42 = vld [vmem:[%s15538_s9 + $0xb0] sm:$0xff]   ;;  %v11335_v56 = vld [vmem:[%s15538_s9 + $0xb8] sm:$0xff]   ;;  %v9468_v31 = vld [vmem:[%s15534_s5 + $0x2] sm:$0x3] }
0x1715   :  { %11744 = vrsqrt.f32 %v4187_v59  ;;  %v4248_v59 = vrot.slane %v9468_v31, %v12390_v4 }
0x1716   :  { %v4222_v54 = vadd.f32 %v4220_v44, %v4210_v45  ;;  %11746 = vrsqrt.f32 %v4188_v60  ;;  %v4211_v34 = vmul.f32 %v13795_v12, %v4199_v6  ;;  %v4252_v60 = vrot.slane %v9468_v31, %v12396_v17 }
0x1717   :  { %v11739_v33 = vpop.eup %11738 }
0x1718   :  { %v4229_v13 = vpack.c.bf16 %v4222_v54, %v4221_v46  ;;  %v4200_v41 = vmul.f32 %v11739_v33, %v13736_v14  ;;  %v4223_v51 = vadd.f32 %v4220_v44, %v4211_v34 }
0x171a   :  { %9477 = vmatmul.mubr.msk.bf16.vlgmr.msra.gmra.mrb[104].mxu1 %vm242_vm12, %v4229_v13  ;;  %v4212_v32 = vmul.f32 %v13795_v12, %v4200_v41 }
0x171b   :  { %v11741_v11 = vpop.eup %11740  ;;  %4349 = vmatprep.mubr.bf16.mxu1 %v12136_v2  ;;  %10059 = vmatpush3.bf16.msra.mxu1 %v11321_v35 }
0x171c   :  { %v11743_v43 = vpop.eup %11742  ;;  %v4224_v14 = vadd.f32 %v4220_v44, %v4212_v32  ;;  %v4201_v48 = vmul.f32 %v11741_v11, %v13745_v15  ;;  %10060 = vmatprep.subr.bf16.mxu1 %v11322_v63  ;;  %v11326_v15 = vld [vmem:[%s15538_s9 + $0xd8] sm:$0xff]  }
0x171d   :  { %v4202_v3 = vmul.f32 %v11743_v43, %v13740_v58  ;;  %v11327_v58 = vld [vmem:[%s15538_s9 + $0x98] sm:$0xff]  }
0x171e   :  { %v4230_v30 = vpack.c.bf16 %v4224_v14, %v4223_v51  ;;  %v4213_v27 = vmul.f32 %v13795_v12, %v4201_v48 }
0x171f   :  { %10061 = vmatpush3.bf16.msra.mxu1 %v11323_v16  ;;  %v11745_v61 = vpop.eup %11744  ;;  %v4214_v18 = vmul.f32 %v13795_v12, %v4202_v3 }
0x1720   :  { %10062 = vmatprep.subr.bf16.mxu1 %v11324_v36  ;;  %v11747_v49 = vpop.eup %11746  ;;  %v4225_v21 = vadd.f32 %v4220_v44, %v4213_v27  ;;  %v4203_v23 = vmul.f32 %v11745_v61, %v13756_v1 }
0x1721   :  { %v4226_v5 = vadd.f32 %v4220_v44, %v4214_v18  ;;  %v4204_v0 = vmul.f32 %v11747_v49, %v13751_v62  ;;  %v11330_v62 = vld [vmem:[%s15538_s9 + $0xe8] sm:$0xff]  }
0x1722   :  { %9478 = vmatmul.mubr.msk.bf16.gmra.mrb[108].mxu1 %vm242_vm12, %v4230_v30  ;;  %v4215_v47 = vmul.f32 %v13795_v12, %v4203_v23 }
0x1723   :  { %4359 = vmatprep.mubr.bf16.mxu1 %v12136_v2  ;;  %10063 = vmatpush3.bf16.msra.mxu1 %v11325_v8  ;;  %v4231_v24 = vpack.c.bf16 %v4226_v5, %v4225_v21  ;;  %v4216_v38 = vmul.f32 %v13795_v12, %v4204_v0  ;;  %v11331_v12 = vld [vmem:[%s15538_s9 + $0xa8] sm:$0xff]  }
0x1724   :  { %10064 = vmatprep.subr.bf16.mxu1 %v11326_v15  ;;  %v4227_v1 = vadd.f32 %v4220_v44, %v4215_v47 }
0x1725   :  { %v4228_v28 = vadd.f32 %v4220_v44, %v4216_v38  ;;  %v11334_v44 = vld [vmem:[%s15538_s9 + $0xf8] sm:$0xff]  }
0x1727   :  { %10065 = vmatpush3.bf16.msra.mxu1 %v11327_v58  ;;  %v4232_v9 = vpack.c.bf16 %v4228_v28, %v4227_v1 }
0x1728   :  { %10066 = vmatprep.subr.bf16.mxu1 %v11328_v40 }
0x172a   :  { %9479 = vmatmul.mubr.msk.bf16.gmra.mrb[112].mxu1 %vm242_vm12, %v4231_v24 }
0x172b   :  { %4369 = vmatprep.mubr.bf16.mxu1 %v12136_v2  ;;  %10067 = vmatpush3.bf16.msra.mxu1 %v11329_v55 }
0x172c   :  { %10068 = vmatprep.subr.bf16.mxu1 %v11330_v62 }
0x172f   :  { %10069 = vmatpush3.bf16.msra.mxu1 %v11331_v12 }
0x1730   :  { %10070 = vmatprep.subr.bf16.mxu1 %v11332_v10 }
0x1732   :  { %9480 = vmatmul.mubr.msk.bf16.gmra.mrb[116].mxu1 %vm242_vm12, %v4232_v9 }
0x1733   :  { %10071 = vmatpush3.bf16.msra.mxu1 %v11333_v42 }
0x1734   :  { %10072 = vmatprep.subr.bf16.mxu1 %v11334_v44 }
0x1737   :  { %10073 = vmatpush3.bf16.msra.mxu1 %v11335_v56 }
0x17ed   :  { %v4341_v45 = vpop.f32.mrb[104].mxu1 }
0x17ee   :  { %v4342_v46 = vadd.f32 %v4341_v45, %v4248_v59  ;;  %v4343_v54 = vpop.f32.mrb[105].mxu1 }
0x17ef   :  { %v4344_v6 = vadd.f32 %v4343_v54, %v4252_v60  ;;  %v4345_v33 = vpop.f32.mrb[106].mxu1 }
0x17f0   :  { %v4346_v35 = vadd.f32 %v4345_v33, %v4248_v59  ;;  %v4347_v13 = vpop.f32.mrb[107].mxu1  ;;  %v4380_v63 = vmax.f32 %v4342_v46, 0.0 }
0x17f1   :  { %v4348_v41 = vadd.f32 %v4347_v13, %v4252_v60  ;;  %v4381_v32 = vmax.f32 %v4344_v6, 0.0 }
0x17f2   :  { %v4382_v34 = vmax.f32 %v4346_v35, 0.0 }
0x17f3   :  { %v4383_v11 = vmax.f32 %v4348_v41, 0.0 }
0x17f4   :  { %v4396_v16 = vpack.c.bf16 %v4382_v34, %v4380_v63 }
0x17f5   :  { %v4397_v43 = vpack.c.bf16 %v4383_v11, %v4381_v32  ;;  %v4351_v14 = vpop.f32.mrb[108].mxu1 }
0x17f6   :  { %v4352_v48 = vadd.f32 %v4351_v14, %v4248_v59  ;;  %v4353_v36 = vpop.f32.mrb[109].mxu1 }
0x17f7   :  { %v4354_v3 = vadd.f32 %v4353_v36, %v4252_v60  ;;  %v4355_v51 = vpop.f32.mrb[110].mxu1  ;;  %4565 = vmatprep.mubr.bf16.mxu1 %v4397_v43  ;;  %v4609_v43 = vrot.slane %v13674_v22, %v13092_v52 }
0x17f8   :  { %v4356_v8 = vadd.f32 %v4355_v51, %v4248_v59  ;;  %v4357_v61 = vpop.f32.mrb[111].mxu1  ;;  %4566 = vmatmul.mubr.bf16.vlgmr.msra.gmra.mrb[120].mxu1 %v4396_v16  ;;  %v4384_v27 = vmax.f32 %v4352_v48, 0.0 }
0x17f9   :  { %v4358_v30 = vadd.f32 %v4357_v61, %v4252_v60  ;;  %v4385_v15 = vmax.f32 %v4354_v3, 0.0 }
0x17fa   :  { %v4386_v18 = vmax.f32 %v4356_v8, 0.0 }
0x17fb   :  { %v4387_v49 = vmax.f32 %v4358_v30, 0.0 }
0x17fc   :  { %v4398_v58 = vpack.c.bf16 %v4386_v18, %v4384_v27 }
0x17fd   :  { %v4399_v21 = vpack.c.bf16 %v4387_v49, %v4385_v15  ;;  %v4361_v5 = vpop.f32.mrb[112].mxu1 }
0x17fe   :  { %v4362_v23 = vadd.f32 %v4361_v5, %v4248_v59  ;;  %v4363_v0 = vpop.f32.mrb[113].mxu1 }
0x17ff   :  { %v4364_v40 = vadd.f32 %v4363_v0, %v4252_v60  ;;  %v4365_v55 = vpop.f32.mrb[114].mxu1  ;;  %4573 = vmatprep.mubr.bf16.mxu1 %v4399_v21 }
0x1800   :  { %v4366_v24 = vadd.f32 %v4365_v55, %v4248_v59  ;;  %v4367_v47 = vpop.f32.mrb[115].mxu1  ;;  %4574 = vmatmul.mubr.bf16.gmra.mrb[124].mxu1 %v4398_v58  ;;  %v4388_v62 = vmax.f32 %v4362_v23, 0.0 }
0x1801   :  { %v4368_v38 = vadd.f32 %v4367_v47, %v4252_v60  ;;  %v4389_v28 = vmax.f32 %v4364_v40, 0.0 }
0x1802   :  { %v4390_v1 = vmax.f32 %v4366_v24, 0.0 }
0x1803   :  { %v4391_v9 = vmax.f32 %v4368_v38, 0.0 }
0x1804   :  { %v4400_v12 = vpack.c.bf16 %v4390_v1, %v4388_v62 }
0x1805   :  { %v4401_v10 = vpack.c.bf16 %v4391_v9, %v4389_v28  ;;  %v4371_v42 = vpop.f32.mrb[116].mxu1 }
0x1806   :  { %v4372_v44 = vadd.f32 %v4371_v42, %v4248_v59  ;;  %v4373_v56 = vpop.f32.mrb[117].mxu1 }
0x1807   :  { %v4374_v31 = vadd.f32 %v4373_v56, %v4252_v60  ;;  %v4375_v45 = vpop.f32.mrb[118].mxu1  ;;  %4581 = vmatprep.mubr.bf16.mxu1 %v4401_v10 }
0x1808   :  { %v4376_v46 = vadd.f32 %v4375_v45, %v4248_v59  ;;  %v4377_v54 = vpop.f32.mrb[119].mxu1  ;;  %4582 = vmatmul.mubr.bf16.gmra.mrb[128].mxu1 %v4400_v12  ;;  %v4392_v33 = vmax.f32 %v4372_v44, 0.0 }
0x1809   :  { %v4378_v6 = vadd.f32 %v4377_v54, %v4252_v60  ;;  %v4393_v13 = vmax.f32 %v4374_v31, 0.0 }
0x180a   :  { %v4394_v35 = vmax.f32 %v4376_v46, 0.0 }
0x180b   :  { %v4395_v41 = vmax.f32 %v4378_v6, 0.0 }
0x180c   :  { %v4402_v63 = vpack.c.bf16 %v4394_v35, %v4392_v33 }
0x180d   :  { %v4403_v34 = vpack.c.bf16 %v4395_v41, %v4393_v13 }
0x180f   :  { %4589 = vmatprep.mubr.bf16.mxu1 %v4403_v34 }
0x1810   :  { %4590 = vmatmul.mubr.bf16.gmra.mrb[132].mxu1 %v4402_v63 }
0x18cb   :  { %v10074_v32 = vpop.f32.mrb[120].mxu1 }
0x18cc   :  { %v10075_v11 = vpop.f32.mrb[121].mxu1 }
0x18cd   :  { %v10076_v16 = vadd.f32 %v10075_v11, %v10074_v32  ;;  %v10077_v14 = vpop.f32.mrb[122].mxu1 }
0x18ce   :  { %v10078_v48 = vpop.f32.mrb[123].mxu1 }
0x18cf   :  { %v4598_v59 = vadd.f32 %v10076_v16, %v13680_v39  ;;  %v10079_v36 = vadd.f32 %v10078_v48, %v10077_v14 }
0x18d1   :  { %v13875_v60 = vadd.f32 %v4609_v43, %v4598_v59  ;;  %v4599_v3 = vadd.f32 %v10079_v36, %v13686_v37 }
0x18d3   :  { %v13878_v51 = vadd.f32 %v4609_v43, %v4599_v3  ;;  %v10080_v8 = vpop.f32.mrb[124].mxu1  ;;  %v4620_v61 = vsel %vm242_vm12, %v13875_v60, 0.0 }
0x18d4   :  { %v10081_v30 = vpop.f32.mrb[125].mxu1  ;;  %4621 = vadd.xlane.f32.xlu1 %v4620_v61 }
0x18d5   :  { %v10082_v27 = vadd.f32 %v10081_v30, %v10080_v8  ;;  %v10083_v18 = vpop.f32.mrb[126].mxu1  ;;  %v4623_v22 = vsel %vm242_vm12, %v13878_v51, 0.0 }
0x18d6   :  { %v10084_v15 = vpop.f32.mrb[127].mxu1  ;;  %4624 = vadd.xlane.f32.xlu0 %v4623_v22 }
0x18d7   :  { %v4600_v39 = vadd.f32 %v10082_v27, %v13683_v20  ;;  %v10085_v49 = vadd.f32 %v10084_v15, %v10083_v18 }
0x18d9   :  { %v13885_v58 = vadd.f32 %v4609_v43, %v4600_v39  ;;  %v4601_v37 = vadd.f32 %v10085_v49, %v13692_v26 }
0x18db   :  { %v13888_v21 = vadd.f32 %v4609_v43, %v4601_v37  ;;  %v10086_v5 = vpop.f32.mrb[128].mxu1  ;;  %v4626_v23 = vsel %vm242_vm12, %v13885_v58, 0.0 }
0x18dc   :  { %v10087_v0 = vpop.f32.mrb[129].mxu1  ;;  %4627 = vadd.xlane.f32.xlu1 %v4626_v23 }
0x18dd   :  { %v10088_v40 = vadd.f32 %v10087_v0, %v10086_v5  ;;  %v10089_v55 = vpop.f32.mrb[130].mxu1  ;;  %v4629_v24 = vsel %vm242_vm12, %v13888_v21, 0.0 }
0x18de   :  { %v10090_v47 = vpop.f32.mrb[131].mxu1  ;;  %4630 = vadd.xlane.f32.xlu0 %v4629_v24 }
0x18df   :  { %v4602_v20 = vadd.f32 %v10088_v40, %v13700_v25  ;;  %v10091_v38 = vadd.f32 %v10090_v47, %v10089_v55 }
0x18e1   :  { %v13895_v62 = vadd.f32 %v4609_v43, %v4602_v20  ;;  %v4603_v26 = vadd.f32 %v10091_v38, %v13702_v57 }
0x18e3   :  { %v13898_v1 = vadd.f32 %v4609_v43, %v4603_v26  ;;  %v10092_v28 = vpop.f32.mrb[132].mxu1  ;;  %v4632_v9 = vsel %vm242_vm12, %v13895_v62, 0.0 }
0x18e4   :  { %4633 = vadd.xlane.f32.xlu1 %v4632_v9  ;;  %v10093_v12 = vpop.f32.mrb[133].mxu1 }
0x18e5   :  { %v10094_v10 = vadd.f32 %v10093_v12, %v10092_v28  ;;  %v10095_v42 = vpop.f32.mrb[134].mxu1  ;;  %v4635_v44 = vsel %vm242_vm12, %v13898_v1, 0.0  ;;  %v11338_v28 = vld [vmem:[%s15535_s6 + $0x84] ss:$8 sps:$4 sm:$0xff]  }
0x18e6   :  { %4636 = vadd.xlane.f32.xlu0 %v4635_v44  ;;  %v10096_v25 = vpop.f32.mrb[135].mxu1  ;;  %4813 = vmatprep.subr.bf16.mxu0 %v11338_v28  ;;  %v11341_v44 = vld [vmem:[%s15535_s6 + $0x94] ss:$8 sps:$4 sm:$0xff]  }
0x18e7   :  { %v4604_v56 = vadd.f32 %v10094_v10, %v13710_v19  ;;  %v10097_v31 = vadd.f32 %v10096_v25, %v10095_v42  ;;  %v11336_v10 = vld [vmem:[%s15535_s6 + $0x80] ss:$8 sps:$4 sm:$0xff]   ;;  %v11339_v25 = vld [vmem:[%s15535_s6 + $0x90] ss:$8 sps:$4 sm:$0xff]  }
0x18e8   :  { %4814 = vmatpush1.bf16.msra.mxu0 %v11336_v10 }
0x18e9   :  { %v13905_v45 = vadd.f32 %v4609_v43, %v4604_v56  ;;  %v4605_v57 = vadd.f32 %v10097_v31, %v13706_v7  ;;  %4815 = vmatprep.subr.bf16.mxu0 %v11341_v44  ;;  %v11344_v56 = vld [vmem:[%s15535_s6 + $0xa4] ss:$8 sps:$4 sm:$0xff]   ;;  %v11342_v31 = vld [vmem:[%s15535_s6 + $0xa0] ss:$8 sps:$4 sm:$0xff]  }
0x18eb   :  { %v13908_v46 = vadd.f32 %v4609_v43, %v4605_v57  ;;  %v4638_v54 = vsel %vm242_vm12, %v13905_v45, 0.0  ;;  %v11347_v57 = vld [vmem:[%s15535_s6 + $0xb4] ss:$8 sps:$4 sm:$0xff]  }
0x18ec   :  { %4639 = vadd.xlane.f32.xlu1 %v4638_v54  ;;  %4816 = vmatpush1.bf16.msra.mxu0 %v11339_v25  ;;  %v11345_v54 = vld [vmem:[%s15535_s6 + $0xb0] ss:$8 sps:$4 sm:$0xff]  }
0x18ed   :  { %v4641_v6 = vsel %vm242_vm12, %v13908_v46, 0.0  ;;  %4817 = vmatprep.subr.bf16.mxu0 %v11344_v56 }
0x18ee   :  { %4642 = vadd.xlane.f32.xlu0 %v4641_v6 }
0x18f0   :  { %4818 = vmatpush1.bf16.msra.mxu0 %v11342_v31 }
0x18f1   :  { %4819 = vmatprep.subr.bf16.mxu0 %v11347_v57 }
0x18f4   :  { %4820 = vmatpush1.bf16.msra.mxu0 %v11345_v54 }
0x1961   :  { %v4622_v33 = vpop.xlane.xlu1 %4621 }
0x1962   :  { %v4644_v35 = vmul.f32 0.015625, %v4622_v33 }
0x1963   :  { %v4625_v13 = vpop.xlane.xlu0 %4624 }
0x1964   :  { %v13915_v19 = vsub.f32 %v13875_v60, %v4644_v35  ;;  %v4645_v41 = vmul.f32 0.015625, %v4625_v13 }
0x1966   :  { %v13918_v63 = vsub.f32 %v13878_v51, %v4645_v41  ;;  %v4660_v7 = vmul.f32 %v13915_v19, %v13915_v19 }
0x1968   :  { %v4668_v34 = vsel %vm242_vm12, %v4660_v7, 0.0  ;;  %v4661_v32 = vmul.f32 %v13918_v63, %v13918_v63 }
0x1969   :  { %v4628_v11 = vpop.xlane.xlu1 %4627  ;;  %4669 = vadd.xlane.f32.xlu1 %v4668_v34 }
0x196a   :  { %v4646_v16 = vmul.f32 0.015625, %v4628_v11  ;;  %v4671_v43 = vsel %vm242_vm12, %v4661_v32, 0.0 }
0x196b   :  { %v4631_v14 = vpop.xlane.xlu0 %4630  ;;  %4672 = vadd.xlane.f32.xlu0 %v4671_v43 }
0x196c   :  { %v13927_v48 = vsub.f32 %v13885_v58, %v4646_v16  ;;  %v4647_v59 = vmul.f32 0.015625, %v4631_v14  ;;  %v9529_v16 = vld [vmem:[%s15533_s4 + $0x10] sm:$0x3f] }
0x196e   :  { %v13930_v36 = vsub.f32 %v13888_v21, %v4647_v59  ;;  %v4662_v3 = vmul.f32 %v13927_v48, %v13927_v48 }
0x1970   :  { %v4674_v8 = vsel %vm242_vm12, %v4662_v3, 0.0  ;;  %v4663_v61 = vmul.f32 %v13930_v36, %v13930_v36  ;;  %v4727_v3 = vrot.slane %v9529_v16, %v12390_v4 }
0x1971   :  { %v4634_v30 = vpop.xlane.xlu1 %4633  ;;  %4675 = vadd.xlane.f32.xlu1 %v4674_v8 }
0x1972   :  { %v4648_v27 = vmul.f32 0.015625, %v4634_v30  ;;  %v4677_v18 = vsel %vm242_vm12, %v4663_v61, 0.0 }
0x1973   :  { %v4637_v22 = vpop.xlane.xlu0 %4636  ;;  %4678 = vadd.xlane.f32.xlu0 %v4677_v18 }
0x1974   :  { %v13939_v15 = vsub.f32 %v13895_v62, %v4648_v27  ;;  %v4649_v39 = vmul.f32 0.015625, %v4637_v22  ;;  %v4739_v22 = vrot.slane %v9529_v16, %v12396_v17 }
0x1976   :  { %v13942_v49 = vsub.f32 %v13898_v1, %v4649_v39  ;;  %v4664_v37 = vmul.f32 %v13939_v15, %v13939_v15 }
0x1978   :  { %v4680_v5 = vsel %vm242_vm12, %v4664_v37, 0.0  ;;  %v4665_v23 = vmul.f32 %v13942_v49, %v13942_v49 }
0x1979   :  { %4681 = vadd.xlane.f32.xlu1 %v4680_v5  ;;  %v4640_v0 = vpop.xlane.xlu1 %4639 }
0x197a   :  { %v4650_v40 = vmul.f32 0.015625, %v4640_v0  ;;  %v4683_v55 = vsel %vm242_vm12, %v4665_v23, 0.0 }
0x197b   :  { %4684 = vadd.xlane.f32.xlu0 %v4683_v55  ;;  %v4643_v24 = vpop.xlane.xlu0 %4642 }
0x197c   :  { %v13951_v47 = vsub.f32 %v13905_v45, %v4650_v40  ;;  %v4651_v20 = vmul.f32 0.015625, %v4643_v24 }
0x197e   :  { %v13954_v38 = vsub.f32 %v13908_v46, %v4651_v20  ;;  %v4666_v26 = vmul.f32 %v13951_v47, %v13951_v47 }
0x1980   :  { %v4686_v9 = vsel %vm242_vm12, %v4666_v26, 0.0  ;;  %v4667_v12 = vmul.f32 %v13954_v38, %v13954_v38 }
0x1981   :  { %4687 = vadd.xlane.f32.xlu1 %v4686_v9 }
0x1982   :  { %v4689_v42 = vsel %vm242_vm12, %v4667_v12, 0.0 }
0x1983   :  { %4690 = vadd.xlane.f32.xlu0 %v4689_v42 }
0x19f6   :  { %v4670_v6 = vpop.xlane.xlu1 %4669 }
0x19f7   :  { %v4692_v33 = vmul.f32 0.015625, %v4670_v6 }
0x19f8   :  { %v4673_v35 = vpop.xlane.xlu0 %4672 }
0x19f9   :  { %v4700_v13 = vadd.f32 1e-05, %v4692_v33  ;;  %v4693_v41 = vmul.f32 0.015625, %v4673_v35 }
0x19fb   :  { %11748 = vrsqrt.f32 %v4700_v13  ;;  %v4701_v7 = vadd.f32 1e-05, %v4693_v41 }
0x19fd   :  { %11750 = vrsqrt.f32 %v4701_v7 }
0x19fe   :  { %v4676_v34 = vpop.xlane.xlu1 %4675 }
0x19ff   :  { %v4694_v32 = vmul.f32 0.015625, %v4676_v34 }
0x1a00   :  { %v4679_v11 = vpop.xlane.xlu0 %4678 }
0x1a01   :  { %v4702_v43 = vadd.f32 1e-05, %v4694_v32  ;;  %v4695_v14 = vmul.f32 0.015625, %v4679_v11 }
0x1a03   :  { %11752 = vrsqrt.f32 %v4702_v43  ;;  %v4703_v59 = vadd.f32 1e-05, %v4695_v14 }
0x1a05   :  { %v11749_v8 = vpop.eup %11748  ;;  %11754 = vrsqrt.f32 %v4703_v59 }
0x1a06   :  { %v4716_v61 = vmul.f32 %v11749_v8, %v13915_v19  ;;  %v4682_v30 = vpop.xlane.xlu1 %4681 }
0x1a07   :  { %v11751_v27 = vpop.eup %11750  ;;  %v4696_v18 = vmul.f32 0.015625, %v4682_v30 }
0x1a08   :  { %v4728_v39 = vmul.f32 %v4727_v3, %v4716_v61  ;;  %v4717_v37 = vmul.f32 %v11751_v27, %v13918_v63  ;;  %v4685_v5 = vpop.xlane.xlu0 %4684 }
0x1a09   :  { %v4704_v23 = vadd.f32 1e-05, %v4696_v18  ;;  %v4697_v0 = vmul.f32 0.015625, %v4685_v5 }
0x1a0a   :  { %v4729_v40 = vmul.f32 %v4727_v3, %v4717_v37  ;;  %v4740_v24 = vadd.f32 %v4739_v22, %v4728_v39 }
0x1a0b   :  { %11756 = vrsqrt.f32 %v4704_v23  ;;  %v4705_v55 = vadd.f32 1e-05, %v4697_v0 }
0x1a0c   :  { %v4741_v20 = vadd.f32 %v4739_v22, %v4729_v40 }
0x1a0d   :  { %v11753_v26 = vpop.eup %11752  ;;  %11758 = vrsqrt.f32 %v4705_v55 }
0x1a0e   :  { %v4688_v28 = vpop.xlane.xlu1 %4687  ;;  %v4748_v19 = vpack.c.bf16 %v4741_v20, %v4740_v24  ;;  %v4718_v9 = vmul.f32 %v11753_v26, %v13927_v48 }
0x1a0f   :  { %v11755_v12 = vpop.eup %11754  ;;  %v4698_v10 = vmul.f32 0.015625, %v4688_v28 }
0x1a10   :  { %v4691_v42 = vpop.xlane.xlu0 %4690  ;;  %9546 = vmatmul.mubr.msk.bf16.vlgmr.msra.gmra.mrb[112].mxu0 %vm242_vm12, %v4748_v19  ;;  %v4719_v63 = vmul.f32 %v11755_v12, %v13930_v36  ;;  %v4730_v44 = vmul.f32 %v4727_v3, %v4718_v9 }
0x1a11   :  { %v4706_v25 = vadd.f32 1e-05, %v4698_v10  ;;  %v4699_v56 = vmul.f32 0.015625, %v4691_v42  ;;  %4855 = vmatprep.mubr.bf16.mxu0 %v12136_v2 }
0x1a12   :  { %v4731_v31 = vmul.f32 %v4727_v3, %v4719_v63  ;;  %v4742_v54 = vadd.f32 %v4739_v22, %v4730_v44 }
0x1a13   :  { %11760 = vrsqrt.f32 %v4706_v25  ;;  %v4707_v57 = vadd.f32 1e-05, %v4699_v56 }
0x1a14   :  { %v4743_v6 = vadd.f32 %v4739_v22, %v4731_v31 }
0x1a15   :  { %v11757_v33 = vpop.eup %11756  ;;  %11762 = vrsqrt.f32 %v4707_v57 }
0x1a16   :  { %v4749_v48 = vpack.c.bf16 %v4743_v6, %v4742_v54  ;;  %v4720_v35 = vmul.f32 %v11757_v33, %v13939_v15 }
0x1a17   :  { %v11759_v13 = vpop.eup %11758 }
0x1a18   :  { %9547 = vmatmul.mubr.msk.bf16.gmra.mrb[116].mxu0 %vm242_vm12, %v4749_v48  ;;  %v4721_v36 = vmul.f32 %v11759_v13, %v13942_v49  ;;  %v4732_v41 = vmul.f32 %v4727_v3, %v4720_v35 }
0x1a19   :  { %4865 = vmatprep.mubr.bf16.mxu0 %v12136_v2 }
0x1a1a   :  { %v4733_v7 = vmul.f32 %v4727_v3, %v4721_v36  ;;  %v4744_v34 = vadd.f32 %v4739_v22, %v4732_v41 }
0x1a1c   :  { %v4745_v32 = vadd.f32 %v4739_v22, %v4733_v7 }
0x1a1d   :  { %v11761_v11 = vpop.eup %11760 }
0x1a1e   :  { %v4750_v16 = vpack.c.bf16 %v4745_v32, %v4744_v34  ;;  %v4722_v43 = vmul.f32 %v11761_v11, %v13951_v47 }
0x1a1f   :  { %v11763_v14 = vpop.eup %11762 }
0x1a20   :  { %9548 = vmatmul.mubr.msk.bf16.gmra.mrb[120].mxu0 %vm242_vm12, %v4750_v16  ;;  %v4723_v15 = vmul.f32 %v11763_v14, %v13954_v38  ;;  %v4734_v59 = vmul.f32 %v4727_v3, %v4722_v43 }
0x1a21   :  { %4875 = vmatprep.mubr.bf16.mxu0 %v12136_v2 }
0x1a22   :  { %v4735_v8 = vmul.f32 %v4727_v3, %v4723_v15  ;;  %v4746_v49 = vadd.f32 %v4739_v22, %v4734_v59 }
0x1a24   :  { %v4747_v61 = vadd.f32 %v4739_v22, %v4735_v8 }
0x1a26   :  { %v4751_v30 = vpack.c.bf16 %v4747_v61, %v4746_v49 }
0x1a28   :  { %9549 = vmatmul.mubr.msk.bf16.gmra.mrb[124].mxu0 %vm242_vm12, %v4751_v30 }
0x1ae3   :  { %v4847_v27 = vpop.f32.mrb[112].mxu0 }
0x1ae4   :  { %v4849_v18 = vpop.f32.mrb[113].mxu0 }
0x1ae5   :  { %v4851_v39 = vpop.f32.mrb[114].mxu0 }
0x1ae6   :  { %v14006_v37 = vpack.c.bf16 %v4851_v39, %v4847_v27  ;;  %v4853_v47 = vpop.f32.mrb[115].mxu0 }
0x1ae7   :  { %v14008_v5 = vpack.c.bf16 %v4853_v47, %v4849_v18 }
0x1ae8   :  { %4907 = vrot.lane.b32.xlu1 %v14006_v37, %s12138_s27  ;;  %10722 = vmatprep.mubr.msk.bf16.mxu0 %vm537_vm13, %v14006_v37 }
0x1ae9   :  { %10730 = vmatprep.subr.bf16.mxu1 %v14008_v5 }
0x1aea   :  { %10731 = vmatpush3.bf16.msra.mxu1 %v14008_v5 }
0x1aeb   :  { %v4857_v38 = vpop.f32.mrb[116].mxu0 }
0x1aec   :  { %v4859_v3 = vpop.f32.mrb[117].mxu0 }
0x1aed   :  { %v4861_v22 = vpop.f32.mrb[118].mxu0 }
0x1aee   :  { %v14016_v23 = vpack.c.bf16 %v4861_v22, %v4857_v38  ;;  %v4863_v0 = vpop.f32.mrb[119].mxu0 }
0x1aef   :  { %v14018_v40 = vpack.c.bf16 %v4863_v0, %v4859_v3 }
0x1af0   :  { %4909 = vrot.lane.b32.xlu0 %v14016_v23, %s12138_s27 }
0x1af1   :  { %10732 = vmatprep.subr.bf16.mxu1 %v14018_v40 }
0x1af2   :  { %10733 = vmatpush3.bf16.msra.mxu1 %v14018_v40 }
0x1af3   :  { %v4867_v55 = vpop.f32.mrb[120].mxu0 }
0x1af4   :  { %5153 = vrot.lane.b32.xlu0 %v14006_v37, %s12139_s21  ;;  %v4869_v24 = vpop.f32.mrb[121].mxu0 }
0x1af5   :  { %v4871_v20 = vpop.f32.mrb[122].mxu0 }
0x1af6   :  { %v14026_v26 = vpack.c.bf16 %v4871_v20, %v4867_v55  ;;  %v4873_v28 = vpop.f32.mrb[123].mxu0 }
0x1af7   :  { %v14028_v19 = vpack.c.bf16 %v4873_v28, %v4869_v24  ;;  %v14118_v24 = vld [vmem:[%s15532_s3 + $0x10] sm:$0xff] }
0x1af8   :  { %5157 = vrot.lane.b32.xlu0 %v14026_v26, %s12139_s21  ;;  %4911 = vrot.lane.b32.xlu1 %v14026_v26, %s12138_s27 }
0x1af9   :  { %10734 = vmatprep.subr.bf16.mxu1 %v14028_v19 }
0x1afa   :  { %10735 = vmatpush3.bf16.msra.mxu1 %v14028_v19 }
0x1afb   :  { %v4877_v9 = vpop.f32.mrb[124].mxu0 }
0x1afc   :  { %5145 = vrot.lane.b32.xlu0 %v14006_v37, %s12140_s25  ;;  %v4879_v12 = vpop.f32.mrb[125].mxu0 }
0x1afd   :  { %v4881_v10 = vpop.f32.mrb[126].mxu0 }
0x1afe   :  { %v14038_v42 = vpack.c.bf16 %v4881_v10, %v4877_v9  ;;  %v4883_v63 = vpop.f32.mrb[127].mxu0  ;;  %v14124_v9 = vld [vmem:[%s15532_s3] sm:$0xff] }
0x1aff   :  { %v14040_v44 = vpack.c.bf16 %v4883_v63, %v4879_v12 }
0x1b00   :  { %5149 = vrot.lane.b32.xlu0 %v14026_v26, %s12140_s25  ;;  %4913 = vrot.lane.b32.xlu1 %v14038_v42, %s12138_s27 }
0x1b01   :  { %10736 = vmatprep.subr.bf16.mxu1 %v14040_v44 }
0x1b02   :  { %10737 = vmatpush3.bf16.msra.mxu1 %v14040_v44 }
0x1b04   :  { %5581 = vrot.lane.b32.xlu0 %v14006_v37, %s12141_s26  ;;  %5155 = vrot.lane.b32.xlu1 %v14016_v23, %s12139_s21 }
0x1b08   :  { %5585 = vrot.lane.b32.xlu0 %v14026_v26, %s12141_s26  ;;  %5159 = vrot.lane.b32.xlu1 %v14038_v42, %s12139_s21 }
0x1b0c   :  { %5573 = vrot.lane.b32.xlu0 %v14006_v37, %s12142_s28  ;;  %5147 = vrot.lane.b32.xlu1 %v14016_v23, %s12140_s25 }
0x1b10   :  { %5577 = vrot.lane.b32.xlu0 %v14026_v26, %s12142_s28  ;;  %5151 = vrot.lane.b32.xlu1 %v14038_v42, %s12140_s25 }
0x1b14   :  { %5583 = vrot.lane.b32.xlu1 %v14016_v23, %s12141_s26 }
0x1b18   :  { %5575 = vrot.lane.b32.xlu1 %v14016_v23, %s12142_s28 }
0x1b1c   :  { %5314 = vrot.lane.b32.xlu1 %v14008_v5, %s12140_s25 }
0x1b20   :  { %5587 = vrot.lane.b32.xlu1 %v14038_v42, %s12141_s26 }
0x1b24   :  { %5579 = vrot.lane.b32.xlu1 %v14038_v42, %s12142_s28 }
0x1b5a   :  { %v4908_v25 = vpop.permute.xlu1 %4907 }
0x1b5b   :  { %11194 = vmatprep.subr.msk.bf16.mxu0 %vm537_vm13, %v4908_v25  ;;  %v4928_v56 = vsel %vm537_vm13, %v4908_v25, 0  ;;  %v14130_v25 = vld [vmem:[%s15532_s3 + $0x18] sm:$0xff] }
0x1b5c   :  { %10715 = vmatpush3.bf16.xpose.msra.mxu0 %v4928_v56 }
0x1b62   :  { %v4910_v31 = vpop.permute.xlu0 %4909 }
0x1b63   :  { %11195 = vmatprep.subr.msk.bf16.mxu0 %vm537_vm13, %v4910_v31  ;;  %v4931_v57 = vsel %vm537_vm13, %v4910_v31, 0 }
0x1b64   :  { %10717 = vmatpush3.bf16.xpose.msra.mxu0 %v4931_v57 }
0x1b66   :  { %v5154_v35 = vpop.permute.xlu0 %5153 }
0x1b67   :  { %v5174_v41 = vsel %vm537_vm13, %v5154_v35, 0 }
0x1b6a   :  { %v4912_v54 = vpop.permute.xlu1 %4911  ;;  %v5158_v7 = vpop.permute.xlu0 %5157 }
0x1b6b   :  { %11196 = vmatprep.subr.msk.bf16.mxu0 %vm537_vm13, %v4912_v54  ;;  %v4934_v6 = vsel %vm537_vm13, %v4912_v54, 0  ;;  %v5180_v15 = vsel %vm537_vm13, %v5158_v7, 0  ;;  %v14136_v54 = vld [vmem:[%s15532_s3 + $0x8] sm:$0xff] }
0x1b6c   :  { %10719 = vmatpush3.bf16.xpose.msra.mxu0 %v4934_v6 }
0x1b6e   :  { %v5146_v11 = vpop.permute.xlu0 %5145 }
0x1b72   :  { %v4914_v33 = vpop.permute.xlu1 %4913  ;;  %v5150_v59 = vpop.permute.xlu0 %5149 }
0x1b73   :  { %11197 = vmatprep.subr.msk.bf16.mxu0 %vm537_vm13, %v4914_v33  ;;  %v4937_v48 = vsel %vm537_vm13, %v4914_v33, 0 }
0x1b74   :  { %10721 = vmatpush3.bf16.xpose.msra.mxu0 %v4937_v48 }
0x1b75   :  { %11198 = vmatprep.subr.msk.bf16.mxu0 %vm537_vm13, %v5154_v35 }
0x1b76   :  { %v5156_v13 = vpop.permute.xlu1 %5155  ;;  %v5582_v61 = vpop.permute.xlu0 %5581 }
0x1b77   :  { %v5177_v16 = vsel %vm537_vm13, %v5156_v13, 0  ;;  %v5602_v30 = vsel %vm537_vm13, %v5582_v61, 0 }
0x1b7a   :  { %v5160_v36 = vpop.permute.xlu1 %5159  ;;  %v5586_v27 = vpop.permute.xlu0 %5585 }
0x1b7b   :  { %10723 = vmatmul.mubr.msk.bf16.vlgmr.msra.gmra.mrb[128].mxu0 %vm537_vm13, %v14016_v23  ;;  %v5183_v49 = vsel %vm537_vm13, %v5160_v36, 0  ;;  %v5608_v47 = vsel %vm537_vm13, %v5586_v27, 0 }
0x1b7c   :  { %10726 = vmatprep.mubr.msk.bf16.mxu0 %vm537_vm13, %v14026_v26  ;;  %10747 = vmatpush3.bf16.xpose.msra.mxu0 %v5174_v41 }
0x1b7d   :  { %11199 = vmatprep.subr.msk.bf16.mxu0 %vm537_vm13, %v5156_v13  ;;  %v14142_v13 = vld [vmem:[%s15532_s3 + $0x30] sm:$0xff] }
0x1b7e   :  { %v5148_v34 = vpop.permute.xlu1 %5147  ;;  %v5574_v18 = vpop.permute.xlu0 %5573 }
0x1b82   :  { %v5152_v32 = vpop.permute.xlu1 %5151  ;;  %v5578_v22 = vpop.permute.xlu0 %5577 }
0x1b83   :  { %10727 = vmatmul.mubr.msk.bf16.gmra.mrb[132].mxu0 %vm537_vm13, %v14038_v42 }
0x1b84   :  { %10749 = vmatpush3.bf16.xpose.msra.mxu0 %v5177_v16  ;;  %10754 = vmatprep.mubr.msk.bf16.mxu0 %vm537_vm13, %v5146_v11  ;;  %v14154_v16 = vld [vmem:[%s15532_s3 + $0x38] sm:$0xff] }
0x1b85   :  { %11200 = vmatprep.subr.msk.bf16.mxu0 %vm537_vm13, %v5158_v7  ;;  %v14148_v7 = vld [vmem:[%s15532_s3 + $0x20] sm:$0xff] }
0x1b86   :  { %v5584_v43 = vpop.permute.xlu1 %5583 }
0x1b87   :  { %v5605_v39 = vsel %vm537_vm13, %v5584_v43, 0 }
0x1b8a   :  { %v5576_v14 = vpop.permute.xlu1 %5575 }
0x1b8c   :  { %10751 = vmatpush3.bf16.xpose.msra.mxu0 %v5180_v15 }
0x1b8d   :  { %11201 = vmatprep.subr.msk.bf16.mxu0 %vm537_vm13, %v5160_v36 }
0x1b8e   :  { %v14096_v8 = vpop.permute.xlu1 %5314 }
0x1b8f   :  { %10762 = vmatprep.subr.bf16.mxu1 %v14096_v8 }
0x1b92   :  { %v5588_v38 = vpop.permute.xlu1 %5587 }
0x1b93   :  { %v5611_v3 = vsel %vm537_vm13, %v5588_v38, 0 }
0x1b94   :  { %10753 = vmatpush3.bf16.xpose.msra.mxu0 %v5183_v49 }
0x1b95   :  { %11202 = vmatprep.subr.msk.bf16.mxu0 %vm537_vm13, %v5582_v61 }
0x1b96   :  { %v5580_v0 = vpop.permute.xlu1 %5579 }
0x1b9b   :  { %10755 = vmatmul.mubr.msk.bf16.vlgmr.msra.gmra.mrb[136].mxu0 %vm537_vm13, %v5148_v34 }
0x1b9c   :  { %10758 = vmatprep.mubr.msk.bf16.mxu0 %vm537_vm13, %v5150_v59  ;;  %10799 = vmatpush3.bf16.xpose.msra.mxu0 %v5602_v30  ;;  %v14160_v59 = vld [vmem:[%s15532_s3 + $0x28] sm:$0xff] }
0x1b9d   :  { %11203 = vmatprep.subr.msk.bf16.mxu0 %vm537_vm13, %v5584_v43 }
0x1ba3   :  { %10759 = vmatmul.mubr.msk.bf16.gmra.mrb[140].mxu0 %vm537_vm13, %v5152_v32 }
0x1ba4   :  { %10801 = vmatpush3.bf16.xpose.msra.mxu0 %v5605_v39  ;;  %10806 = vmatprep.mubr.msk.bf16.mxu0 %vm537_vm13, %v5574_v18 }
0x1ba5   :  { %11204 = vmatprep.subr.msk.bf16.mxu0 %vm537_vm13, %v5586_v27 }
0x1bac   :  { %10803 = vmatpush3.bf16.xpose.msra.mxu0 %v5608_v47 }
0x1bad   :  { %11205 = vmatprep.subr.msk.bf16.mxu0 %vm537_vm13, %v5588_v38 }
0x1bb4   :  { %10805 = vmatpush3.bf16.xpose.msra.mxu0 %v5611_v3 }
0x1bbb   :  { %10807 = vmatmul.mubr.msk.bf16.vlgmr.msra.gmra.mrb[144].mxu0 %vm537_vm13, %v5576_v14 }
0x1bbc   :  { %10810 = vmatprep.mubr.msk.bf16.mxu0 %vm537_vm13, %v5578_v22 }
0x1bc3   :  { %10811 = vmatmul.mubr.msk.bf16.gmra.mrb[148].mxu0 %vm537_vm13, %v5580_v0 }
0x1c4e   :  { %v10724_v55 = vpop.f32.mrb[128].mxu0 }
0x1c4f   :  { %v4982_v20 = vadd.f32 %v14118_v24, %v10724_v55  ;;  %v4973_v28 = vpop.f32.mrb[129].mxu0 }
0x1c50   :  { %v4974_v12 = vadd.f32 %v14124_v9, %v4973_v28  ;;  %v10725_v10 = vpop.f32.mrb[130].mxu0 }
0x1c51   :  { %v5008_v63 = vmul.f32 1.442695, %v4982_v20  ;;  %v4985_v56 = vadd.f32 %v14130_v25, %v10725_v10  ;;  %v4976_v31 = vpop.f32.mrb[131].mxu0 }
0x1c52   :  { %v5004_v57 = vmul.f32 1.442695, %v4974_v12  ;;  %v4977_v6 = vadd.f32 %v14136_v54, %v4976_v31 }
0x1c53   :  { %11764 = vpow2.f32 %v5008_v63  ;;  %v5010_v48 = vmul.f32 1.442695, %v4985_v56 }
0x1c54   :  { %v5006_v33 = vmul.f32 1.442695, %v4977_v6  ;;  %11766 = vpow2.f32 %v5004_v57 }
0x1c56   :  { %11768 = vpow2.f32 %v5006_v33  ;;  %v10728_v35 = vpop.f32.mrb[132].mxu0 }
0x1c57   :  { %v4998_v36 = vadd.f32 %v14142_v13, %v10728_v35  ;;  %v4989_v41 = vpop.f32.mrb[133].mxu0  ;;  %11770 = vpow2.f32 %v5010_v48 }
0x1c58   :  { %v4990_v34 = vadd.f32 %v14148_v7, %v4989_v41  ;;  %v10729_v32 = vpop.f32.mrb[134].mxu0 }
0x1c59   :  { %v5016_v11 = vmul.f32 1.442695, %v4998_v36  ;;  %v5001_v43 = vadd.f32 %v14154_v16, %v10729_v32  ;;  %v4992_v14 = vpop.f32.mrb[135].mxu0 }
0x1c5a   :  { %v5012_v15 = vmul.f32 1.442695, %v4990_v34  ;;  %v4993_v49 = vadd.f32 %v14160_v59, %v4992_v14 }
0x1c5b   :  { %11772 = vpow2.f32 %v5016_v11  ;;  %v5018_v61 = vmul.f32 1.442695, %v5001_v43 }
0x1c5c   :  { %11774 = vpow2.f32 %v5012_v15  ;;  %v5014_v27 = vmul.f32 1.442695, %v4993_v49 }
0x1c5d   :  { %v14163_v30 = vpop.eup %11764  ;;  %11776 = vpow2.f32 %v5018_v61 }
0x1c5e   :  { %v5026_v18 = vsel %vm242_vm12, %v14163_v30, 0.0  ;;  %v14167_v39 = vpop.eup %11766  ;;  %11778 = vpow2.f32 %v5014_v27 }
0x1c5f   :  { %5027 = vadd.xlane.f32.xlu0 %v5026_v18  ;;  %v5020_v3 = vsel %vm242_vm12, %v14167_v39, 0.0 }
0x1c60   :  { %v14169_v47 = vpop.eup %11768 }
0x1c61   :  { %v5023_v38 = vsel %vm242_vm12, %v14169_v47, 0.0  ;;  %v14175_v22 = vpop.eup %11770 }
0x1c62   :  { %5024 = vadd.xlane.f32.xlu1 %v5023_v38  ;;  %v5029_v28 = vsel %vm242_vm12, %v14175_v22, 0.0 }
0x1c63   :  { %5021 = vadd.xlane.f32.xlu0 %v5020_v3 }
0x1c65   :  { %v14177_v0 = vpop.eup %11772 }
0x1c66   :  { %v14179_v55 = vpop.eup %11774  ;;  %v5038_v20 = vsel %vm242_vm12, %v14177_v0, 0.0 }
0x1c67   :  { %v14185_v12 = vpop.eup %11776  ;;  %5039 = vadd.xlane.f32.xlu1 %v5038_v20  ;;  %5030 = vadd.xlane.f32.xlu0 %v5029_v28  ;;  %v5032_v10 = vsel %vm242_vm12, %v14179_v55, 0.0 }
0x1c68   :  { %v5041_v63 = vsel %vm242_vm12, %v14185_v12, 0.0  ;;  %v14191_v56 = vpop.eup %11778 }
0x1c69   :  { %v5035_v57 = vsel %vm242_vm12, %v14191_v56, 0.0 }
0x1c6b   :  { %5033 = vadd.xlane.f32.xlu1 %v5032_v10  ;;  %5042 = vadd.xlane.f32.xlu0 %v5041_v63 }
0x1c6e   :  { %v10756_v31 = vpop.f32.mrb[136].mxu0 }
0x1c6f   :  { %v5228_v6 = vadd.f32 %v14118_v24, %v10756_v31  ;;  %5036 = vadd.xlane.f32.xlu0 %v5035_v57  ;;  %v5219_v33 = vpop.f32.mrb[137].mxu0 }
0x1c70   :  { %v5220_v48 = vadd.f32 %v14124_v9, %v5219_v33  ;;  %v10757_v35 = vpop.f32.mrb[138].mxu0 }
0x1c71   :  { %v5254_v36 = vmul.f32 1.442695, %v5228_v6  ;;  %v5231_v41 = vadd.f32 %v14130_v25, %v10757_v35  ;;  %v5222_v34 = vpop.f32.mrb[139].mxu0 }
0x1c72   :  { %v5250_v32 = vmul.f32 1.442695, %v5220_v48  ;;  %v5223_v11 = vadd.f32 %v14136_v54, %v5222_v34 }
0x1c73   :  { %11780 = vpow2.f32 %v5254_v36  ;;  %v5256_v43 = vmul.f32 1.442695, %v5231_v41 }
0x1c74   :  { %11782 = vpow2.f32 %v5250_v32  ;;  %v5252_v14 = vmul.f32 1.442695, %v5223_v11 }
0x1c75   :  { %11784 = vpow2.f32 %v5256_v43 }
0x1c76   :  { %v10760_v15 = vpop.f32.mrb[140].mxu0  ;;  %11786 = vpow2.f32 %v5252_v14 }
0x1c77   :  { %v5244_v49 = vadd.f32 %v14142_v13, %v10760_v15  ;;  %v5235_v61 = vpop.f32.mrb[141].mxu0 }
0x1c78   :  { %v5236_v27 = vadd.f32 %v14148_v7, %v5235_v61  ;;  %v10761_v18 = vpop.f32.mrb[142].mxu0 }
0x1c79   :  { %v5262_v38 = vmul.f32 1.442695, %v5244_v49  ;;  %v5247_v3 = vadd.f32 %v14154_v16, %v10761_v18  ;;  %v5238_v20 = vpop.f32.mrb[143].mxu0 }
0x1c7a   :  { %v5258_v28 = vmul.f32 1.442695, %v5236_v27  ;;  %v5239_v10 = vadd.f32 %v14160_v59, %v5238_v20 }
0x1c7b   :  { %11788 = vpow2.f32 %v5262_v38  ;;  %v5264_v63 = vmul.f32 1.442695, %v5247_v3 }
0x1c7c   :  { %11790 = vpow2.f32 %v5258_v28  ;;  %v5260_v31 = vmul.f32 1.442695, %v5239_v10 }
0x1c7d   :  { %v14203_v57 = vpop.eup %11780  ;;  %11792 = vpow2.f32 %v5264_v63 }
0x1c7e   :  { %v14205_v6 = vpop.eup %11782  ;;  %v5272_v33 = vsel %vm242_vm12, %v14203_v57, 0.0  ;;  %11794 = vpow2.f32 %v5260_v31 }
0x1c7f   :  { %v14209_v48 = vpop.eup %11784  ;;  %5273 = vadd.xlane.f32.xlu1 %v5272_v33  ;;  %v5266_v41 = vsel %vm242_vm12, %v14205_v6, 0.0 }
0x1c80   :  { %v5275_v35 = vsel %vm242_vm12, %v14209_v48, 0.0  ;;  %v14213_v36 = vpop.eup %11786 }
0x1c81   :  { %5276 = vadd.xlane.f32.xlu0 %v5275_v35  ;;  %v5269_v34 = vsel %vm242_vm12, %v14213_v36, 0.0 }
0x1c83   :  { %5267 = vadd.xlane.f32.xlu1 %v5266_v41 }
0x1c85   :  { %v14219_v32 = vpop.eup %11788  ;;  %5270 = vadd.xlane.f32.xlu0 %v5269_v34 }
0x1c86   :  { %v14221_v11 = vpop.eup %11790  ;;  %v5284_v43 = vsel %vm242_vm12, %v14219_v32, 0.0 }
0x1c87   :  { %v14225_v14 = vpop.eup %11792  ;;  %5285 = vadd.xlane.f32.xlu1 %v5284_v43  ;;  %v5278_v61 = vsel %vm242_vm12, %v14221_v11, 0.0 }
0x1c88   :  { %v5287_v15 = vsel %vm242_vm12, %v14225_v14, 0.0  ;;  %v14229_v49 = vpop.eup %11794 }
0x1c89   :  { %5288 = vadd.xlane.f32.xlu0 %v5287_v15  ;;  %v5281_v27 = vsel %vm242_vm12, %v14229_v49, 0.0 }
0x1c8b   :  { %5279 = vadd.xlane.f32.xlu1 %v5278_v61 }
0x1c8d   :  { %5282 = vadd.xlane.f32.xlu0 %v5281_v27 }
0x1c8e   :  { %v10808_v18 = vpop.f32.mrb[144].mxu0 }
0x1c8f   :  { %v5647_v38 = vpop.f32.mrb[145].mxu0  ;;  %v5656_v33 = vadd.f32 %v14118_v24, %v10808_v18 }
0x1c90   :  { %v10809_v3 = vpop.f32.mrb[146].mxu0  ;;  %v5648_v41 = vadd.f32 %v14124_v9, %v5647_v38 }
0x1c91   :  { %v5650_v20 = vpop.f32.mrb[147].mxu0  ;;  %v5682_v35 = vmul.f32 1.442695, %v5656_v33 }
0x1c92   :  { %v5651_v34 = vadd.f32 %v14136_v54, %v5650_v20 }
0x1c93   :  { %11796 = vpow2.f32 %v5682_v35 }
0x1c94   :  { %v5680_v43 = vmul.f32 1.442695, %v5651_v34 }
0x1c96   :  { %v10812_v28 = vpop.f32.mrb[148].mxu0 }
0x1c97   :  { %v5663_v10 = vpop.f32.mrb[149].mxu0 }
0x1c98   :  { %v10813_v63 = vpop.f32.mrb[150].mxu0  ;;  %v5664_v27 = vadd.f32 %v14148_v7, %v5663_v10 }
0x1c99   :  { %v5666_v31 = vpop.f32.mrb[151].mxu0 }
0x1c9a   :  { %v5667_v38 = vadd.f32 %v14160_v59, %v5666_v31  ;;  %v5686_v33 = vmul.f32 1.442695, %v5664_v27 }
0x1c9c   :  { %5318 = vrot.lane.b32.xlu1 %v14028_v19, %s12140_s25 }
0x1c9d   :  { %v14267_v20 = vpop.eup %11796 }
0x1ca0   :  { %5320 = vrot.lane.b32.xlu1 %v14040_v44, %s12140_s25 }
0x1ca3   :  { %5316 = vrot.lane.b32.xlu0 %v14018_v40, %s12140_s25 }
0x1ca4   :  { %5932 = vrot.lane.b32.xlu1 %v14016_v23, %s12143_s2 }
0x1ca7   :  { %5930 = vrot.lane.b32.xlu0 %v14006_v37, %s12143_s2 }
0x1ca8   :  { %5936 = vrot.lane.b32.xlu1 %v14038_v42, %s12143_s2 }
0x1cab   :  { %5934 = vrot.lane.b32.xlu0 %v14026_v26, %s12143_s2 }
0x1cac   :  { %5924 = vrot.lane.b32.xlu1 %v14016_v23, %s12144_s29  ;;  %v5678_v23 = vmul.f32 1.442695, %v5648_v41 }
0x1cae   :  { %11798 = vpow2.f32 %v5678_v23 }
0x1caf   :  { %5922 = vrot.lane.b32.xlu0 %v14006_v37, %s12144_s29  ;;  %v5659_v37 = vadd.f32 %v14130_v25, %v10809_v3  ;;  %11800 = vpow2.f32 %v5680_v43  ;;  %v5688_v3 = vmul.f32 1.442695, %v5667_v38 }
0x1cb0   :  { %5928 = vrot.lane.b32.xlu1 %v14038_v42, %s12144_s29  ;;  %v5672_v42 = vadd.f32 %v14142_v13, %v10812_v28  ;;  %v5700_v28 = vsel %vm242_vm12, %v14267_v20, 0.0 }
0x1cb1   :  { %v5684_v15 = vmul.f32 1.442695, %v5659_v37 }
0x1cb2   :  { %v5690_v61 = vmul.f32 1.442695, %v5672_v42 }
0x1cb3   :  { %5926 = vrot.lane.b32.xlu0 %v14026_v26, %s12144_s29  ;;  %v5675_v26 = vadd.f32 %v14154_v16, %v10813_v63  ;;  %11802 = vpow2.f32 %v5684_v15 }
0x1cb4   :  { %5738 = vrot.lane.b32.xlu1 %v14008_v5, %s12142_s28  ;;  %11804 = vpow2.f32 %v5690_v61 }
0x1cb5   :  { %v5692_v18 = vmul.f32 1.442695, %v5675_v26 }
0x1cb7   :  { %11806 = vpow2.f32 %v5692_v18 }
0x1cb8   :  { %v14271_v35 = vpop.eup %11798  ;;  %11808 = vpow2.f32 %v5686_v33 }
0x1cb9   :  { %v14273_v63 = vpop.eup %11800  ;;  %11810 = vpow2.f32 %v5688_v3  ;;  %v5694_v10 = vsel %vm242_vm12, %v14271_v35, 0.0 }
0x1cba   :  { %v5697_v41 = vsel %vm242_vm12, %v14273_v63, 0.0 }
0x1cbd   :  { %v14277_v31 = vpop.eup %11802 }
0x1cbe   :  { %v14281_v34 = vpop.eup %11804  ;;  %v5703_v23 = vsel %vm242_vm12, %v14277_v31, 0.0 }
0x1cbf   :  { %v5712_v43 = vsel %vm242_vm12, %v14281_v34, 0.0 }
0x1cc1   :  { %v14285_v37 = vpop.eup %11806 }
0x1cc2   :  { %v14289_v42 = vpop.eup %11808  ;;  %v5715_v15 = vsel %vm242_vm12, %v14285_v37, 0.0 }
0x1cc3   :  { %v14293_v26 = vpop.eup %11810  ;;  %v5706_v61 = vsel %vm242_vm12, %v14289_v42, 0.0 }
0x1cc4   :  { %v5709_v27 = vsel %vm242_vm12, %v14293_v26, 0.0 }
0x1cd2   :  { %5701 = vadd.xlane.f32.xlu0 %v5700_v28 }
0x1cd6   :  { %5695 = vadd.xlane.f32.xlu0 %v5694_v10 }
0x1cd8   :  { %5698 = vadd.xlane.f32.xlu1 %v5697_v41 }
0x1cda   :  { %5704 = vadd.xlane.f32.xlu0 %v5703_v23 }
0x1cdc   :  { %5713 = vadd.xlane.f32.xlu1 %v5712_v43 }
0x1cde   :  { %5716 = vadd.xlane.f32.xlu0 %v5715_v15 }
0x1ce0   :  { %5707 = vadd.xlane.f32.xlu1 %v5706_v61 }
0x1ce2   :  { %5710 = vadd.xlane.f32.xlu0 %v5709_v27 }
0x1cec   :  { %v5028_v18 = vpop.xlane.xlu0 %5027 }
0x1cef   :  { %v5025_v38 = vpop.xlane.xlu1 %5024 }
0x1cf0   :  { %11812 = vrcp.f32 %v5025_v38  ;;  %v5022_v33 = vpop.xlane.xlu0 %5021 }
0x1cf1   :  { %11814 = vrcp.f32 %v5022_v33  ;;  %5742 = vrot.lane.b32.xlu1 %v14028_v19, %s12142_s28 }
0x1cf2   :  { %11816 = vrcp.f32 %v5028_v18 }
0x1cf4   :  { %v5031_v3 = vpop.xlane.xlu0 %5030  ;;  %v5040_v28 = vpop.xlane.xlu1 %5039 }
0x1cf5   :  { %11818 = vrcp.f32 %v5031_v3  ;;  %5744 = vrot.lane.b32.xlu1 %v14040_v44, %s12142_s28 }
0x1cf8   :  { %v5043_v10 = vpop.xlane.xlu0 %5042  ;;  %5740 = vrot.lane.b32.xlu0 %v14018_v40, %s12142_s28  ;;  %v5034_v41 = vpop.xlane.xlu1 %5033 }
0x1cf9   :  { %6087 = vrot.lane.b32.xlu1 %v14008_v5, %s12144_s29  ;;  %11820 = vrcp.f32 %v5043_v10 }
0x1cfa   :  { %v11813_v23 = vpop.eup %11812  ;;  %11822 = vrcp.f32 %v5034_v41 }
0x1cfb   :  { %v11815_v43 = vpop.eup %11814  ;;  %v5053_v15 = vmul.f32 %v11813_v23, %v14169_v47  ;;  %11824 = vrcp.f32 %v5040_v28 }
0x1cfc   :  { %v5037_v61 = vpop.xlane.xlu0 %5036  ;;  %v5052_v27 = vmul.f32 %v11815_v43, %v14167_v39  ;;  %v11817_v18 = vpop.eup %11816 }
0x1cfd   :  { %11826 = vrcp.f32 %v5037_v61  ;;  %6089 = vrot.lane.b32.xlu1 %v14018_v40, %s12144_s29  ;;  %v5054_v3 = vmul.f32 %v11817_v18, %v14163_v30 }
0x1cfe   :  { %v5060_v38 = vpack.c.bf16 %v5053_v15, %v5052_v27 }
0x1cff   :  { %v11819_v33 = vpop.eup %11818 }
0x1d00   :  { %v5055_v5 = vmul.f32 %v11819_v33, %v14175_v22  ;;  %10738 = vmatprep.mubr.msk.bf16.mxu1 %vm242_vm12, %v5060_v38 }
0x1d02   :  { %v5061_v10 = vpack.c.bf16 %v5055_v5, %v5054_v3 }
0x1d03   :  { %v11821_v41 = vpop.eup %11820 }
0x1d04   :  { %10739 = vmatmul.mubr.msk.bf16.vlgmr.msra.gmra.mrb[136].mxu1 %vm242_vm12, %v5061_v10  ;;  %v11823_v47 = vpop.eup %11822  ;;  %v5059_v23 = vmul.f32 %v11821_v41, %v14185_v12 }
0x1d05   :  { %10763 = vmatpush3.bf16.msra.mxu1 %v14096_v8  ;;  %v11825_v39 = vpop.eup %11824  ;;  %v5056_v40 = vmul.f32 %v11823_v47, %v14179_v55 }
0x1d06   :  { %v5058_v30 = vmul.f32 %v11825_v39, %v14177_v0 }
0x1d07   :  { %v11827_v28 = vpop.eup %11826 }
0x1d08   :  { %v5057_v43 = vmul.f32 %v11827_v28, %v14191_v56  ;;  %v5063_v15 = vpack.c.bf16 %v5059_v23, %v5058_v30 }
0x1d0a   :  { %v5062_v22 = vpack.c.bf16 %v5057_v43, %v5056_v40 }
0x1d0c   :  { %10742 = vmatprep.mubr.msk.bf16.mxu1 %vm242_vm12, %v5062_v22  ;;  %v5274_v61 = vpop.xlane.xlu1 %5273 }
0x1d0d   :  { %10743 = vmatmul.mubr.msk.bf16.gmra.mrb[140].mxu1 %vm242_vm12, %v5063_v15 }
0x1d0e   :  { %v5277_v27 = vpop.xlane.xlu0 %5276 }
0x1d10   :  { %v5268_v18 = vpop.xlane.xlu1 %5267 }
0x1d11   :  { %11828 = vrcp.f32 %v5268_v18 }
0x1d12   :  { %v5271_v8 = vpop.xlane.xlu0 %5270 }
0x1d13   :  { %11830 = vrcp.f32 %v5271_v8 }
0x1d14   :  { %v5286_v38 = vpop.xlane.xlu1 %5285  ;;  %11832 = vrcp.f32 %v5277_v27 }
0x1d15   :  { %11834 = vrcp.f32 %v5274_v61 }
0x1d16   :  { %v5289_v12 = vpop.xlane.xlu0 %5288 }
0x1d18   :  { %v5280_v55 = vpop.xlane.xlu1 %5279 }
0x1d19   :  { %11836 = vrcp.f32 %v5280_v55 }
0x1d1a   :  { %v5283_v56 = vpop.xlane.xlu0 %5282 }
0x1d1b   :  { %v11829_v0 = vpop.eup %11828  ;;  %11838 = vrcp.f32 %v5283_v56 }
0x1d1c   :  { %v5319_v33 = vpop.permute.xlu1 %5318  ;;  %v5298_v10 = vmul.f32 %v11829_v0, %v14205_v6  ;;  %11840 = vrcp.f32 %v5289_v12 }
0x1d1d   :  { %v11831_v3 = vpop.eup %11830  ;;  %11842 = vrcp.f32 %v5286_v38 }
0x1d1e   :  { %v5317_v5 = vpop.permute.xlu0 %5316  ;;  %v5299_v41 = vmul.f32 %v11831_v3, %v14213_v36  ;;  %v11833_v28 = vpop.eup %11832 }
0x1d1f   :  { %10764 = vmatprep.subr.bf16.mxu1 %v5317_v5  ;;  %v11835_v40 = vpop.eup %11834  ;;  %v5301_v22 = vmul.f32 %v11833_v28, %v14209_v48 }
0x1d20   :  { %10765 = vmatpush3.bf16.msra.mxu1 %v5317_v5  ;;  %v5321_v47 = vpop.permute.xlu1 %5320  ;;  %v5306_v39 = vpack.c.bf16 %v5299_v41, %v5298_v10  ;;  %v5300_v27 = vmul.f32 %v11835_v40, %v14203_v57  ;;  %v11349_v41 = vld [vmem:[%s15536_s7 + $0x40] sm:$0xff]  }
0x1d21   :  { %10766 = vmatprep.subr.bf16.mxu1 %v5319_v33 }
0x1d22   :  { %v5931_v23 = vpop.permute.xlu0 %5930  ;;  %10770 = vmatprep.mubr.msk.bf16.mxu1 %vm242_vm12, %v5306_v39  ;;  %v5307_v8 = vpack.c.bf16 %v5301_v22, %v5300_v27 }
0x1d23   :  { %11206 = vmatprep.subr.msk.bf16.mxu0 %vm537_vm13, %v5931_v23  ;;  %v5951_v43 = vsel %vm537_vm13, %v5931_v23, 0  ;;  %v11837_v30 = vpop.eup %11836 }
0x1d24   :  { %10767 = vmatpush3.bf16.msra.mxu1 %v5319_v33  ;;  %10841 = vmatpush3.bf16.xpose.msra.mxu0 %v5951_v43  ;;  %v5933_v6 = vpop.permute.xlu1 %5932  ;;  %v5302_v18 = vmul.f32 %v11837_v30, %v14221_v11 }
0x1d25   :  { %v11839_v36 = vpop.eup %11838  ;;  %10768 = vmatprep.subr.bf16.mxu1 %v5321_v47  ;;  %11207 = vmatprep.subr.msk.bf16.mxu0 %vm537_vm13, %v5933_v6  ;;  %v5954_v48 = vsel %vm537_vm13, %v5933_v6, 0 }
0x1d26   :  { %v5935_v15 = vpop.permute.xlu0 %5934  ;;  %v5303_v61 = vmul.f32 %v11839_v36, %v14229_v49  ;;  %v11841_v38 = vpop.eup %11840 }
0x1d27   :  { %v11843_v56 = vpop.eup %11842  ;;  %v5305_v57 = vmul.f32 %v11841_v38, %v14225_v14  ;;  %v5957_v0 = vsel %vm537_vm13, %v5935_v15, 0 }
0x1d28   :  { %10769 = vmatpush3.bf16.msra.mxu1 %v5321_v47  ;;  %v5308_v55 = vpack.c.bf16 %v5303_v61, %v5302_v18  ;;  %v5304_v11 = vmul.f32 %v11843_v56, %v14219_v32  ;;  %v5937_v33 = vpop.permute.xlu1 %5936  ;;  %v11348_v32 = vld [vmem:[%s15536_s7 + $0x48] sm:$0xff]  }
0x1d29   :  { %v5960_v3 = vsel %vm537_vm13, %v5937_v33, 0  ;;  %10778 = vmatprep.subr.bf16.mxu1 %v11348_v32 }
0x1d2a   :  { %v5923_v12 = vpop.permute.xlu0 %5922  ;;  %v5309_v49 = vpack.c.bf16 %v5305_v57, %v5304_v11 }
0x1d2b   :  { %10771 = vmatmul.mubr.msk.bf16.vlgmr.msra.gmra.mrb[144].mxu1 %vm242_vm12, %v5307_v8  ;;  %10848 = vmatprep.mubr.msk.bf16.mxu0 %vm537_vm13, %v5923_v12 }
0x1d2c   :  { %10774 = vmatprep.mubr.msk.bf16.mxu1 %vm242_vm12, %v5308_v55  ;;  %10843 = vmatpush3.bf16.xpose.msra.mxu0 %v5954_v48  ;;  %v5925_v5 = vpop.permute.xlu1 %5924 }
0x1d2d   :  { %11208 = vmatprep.subr.msk.bf16.mxu0 %vm537_vm13, %v5935_v15  ;;  %10779 = vmatpush3.bf16.msra.mxu1 %v11348_v32 }
0x1d2e   :  { %v5927_v10 = vpop.permute.xlu0 %5926  ;;  %10788 = vmatprep.subr.bf16.mxu1 %v11349_v41 }
0x1d30   :  { %v5929_v14 = vpop.permute.xlu1 %5928 }
0x1d33   :  { %10775 = vmatmul.mubr.msk.bf16.gmra.mrb[148].mxu1 %vm242_vm12, %v5309_v49 }
0x1d34   :  { %10845 = vmatpush3.bf16.xpose.msra.mxu0 %v5957_v0  ;;  %v5739_v56 = vpop.permute.xlu1 %5738 }
0x1d35   :  { %11209 = vmatprep.subr.msk.bf16.mxu0 %vm537_vm13, %v5937_v33 }
0x1d3c   :  { %10847 = vmatpush3.bf16.xpose.msra.mxu0 %v5960_v3 }
0x1d43   :  { %10849 = vmatmul.mubr.msk.bf16.vlgmr.msra.gmra.mrb[152].mxu0 %vm537_vm13, %v5925_v5 }
0x1d44   :  { %10852 = vmatprep.mubr.msk.bf16.mxu0 %vm537_vm13, %v5927_v10 }
0x1d4b   :  { %10853 = vmatmul.mubr.msk.bf16.gmra.mrb[156].mxu0 %vm537_vm13, %v5929_v14 }
0x1d4c   :  { %6529 = vmatprep.mubr.bf16.mxu0 %v12136_v2 }
0x1d5f   :  { %v5702_v27 = vpop.xlane.xlu0 %5701 }
0x1d63   :  { %v5696_v18 = vpop.xlane.xlu0 %5695 }
0x1d65   :  { %v5699_v49 = vpop.xlane.xlu1 %5698 }
0x1d66   :  { %11844 = vrcp.f32 %v5699_v49 }
0x1d67   :  { %v5705_v11 = vpop.xlane.xlu0 %5704  ;;  %11846 = vrcp.f32 %v5696_v18 }
0x1d68   :  { %11848 = vrcp.f32 %v5705_v11 }
0x1d6b   :  { %v5717_v14 = vpop.xlane.xlu0 %5716 }
0x1dd7   :  { %v10740_v47 = vpop.f32.mrb[136].mxu1 }
0x1dd8   :  { %v5110_v39 = vpop.f32.mrb[137].mxu1 }
0x1dd9   :  { %v10741_v28 = vpop.f32.mrb[138].mxu1 }
0x1dda   :  { %v5142_v23 = vpack.c.bf16 %v10741_v28, %v10740_v47  ;;  %v5113_v40 = vpop.f32.mrb[139].mxu1  ;;  %v5714_v47 = vpop.xlane.xlu1 %5713 }
0x1ddb   :  { %v5141_v43 = vpack.c.bf16 %v5113_v40, %v5110_v39  ;;  %v5711_v39 = vpop.xlane.xlu0 %5710  ;;  %v11845_v28 = vpop.eup %11844 }
0x1ddc   :  { %11850 = vrcp.f32 %v5711_v39 }
0x1ddd   :  { %11852 = vrcp.f32 %v5702_v27  ;;  %v5727_v27 = vmul.f32 %v11845_v28, %v14273_v63 }
0x1ddf   :  { %v5741_v40 = vpop.permute.xlu0 %5740 }
0x1de0   :  { %v14353_v30 = vpop.f32.mrb[140].mxu1 }
0x1de1   :  { %v5126_v6 = vpop.f32.mrb[141].mxu1 }
0x1de2   :  { %v14355_v36 = vpop.f32.mrb[142].mxu1 }
0x1de3   :  { %v5144_v22 = vpack.c.bf16 %v14355_v36, %v14353_v30  ;;  %v5129_v15 = vpop.f32.mrb[143].mxu1  ;;  %v11350_v30 = vld [vmem:[%s15536_s7 + $0x50] sm:$0xff]  }
0x1de4   :  { %v5143_v61 = vpack.c.bf16 %v5129_v15, %v5126_v6  ;;  %v11847_v15 = vpop.eup %11846 }
0x1dfe   :  { %v10772_v8 = vpop.f32.mrb[144].mxu1 }
0x1dff   :  { %v5372_v38 = vpop.f32.mrb[145].mxu1 }
0x1e00   :  { %v10773_v12 = vpop.f32.mrb[146].mxu1 }
0x1e01   :  { %v5404_v55 = vpack.c.bf16 %v10773_v12, %v10772_v8  ;;  %v5375_v48 = vpop.f32.mrb[147].mxu1 }
0x1e02   :  { %v5403_v57 = vpack.c.bf16 %v5375_v48, %v5372_v38 }
0x1e04   :  { %10780 = vmatprep.mubr.msk.bf16.mxu1 %vm537_vm13, %v5403_v57  ;;  %v5726_v57 = vmul.f32 %v11847_v15, %v14271_v35 }
0x1e05   :  { %10781 = vmatmul.mubr.msk.bf16.vlgmr.msra.gmra.mrb[152].mxu1 %vm537_vm13, %v5404_v55 }
0x1e06   :  { %10789 = vmatpush3.bf16.msra.mxu1 %v11349_v41  ;;  %v10776_v0 = vpop.f32.mrb[148].mxu1  ;;  %v5708_v41 = vpop.xlane.xlu1 %5707 }
0x1e07   :  { %10814 = vmatprep.subr.bf16.mxu1 %v5739_v56  ;;  %v5388_v33 = vpop.f32.mrb[149].mxu1  ;;  %11854 = vrcp.f32 %v5708_v41 }
0x1e08   :  { %v10777_v3 = vpop.f32.mrb[150].mxu1  ;;  %11856 = vrcp.f32 %v5714_v47 }
0x1e09   :  { %v5406_v5 = vpack.c.bf16 %v10777_v3, %v10776_v0  ;;  %v5391_v10 = vpop.f32.mrb[151].mxu1  ;;  %11858 = vrcp.f32 %v5717_v14 }
0x1e0a   :  { %v5405_v32 = vpack.c.bf16 %v5391_v10, %v5388_v33 }
0x1e0c   :  { %10784 = vmatprep.mubr.msk.bf16.mxu1 %vm537_vm13, %v5405_v32 }
0x1e0d   :  { %10785 = vmatmul.mubr.msk.bf16.gmra.mrb[156].mxu1 %vm537_vm13, %v5406_v5 }
0x1e0e   :  { %10790 = vmatprep.mubr.msk.bf16.mxu1 %vm537_vm13, %v5141_v43  ;;  %v5743_v43 = vpop.permute.xlu1 %5742 }
0x1e12   :  { %v5745_v0 = vpop.permute.xlu1 %5744 }
0x1e15   :  { %10791 = vmatmul.mubr.msk.bf16.vlgmr.msra.gmra.mrb[152].mxu1 %vm537_vm13, %v5142_v23 }
0x1e16   :  { %10815 = vmatpush3.bf16.msra.mxu1 %v5739_v56  ;;  %10794 = vmatprep.mubr.msk.bf16.mxu1 %vm537_vm13, %v5143_v61  ;;  %v10850_v6 = vpop.f32.mrb[152].mxu0 }
0x1e17   :  { %10816 = vmatprep.subr.bf16.mxu1 %v5741_v40  ;;  %v6005_v18 = vadd.f32 %v14118_v24, %v10850_v6  ;;  %v5996_v8 = vpop.f32.mrb[153].mxu0  ;;  %v11849_v24 = vpop.eup %11848 }
0x1e18   :  { %v5997_v38 = vadd.f32 %v14124_v9, %v5996_v8  ;;  %v10851_v12 = vpop.f32.mrb[154].mxu0  ;;  %v5734_v9 = vpack.c.bf16 %v5727_v27, %v5726_v57  ;;  %v11851_v49 = vpop.eup %11850  ;;  %v5729_v33 = vmul.f32 %v11849_v24, %v14277_v31 }
0x1e19   :  { %v6031_v55 = vmul.f32 1.442695, %v6005_v18  ;;  %v6008_v23 = vadd.f32 %v14130_v25, %v10851_v12  ;;  %v5999_v48 = vpop.f32.mrb[155].mxu0  ;;  %v11853_v25 = vpop.eup %11852 }
0x1e1a   :  { %v6027_v56 = vmul.f32 1.442695, %v5997_v38  ;;  %10817 = vmatpush3.bf16.msra.mxu1 %v5741_v40  ;;  %v6000_v61 = vadd.f32 %v14136_v54, %v5999_v48  ;;  %v11855_v35 = vpop.eup %11854  ;;  %v5728_v10 = vmul.f32 %v11853_v25, %v14267_v20  ;;  %v14390_v20 = vpop.permute.xlu1 %6087 }
0x1e1b   :  { %11860 = vpow2.f32 %v6031_v55  ;;  %10818 = vmatprep.subr.bf16.mxu1 %v5743_v43  ;;  %v6033_v63 = vmul.f32 1.442695, %v6008_v23  ;;  %v5730_v31 = vmul.f32 %v11855_v35, %v14289_v42  ;;  %v11857_v39 = vpop.eup %11856 }
0x1e1c   :  { %v6029_v11 = vmul.f32 1.442695, %v6000_v61  ;;  %11862 = vpow2.f32 %v6027_v56  ;;  %v11859_v41 = vpop.eup %11858 }
0x1e1d   :  { %10795 = vmatmul.mubr.msk.bf16.gmra.mrb[156].mxu1 %vm537_vm13, %v5144_v22  ;;  %v5731_v22 = vmul.f32 %v11851_v49, %v14293_v26  ;;  %v5733_v15 = vmul.f32 %v11859_v41, %v14285_v37 }
0x1e1e   :  { %11864 = vpow2.f32 %v6029_v11  ;;  %10819 = vmatpush3.bf16.msra.mxu1 %v5743_v43  ;;  %10822 = vmatprep.mubr.msk.bf16.mxu1 %vm242_vm12, %v5734_v9  ;;  %v10854_v54 = vpop.f32.mrb[156].mxu0 }
0x1e1f   :  { %10820 = vmatprep.subr.bf16.mxu1 %v5745_v0  ;;  %v6021_v3 = vadd.f32 %v14142_v13, %v10854_v54  ;;  %v6012_v5 = vpop.f32.mrb[157].mxu0  ;;  %11866 = vpow2.f32 %v6033_v63  ;;  %v5735_v13 = vpack.c.bf16 %v5729_v33, %v5728_v10  ;;  %v5736_v28 = vpack.c.bf16 %v5731_v22, %v5730_v31 }
0x1e20   :  { %v10855_v36 = vpop.f32.mrb[158].mxu0  ;;  %v6013_v32 = vadd.f32 %v14148_v7, %v6012_v5 }
0x1e21   :  { %v6039_v14 = vmul.f32 1.442695, %v6021_v3  ;;  %v6015_v47 = vpop.f32.mrb[159].mxu0  ;;  %v6024_v26 = vadd.f32 %v14154_v16, %v10855_v36  ;;  %v5732_v16 = vmul.f32 %v11857_v39, %v14281_v34 }
0x1e22   :  { %10821 = vmatpush3.bf16.msra.mxu1 %v5745_v0  ;;  %v6035_v6 = vmul.f32 1.442695, %v6013_v32  ;;  %v6016_v43 = vadd.f32 %v14160_v59, %v6015_v47  ;;  %v6090_v0 = vpop.permute.xlu1 %6089 }
0x1e23   :  { %10830 = vmatprep.subr.bf16.mxu1 %v11350_v30  ;;  %11868 = vpow2.f32 %v6039_v14  ;;  %v6041_v8 = vmul.f32 1.442695, %v6024_v26  ;;  %v5737_v55 = vpack.c.bf16 %v5733_v15, %v5732_v16 }
0x1e24   :  { %11870 = vpow2.f32 %v6035_v6  ;;  %v6037_v23 = vmul.f32 1.442695, %v6016_v43  ;;  %v11351_v43 = vld [vmem:[%s15536_s7 + $0x58] sm:$0xff]  }
0x1e25   :  { %v14386_v40 = vpop.eup %11860  ;;  %10823 = vmatmul.mubr.msk.bf16.vlgmr.msra.gmra.mrb[160].mxu1 %vm242_vm12, %v5735_v13  ;;  %11872 = vpow2.f32 %v6041_v8 }
0x1e26   :  { %10831 = vmatpush3.bf16.msra.mxu1 %v11350_v30  ;;  %10826 = vmatprep.mubr.msk.bf16.mxu1 %vm242_vm12, %v5736_v28  ;;  %v6049_v7 = vsel %vm242_vm12, %v14386_v40, 0.0  ;;  %v14395_v42 = vpop.eup %11862  ;;  %11874 = vpow2.f32 %v6037_v23 }
0x1e27   :  { %10856 = vmatprep.subr.bf16.mxu1 %v14390_v20  ;;  %6050 = vadd.xlane.f32.xlu0 %v6049_v7  ;;  %v6043_v12 = vsel %vm242_vm12, %v14395_v42, 0.0 }
0x1e28   :  { %v11865_v18 = vpop.eup %11864 }
0x1e29   :  { %v6046_v38 = vsel %vm242_vm12, %v11865_v18, 0.0  ;;  %v14404_v27 = vpop.eup %11866 }
0x1e2a   :  { %6047 = vadd.xlane.f32.xlu1 %v6046_v38  ;;  %v6052_v34 = vsel %vm242_vm12, %v14404_v27, 0.0 }
0x1e2b   :  { %6044 = vadd.xlane.f32.xlu0 %v6043_v12 }
0x1e2d   :  { %10827 = vmatmul.mubr.msk.bf16.gmra.mrb[164].mxu1 %vm242_vm12, %v5737_v55  ;;  %v14409_v37 = vpop.eup %11868 }
0x1e2e   :  { %v6061_v59 = vsel %vm242_vm12, %v14409_v37, 0.0  ;;  %v14413_v48 = vpop.eup %11870 }
0x1e2f   :  { %6053 = vadd.xlane.f32.xlu0 %v6052_v34  ;;  %v6055_v56 = vsel %vm242_vm12, %v14413_v48, 0.0  ;;  %v14417_v61 = vpop.eup %11872 }
0x1e30   :  { %v6064_v57 = vsel %vm242_vm12, %v14417_v61, 0.0  ;;  %v11875_v24 = vpop.eup %11874 }
0x1e31   :  { %v6058_v11 = vsel %vm242_vm12, %v11875_v24, 0.0 }
0x1e33   :  { %6062 = vadd.xlane.f32.xlu0 %v6061_v59 }
0x1e37   :  { %6056 = vadd.xlane.f32.xlu0 %v6055_v56 }
0x1e3b   :  { %6093 = vrot.lane.b32.xlu1 %v14040_v44, %s12144_s29  ;;  %6065 = vadd.xlane.f32.xlu0 %v6064_v57 }
0x1e3f   :  { %6059 = vadd.xlane.f32.xlu0 %v6058_v11 }
0x1e55   :  { %6091 = vrot.lane.b32.xlu0 %v14028_v19, %s12144_s29 }
0x1eb4   :  { %v6051_v9 = vpop.xlane.xlu0 %6050 }
0x1eb7   :  { %v6048_v35 = vpop.xlane.xlu1 %6047 }
0x1eb8   :  { %v6045_v49 = vpop.xlane.xlu0 %6044  ;;  %11876 = vrcp.f32 %v6048_v35 }
0x1eb9   :  { %11878 = vrcp.f32 %v6045_v49 }
0x1ebb   :  { %v6094_v8 = vpop.permute.xlu1 %6093 }
0x1ebc   :  { %v6054_v63 = vpop.xlane.xlu0 %6053 }
0x1ebd   :  { %11880 = vrcp.f32 %v6054_v63 }
0x1ec0   :  { %v6063_v25 = vpop.xlane.xlu0 %6062 }
0x1ec2   :  { %v11877_v19 = vpop.eup %11876 }
0x1ec3   :  { %v11879_v14 = vpop.eup %11878  ;;  %v6076_v13 = vmul.f32 %v11877_v19, %v11865_v18 }
0x1ec4   :  { %v6057_v54 = vpop.xlane.xlu0 %6056  ;;  %v6075_v39 = vmul.f32 %v11879_v14, %v14395_v42 }
0x1ec6   :  { %v6083_v15 = vpack.c.bf16 %v6076_v13, %v6075_v39 }
0x1ec7   :  { %v11881_v7 = vpop.eup %11880 }
0x1ec8   :  { %v6066_v33 = vpop.xlane.xlu0 %6065  ;;  %v6078_v18 = vmul.f32 %v11881_v7, %v14404_v27 }
0x1ecc   :  { %v6060_v44 = vpop.xlane.xlu0 %6059 }
0x1ecd   :  { %11882 = vrcp.f32 %v6060_v44 }
0x1ece   :  { %11884 = vrcp.f32 %v6051_v9 }
0x1ecf   :  { %11886 = vrcp.f32 %v6057_v54 }
0x1ed0   :  { %11888 = vrcp.f32 %v6066_v33  ;;  %v6092_v6 = vpop.permute.xlu0 %6091 }
0x1ed1   :  { %11890 = vrcp.f32 %v6063_v25 }
0x1ef8   :  { %v10824_v3 = vpop.f32.mrb[160].mxu1 }
0x1ef9   :  { %v5796_v5 = vpop.f32.mrb[161].mxu1 }
0x1efa   :  { %v10825_v30 = vpop.f32.mrb[162].mxu1 }
0x1efb   :  { %v5828_v36 = vpack.c.bf16 %v10825_v30, %v10824_v3  ;;  %v5799_v22 = vpop.f32.mrb[163].mxu1  ;;  %v14452_v3 = vld [vmem:[%s15533_s4 + $0x10] sm:$0x3f] }
0x1efc   :  { %v5827_v10 = vpack.c.bf16 %v5799_v22, %v5796_v5  ;;  %v6282_v5 = vrot.slane %v14452_v3, %v12882_v29 }
0x1efe   :  { %10832 = vmatprep.mubr.msk.bf16.mxu1 %vm537_vm13, %v5827_v10 }
0x1eff   :  { %10833 = vmatmul.mubr.msk.bf16.vlgmr.msra.gmra.mrb[152].mxu1 %vm537_vm13, %v5828_v36 }
0x1f00   :  { %10857 = vmatpush3.bf16.msra.mxu1 %v14390_v20  ;;  %v10828_v32 = vpop.f32.mrb[164].mxu1  ;;  %v11883_v20 = vpop.eup %11882 }
0x1f01   :  { %10858 = vmatprep.subr.bf16.mxu1 %v6090_v0  ;;  %v5812_v47 = vpop.f32.mrb[165].mxu1  ;;  %v11885_v16 = vpop.eup %11884  ;;  %v6080_v38 = vmul.f32 %v11883_v20, %v11875_v24 }
0x1f02   :  { %v10829_v31 = vpop.f32.mrb[166].mxu1  ;;  %v11887_v42 = vpop.eup %11886  ;;  %v6077_v12 = vmul.f32 %v11885_v16, %v14386_v40 }
0x1f03   :  { %v5830_v41 = vpack.c.bf16 %v10829_v31, %v10828_v32  ;;  %v5815_v28 = vpop.f32.mrb[167].mxu1  ;;  %v6079_v55 = vmul.f32 %v11887_v42, %v14413_v48  ;;  %v11889_v34 = vpop.eup %11888 }
0x1f04   :  { %v5829_v26 = vpack.c.bf16 %v5815_v28, %v5812_v47  ;;  %10859 = vmatpush3.bf16.msra.mxu1 %v6090_v0  ;;  %v6084_v23 = vpack.c.bf16 %v6078_v18, %v6077_v12  ;;  %v11891_v56 = vpop.eup %11890  ;;  %v6082_v27 = vmul.f32 %v11889_v34, %v14417_v61 }
0x1f05   :  { %10860 = vmatprep.subr.bf16.mxu1 %v6092_v6  ;;  %v6085_v59 = vpack.c.bf16 %v6080_v38, %v6079_v55  ;;  %v6081_v57 = vmul.f32 %v11891_v56, %v14409_v37 }
0x1f06   :  { %10836 = vmatprep.mubr.msk.bf16.mxu1 %vm537_vm13, %v5829_v26 }
0x1f07   :  { %10837 = vmatmul.mubr.msk.bf16.gmra.mrb[156].mxu1 %vm537_vm13, %v5830_v41  ;;  %v6086_v24 = vpack.c.bf16 %v6082_v27, %v6081_v57 }
0x1f08   :  { %10861 = vmatpush3.bf16.msra.mxu1 %v6092_v6  ;;  %10864 = vmatprep.mubr.msk.bf16.mxu1 %vm242_vm12, %v6083_v15 }
0x1f09   :  { %10862 = vmatprep.subr.bf16.mxu1 %v6094_v8 }
0x1f0c   :  { %10863 = vmatpush3.bf16.msra.mxu1 %v6094_v8 }
0x1f0d   :  { %10872 = vmatprep.subr.bf16.mxu1 %v11351_v43 }
0x1f0f   :  { %10865 = vmatmul.mubr.msk.bf16.vlgmr.msra.gmra.mrb[168].mxu1 %vm242_vm12, %v6084_v23 }
0x1f10   :  { %10868 = vmatprep.mubr.msk.bf16.mxu1 %vm242_vm12, %v6085_v59  ;;  %10873 = vmatpush3.bf16.msra.mxu1 %v11351_v43 }
0x1f17   :  { %10869 = vmatmul.mubr.msk.bf16.gmra.mrb[172].mxu1 %vm242_vm12, %v6086_v24 }
0x1fe2   :  { %v10866_v40 = vpop.f32.mrb[168].mxu1 }
0x1fe3   :  { %v6145_v11 = vpop.f32.mrb[169].mxu1 }
0x1fe4   :  { %v10867_v48 = vpop.f32.mrb[170].mxu1 }
0x1fe5   :  { %v6177_v9 = vpack.c.bf16 %v10867_v48, %v10866_v40  ;;  %v6148_v49 = vpop.f32.mrb[171].mxu1 }
0x1fe6   :  { %v6176_v63 = vpack.c.bf16 %v6148_v49, %v6145_v11 }
0x1fe8   :  { %10874 = vmatprep.mubr.msk.bf16.mxu1 %vm537_vm13, %v6176_v63 }
0x1fe9   :  { %10875 = vmatmul.mubr.msk.bf16.vlgmr.msra.gmra.mrb[152].mxu1 %vm537_vm13, %v6177_v9 }
0x1fea   :  { %v10870_v25 = vpop.f32.mrb[172].mxu1 }
0x1feb   :  { %v6161_v0 = vpop.f32.mrb[173].mxu1 }
0x1fec   :  { %v10871_v54 = vpop.f32.mrb[174].mxu1 }
0x1fed   :  { %v6179_v35 = vpack.c.bf16 %v10871_v54, %v10870_v25  ;;  %v6164_v61 = vpop.f32.mrb[175].mxu1 }
0x1fee   :  { %v6178_v33 = vpack.c.bf16 %v6164_v61, %v6161_v0 }
0x1ff0   :  { %10878 = vmatprep.mubr.msk.bf16.mxu1 %vm537_vm13, %v6178_v33 }
0x1ff1   :  { %10879 = vmatmul.mubr.msk.bf16.gmra.mrb[156].mxu1 %vm537_vm13, %v6179_v35 }
0x1ff2   :  { %7035 = vmatprep.mubr.bf16.mxu1 %v12136_v2 }
0x20bc   :  { %v10876_v37 = vpop.f32.mrb[152].mxu1 }
0x20bd   :  { %v6232_v44 = vpop.f32.mrb[153].mxu1  ;;  %v6273_v30 = vadd.f32 %v10876_v37, %v13885_v58 }
0x20be   :  { %v6271_v36 = vadd.f32 %v6232_v44, %v13875_v60  ;;  %v10877_v22 = vpop.f32.mrb[154].mxu1 }
0x20bf   :  { %v6235_v10 = vpop.f32.mrb[155].mxu1  ;;  %v14461_v32 = vadd.f32 %v6282_v5, %v6273_v30  ;;  %v6274_v47 = vadd.f32 %v10877_v22, %v13888_v21 }
0x20c0   :  { %v14458_v19 = vadd.f32 %v6282_v5, %v6271_v36  ;;  %v6272_v14 = vadd.f32 %v6235_v10, %v13878_v51 }
0x20c1   :  { %v14470_v41 = vadd.f32 %v6282_v5, %v6274_v47  ;;  %v6297_v21 = vsel %vm242_vm12, %v14461_v32, 0.0 }
0x20c2   :  { %v14464_v31 = vadd.f32 %v6282_v5, %v6272_v14  ;;  %v6291_v39 = vsel %vm242_vm12, %v14458_v19, 0.0 }
0x20c3   :  { %6292 = vadd.xlane.f32.xlu1 %v6291_v39  ;;  %v6300_v8 = vsel %vm242_vm12, %v14470_v41, 0.0 }
0x20c4   :  { %v10880_v13 = vpop.f32.mrb[156].mxu1  ;;  %v6294_v60 = vsel %vm242_vm12, %v14464_v31, 0.0 }
0x20c5   :  { %6295 = vadd.xlane.f32.xlu0 %v6294_v60  ;;  %v6248_v58 = vpop.f32.mrb[157].mxu1  ;;  %v6277_v15 = vadd.f32 %v10880_v13, %v13905_v45 }
0x20c6   :  { %v6275_v51 = vadd.f32 %v6248_v58, %v13895_v62  ;;  %v10881_v28 = vpop.f32.mrb[158].mxu1 }
0x20c7   :  { %6298 = vadd.xlane.f32.xlu1 %v6297_v21  ;;  %v6251_v6 = vpop.f32.mrb[159].mxu1  ;;  %v6278_v26 = vadd.f32 %v10881_v28, %v13908_v46  ;;  %v14488_v18 = vadd.f32 %v6282_v5, %v6277_v15  ;;  %v11357_v15 = vld [vmem:[%s15537_s8 + $0x94] ss:$8 sps:$4 sm:$0xff]  }
0x20c8   :  { %v6276_v7 = vadd.f32 %v6251_v6, %v13898_v1  ;;  %v14478_v20 = vadd.f32 %v6282_v5, %v6275_v51 }
0x20c9   :  { %v14484_v62 = vadd.f32 %v6282_v5, %v6278_v26  ;;  %v6309_v46 = vsel %vm242_vm12, %v14488_v18, 0.0  ;;  %v11354_v26 = vld [vmem:[%s15537_s8 + $0x84] ss:$8 sps:$4 sm:$0xff]  }
0x20ca   :  { %v14480_v16 = vadd.f32 %v6282_v5, %v6276_v7  ;;  %v6303_v1 = vsel %vm242_vm12, %v14478_v20, 0.0  ;;  %v11352_v7 = vld [vmem:[%s15537_s8 + $0x80] ss:$8 sps:$4 sm:$0xff]   ;;  %6497 = vmatprep.subr.bf16.mxu0 %v11354_v26 }
0x20cb   :  { %6301 = vadd.xlane.f32.xlu1 %v6300_v8  ;;  %v6312_v45 = vsel %vm242_vm12, %v14484_v62, 0.0  ;;  %6498 = vmatpush1.bf16.msra.mxu0 %v11352_v7  ;;  %v11355_v8 = vld [vmem:[%s15537_s8 + $0x90] ss:$8 sps:$4 sm:$0xff]  }
0x20cc   :  { %v6306_v42 = vsel %vm242_vm12, %v14480_v16, 0.0  ;;  %6499 = vmatprep.subr.bf16.mxu0 %v11357_v15 }
0x20cd   :  { %6307 = vadd.xlane.f32.xlu0 %v6306_v42  ;;  %v11360_v42 = vld [vmem:[%s15537_s8 + $0xa4] ss:$8 sps:$4 sm:$0xff]  }
0x20cf   :  { %6304 = vadd.xlane.f32.xlu1 %v6303_v1  ;;  %6500 = vmatpush1.bf16.msra.mxu0 %v11355_v8  ;;  %v11358_v1 = vld [vmem:[%s15537_s8 + $0xa0] ss:$8 sps:$4 sm:$0xff]  }
0x20d0   :  { %6501 = vmatprep.subr.bf16.mxu0 %v11360_v42 }
0x20d1   :  { %6313 = vadd.xlane.f32.xlu0 %v6312_v45  ;;  %v11363_v45 = vld [vmem:[%s15537_s8 + $0xb4] ss:$8 sps:$4 sm:$0xff]  }
0x20d3   :  { %6310 = vadd.xlane.f32.xlu1 %v6309_v46  ;;  %6502 = vmatpush1.bf16.msra.mxu0 %v11358_v1  ;;  %v11361_v46 = vld [vmem:[%s15537_s8 + $0xb0] ss:$8 sps:$4 sm:$0xff]   ;;  %v11365_v1 = vld [vmem:[%s15538_s9 + $0x100] sm:$0xff]  }
0x20d4   :  { %6503 = vmatprep.subr.bf16.mxu0 %v11363_v45 }
0x20d7   :  { %6504 = vmatpush1.bf16.msra.mxu0 %v11361_v46  ;;  %v11366_v46 = vld [vmem:[%s15538_s9 + $0x148] sm:$0xff]  }
0x2150   :  { %v6293_v43 = vpop.xlane.xlu1 %6292 }
0x2151   :  { %v6315_v38 = vmul.f32 0.015625, %v6293_v43  ;;  %v11364_v43 = vld [vmem:[%s15538_s9 + $0x140] sm:$0xff]  }
0x2152   :  { %v6296_v12 = vpop.xlane.xlu0 %6295  ;;  %10182 = vmatprep.subr.bf16.mxu0 %v11364_v43 }
0x2153   :  { %v14497_v55 = vsub.f32 %v14458_v19, %v6315_v38  ;;  %v6316_v23 = vmul.f32 0.015625, %v6296_v12 }
0x2154   :  { %v6299_v34 = vpop.xlane.xlu1 %6298 }
0x2155   :  { %v14500_v59 = vsub.f32 %v14464_v31, %v6316_v23  ;;  %v6317_v56 = vmul.f32 0.015625, %v6299_v34  ;;  %v6331_v27 = vmul.f32 %v14497_v55, %v14497_v55 }
0x2157   :  { %v14505_v57 = vsub.f32 %v14461_v32, %v6317_v56  ;;  %v6339_v24 = vsel %vm242_vm12, %v6331_v27, 0.0  ;;  %v6332_v40 = vmul.f32 %v14500_v59, %v14500_v59 }
0x2158   :  { %v6302_v11 = vpop.xlane.xlu1 %6301  ;;  %6340 = vadd.xlane.f32.xlu1 %v6339_v24 }
0x2159   :  { %v6318_v48 = vmul.f32 0.015625, %v6302_v11  ;;  %v6342_v9 = vsel %vm242_vm12, %v6332_v40, 0.0  ;;  %v6333_v49 = vmul.f32 %v14505_v57, %v14505_v57 }
0x215a   :  { %6343 = vadd.xlane.f32.xlu0 %v6342_v9  ;;  %v6308_v63 = vpop.xlane.xlu0 %6307 }
0x215b   :  { %v14514_v25 = vsub.f32 %v14470_v41, %v6318_v48  ;;  %v6320_v0 = vmul.f32 0.015625, %v6308_v63  ;;  %v6345_v54 = vsel %vm242_vm12, %v6333_v49, 0.0 }
0x215c   :  { %6346 = vadd.xlane.f32.xlu1 %v6345_v54  ;;  %v6305_v35 = vpop.xlane.xlu1 %6304 }
0x215d   :  { %v14518_v61 = vsub.f32 %v14480_v16, %v6320_v0  ;;  %v6319_v33 = vmul.f32 0.015625, %v6305_v35  ;;  %v6334_v37 = vmul.f32 %v14514_v25, %v14514_v25 }
0x215e   :  { %v6314_v5 = vpop.xlane.xlu0 %6313 }
0x215f   :  { %v14523_v44 = vsub.f32 %v14478_v20, %v6319_v33  ;;  %v6322_v30 = vmul.f32 0.015625, %v6314_v5  ;;  %v6348_v36 = vsel %vm242_vm12, %v6334_v37, 0.0  ;;  %v6336_v22 = vmul.f32 %v14518_v61, %v14518_v61 }
0x2160   :  { %v6311_v10 = vpop.xlane.xlu1 %6310  ;;  %6349 = vadd.xlane.f32.xlu0 %v6348_v36  ;;  %v14573_v33 = vrot.slane %v14452_v3, %v13007_v53 }
0x2161   :  { %v14529_v14 = vsub.f32 %v14484_v62, %v6322_v30  ;;  %v6321_v47 = vmul.f32 0.015625, %v6311_v10  ;;  %v6335_v39 = vmul.f32 %v14523_v44, %v14523_v44  ;;  %v6354_v58 = vsel %vm242_vm12, %v6336_v22, 0.0 }
0x2163   :  { %v14534_v13 = vsub.f32 %v14488_v18, %v6321_v47  ;;  %v6351_v60 = vsel %vm242_vm12, %v6335_v39, 0.0  ;;  %v6338_v51 = vmul.f32 %v14529_v14, %v14529_v14 }
0x2164   :  { %6352 = vadd.xlane.f32.xlu1 %v6351_v60  ;;  %6355 = vadd.xlane.f32.xlu0 %v6354_v58  ;;  %v6410_v58 = vrot.slane %v14452_v3, %v13010_v50 }
0x2165   :  { %v6337_v28 = vmul.f32 %v14534_v13, %v14534_v13  ;;  %v6360_v6 = vsel %vm242_vm12, %v6338_v51, 0.0 }
0x2167   :  { %v6357_v21 = vsel %vm242_vm12, %v6337_v28, 0.0 }
0x2168   :  { %6358 = vadd.xlane.f32.xlu1 %v6357_v21  ;;  %6361 = vadd.xlane.f32.xlu0 %v6360_v6 }
0x21e5   :  { %v6341_v38 = vpop.xlane.xlu1 %6340 }
0x21e6   :  { %v6363_v12 = vmul.f32 0.015625, %v6341_v38 }
0x21e7   :  { %v6344_v23 = vpop.xlane.xlu0 %6343 }
0x21e8   :  { %v6371_v34 = vadd.f32 1e-05, %v6363_v12  ;;  %v6364_v56 = vmul.f32 0.015625, %v6344_v23  ;;  %v11367_v12 = vld [vmem:[%s15538_s9 + $0x108] sm:$0xff]  }
0x21e9   :  { %v6347_v27 = vpop.xlane.xlu1 %6346 }
0x21ea   :  { %11892 = vrsqrt.f32 %v6371_v34  ;;  %v6372_v24 = vadd.f32 1e-05, %v6364_v56  ;;  %v6365_v40 = vmul.f32 0.015625, %v6347_v27  ;;  %v11368_v56 = vld [vmem:[%s15538_s9 + $0x150] sm:$0xff]  }
0x21ec   :  { %11894 = vrsqrt.f32 %v6372_v24  ;;  %v6373_v11 = vadd.f32 1e-05, %v6365_v40  ;;  %v11369_v40 = vld [vmem:[%s15538_s9 + $0x110] sm:$0xff]  }
0x21ed   :  { %v6350_v48 = vpop.xlane.xlu0 %6349 }
0x21ee   :  { %11896 = vrsqrt.f32 %v6373_v11  ;;  %v6366_v9 = vmul.f32 0.015625, %v6350_v48 }
0x21f0   :  { %v6374_v49 = vadd.f32 1e-05, %v6366_v9 }
0x21f1   :  { %v6353_v63 = vpop.xlane.xlu1 %6352  ;;  %v6356_v0 = vpop.xlane.xlu0 %6355 }
0x21f2   :  { %11898 = vrsqrt.f32 %v6374_v49  ;;  %v6367_v54 = vmul.f32 0.015625, %v6353_v63  ;;  %v6368_v35 = vmul.f32 0.015625, %v6356_v0 }
0x21f4   :  { %v11893_v37 = vpop.eup %11892  ;;  %v6375_v5 = vadd.f32 1e-05, %v6367_v54  ;;  %v6376_v30 = vadd.f32 1e-05, %v6368_v35 }
0x21f5   :  { %v6387_v36 = vmul.f32 %v11893_v37, %v14497_v55  ;;  %v6359_v22 = vpop.xlane.xlu1 %6358  ;;  %v6362_v10 = vpop.xlane.xlu0 %6361 }
0x21f6   :  { %v11895_v47 = vpop.eup %11894  ;;  %11900 = vrsqrt.f32 %v6375_v5  ;;  %v6369_v39 = vmul.f32 0.015625, %v6359_v22  ;;  %v6370_v60 = vmul.f32 0.015625, %v6362_v10  ;;  %v11372_v5 = vld [vmem:[%s15538_s9 + $0x160] sm:$0xff]  }
0x21f7   :  { %v6399_v51 = vmul.f32 %v14573_v33, %v6387_v36  ;;  %v6388_v28 = vmul.f32 %v11895_v47, %v14500_v59  ;;  %11902 = vrsqrt.f32 %v6376_v30  ;;  %v11373_v30 = vld [vmem:[%s15538_s9 + $0x120] sm:$0xff]  }
0x21f8   :  { %v11897_v21 = vpop.eup %11896  ;;  %v6377_v6 = vadd.f32 1e-05, %v6369_v39  ;;  %v6378_v26 = vadd.f32 1e-05, %v6370_v60  ;;  %v11376_v60 = vld [vmem:[%s15538_s9 + $0x170] sm:$0xff]  }
0x21f9   :  { %v6400_v7 = vmul.f32 %v14573_v33, %v6388_v28  ;;  %v6411_v55 = vadd.f32 %v6410_v58, %v6399_v51  ;;  %v6389_v8 = vmul.f32 %v11897_v21, %v14505_v57  ;;  %v11377_v51 = vld [vmem:[%s15538_s9 + $0x130] sm:$0xff]   ;;  %v11379_v28 = vld [vmem:[%s15538_s9 + $0x138] sm:$0xff]   ;;  %v9618_v21 = vld [vmem:[%s15534_s5 + $0x4] sm:$0x3] }
0x21fa   :  { %11904 = vrsqrt.f32 %v6377_v6  ;;  %v6438_v6 = vrot.slane %v9618_v21, %v12390_v4 }
0x21fb   :  { %v6412_v15 = vadd.f32 %v6410_v58, %v6400_v7  ;;  %11906 = vrsqrt.f32 %v6378_v26  ;;  %v6401_v43 = vmul.f32 %v14573_v33, %v6389_v8  ;;  %v6442_v26 = vrot.slane %v9618_v21, %v12396_v17 }
0x21fc   :  { %v11899_v42 = vpop.eup %11898 }
0x21fd   :  { %v6419_v45 = vpack.c.bf16 %v6412_v15, %v6411_v55  ;;  %v6390_v59 = vmul.f32 %v11899_v42, %v14514_v25  ;;  %v6413_v24 = vadd.f32 %v6410_v58, %v6401_v43 }
0x21ff   :  { %9627 = vmatmul.mubr.msk.bf16.vlgmr.msra.gmra.mrb[160].mxu0 %vm242_vm12, %v6419_v45  ;;  %v6402_v38 = vmul.f32 %v14573_v33, %v6390_v59 }
0x2200   :  { %v11901_v57 = vpop.eup %11900  ;;  %6539 = vmatprep.mubr.bf16.mxu0 %v12136_v2  ;;  %10183 = vmatpush3.bf16.msra.mxu0 %v11365_v1 }
0x2201   :  { %v11903_v23 = vpop.eup %11902  ;;  %v6414_v25 = vadd.f32 %v6410_v58, %v6402_v38  ;;  %v6391_v34 = vmul.f32 %v11901_v57, %v14523_v44  ;;  %10184 = vmatprep.subr.bf16.mxu0 %v11366_v46  ;;  %v11370_v44 = vld [vmem:[%s15538_s9 + $0x158] sm:$0xff]  }
0x2202   :  { %v6392_v27 = vmul.f32 %v11903_v23, %v14518_v61  ;;  %v11371_v61 = vld [vmem:[%s15538_s9 + $0x118] sm:$0xff]  }
0x2203   :  { %v6420_v48 = vpack.c.bf16 %v6414_v25, %v6413_v24  ;;  %v6403_v9 = vmul.f32 %v14573_v33, %v6391_v34 }
0x2204   :  { %10185 = vmatpush3.bf16.msra.mxu0 %v11367_v12  ;;  %v11905_v11 = vpop.eup %11904  ;;  %v6404_v49 = vmul.f32 %v14573_v33, %v6392_v27 }
0x2205   :  { %10186 = vmatprep.subr.bf16.mxu0 %v11368_v56  ;;  %v11907_v63 = vpop.eup %11906  ;;  %v6415_v0 = vadd.f32 %v6410_v58, %v6403_v9  ;;  %v6393_v35 = vmul.f32 %v11905_v11, %v14534_v13 }
0x2206   :  { %v6416_v54 = vadd.f32 %v6410_v58, %v6404_v49  ;;  %v6394_v37 = vmul.f32 %v11907_v63, %v14529_v14  ;;  %v11374_v14 = vld [vmem:[%s15538_s9 + $0x168] sm:$0xff]  }
0x2207   :  { %9628 = vmatmul.mubr.msk.bf16.gmra.mrb[164].mxu0 %vm242_vm12, %v6420_v48  ;;  %v6405_v22 = vmul.f32 %v14573_v33, %v6393_v35 }
0x2208   :  { %6549 = vmatprep.mubr.bf16.mxu0 %v12136_v2  ;;  %10187 = vmatpush3.bf16.msra.mxu0 %v11369_v40  ;;  %v6421_v36 = vpack.c.bf16 %v6416_v54, %v6415_v0  ;;  %v6406_v10 = vmul.f32 %v14573_v33, %v6394_v37  ;;  %v11375_v33 = vld [vmem:[%s15538_s9 + $0x128] sm:$0xff]  }
0x2209   :  { %10188 = vmatprep.subr.bf16.mxu0 %v11370_v44  ;;  %v6417_v13 = vadd.f32 %v6410_v58, %v6405_v22 }
0x220a   :  { %v6418_v47 = vadd.f32 %v6410_v58, %v6406_v10  ;;  %v11378_v58 = vld [vmem:[%s15538_s9 + $0x178] sm:$0xff]  }
0x220c   :  { %10189 = vmatpush3.bf16.msra.mxu0 %v11371_v61  ;;  %v6422_v39 = vpack.c.bf16 %v6418_v47, %v6417_v13 }
0x220d   :  { %10190 = vmatprep.subr.bf16.mxu0 %v11372_v5 }
0x220f   :  { %9629 = vmatmul.mubr.msk.bf16.gmra.mrb[168].mxu0 %vm242_vm12, %v6421_v36 }
0x2210   :  { %6559 = vmatprep.mubr.bf16.mxu0 %v12136_v2  ;;  %10191 = vmatpush3.bf16.msra.mxu0 %v11373_v30 }
0x2211   :  { %10192 = vmatprep.subr.bf16.mxu0 %v11374_v14 }
0x2214   :  { %10193 = vmatpush3.bf16.msra.mxu0 %v11375_v33 }
0x2215   :  { %10194 = vmatprep.subr.bf16.mxu0 %v11376_v60 }
0x2217   :  { %9630 = vmatmul.mubr.msk.bf16.gmra.mrb[172].mxu0 %vm242_vm12, %v6422_v39 }
0x2218   :  { %10195 = vmatpush3.bf16.msra.mxu0 %v11377_v51 }
0x2219   :  { %10196 = vmatprep.subr.bf16.mxu0 %v11378_v58 }
0x221c   :  { %10197 = vmatpush3.bf16.msra.mxu0 %v11379_v28 }
0x22d2   :  { %v6531_v7 = vpop.f32.mrb[160].mxu0 }
0x22d3   :  { %v6532_v55 = vadd.f32 %v6531_v7, %v6438_v6  ;;  %v6533_v15 = vpop.f32.mrb[161].mxu0 }
0x22d4   :  { %v6534_v8 = vadd.f32 %v6533_v15, %v6442_v26  ;;  %v6535_v42 = vpop.f32.mrb[162].mxu0 }
0x22d5   :  { %v6536_v1 = vadd.f32 %v6535_v42, %v6438_v6  ;;  %v6537_v45 = vpop.f32.mrb[163].mxu0  ;;  %v6570_v46 = vmax.f32 %v6532_v55, 0.0 }
0x22d6   :  { %v6538_v59 = vadd.f32 %v6537_v45, %v6442_v26  ;;  %v6571_v38 = vmax.f32 %v6534_v8, 0.0 }
0x22d7   :  { %v6572_v43 = vmax.f32 %v6536_v1, 0.0 }
0x22d8   :  { %v6573_v57 = vmax.f32 %v6538_v59, 0.0 }
0x22d9   :  { %v6586_v12 = vpack.c.bf16 %v6572_v43, %v6570_v46 }
0x22da   :  { %v6587_v23 = vpack.c.bf16 %v6573_v57, %v6571_v38  ;;  %v6541_v25 = vpop.f32.mrb[164].mxu0 }
0x22db   :  { %v6542_v34 = vadd.f32 %v6541_v25, %v6438_v6  ;;  %v6543_v56 = vpop.f32.mrb[165].mxu0 }
0x22dc   :  { %v6544_v27 = vadd.f32 %v6543_v56, %v6442_v26  ;;  %v6545_v24 = vpop.f32.mrb[166].mxu0  ;;  %6755 = vmatprep.mubr.bf16.mxu0 %v6587_v23  ;;  %v6799_v23 = vrot.slane %v14452_v3, %v13092_v52 }
0x22dd   :  { %v6546_v40 = vadd.f32 %v6545_v24, %v6438_v6  ;;  %v6547_v11 = vpop.f32.mrb[167].mxu0  ;;  %6756 = vmatmul.mubr.bf16.vlgmr.msra.gmra.mrb[176].mxu0 %v6586_v12  ;;  %v6574_v9 = vmax.f32 %v6542_v34, 0.0 }
0x22de   :  { %v6548_v48 = vadd.f32 %v6547_v11, %v6442_v26  ;;  %v6575_v44 = vmax.f32 %v6544_v27, 0.0 }
0x22df   :  { %v6576_v49 = vmax.f32 %v6546_v40, 0.0 }
0x22e0   :  { %v6577_v63 = vmax.f32 %v6548_v48, 0.0 }
0x22e1   :  { %v6588_v61 = vpack.c.bf16 %v6576_v49, %v6574_v9 }
0x22e2   :  { %v6589_v0 = vpack.c.bf16 %v6577_v63, %v6575_v44  ;;  %v6551_v54 = vpop.f32.mrb[168].mxu0 }
0x22e3   :  { %v6552_v35 = vadd.f32 %v6551_v54, %v6438_v6  ;;  %v6553_v37 = vpop.f32.mrb[169].mxu0 }
0x22e4   :  { %v6554_v5 = vadd.f32 %v6553_v37, %v6442_v26  ;;  %v6555_v30 = vpop.f32.mrb[170].mxu0  ;;  %6763 = vmatprep.mubr.bf16.mxu0 %v6589_v0 }
0x22e5   :  { %v6556_v36 = vadd.f32 %v6555_v30, %v6438_v6  ;;  %v6557_v22 = vpop.f32.mrb[171].mxu0  ;;  %6764 = vmatmul.mubr.bf16.gmra.mrb[180].mxu0 %v6588_v61  ;;  %v6578_v14 = vmax.f32 %v6552_v35, 0.0 }
0x22e6   :  { %v6558_v10 = vadd.f32 %v6557_v22, %v6442_v26  ;;  %v6579_v47 = vmax.f32 %v6554_v5, 0.0 }
0x22e7   :  { %v6580_v13 = vmax.f32 %v6556_v36, 0.0 }
0x22e8   :  { %v6581_v39 = vmax.f32 %v6558_v10, 0.0 }
0x22e9   :  { %v6590_v33 = vpack.c.bf16 %v6580_v13, %v6578_v14 }
0x22ea   :  { %v6591_v60 = vpack.c.bf16 %v6581_v39, %v6579_v47  ;;  %v6561_v51 = vpop.f32.mrb[172].mxu0 }
0x22eb   :  { %v6562_v58 = vadd.f32 %v6561_v51, %v6438_v6  ;;  %v6563_v28 = vpop.f32.mrb[173].mxu0 }
0x22ec   :  { %v6564_v21 = vadd.f32 %v6563_v28, %v6442_v26  ;;  %v6565_v7 = vpop.f32.mrb[174].mxu0  ;;  %6771 = vmatprep.mubr.bf16.mxu0 %v6591_v60 }
0x22ed   :  { %v6566_v55 = vadd.f32 %v6565_v7, %v6438_v6  ;;  %v6567_v15 = vpop.f32.mrb[175].mxu0  ;;  %6772 = vmatmul.mubr.bf16.gmra.mrb[184].mxu0 %v6590_v33  ;;  %v6582_v42 = vmax.f32 %v6562_v58, 0.0 }
0x22ee   :  { %v6568_v8 = vadd.f32 %v6567_v15, %v6442_v26  ;;  %v6583_v45 = vmax.f32 %v6564_v21, 0.0 }
0x22ef   :  { %v6584_v1 = vmax.f32 %v6566_v55, 0.0 }
0x22f0   :  { %v6585_v59 = vmax.f32 %v6568_v8, 0.0 }
0x22f1   :  { %v6592_v46 = vpack.c.bf16 %v6584_v1, %v6582_v42 }
0x22f2   :  { %v6593_v43 = vpack.c.bf16 %v6585_v59, %v6583_v45 }
0x22f4   :  { %6779 = vmatprep.mubr.bf16.mxu0 %v6593_v43 }
0x22f5   :  { %6780 = vmatmul.mubr.bf16.gmra.mrb[188].mxu0 %v6592_v46 }
0x23b0   :  { %v10198_v38 = vpop.f32.mrb[176].mxu0 }
0x23b1   :  { %v10199_v57 = vpop.f32.mrb[177].mxu0 }
0x23b2   :  { %v10200_v12 = vadd.f32 %v10199_v57, %v10198_v38  ;;  %v10201_v25 = vpop.f32.mrb[178].mxu0 }
0x23b3   :  { %v10202_v34 = vpop.f32.mrb[179].mxu0 }
0x23b4   :  { %v6788_v6 = vadd.f32 %v10200_v12, %v14458_v19  ;;  %v10203_v56 = vadd.f32 %v10202_v34, %v10201_v25 }
0x23b6   :  { %v14653_v26 = vadd.f32 %v6799_v23, %v6788_v6  ;;  %v6789_v27 = vadd.f32 %v10203_v56, %v14464_v31 }
0x23b8   :  { %v14656_v24 = vadd.f32 %v6799_v23, %v6789_v27  ;;  %v10204_v40 = vpop.f32.mrb[180].mxu0  ;;  %v6810_v11 = vsel %vm242_vm12, %v14653_v26, 0.0 }
0x23b9   :  { %v10205_v48 = vpop.f32.mrb[181].mxu0  ;;  %6811 = vadd.xlane.f32.xlu1 %v6810_v11 }
0x23ba   :  { %v10206_v9 = vadd.f32 %v10205_v48, %v10204_v40  ;;  %v10207_v49 = vpop.f32.mrb[182].mxu0  ;;  %v6813_v3 = vsel %vm242_vm12, %v14656_v24, 0.0 }
0x23bb   :  { %v10208_v44 = vpop.f32.mrb[183].mxu0  ;;  %6814 = vadd.xlane.f32.xlu0 %v6813_v3 }
0x23bc   :  { %v6790_v19 = vadd.f32 %v10206_v9, %v14461_v32  ;;  %v10209_v63 = vadd.f32 %v10208_v44, %v10207_v49 }
0x23be   :  { %v14663_v61 = vadd.f32 %v6799_v23, %v6790_v19  ;;  %v6791_v31 = vadd.f32 %v10209_v63, %v14470_v41 }
0x23c0   :  { %v14666_v0 = vadd.f32 %v6799_v23, %v6791_v31  ;;  %v10210_v54 = vpop.f32.mrb[184].mxu0  ;;  %v6816_v35 = vsel %vm242_vm12, %v14663_v61, 0.0 }
0x23c1   :  { %v10211_v37 = vpop.f32.mrb[185].mxu0  ;;  %6817 = vadd.xlane.f32.xlu1 %v6816_v35 }
0x23c2   :  { %v10212_v5 = vadd.f32 %v10211_v37, %v10210_v54  ;;  %v10213_v30 = vpop.f32.mrb[186].mxu0  ;;  %v6819_v36 = vsel %vm242_vm12, %v14666_v0, 0.0 }
0x23c3   :  { %v10214_v22 = vpop.f32.mrb[187].mxu0  ;;  %6820 = vadd.xlane.f32.xlu0 %v6819_v36 }
0x23c4   :  { %v6792_v32 = vadd.f32 %v10212_v5, %v14478_v20  ;;  %v10215_v10 = vadd.f32 %v10214_v22, %v10213_v30 }
0x23c6   :  { %v14673_v14 = vadd.f32 %v6799_v23, %v6792_v32  ;;  %v6793_v41 = vadd.f32 %v10215_v10, %v14480_v16 }
0x23c8   :  { %v14676_v13 = vadd.f32 %v6799_v23, %v6793_v41  ;;  %v10216_v47 = vpop.f32.mrb[188].mxu0  ;;  %v6822_v39 = vsel %vm242_vm12, %v14673_v14, 0.0 }
0x23c9   :  { %6823 = vadd.xlane.f32.xlu1 %v6822_v39  ;;  %v10217_v33 = vpop.f32.mrb[189].mxu0 }
0x23ca   :  { %v10218_v60 = vadd.f32 %v10217_v33, %v10216_v47  ;;  %v10219_v51 = vpop.f32.mrb[190].mxu0  ;;  %v6825_v58 = vsel %vm242_vm12, %v14676_v13, 0.0  ;;  %v11382_v47 = vld [vmem:[%s15535_s6 + $0xc4] ss:$8 sps:$4 sm:$0xff]  }
0x23cb   :  { %6826 = vadd.xlane.f32.xlu0 %v6825_v58  ;;  %v10220_v20 = vpop.f32.mrb[191].mxu0  ;;  %7003 = vmatprep.subr.bf16.mxu1 %v11382_v47  ;;  %v11385_v58 = vld [vmem:[%s15535_s6 + $0xd4] ss:$8 sps:$4 sm:$0xff]  }
0x23cc   :  { %v6794_v28 = vadd.f32 %v10218_v60, %v14488_v18  ;;  %v10221_v21 = vadd.f32 %v10220_v20, %v10219_v51  ;;  %v11380_v60 = vld [vmem:[%s15535_s6 + $0xc0] ss:$8 sps:$4 sm:$0xff]   ;;  %v11383_v20 = vld [vmem:[%s15535_s6 + $0xd0] ss:$8 sps:$4 sm:$0xff]  }
0x23cd   :  { %7004 = vmatpush1.bf16.msra.mxu1 %v11380_v60 }
0x23ce   :  { %v14683_v7 = vadd.f32 %v6799_v23, %v6794_v28  ;;  %v6795_v16 = vadd.f32 %v10221_v21, %v14484_v62  ;;  %7005 = vmatprep.subr.bf16.mxu1 %v11385_v58  ;;  %v11388_v28 = vld [vmem:[%s15535_s6 + $0xe4] ss:$8 sps:$4 sm:$0xff]   ;;  %v11386_v21 = vld [vmem:[%s15535_s6 + $0xe0] ss:$8 sps:$4 sm:$0xff]  }
0x23d0   :  { %v14686_v55 = vadd.f32 %v6799_v23, %v6795_v16  ;;  %v6828_v15 = vsel %vm242_vm12, %v14683_v7, 0.0  ;;  %v11391_v16 = vld [vmem:[%s15535_s6 + $0xf4] ss:$8 sps:$4 sm:$0xff]  }
0x23d1   :  { %6829 = vadd.xlane.f32.xlu1 %v6828_v15  ;;  %7006 = vmatpush1.bf16.msra.mxu1 %v11383_v20  ;;  %v11389_v15 = vld [vmem:[%s15535_s6 + $0xf0] ss:$8 sps:$4 sm:$0xff]  }
0x23d2   :  { %v6831_v8 = vsel %vm242_vm12, %v14686_v55, 0.0  ;;  %7007 = vmatprep.subr.bf16.mxu1 %v11388_v28 }
0x23d3   :  { %6832 = vadd.xlane.f32.xlu0 %v6831_v8 }
0x23d5   :  { %7008 = vmatpush1.bf16.msra.mxu1 %v11386_v21 }
0x23d6   :  { %7009 = vmatprep.subr.bf16.mxu1 %v11391_v16 }
0x23d9   :  { %7010 = vmatpush1.bf16.msra.mxu1 %v11389_v15 }
0x2446   :  { %v6812_v42 = vpop.xlane.xlu1 %6811 }
0x2447   :  { %v6834_v1 = vmul.f32 0.015625, %v6812_v42 }
0x2448   :  { %v6815_v45 = vpop.xlane.xlu0 %6814 }
0x2449   :  { %v14693_v18 = vsub.f32 %v14653_v26, %v6834_v1  ;;  %v6835_v59 = vmul.f32 0.015625, %v6815_v45 }
0x244b   :  { %v14696_v46 = vsub.f32 %v14656_v24, %v6835_v59  ;;  %v6850_v62 = vmul.f32 %v14693_v18, %v14693_v18 }
0x244d   :  { %v6858_v43 = vsel %vm242_vm12, %v6850_v62, 0.0  ;;  %v6851_v38 = vmul.f32 %v14696_v46, %v14696_v46 }
0x244e   :  { %v6818_v57 = vpop.xlane.xlu1 %6817  ;;  %6859 = vadd.xlane.f32.xlu1 %v6858_v43 }
0x244f   :  { %v6836_v12 = vmul.f32 0.015625, %v6818_v57  ;;  %v6861_v23 = vsel %vm242_vm12, %v6851_v38, 0.0 }
0x2450   :  { %v6821_v25 = vpop.xlane.xlu0 %6820  ;;  %6862 = vadd.xlane.f32.xlu0 %v6861_v23 }
0x2451   :  { %v14705_v34 = vsub.f32 %v14663_v61, %v6836_v12  ;;  %v6837_v6 = vmul.f32 0.015625, %v6821_v25  ;;  %v9679_v12 = vld [vmem:[%s15533_s4 + $0x18] sm:$0x3f] }
0x2453   :  { %v14708_v56 = vsub.f32 %v14666_v0, %v6837_v6  ;;  %v6852_v27 = vmul.f32 %v14705_v34, %v14705_v34 }
0x2455   :  { %v6864_v40 = vsel %vm242_vm12, %v6852_v27, 0.0  ;;  %v6853_v11 = vmul.f32 %v14708_v56, %v14708_v56  ;;  %v6917_v27 = vrot.slane %v9679_v12, %v12390_v4 }
0x2456   :  { %v6824_v48 = vpop.xlane.xlu1 %6823  ;;  %6865 = vadd.xlane.f32.xlu1 %v6864_v40 }
0x2457   :  { %v6838_v9 = vmul.f32 0.015625, %v6824_v48  ;;  %v6867_v49 = vsel %vm242_vm12, %v6853_v11, 0.0 }
0x2458   :  { %v6827_v3 = vpop.xlane.xlu0 %6826  ;;  %6868 = vadd.xlane.f32.xlu0 %v6867_v49 }
0x2459   :  { %v14717_v44 = vsub.f32 %v14673_v14, %v6838_v9  ;;  %v6839_v19 = vmul.f32 0.015625, %v6827_v3  ;;  %v6929_v3 = vrot.slane %v9679_v12, %v12396_v17 }
0x245b   :  { %v14720_v63 = vsub.f32 %v14676_v13, %v6839_v19  ;;  %v6854_v31 = vmul.f32 %v14717_v44, %v14717_v44 }
0x245d   :  { %v6870_v54 = vsel %vm242_vm12, %v6854_v31, 0.0  ;;  %v6855_v35 = vmul.f32 %v14720_v63, %v14720_v63 }
0x245e   :  { %6871 = vadd.xlane.f32.xlu1 %v6870_v54  ;;  %v6830_v37 = vpop.xlane.xlu1 %6829 }
0x245f   :  { %v6840_v5 = vmul.f32 0.015625, %v6830_v37  ;;  %v6873_v30 = vsel %vm242_vm12, %v6855_v35, 0.0 }
0x2460   :  { %6874 = vadd.xlane.f32.xlu0 %v6873_v30  ;;  %v6833_v36 = vpop.xlane.xlu0 %6832 }
0x2461   :  { %v14729_v22 = vsub.f32 %v14683_v7, %v6840_v5  ;;  %v6841_v32 = vmul.f32 0.015625, %v6833_v36 }
0x2463   :  { %v14732_v10 = vsub.f32 %v14686_v55, %v6841_v32  ;;  %v6856_v41 = vmul.f32 %v14729_v22, %v14729_v22 }
0x2465   :  { %v6876_v39 = vsel %vm242_vm12, %v6856_v41, 0.0  ;;  %v6857_v33 = vmul.f32 %v14732_v10, %v14732_v10 }
0x2466   :  { %6877 = vadd.xlane.f32.xlu1 %v6876_v39 }
0x2467   :  { %v6879_v51 = vsel %vm242_vm12, %v6857_v33, 0.0 }
0x2468   :  { %6880 = vadd.xlane.f32.xlu0 %v6879_v51 }
0x24db   :  { %v6860_v8 = vpop.xlane.xlu1 %6859 }
0x24dc   :  { %v6882_v42 = vmul.f32 0.015625, %v6860_v8 }
0x24dd   :  { %v6863_v1 = vpop.xlane.xlu0 %6862 }
0x24de   :  { %v6890_v45 = vadd.f32 1e-05, %v6882_v42  ;;  %v6883_v59 = vmul.f32 0.015625, %v6863_v1 }
0x24e0   :  { %11908 = vrsqrt.f32 %v6890_v45  ;;  %v6891_v62 = vadd.f32 1e-05, %v6883_v59 }
0x24e2   :  { %11910 = vrsqrt.f32 %v6891_v62 }
0x24e3   :  { %v6866_v43 = vpop.xlane.xlu1 %6865 }
0x24e4   :  { %v6884_v38 = vmul.f32 0.015625, %v6866_v43 }
0x24e5   :  { %v6869_v57 = vpop.xlane.xlu0 %6868 }
0x24e6   :  { %v6892_v23 = vadd.f32 1e-05, %v6884_v38  ;;  %v6885_v25 = vmul.f32 0.015625, %v6869_v57 }
0x24e8   :  { %11912 = vrsqrt.f32 %v6892_v23  ;;  %v6893_v6 = vadd.f32 1e-05, %v6885_v25 }
0x24ea   :  { %v11909_v40 = vpop.eup %11908  ;;  %11914 = vrsqrt.f32 %v6893_v6 }
0x24eb   :  { %v6906_v11 = vmul.f32 %v11909_v40, %v14693_v18  ;;  %v6872_v48 = vpop.xlane.xlu1 %6871 }
0x24ec   :  { %v11911_v9 = vpop.eup %11910  ;;  %v6886_v49 = vmul.f32 0.015625, %v6872_v48 }
0x24ed   :  { %v6918_v19 = vmul.f32 %v6917_v27, %v6906_v11  ;;  %v6907_v31 = vmul.f32 %v11911_v9, %v14696_v46  ;;  %v6875_v54 = vpop.xlane.xlu0 %6874 }
0x24ee   :  { %v6894_v35 = vadd.f32 1e-05, %v6886_v49  ;;  %v6887_v37 = vmul.f32 0.015625, %v6875_v54 }
0x24ef   :  { %v6919_v5 = vmul.f32 %v6917_v27, %v6907_v31  ;;  %v6930_v36 = vadd.f32 %v6929_v3, %v6918_v19 }
0x24f0   :  { %11916 = vrsqrt.f32 %v6894_v35  ;;  %v6895_v30 = vadd.f32 1e-05, %v6887_v37 }
0x24f1   :  { %v6931_v32 = vadd.f32 %v6929_v3, %v6919_v5 }
0x24f2   :  { %v11913_v41 = vpop.eup %11912  ;;  %11918 = vrsqrt.f32 %v6895_v30 }
0x24f3   :  { %v6878_v47 = vpop.xlane.xlu1 %6877  ;;  %v6938_v18 = vpack.c.bf16 %v6931_v32, %v6930_v36  ;;  %v6908_v39 = vmul.f32 %v11913_v41, %v14705_v34 }
0x24f4   :  { %v11915_v33 = vpop.eup %11914  ;;  %v6888_v60 = vmul.f32 0.015625, %v6878_v47 }
0x24f5   :  { %v6881_v51 = vpop.xlane.xlu0 %6880  ;;  %9696 = vmatmul.mubr.msk.bf16.vlgmr.msra.gmra.mrb[176].mxu1 %vm242_vm12, %v6938_v18  ;;  %v6909_v46 = vmul.f32 %v11915_v33, %v14708_v56  ;;  %v6920_v58 = vmul.f32 %v6917_v27, %v6908_v39 }
0x24f6   :  { %v6896_v20 = vadd.f32 1e-05, %v6888_v60  ;;  %v6889_v28 = vmul.f32 0.015625, %v6881_v51  ;;  %7045 = vmatprep.mubr.bf16.mxu1 %v12136_v2 }
0x24f7   :  { %v6921_v21 = vmul.f32 %v6917_v27, %v6909_v46  ;;  %v6932_v15 = vadd.f32 %v6929_v3, %v6920_v58 }
0x24f8   :  { %11920 = vrsqrt.f32 %v6896_v20  ;;  %v6897_v16 = vadd.f32 1e-05, %v6889_v28 }
0x24f9   :  { %v6933_v8 = vadd.f32 %v6929_v3, %v6921_v21 }
0x24fa   :  { %v11917_v42 = vpop.eup %11916  ;;  %11922 = vrsqrt.f32 %v6897_v16 }
0x24fb   :  { %v6939_v34 = vpack.c.bf16 %v6933_v8, %v6932_v15  ;;  %v6910_v1 = vmul.f32 %v11917_v42, %v14717_v44 }
0x24fc   :  { %v11919_v45 = vpop.eup %11918 }
0x24fd   :  { %9697 = vmatmul.mubr.msk.bf16.gmra.mrb[180].mxu1 %vm242_vm12, %v6939_v34  ;;  %v6911_v56 = vmul.f32 %v11919_v45, %v14720_v63  ;;  %v6922_v59 = vmul.f32 %v6917_v27, %v6910_v1 }
0x24fe   :  { %7055 = vmatprep.mubr.bf16.mxu1 %v12136_v2 }
0x24ff   :  { %v6923_v62 = vmul.f32 %v6917_v27, %v6911_v56  ;;  %v6934_v43 = vadd.f32 %v6929_v3, %v6922_v59 }
0x2501   :  { %v6935_v38 = vadd.f32 %v6929_v3, %v6923_v62 }
0x2502   :  { %v11921_v57 = vpop.eup %11920 }
0x2503   :  { %v6940_v12 = vpack.c.bf16 %v6935_v38, %v6934_v43  ;;  %v6912_v23 = vmul.f32 %v11921_v57, %v14729_v22 }
0x2504   :  { %v11923_v25 = vpop.eup %11922 }
0x2505   :  { %9698 = vmatmul.mubr.msk.bf16.gmra.mrb[184].mxu1 %vm242_vm12, %v6940_v12  ;;  %v6913_v44 = vmul.f32 %v11923_v25, %v14732_v10  ;;  %v6924_v6 = vmul.f32 %v6917_v27, %v6912_v23 }
0x2506   :  { %7065 = vmatprep.mubr.bf16.mxu1 %v12136_v2 }
0x2507   :  { %v6925_v40 = vmul.f32 %v6917_v27, %v6913_v44  ;;  %v6936_v63 = vadd.f32 %v6929_v3, %v6924_v6 }
0x2509   :  { %v6937_v11 = vadd.f32 %v6929_v3, %v6925_v40 }
0x250b   :  { %v6941_v48 = vpack.c.bf16 %v6937_v11, %v6936_v63 }
0x250d   :  { %9699 = vmatmul.mubr.msk.bf16.gmra.mrb[188].mxu1 %vm242_vm12, %v6941_v48 }
0x25c8   :  { %v7037_v9 = vpop.f32.mrb[176].mxu1 }
0x25c9   :  { %v7039_v49 = vpop.f32.mrb[177].mxu1 }
0x25ca   :  { %v7041_v19 = vpop.f32.mrb[178].mxu1 }
0x25cb   :  { %v14784_v31 = vpack.c.bf16 %v7041_v19, %v7037_v9  ;;  %v7043_v22 = vpop.f32.mrb[179].mxu1 }
0x25cc   :  { %v14786_v54 = vpack.c.bf16 %v7043_v22, %v7039_v49 }
0x25cd   :  { %7097 = vrot.lane.b32.xlu1 %v14784_v31, %s12138_s27  ;;  %10890 = vmatprep.mubr.msk.bf16.mxu1 %vm537_vm13, %v14784_v31 }
0x25ce   :  { %10898 = vmatprep.subr.bf16.mxu0 %v14786_v54 }
0x25cf   :  { %10899 = vmatpush3.bf16.msra.mxu0 %v14786_v54 }
0x25d0   :  { %v7047_v10 = vpop.f32.mrb[180].mxu1 }
0x25d1   :  { %v7049_v27 = vpop.f32.mrb[181].mxu1 }
0x25d2   :  { %v7051_v3 = vpop.f32.mrb[182].mxu1 }
0x25d3   :  { %v14794_v35 = vpack.c.bf16 %v7051_v3, %v7047_v10  ;;  %v7053_v37 = vpop.f32.mrb[183].mxu1 }
0x25d4   :  { %v14796_v5 = vpack.c.bf16 %v7053_v37, %v7049_v27 }
0x25d5   :  { %7099 = vrot.lane.b32.xlu0 %v14794_v35, %s12138_s27 }
0x25d6   :  { %10900 = vmatprep.subr.bf16.mxu0 %v14796_v5 }
0x25d7   :  { %10901 = vmatpush3.bf16.msra.mxu0 %v14796_v5 }
0x25d8   :  { %v7057_v30 = vpop.f32.mrb[184].mxu1 }
0x25d9   :  { %7343 = vrot.lane.b32.xlu0 %v14784_v31, %s12139_s21  ;;  %v7059_v36 = vpop.f32.mrb[185].mxu1 }
0x25da   :  { %v7061_v32 = vpop.f32.mrb[186].mxu1 }
0x25db   :  { %v14804_v41 = vpack.c.bf16 %v7061_v32, %v7057_v30  ;;  %v7063_v47 = vpop.f32.mrb[187].mxu1 }
0x25dc   :  { %v14806_v18 = vpack.c.bf16 %v7063_v47, %v7059_v36  ;;  %v14896_v36 = vld [vmem:[%s15532_s3 + $0x10] sm:$0xff] }
0x25dd   :  { %7347 = vrot.lane.b32.xlu0 %v14804_v41, %s12139_s21  ;;  %7101 = vrot.lane.b32.xlu1 %v14804_v41, %s12138_s27 }
0x25de   :  { %10902 = vmatprep.subr.bf16.mxu0 %v14806_v18 }
0x25df   :  { %10903 = vmatpush3.bf16.msra.mxu0 %v14806_v18 }
0x25e0   :  { %v7067_v39 = vpop.f32.mrb[188].mxu1 }
0x25e1   :  { %7335 = vrot.lane.b32.xlu0 %v14784_v31, %s12140_s25  ;;  %v7069_v33 = vpop.f32.mrb[189].mxu1 }
0x25e2   :  { %v7071_v60 = vpop.f32.mrb[190].mxu1 }
0x25e3   :  { %v14816_v51 = vpack.c.bf16 %v7071_v60, %v7067_v39  ;;  %v7073_v46 = vpop.f32.mrb[191].mxu1  ;;  %v14902_v39 = vld [vmem:[%s15532_s3] sm:$0xff] }
0x25e4   :  { %v14818_v58 = vpack.c.bf16 %v7073_v46, %v7069_v33 }
0x25e5   :  { %7339 = vrot.lane.b32.xlu0 %v14804_v41, %s12140_s25  ;;  %7103 = vrot.lane.b32.xlu1 %v14816_v51, %s12138_s27 }
0x25e6   :  { %10904 = vmatprep.subr.bf16.mxu0 %v14818_v58 }
0x25e7   :  { %10905 = vmatpush3.bf16.msra.mxu0 %v14818_v58 }
0x25e9   :  { %7771 = vrot.lane.b32.xlu0 %v14784_v31, %s12141_s26  ;;  %7345 = vrot.lane.b32.xlu1 %v14794_v35, %s12139_s21 }
0x25ed   :  { %7775 = vrot.lane.b32.xlu0 %v14804_v41, %s12141_s26  ;;  %7349 = vrot.lane.b32.xlu1 %v14816_v51, %s12139_s21 }
0x25f1   :  { %7763 = vrot.lane.b32.xlu0 %v14784_v31, %s12142_s28  ;;  %7337 = vrot.lane.b32.xlu1 %v14794_v35, %s12140_s25 }
0x25f5   :  { %7767 = vrot.lane.b32.xlu0 %v14804_v41, %s12142_s28  ;;  %7341 = vrot.lane.b32.xlu1 %v14816_v51, %s12140_s25 }
0x25f9   :  { %7773 = vrot.lane.b32.xlu1 %v14794_v35, %s12141_s26 }
0x25fd   :  { %7765 = vrot.lane.b32.xlu1 %v14794_v35, %s12142_s28 }
0x2601   :  { %7504 = vrot.lane.b32.xlu1 %v14786_v54, %s12140_s25 }
0x2605   :  { %7777 = vrot.lane.b32.xlu1 %v14816_v51, %s12141_s26 }
0x2609   :  { %7769 = vrot.lane.b32.xlu1 %v14816_v51, %s12142_s28 }
0x263f   :  { %v7098_v20 = vpop.permute.xlu1 %7097 }
0x2640   :  { %11210 = vmatprep.subr.msk.bf16.mxu1 %vm537_vm13, %v7098_v20  ;;  %v7118_v28 = vsel %vm537_vm13, %v7098_v20, 0  ;;  %v14908_v20 = vld [vmem:[%s15532_s3 + $0x18] sm:$0xff] }
0x2641   :  { %10883 = vmatpush3.bf16.xpose.msra.mxu1 %v7118_v28 }
0x2647   :  { %v7100_v21 = vpop.permute.xlu0 %7099 }
0x2648   :  { %11211 = vmatprep.subr.msk.bf16.mxu1 %vm537_vm13, %v7100_v21  ;;  %v7121_v16 = vsel %vm537_vm13, %v7100_v21, 0 }
0x2649   :  { %10885 = vmatpush3.bf16.xpose.msra.mxu1 %v7121_v16 }
0x264b   :  { %v7344_v1 = vpop.permute.xlu0 %7343 }
0x264c   :  { %v7364_v59 = vsel %vm537_vm13, %v7344_v1, 0 }
0x264f   :  { %v7102_v15 = vpop.permute.xlu1 %7101  ;;  %v7348_v62 = vpop.permute.xlu0 %7347 }
0x2650   :  { %11212 = vmatprep.subr.msk.bf16.mxu1 %vm537_vm13, %v7102_v15  ;;  %v7124_v8 = vsel %vm537_vm13, %v7102_v15, 0  ;;  %v7370_v44 = vsel %vm537_vm13, %v7348_v62, 0  ;;  %v14914_v15 = vld [vmem:[%s15532_s3 + $0x8] sm:$0xff] }
0x2651   :  { %10887 = vmatpush3.bf16.xpose.msra.mxu1 %v7124_v8 }
0x2653   :  { %v7336_v57 = vpop.permute.xlu0 %7335 }
0x2657   :  { %v7104_v42 = vpop.permute.xlu1 %7103  ;;  %v7340_v6 = vpop.permute.xlu0 %7339 }
0x2658   :  { %11213 = vmatprep.subr.msk.bf16.mxu1 %vm537_vm13, %v7104_v42  ;;  %v7127_v34 = vsel %vm537_vm13, %v7104_v42, 0 }
0x2659   :  { %10889 = vmatpush3.bf16.xpose.msra.mxu1 %v7127_v34 }
0x265a   :  { %11214 = vmatprep.subr.msk.bf16.mxu1 %vm537_vm13, %v7344_v1 }
0x265b   :  { %v7346_v45 = vpop.permute.xlu1 %7345  ;;  %v7772_v11 = vpop.permute.xlu0 %7771 }
0x265c   :  { %v7367_v12 = vsel %vm537_vm13, %v7346_v45, 0  ;;  %v7792_v48 = vsel %vm537_vm13, %v7772_v11, 0 }
0x265f   :  { %v7350_v56 = vpop.permute.xlu1 %7349  ;;  %v7776_v9 = vpop.permute.xlu0 %7775 }
0x2660   :  { %10891 = vmatmul.mubr.msk.bf16.vlgmr.msra.gmra.mrb[192].mxu1 %vm537_vm13, %v14794_v35  ;;  %v7373_v63 = vsel %vm537_vm13, %v7350_v56, 0  ;;  %v7798_v22 = vsel %vm537_vm13, %v7776_v9, 0 }
0x2661   :  { %10894 = vmatprep.mubr.msk.bf16.mxu1 %vm537_vm13, %v14804_v41  ;;  %10915 = vmatpush3.bf16.xpose.msra.mxu1 %v7364_v59 }
0x2662   :  { %11215 = vmatprep.subr.msk.bf16.mxu1 %vm537_vm13, %v7346_v45  ;;  %v14920_v45 = vld [vmem:[%s15532_s3 + $0x30] sm:$0xff] }
0x2663   :  { %v7338_v43 = vpop.permute.xlu1 %7337  ;;  %v7764_v49 = vpop.permute.xlu0 %7763 }
0x2667   :  { %v7342_v38 = vpop.permute.xlu1 %7341  ;;  %v7768_v3 = vpop.permute.xlu0 %7767 }
0x2668   :  { %10895 = vmatmul.mubr.msk.bf16.gmra.mrb[196].mxu1 %vm537_vm13, %v14816_v51 }
0x2669   :  { %10917 = vmatpush3.bf16.xpose.msra.mxu1 %v7367_v12  ;;  %10922 = vmatprep.mubr.msk.bf16.mxu1 %vm537_vm13, %v7336_v57  ;;  %v14932_v12 = vld [vmem:[%s15532_s3 + $0x38] sm:$0xff] }
0x266a   :  { %11216 = vmatprep.subr.msk.bf16.mxu1 %vm537_vm13, %v7348_v62  ;;  %v14926_v62 = vld [vmem:[%s15532_s3 + $0x20] sm:$0xff] }
0x266b   :  { %v7774_v23 = vpop.permute.xlu1 %7773 }
0x266c   :  { %v7795_v19 = vsel %vm537_vm13, %v7774_v23, 0 }
0x266f   :  { %v7766_v25 = vpop.permute.xlu1 %7765 }
0x2671   :  { %10919 = vmatpush3.bf16.xpose.msra.mxu1 %v7370_v44 }
0x2672   :  { %11217 = vmatprep.subr.msk.bf16.mxu1 %vm537_vm13, %v7350_v56 }
0x2673   :  { %v14874_v40 = vpop.permute.xlu1 %7504 }
0x2674   :  { %10930 = vmatprep.subr.bf16.mxu0 %v14874_v40 }
0x2677   :  { %v7778_v10 = vpop.permute.xlu1 %7777 }
0x2678   :  { %v7801_v27 = vsel %vm537_vm13, %v7778_v10, 0 }
0x2679   :  { %10921 = vmatpush3.bf16.xpose.msra.mxu1 %v7373_v63 }
0x267a   :  { %11218 = vmatprep.subr.msk.bf16.mxu1 %vm537_vm13, %v7772_v11 }
0x267b   :  { %v7770_v37 = vpop.permute.xlu1 %7769 }
0x2680   :  { %10923 = vmatmul.mubr.msk.bf16.vlgmr.msra.gmra.mrb[200].mxu1 %vm537_vm13, %v7338_v43 }
0x2681   :  { %10926 = vmatprep.mubr.msk.bf16.mxu1 %vm537_vm13, %v7340_v6  ;;  %10967 = vmatpush3.bf16.xpose.msra.mxu1 %v7792_v48  ;;  %v14938_v6 = vld [vmem:[%s15532_s3 + $0x28] sm:$0xff] }
0x2682   :  { %11219 = vmatprep.subr.msk.bf16.mxu1 %vm537_vm13, %v7774_v23 }
0x2688   :  { %10927 = vmatmul.mubr.msk.bf16.gmra.mrb[204].mxu1 %vm537_vm13, %v7342_v38 }
0x2689   :  { %10969 = vmatpush3.bf16.xpose.msra.mxu1 %v7795_v19  ;;  %10974 = vmatprep.mubr.msk.bf16.mxu1 %vm537_vm13, %v7764_v49 }
0x268a   :  { %11220 = vmatprep.subr.msk.bf16.mxu1 %vm537_vm13, %v7776_v9 }
0x2691   :  { %10971 = vmatpush3.bf16.xpose.msra.mxu1 %v7798_v22 }
0x2692   :  { %11221 = vmatprep.subr.msk.bf16.mxu1 %vm537_vm13, %v7778_v10 }
0x2699   :  { %10973 = vmatpush3.bf16.xpose.msra.mxu1 %v7801_v27 }
0x26a0   :  { %10975 = vmatmul.mubr.msk.bf16.vlgmr.msra.gmra.mrb[208].mxu1 %vm537_vm13, %v7766_v25 }
0x26a1   :  { %10978 = vmatprep.mubr.msk.bf16.mxu1 %vm537_vm13, %v7768_v3 }
0x26a8   :  { %10979 = vmatmul.mubr.msk.bf16.gmra.mrb[212].mxu1 %vm537_vm13, %v7770_v37 }
0x2733   :  { %v10892_v30 = vpop.f32.mrb[192].mxu1 }
0x2734   :  { %v7172_v32 = vadd.f32 %v14896_v36, %v10892_v30  ;;  %v7163_v47 = vpop.f32.mrb[193].mxu1 }
0x2735   :  { %v7164_v33 = vadd.f32 %v14902_v39, %v7163_v47  ;;  %v10893_v60 = vpop.f32.mrb[194].mxu1 }
0x2736   :  { %v7198_v46 = vmul.f32 1.442695, %v7172_v32  ;;  %v7175_v28 = vadd.f32 %v14908_v20, %v10893_v60  ;;  %v7166_v21 = vpop.f32.mrb[195].mxu1 }
0x2737   :  { %v7194_v16 = vmul.f32 1.442695, %v7164_v33  ;;  %v7167_v8 = vadd.f32 %v14914_v15, %v7166_v21 }
0x2738   :  { %11924 = vpow2.f32 %v7198_v46  ;;  %v7200_v34 = vmul.f32 1.442695, %v7175_v28 }
0x2739   :  { %v7196_v42 = vmul.f32 1.442695, %v7167_v8  ;;  %11926 = vpow2.f32 %v7194_v16 }
0x273b   :  { %11928 = vpow2.f32 %v7196_v42  ;;  %v10896_v1 = vpop.f32.mrb[196].mxu1 }
0x273c   :  { %v7188_v56 = vadd.f32 %v14920_v45, %v10896_v1  ;;  %v7179_v59 = vpop.f32.mrb[197].mxu1  ;;  %11930 = vpow2.f32 %v7200_v34 }
0x273d   :  { %v7180_v43 = vadd.f32 %v14926_v62, %v7179_v59  ;;  %v10897_v38 = vpop.f32.mrb[198].mxu1 }
0x273e   :  { %v7206_v57 = vmul.f32 1.442695, %v7188_v56  ;;  %v7191_v23 = vadd.f32 %v14932_v12, %v10897_v38  ;;  %v7182_v25 = vpop.f32.mrb[199].mxu1 }
0x273f   :  { %v7202_v44 = vmul.f32 1.442695, %v7180_v43  ;;  %v7183_v63 = vadd.f32 %v14938_v6, %v7182_v25 }
0x2740   :  { %11932 = vpow2.f32 %v7206_v57  ;;  %v7208_v11 = vmul.f32 1.442695, %v7191_v23 }
0x2741   :  { %11934 = vpow2.f32 %v7202_v44  ;;  %v7204_v9 = vmul.f32 1.442695, %v7183_v63 }
0x2742   :  { %v14941_v48 = vpop.eup %11924  ;;  %11936 = vpow2.f32 %v7208_v11 }
0x2743   :  { %v7216_v49 = vsel %vm242_vm12, %v14941_v48, 0.0  ;;  %v14945_v19 = vpop.eup %11926  ;;  %11938 = vpow2.f32 %v7204_v9 }
0x2744   :  { %7217 = vadd.xlane.f32.xlu0 %v7216_v49  ;;  %v7210_v27 = vsel %vm242_vm12, %v14945_v19, 0.0 }
0x2745   :  { %v14947_v22 = vpop.eup %11928 }
0x2746   :  { %v7213_v10 = vsel %vm242_vm12, %v14947_v22, 0.0  ;;  %v14953_v3 = vpop.eup %11930 }
0x2747   :  { %7214 = vadd.xlane.f32.xlu1 %v7213_v10  ;;  %v7219_v47 = vsel %vm242_vm12, %v14953_v3, 0.0 }
0x2748   :  { %7211 = vadd.xlane.f32.xlu0 %v7210_v27 }
0x274a   :  { %v14955_v37 = vpop.eup %11932 }
0x274b   :  { %v14957_v30 = vpop.eup %11934  ;;  %v7228_v32 = vsel %vm242_vm12, %v14955_v37, 0.0 }
0x274c   :  { %v14963_v33 = vpop.eup %11936  ;;  %7229 = vadd.xlane.f32.xlu1 %v7228_v32  ;;  %7220 = vadd.xlane.f32.xlu0 %v7219_v47  ;;  %v7222_v60 = vsel %vm242_vm12, %v14957_v30, 0.0 }
0x274d   :  { %v7231_v46 = vsel %vm242_vm12, %v14963_v33, 0.0  ;;  %v14969_v28 = vpop.eup %11938 }
0x274e   :  { %v7225_v16 = vsel %vm242_vm12, %v14969_v28, 0.0 }
0x2750   :  { %7223 = vadd.xlane.f32.xlu1 %v7222_v60  ;;  %7232 = vadd.xlane.f32.xlu0 %v7231_v46 }
0x2753   :  { %v10924_v21 = vpop.f32.mrb[200].mxu1 }
0x2754   :  { %v7418_v8 = vadd.f32 %v14896_v36, %v10924_v21  ;;  %7226 = vadd.xlane.f32.xlu0 %v7225_v16  ;;  %v7409_v42 = vpop.f32.mrb[201].mxu1 }
0x2755   :  { %v7410_v34 = vadd.f32 %v14902_v39, %v7409_v42  ;;  %v10925_v1 = vpop.f32.mrb[202].mxu1 }
0x2756   :  { %v7444_v56 = vmul.f32 1.442695, %v7418_v8  ;;  %v7421_v59 = vadd.f32 %v14908_v20, %v10925_v1  ;;  %v7412_v43 = vpop.f32.mrb[203].mxu1 }
0x2757   :  { %v7440_v38 = vmul.f32 1.442695, %v7410_v34  ;;  %v7413_v57 = vadd.f32 %v14914_v15, %v7412_v43 }
0x2758   :  { %11940 = vpow2.f32 %v7444_v56  ;;  %v7446_v23 = vmul.f32 1.442695, %v7421_v59 }
0x2759   :  { %11942 = vpow2.f32 %v7440_v38  ;;  %v7442_v25 = vmul.f32 1.442695, %v7413_v57 }
0x275a   :  { %11944 = vpow2.f32 %v7446_v23 }
0x275b   :  { %v10928_v44 = vpop.f32.mrb[204].mxu1  ;;  %11946 = vpow2.f32 %v7442_v25 }
0x275c   :  { %v7434_v63 = vadd.f32 %v14920_v45, %v10928_v44  ;;  %v7425_v11 = vpop.f32.mrb[205].mxu1 }
0x275d   :  { %v7426_v9 = vadd.f32 %v14926_v62, %v7425_v11  ;;  %v10929_v49 = vpop.f32.mrb[206].mxu1 }
0x275e   :  { %v7452_v10 = vmul.f32 1.442695, %v7434_v63  ;;  %v7437_v27 = vadd.f32 %v14932_v12, %v10929_v49  ;;  %v7428_v32 = vpop.f32.mrb[207].mxu1 }
0x275f   :  { %v7448_v47 = vmul.f32 1.442695, %v7426_v9  ;;  %v7429_v60 = vadd.f32 %v14938_v6, %v7428_v32 }
0x2760   :  { %11948 = vpow2.f32 %v7452_v10  ;;  %v7454_v46 = vmul.f32 1.442695, %v7437_v27 }
0x2761   :  { %11950 = vpow2.f32 %v7448_v47  ;;  %v7450_v21 = vmul.f32 1.442695, %v7429_v60 }
0x2762   :  { %v14981_v16 = vpop.eup %11940  ;;  %11952 = vpow2.f32 %v7454_v46 }
0x2763   :  { %v14983_v8 = vpop.eup %11942  ;;  %v7462_v42 = vsel %vm242_vm12, %v14981_v16, 0.0  ;;  %11954 = vpow2.f32 %v7450_v21 }
0x2764   :  { %v14987_v34 = vpop.eup %11944  ;;  %7463 = vadd.xlane.f32.xlu1 %v7462_v42  ;;  %v7456_v59 = vsel %vm242_vm12, %v14983_v8, 0.0 }
0x2765   :  { %v7465_v1 = vsel %vm242_vm12, %v14987_v34, 0.0  ;;  %v14991_v56 = vpop.eup %11946 }
0x2766   :  { %7466 = vadd.xlane.f32.xlu0 %v7465_v1  ;;  %v7459_v43 = vsel %vm242_vm12, %v14991_v56, 0.0 }
0x2768   :  { %7457 = vadd.xlane.f32.xlu1 %v7456_v59 }
0x276a   :  { %v14997_v38 = vpop.eup %11948  ;;  %7460 = vadd.xlane.f32.xlu0 %v7459_v43 }
0x276b   :  { %v14999_v57 = vpop.eup %11950  ;;  %v7474_v23 = vsel %vm242_vm12, %v14997_v38, 0.0 }
0x276c   :  { %v15003_v25 = vpop.eup %11952  ;;  %7475 = vadd.xlane.f32.xlu1 %v7474_v23  ;;  %v7468_v11 = vsel %vm242_vm12, %v14999_v57, 0.0 }
0x276d   :  { %v7477_v44 = vsel %vm242_vm12, %v15003_v25, 0.0  ;;  %v15007_v63 = vpop.eup %11954 }
0x276e   :  { %7478 = vadd.xlane.f32.xlu0 %v7477_v44  ;;  %v7471_v9 = vsel %vm242_vm12, %v15007_v63, 0.0 }
0x2770   :  { %7469 = vadd.xlane.f32.xlu1 %v7468_v11 }
0x2772   :  { %7472 = vadd.xlane.f32.xlu0 %v7471_v9 }
0x2773   :  { %v10976_v49 = vpop.f32.mrb[208].mxu1 }
0x2774   :  { %v7837_v10 = vpop.f32.mrb[209].mxu1  ;;  %v7846_v42 = vadd.f32 %v14896_v36, %v10976_v49 }
0x2775   :  { %v10977_v27 = vpop.f32.mrb[210].mxu1  ;;  %v7838_v59 = vadd.f32 %v14902_v39, %v7837_v10 }
0x2776   :  { %v7840_v32 = vpop.f32.mrb[211].mxu1  ;;  %v7872_v1 = vmul.f32 1.442695, %v7846_v42 }
0x2777   :  { %v7841_v43 = vadd.f32 %v14914_v15, %v7840_v32 }
0x2778   :  { %11956 = vpow2.f32 %v7872_v1 }
0x2779   :  { %v7870_v23 = vmul.f32 1.442695, %v7841_v43 }
0x277b   :  { %v10980_v47 = vpop.f32.mrb[212].mxu1 }
0x277c   :  { %v7853_v60 = vpop.f32.mrb[213].mxu1 }
0x277d   :  { %v10981_v46 = vpop.f32.mrb[214].mxu1  ;;  %v7854_v9 = vadd.f32 %v14926_v62, %v7853_v60 }
0x277e   :  { %v7856_v21 = vpop.f32.mrb[215].mxu1 }
0x277f   :  { %v7857_v10 = vadd.f32 %v14938_v6, %v7856_v21  ;;  %v7876_v42 = vmul.f32 1.442695, %v7854_v9 }
0x2781   :  { %7508 = vrot.lane.b32.xlu1 %v14806_v18, %s12140_s25 }
0x2782   :  { %v15045_v32 = vpop.eup %11956 }
0x2785   :  { %7510 = vrot.lane.b32.xlu1 %v14818_v58, %s12140_s25 }
0x2788   :  { %7506 = vrot.lane.b32.xlu0 %v14796_v5, %s12140_s25 }
0x2789   :  { %8122 = vrot.lane.b32.xlu1 %v14794_v35, %s12143_s2 }
0x278c   :  { %8120 = vrot.lane.b32.xlu0 %v14784_v31, %s12143_s2 }
0x278d   :  { %8126 = vrot.lane.b32.xlu1 %v14816_v51, %s12143_s2 }
0x2790   :  { %8124 = vrot.lane.b32.xlu0 %v14804_v41, %s12143_s2 }
0x2791   :  { %8114 = vrot.lane.b32.xlu1 %v14794_v35, %s12144_s29  ;;  %v7868_v35 = vmul.f32 1.442695, %v7838_v59 }
0x2793   :  { %11958 = vpow2.f32 %v7868_v35 }
0x2794   :  { %8112 = vrot.lane.b32.xlu0 %v14784_v31, %s12144_s29  ;;  %v7849_v31 = vadd.f32 %v14908_v20, %v10977_v27  ;;  %11960 = vpow2.f32 %v7870_v23  ;;  %v7878_v27 = vmul.f32 1.442695, %v7857_v10 }
0x2795   :  { %8118 = vrot.lane.b32.xlu1 %v14816_v51, %s12144_s29  ;;  %v7862_v51 = vadd.f32 %v14920_v45, %v10980_v47  ;;  %v7890_v47 = vsel %vm242_vm12, %v15045_v32, 0.0 }
0x2796   :  { %v7874_v44 = vmul.f32 1.442695, %v7849_v31 }
0x2797   :  { %v7880_v11 = vmul.f32 1.442695, %v7862_v51 }
0x2798   :  { %8116 = vrot.lane.b32.xlu0 %v14804_v41, %s12144_s29  ;;  %v7865_v41 = vadd.f32 %v14932_v12, %v10981_v46  ;;  %11962 = vpow2.f32 %v7874_v44 }
0x2799   :  { %7928 = vrot.lane.b32.xlu1 %v14786_v54, %s12142_s28  ;;  %11964 = vpow2.f32 %v7880_v11 }
0x279a   :  { %v7882_v49 = vmul.f32 1.442695, %v7865_v41 }
0x279c   :  { %11966 = vpow2.f32 %v7882_v49 }
0x279d   :  { %v15049_v1 = vpop.eup %11958  ;;  %11968 = vpow2.f32 %v7876_v42 }
0x279e   :  { %v15051_v46 = vpop.eup %11960  ;;  %11970 = vpow2.f32 %v7878_v27  ;;  %v7884_v60 = vsel %vm242_vm12, %v15049_v1, 0.0 }
0x279f   :  { %v7887_v59 = vsel %vm242_vm12, %v15051_v46, 0.0 }
0x27a2   :  { %v15055_v21 = vpop.eup %11962 }
0x27a3   :  { %v15059_v43 = vpop.eup %11964  ;;  %v7893_v35 = vsel %vm242_vm12, %v15055_v21, 0.0 }
0x27a4   :  { %v7902_v23 = vsel %vm242_vm12, %v15059_v43, 0.0 }
0x27a6   :  { %v15063_v31 = vpop.eup %11966 }
0x27a7   :  { %v15067_v51 = vpop.eup %11968  ;;  %v7905_v44 = vsel %vm242_vm12, %v15063_v31, 0.0 }
0x27a8   :  { %v15071_v41 = vpop.eup %11970  ;;  %v7896_v11 = vsel %vm242_vm12, %v15067_v51, 0.0 }
0x27a9   :  { %v7899_v9 = vsel %vm242_vm12, %v15071_v41, 0.0 }
0x27b7   :  { %7891 = vadd.xlane.f32.xlu0 %v7890_v47 }
0x27bb   :  { %7885 = vadd.xlane.f32.xlu0 %v7884_v60 }
0x27bd   :  { %7888 = vadd.xlane.f32.xlu1 %v7887_v59 }
0x27bf   :  { %7894 = vadd.xlane.f32.xlu0 %v7893_v35 }
0x27c1   :  { %7903 = vadd.xlane.f32.xlu1 %v7902_v23 }
0x27c3   :  { %7906 = vadd.xlane.f32.xlu0 %v7905_v44 }
0x27c5   :  { %7897 = vadd.xlane.f32.xlu1 %v7896_v11 }
0x27c7   :  { %7900 = vadd.xlane.f32.xlu0 %v7899_v9 }
0x27d1   :  { %v7218_v49 = vpop.xlane.xlu0 %7217 }
0x27d4   :  { %v7215_v10 = vpop.xlane.xlu1 %7214 }
0x27d5   :  { %11972 = vrcp.f32 %v7215_v10  ;;  %v7212_v42 = vpop.xlane.xlu0 %7211 }
0x27d6   :  { %11974 = vrcp.f32 %v7212_v42  ;;  %7932 = vrot.lane.b32.xlu1 %v14806_v18, %s12142_s28 }
0x27d7   :  { %11976 = vrcp.f32 %v7218_v49 }
0x27d9   :  { %v7221_v27 = vpop.xlane.xlu0 %7220  ;;  %v7230_v47 = vpop.xlane.xlu1 %7229 }
0x27da   :  { %11978 = vrcp.f32 %v7221_v27  ;;  %7934 = vrot.lane.b32.xlu1 %v14818_v58, %s12142_s28 }
0x27dd   :  { %v7233_v60 = vpop.xlane.xlu0 %7232  ;;  %7930 = vrot.lane.b32.xlu0 %v14796_v5, %s12142_s28  ;;  %v7224_v59 = vpop.xlane.xlu1 %7223 }
0x27de   :  { %8277 = vrot.lane.b32.xlu1 %v14786_v54, %s12144_s29  ;;  %11980 = vrcp.f32 %v7233_v60 }
0x27df   :  { %v11973_v35 = vpop.eup %11972  ;;  %11982 = vrcp.f32 %v7224_v59 }
0x27e0   :  { %v11975_v23 = vpop.eup %11974  ;;  %v7243_v44 = vmul.f32 %v11973_v35, %v14947_v22  ;;  %11984 = vrcp.f32 %v7230_v47 }
0x27e1   :  { %v7227_v11 = vpop.xlane.xlu0 %7226  ;;  %v7242_v9 = vmul.f32 %v11975_v23, %v14945_v19  ;;  %v11977_v49 = vpop.eup %11976 }
0x27e2   :  { %11986 = vrcp.f32 %v7227_v11  ;;  %8279 = vrot.lane.b32.xlu1 %v14796_v5, %s12144_s29  ;;  %v7244_v27 = vmul.f32 %v11977_v49, %v14941_v48 }
0x27e3   :  { %v7250_v10 = vpack.c.bf16 %v7243_v44, %v7242_v9 }
0x27e4   :  { %v11979_v42 = vpop.eup %11978 }
0x27e5   :  { %v7245_v54 = vmul.f32 %v11979_v42, %v14953_v3  ;;  %10906 = vmatprep.mubr.msk.bf16.mxu0 %vm242_vm12, %v7250_v10 }
0x27e7   :  { %v7251_v60 = vpack.c.bf16 %v7245_v54, %v7244_v27 }
0x27e8   :  { %v11981_v59 = vpop.eup %11980 }
0x27e9   :  { %10907 = vmatmul.mubr.msk.bf16.vlgmr.msra.gmra.mrb[192].mxu0 %vm242_vm12, %v7251_v60  ;;  %v11983_v22 = vpop.eup %11982  ;;  %v7249_v35 = vmul.f32 %v11981_v59, %v14963_v33 }
0x27ea   :  { %10931 = vmatpush3.bf16.msra.mxu0 %v14874_v40  ;;  %v11985_v19 = vpop.eup %11984  ;;  %v7246_v5 = vmul.f32 %v11983_v22, %v14957_v30 }
0x27eb   :  { %v7248_v48 = vmul.f32 %v11985_v19, %v14955_v37 }
0x27ec   :  { %v11987_v47 = vpop.eup %11986 }
0x27ed   :  { %v7247_v23 = vmul.f32 %v11987_v47, %v14969_v28  ;;  %v7253_v44 = vpack.c.bf16 %v7249_v35, %v7248_v48 }
0x27ef   :  { %v7252_v3 = vpack.c.bf16 %v7247_v23, %v7246_v5 }
0x27f1   :  { %10910 = vmatprep.mubr.msk.bf16.mxu0 %vm242_vm12, %v7252_v3  ;;  %v7464_v11 = vpop.xlane.xlu1 %7463 }
0x27f2   :  { %10911 = vmatmul.mubr.msk.bf16.gmra.mrb[196].mxu0 %vm242_vm12, %v7253_v44 }
0x27f3   :  { %v7467_v9 = vpop.xlane.xlu0 %7466 }
0x27f5   :  { %v7458_v49 = vpop.xlane.xlu1 %7457 }
0x27f6   :  { %11988 = vrcp.f32 %v7458_v49 }
0x27f7   :  { %v7461_v40 = vpop.xlane.xlu0 %7460 }
0x27f8   :  { %11990 = vrcp.f32 %v7461_v40 }
0x27f9   :  { %v7476_v10 = vpop.xlane.xlu1 %7475  ;;  %11992 = vrcp.f32 %v7467_v9 }
0x27fa   :  { %11994 = vrcp.f32 %v7464_v11 }
0x27fb   :  { %v7479_v33 = vpop.xlane.xlu0 %7478 }
0x27fd   :  { %v7470_v30 = vpop.xlane.xlu1 %7469 }
0x27fe   :  { %11996 = vrcp.f32 %v7470_v30 }
0x27ff   :  { %v7473_v28 = vpop.xlane.xlu0 %7472 }
0x2800   :  { %v11989_v37 = vpop.eup %11988  ;;  %11998 = vrcp.f32 %v7473_v28 }
0x2801   :  { %v7509_v42 = vpop.permute.xlu1 %7508  ;;  %v7488_v60 = vmul.f32 %v11989_v37, %v14983_v8  ;;  %12000 = vrcp.f32 %v7479_v33 }
0x2802   :  { %v11991_v27 = vpop.eup %11990  ;;  %12002 = vrcp.f32 %v7476_v10 }
0x2803   :  { %v7507_v54 = vpop.permute.xlu0 %7506  ;;  %v7489_v59 = vmul.f32 %v11991_v27, %v14991_v56  ;;  %v11993_v47 = vpop.eup %11992 }
0x2804   :  { %10932 = vmatprep.subr.bf16.mxu0 %v7507_v54  ;;  %v11995_v5 = vpop.eup %11994  ;;  %v7491_v3 = vmul.f32 %v11993_v47, %v14987_v34 }
0x2805   :  { %10933 = vmatpush3.bf16.msra.mxu0 %v7507_v54  ;;  %v7511_v22 = vpop.permute.xlu1 %7510  ;;  %v7496_v19 = vpack.c.bf16 %v7489_v59, %v7488_v60  ;;  %v7490_v9 = vmul.f32 %v11995_v5, %v14981_v16  ;;  %v11393_v59 = vld [vmem:[%s15536_s7 + $0x60] sm:$0xff]  }
0x2806   :  { %10934 = vmatprep.subr.bf16.mxu0 %v7509_v42 }
0x2807   :  { %v8121_v35 = vpop.permute.xlu0 %8120  ;;  %10938 = vmatprep.mubr.msk.bf16.mxu0 %vm242_vm12, %v7496_v19  ;;  %v7497_v40 = vpack.c.bf16 %v7491_v3, %v7490_v9 }
0x2808   :  { %v8141_v23 = vsel %vm537_vm13, %v8121_v35, 0  ;;  %11222 = vmatprep.subr.msk.bf16.mxu1 %vm537_vm13, %v8121_v35  ;;  %v11997_v48 = vpop.eup %11996 }
0x2809   :  { %10935 = vmatpush3.bf16.msra.mxu0 %v7509_v42  ;;  %11009 = vmatpush3.bf16.xpose.msra.mxu1 %v8141_v23  ;;  %v8123_v8 = vpop.permute.xlu1 %8122  ;;  %v7492_v49 = vmul.f32 %v11997_v48, %v14999_v57 }
0x280a   :  { %v11999_v56 = vpop.eup %11998  ;;  %10936 = vmatprep.subr.bf16.mxu0 %v7511_v22  ;;  %11223 = vmatprep.subr.msk.bf16.mxu1 %vm537_vm13, %v8123_v8  ;;  %v8144_v28 = vsel %vm537_vm13, %v8123_v8, 0 }
0x280b   :  { %v8125_v44 = vpop.permute.xlu0 %8124  ;;  %v7493_v11 = vmul.f32 %v11999_v56, %v15007_v63  ;;  %v12001_v10 = vpop.eup %12000 }
0x280c   :  { %v12003_v34 = vpop.eup %12002  ;;  %v7495_v16 = vmul.f32 %v12001_v10, %v15003_v25  ;;  %v8147_v37 = vsel %vm537_vm13, %v8125_v44, 0 }
0x280d   :  { %10937 = vmatpush3.bf16.msra.mxu0 %v7511_v22  ;;  %v7498_v30 = vpack.c.bf16 %v7493_v11, %v7492_v49  ;;  %v7494_v57 = vmul.f32 %v12003_v34, %v14997_v38  ;;  %v8127_v42 = vpop.permute.xlu1 %8126  ;;  %v11392_v38 = vld [vmem:[%s15536_s7 + $0x68] sm:$0xff]  }
0x280e   :  { %v8150_v27 = vsel %vm537_vm13, %v8127_v42, 0  ;;  %10946 = vmatprep.subr.bf16.mxu0 %v11392_v38 }
0x280f   :  { %v8113_v33 = vpop.permute.xlu0 %8112  ;;  %v7499_v63 = vpack.c.bf16 %v7495_v16, %v7494_v57 }
0x2810   :  { %10939 = vmatmul.mubr.msk.bf16.vlgmr.msra.gmra.mrb[200].mxu0 %vm242_vm12, %v7497_v40  ;;  %11016 = vmatprep.mubr.msk.bf16.mxu1 %vm537_vm13, %v8113_v33 }
0x2811   :  { %10942 = vmatprep.mubr.msk.bf16.mxu0 %vm242_vm12, %v7498_v30  ;;  %11011 = vmatpush3.bf16.xpose.msra.mxu1 %v8144_v28  ;;  %v8115_v54 = vpop.permute.xlu1 %8114 }
0x2812   :  { %11224 = vmatprep.subr.msk.bf16.mxu1 %vm537_vm13, %v8125_v44  ;;  %10947 = vmatpush3.bf16.msra.mxu0 %v11392_v38 }
0x2813   :  { %v8117_v60 = vpop.permute.xlu0 %8116  ;;  %10956 = vmatprep.subr.bf16.mxu0 %v11393_v59 }
0x2815   :  { %v8119_v25 = vpop.permute.xlu1 %8118 }
0x2818   :  { %10943 = vmatmul.mubr.msk.bf16.gmra.mrb[204].mxu0 %vm242_vm12, %v7499_v63 }
0x2819   :  { %11013 = vmatpush3.bf16.xpose.msra.mxu1 %v8147_v37  ;;  %v7929_v34 = vpop.permute.xlu1 %7928 }
0x281a   :  { %11225 = vmatprep.subr.msk.bf16.mxu1 %vm537_vm13, %v8127_v42 }
0x2821   :  { %11015 = vmatpush3.bf16.xpose.msra.mxu1 %v8150_v27 }
0x2828   :  { %11017 = vmatmul.mubr.msk.bf16.vlgmr.msra.gmra.mrb[216].mxu1 %vm537_vm13, %v8115_v54 }
0x2829   :  { %11020 = vmatprep.mubr.msk.bf16.mxu1 %vm537_vm13, %v8117_v60 }
0x2830   :  { %11021 = vmatmul.mubr.msk.bf16.gmra.mrb[220].mxu1 %vm537_vm13, %v8119_v25 }
0x2831   :  { %8719 = vmatprep.mubr.bf16.mxu1 %v12136_v2 }
0x2844   :  { %v7892_v9 = vpop.xlane.xlu0 %7891 }
0x2848   :  { %v7886_v49 = vpop.xlane.xlu0 %7885 }
0x284a   :  { %v7889_v63 = vpop.xlane.xlu1 %7888 }
0x284b   :  { %12004 = vrcp.f32 %v7889_v63 }
0x284c   :  { %v7895_v57 = vpop.xlane.xlu0 %7894  ;;  %12006 = vrcp.f32 %v7886_v49 }
0x284d   :  { %12008 = vrcp.f32 %v7895_v57 }
0x2850   :  { %v7907_v25 = vpop.xlane.xlu0 %7906 }
0x28bc   :  { %v10908_v22 = vpop.f32.mrb[192].mxu0 }
0x28bd   :  { %v7300_v19 = vpop.f32.mrb[193].mxu0 }
0x28be   :  { %v10909_v47 = vpop.f32.mrb[194].mxu0 }
0x28bf   :  { %v7332_v35 = vpack.c.bf16 %v10909_v47, %v10908_v22  ;;  %v7303_v5 = vpop.f32.mrb[195].mxu0  ;;  %v7904_v22 = vpop.xlane.xlu1 %7903 }
0x28c0   :  { %v7331_v23 = vpack.c.bf16 %v7303_v5, %v7300_v19  ;;  %v7901_v19 = vpop.xlane.xlu0 %7900  ;;  %v12005_v47 = vpop.eup %12004 }
0x28c1   :  { %12010 = vrcp.f32 %v7901_v19 }
0x28c2   :  { %12012 = vrcp.f32 %v7892_v9  ;;  %v7917_v9 = vmul.f32 %v12005_v47, %v15051_v46 }
0x28c4   :  { %v7931_v5 = vpop.permute.xlu0 %7930 }
0x28c5   :  { %v15131_v48 = vpop.f32.mrb[196].mxu0 }
0x28c6   :  { %v7316_v8 = vpop.f32.mrb[197].mxu0 }
0x28c7   :  { %v15133_v56 = vpop.f32.mrb[198].mxu0 }
0x28c8   :  { %v7334_v3 = vpack.c.bf16 %v15133_v56, %v15131_v48  ;;  %v7319_v44 = vpop.f32.mrb[199].mxu0  ;;  %v11394_v48 = vld [vmem:[%s15536_s7 + $0x70] sm:$0xff]  }
0x28c9   :  { %v7333_v11 = vpack.c.bf16 %v7319_v44, %v7316_v8  ;;  %v12007_v44 = vpop.eup %12006 }
0x28e3   :  { %v10940_v40 = vpop.f32.mrb[200].mxu0 }
0x28e4   :  { %v7562_v10 = vpop.f32.mrb[201].mxu0 }
0x28e5   :  { %v10941_v33 = vpop.f32.mrb[202].mxu0 }
0x28e6   :  { %v7594_v30 = vpack.c.bf16 %v10941_v33, %v10940_v40  ;;  %v7565_v28 = vpop.f32.mrb[203].mxu0 }
0x28e7   :  { %v7593_v16 = vpack.c.bf16 %v7565_v28, %v7562_v10 }
0x28e9   :  { %10948 = vmatprep.mubr.msk.bf16.mxu0 %vm537_vm13, %v7593_v16  ;;  %v7916_v16 = vmul.f32 %v12007_v44, %v15049_v1 }
0x28ea   :  { %10949 = vmatmul.mubr.msk.bf16.vlgmr.msra.gmra.mrb[208].mxu0 %vm537_vm13, %v7594_v30 }
0x28eb   :  { %10957 = vmatpush3.bf16.msra.mxu0 %v11393_v59  ;;  %v10944_v37 = vpop.f32.mrb[204].mxu0  ;;  %v7898_v59 = vpop.xlane.xlu1 %7897 }
0x28ec   :  { %10982 = vmatprep.subr.bf16.mxu0 %v7929_v34  ;;  %v7578_v42 = vpop.f32.mrb[205].mxu0  ;;  %12014 = vrcp.f32 %v7898_v59 }
0x28ed   :  { %v10945_v27 = vpop.f32.mrb[206].mxu0  ;;  %12016 = vrcp.f32 %v7904_v22 }
0x28ee   :  { %v7596_v54 = vpack.c.bf16 %v10945_v27, %v10944_v37  ;;  %v7581_v60 = vpop.f32.mrb[207].mxu0  ;;  %12018 = vrcp.f32 %v7907_v25 }
0x28ef   :  { %v7595_v38 = vpack.c.bf16 %v7581_v60, %v7578_v42 }
0x28f1   :  { %10952 = vmatprep.mubr.msk.bf16.mxu0 %vm537_vm13, %v7595_v38 }
0x28f2   :  { %10953 = vmatmul.mubr.msk.bf16.gmra.mrb[212].mxu0 %vm537_vm13, %v7596_v54 }
0x28f3   :  { %10958 = vmatprep.mubr.msk.bf16.mxu0 %vm537_vm13, %v7331_v23  ;;  %v7933_v23 = vpop.permute.xlu1 %7932 }
0x28f7   :  { %v7935_v37 = vpop.permute.xlu1 %7934 }
0x28fa   :  { %10959 = vmatmul.mubr.msk.bf16.vlgmr.msra.gmra.mrb[208].mxu0 %vm537_vm13, %v7332_v35 }
0x28fb   :  { %10983 = vmatpush3.bf16.msra.mxu0 %v7929_v34  ;;  %10962 = vmatprep.mubr.msk.bf16.mxu0 %vm537_vm13, %v7333_v11  ;;  %v11018_v8 = vpop.f32.mrb[216].mxu1 }
0x28fc   :  { %10984 = vmatprep.subr.bf16.mxu0 %v7931_v5  ;;  %v8195_v49 = vadd.f32 %v14896_v36, %v11018_v8  ;;  %v8186_v40 = vpop.f32.mrb[217].mxu1  ;;  %v12009_v36 = vpop.eup %12008 }
0x28fd   :  { %v8187_v10 = vadd.f32 %v14902_v39, %v8186_v40  ;;  %v11019_v33 = vpop.f32.mrb[218].mxu1  ;;  %v7924_v39 = vpack.c.bf16 %v7917_v9, %v7916_v16  ;;  %v12011_v63 = vpop.eup %12010  ;;  %v7919_v42 = vmul.f32 %v12009_v36, %v15055_v21 }
0x28fe   :  { %v8221_v30 = vmul.f32 1.442695, %v8195_v49  ;;  %v8198_v35 = vadd.f32 %v14908_v20, %v11019_v33  ;;  %v8189_v28 = vpop.f32.mrb[219].mxu1  ;;  %v12013_v20 = vpop.eup %12012 }
0x28ff   :  { %v8217_v34 = vmul.f32 1.442695, %v8187_v10  ;;  %10985 = vmatpush3.bf16.msra.mxu0 %v7931_v5  ;;  %v8190_v11 = vadd.f32 %v14914_v15, %v8189_v28  ;;  %v12015_v1 = vpop.eup %12014  ;;  %v7918_v60 = vmul.f32 %v12013_v20, %v15045_v32  ;;  %v15168_v32 = vpop.permute.xlu1 %8277 }
0x2900   :  { %12020 = vpow2.f32 %v8221_v30  ;;  %10986 = vmatprep.subr.bf16.mxu0 %v7933_v23  ;;  %v8223_v46 = vmul.f32 1.442695, %v8198_v35  ;;  %v7920_v21 = vmul.f32 %v12015_v1, %v15067_v51  ;;  %v12017_v19 = vpop.eup %12016 }
0x2901   :  { %v8219_v57 = vmul.f32 1.442695, %v8190_v11  ;;  %12022 = vpow2.f32 %v8217_v34  ;;  %v12019_v59 = vpop.eup %12018 }
0x2902   :  { %10963 = vmatmul.mubr.msk.bf16.gmra.mrb[212].mxu0 %vm537_vm13, %v7334_v3  ;;  %v7921_v3 = vmul.f32 %v12011_v63, %v15071_v41  ;;  %v7923_v44 = vmul.f32 %v12019_v59, %v15063_v31 }
0x2903   :  { %12024 = vpow2.f32 %v8219_v57  ;;  %10987 = vmatpush3.bf16.msra.mxu0 %v7933_v23  ;;  %10990 = vmatprep.mubr.msk.bf16.mxu0 %vm242_vm12, %v7924_v39  ;;  %v11022_v15 = vpop.f32.mrb[220].mxu1 }
0x2904   :  { %10988 = vmatprep.subr.bf16.mxu0 %v7935_v37  ;;  %v8211_v27 = vadd.f32 %v14920_v45, %v11022_v15  ;;  %v8202_v54 = vpop.f32.mrb[221].mxu1  ;;  %12026 = vpow2.f32 %v8223_v46  ;;  %v7925_v45 = vpack.c.bf16 %v7919_v42, %v7918_v60  ;;  %v7926_v47 = vpack.c.bf16 %v7921_v3, %v7920_v21 }
0x2905   :  { %v11023_v56 = vpop.f32.mrb[222].mxu1  ;;  %v8203_v38 = vadd.f32 %v14926_v62, %v8202_v54 }
0x2906   :  { %v8229_v25 = vmul.f32 1.442695, %v8211_v27  ;;  %v8205_v22 = vpop.f32.mrb[223].mxu1  ;;  %v8214_v41 = vadd.f32 %v14932_v12, %v11023_v56  ;;  %v7922_v12 = vmul.f32 %v12017_v19, %v15059_v43 }
0x2907   :  { %10989 = vmatpush3.bf16.msra.mxu0 %v7935_v37  ;;  %v8225_v8 = vmul.f32 1.442695, %v8203_v38  ;;  %v8206_v23 = vadd.f32 %v14938_v6, %v8205_v22  ;;  %v8280_v37 = vpop.permute.xlu1 %8279 }
0x2908   :  { %10998 = vmatprep.subr.bf16.mxu0 %v11394_v48  ;;  %12028 = vpow2.f32 %v8229_v25  ;;  %v8231_v40 = vmul.f32 1.442695, %v8214_v41  ;;  %v7927_v30 = vpack.c.bf16 %v7923_v44, %v7922_v12 }
0x2909   :  { %12030 = vpow2.f32 %v8225_v8  ;;  %v8227_v35 = vmul.f32 1.442695, %v8206_v23  ;;  %v11395_v23 = vld [vmem:[%s15536_s7 + $0x78] sm:$0xff]  }
0x290a   :  { %v15164_v5 = vpop.eup %12020  ;;  %10991 = vmatmul.mubr.msk.bf16.vlgmr.msra.gmra.mrb[216].mxu0 %vm242_vm12, %v7925_v45  ;;  %12032 = vpow2.f32 %v8231_v40 }
0x290b   :  { %10999 = vmatpush3.bf16.msra.mxu0 %v11394_v48  ;;  %10994 = vmatprep.mubr.msk.bf16.mxu0 %vm242_vm12, %v7926_v47  ;;  %v8239_v62 = vsel %vm242_vm12, %v15164_v5, 0.0  ;;  %v15173_v51 = vpop.eup %12022  ;;  %12034 = vpow2.f32 %v8227_v35 }
0x290c   :  { %11024 = vmatprep.subr.bf16.mxu0 %v15168_v32  ;;  %8240 = vadd.xlane.f32.xlu0 %v8239_v62  ;;  %v8233_v33 = vsel %vm242_vm12, %v15173_v51, 0.0 }
0x290d   :  { %v12025_v49 = vpop.eup %12024 }
0x290e   :  { %v8236_v10 = vsel %vm242_vm12, %v12025_v49, 0.0  ;;  %v15182_v9 = vpop.eup %12026 }
0x290f   :  { %8237 = vadd.xlane.f32.xlu1 %v8236_v10  ;;  %v8242_v43 = vsel %vm242_vm12, %v15182_v9, 0.0 }
0x2910   :  { %8234 = vadd.xlane.f32.xlu0 %v8233_v33 }
0x2912   :  { %10995 = vmatmul.mubr.msk.bf16.gmra.mrb[220].mxu0 %vm242_vm12, %v7927_v30  ;;  %v15187_v31 = vpop.eup %12028 }
0x2913   :  { %v8251_v6 = vsel %vm242_vm12, %v15187_v31, 0.0  ;;  %v15191_v28 = vpop.eup %12030 }
0x2914   :  { %8243 = vadd.xlane.f32.xlu0 %v8242_v43  ;;  %v8245_v34 = vsel %vm242_vm12, %v15191_v28, 0.0  ;;  %v15195_v11 = vpop.eup %12032 }
0x2915   :  { %v8254_v16 = vsel %vm242_vm12, %v15195_v11, 0.0  ;;  %v12035_v36 = vpop.eup %12034 }
0x2916   :  { %v8248_v57 = vsel %vm242_vm12, %v12035_v36, 0.0 }
0x2918   :  { %8252 = vadd.xlane.f32.xlu0 %v8251_v6 }
0x291c   :  { %8246 = vadd.xlane.f32.xlu0 %v8245_v34 }
0x2920   :  { %8283 = vrot.lane.b32.xlu1 %v14818_v58, %s12144_s29  ;;  %8255 = vadd.xlane.f32.xlu0 %v8254_v16 }
0x2924   :  { %8249 = vadd.xlane.f32.xlu0 %v8248_v57 }
0x293a   :  { %8281 = vrot.lane.b32.xlu0 %v14806_v18, %s12144_s29 }
0x2999   :  { %v8241_v39 = vpop.xlane.xlu0 %8240 }
0x299c   :  { %v8238_v1 = vpop.xlane.xlu1 %8237 }
0x299d   :  { %v8235_v63 = vpop.xlane.xlu0 %8234  ;;  %12036 = vrcp.f32 %v8238_v1 }
0x299e   :  { %12038 = vrcp.f32 %v8235_v63 }
0x29a0   :  { %v8284_v40 = vpop.permute.xlu1 %8283 }
0x29a1   :  { %v8244_v46 = vpop.xlane.xlu0 %8243 }
0x29a2   :  { %12040 = vrcp.f32 %v8244_v46 }
0x29a5   :  { %v8253_v20 = vpop.xlane.xlu0 %8252 }
0x29a7   :  { %v12037_v18 = vpop.eup %12036 }
0x29a8   :  { %v12039_v25 = vpop.eup %12038  ;;  %v8266_v45 = vmul.f32 %v12037_v18, %v12025_v49 }
0x29a9   :  { %v8247_v15 = vpop.xlane.xlu0 %8246  ;;  %v8265_v19 = vmul.f32 %v12039_v25, %v15173_v51 }
0x29ab   :  { %v8273_v44 = vpack.c.bf16 %v8266_v45, %v8265_v19 }
0x29ac   :  { %v12041_v62 = vpop.eup %12040 }
0x29ad   :  { %v8256_v42 = vpop.xlane.xlu0 %8255  ;;  %v8268_v49 = vmul.f32 %v12041_v62, %v15182_v9 }
0x29b1   :  { %v8250_v58 = vpop.xlane.xlu0 %8249 }
0x29b2   :  { %12042 = vrcp.f32 %v8250_v58 }
0x29b3   :  { %12044 = vrcp.f32 %v8241_v39 }
0x29b4   :  { %12046 = vrcp.f32 %v8247_v15 }
0x29b5   :  { %12048 = vrcp.f32 %v8256_v42  ;;  %v8282_v8 = vpop.permute.xlu0 %8281 }
0x29b6   :  { %12050 = vrcp.f32 %v8253_v20 }
0x29dd   :  { %v10992_v27 = vpop.f32.mrb[216].mxu0 }
0x29de   :  { %v7986_v54 = vpop.f32.mrb[217].mxu0 }
0x29df   :  { %v10993_v48 = vpop.f32.mrb[218].mxu0 }
0x29e0   :  { %v8018_v56 = vpack.c.bf16 %v10993_v48, %v10992_v27  ;;  %v7989_v3 = vpop.f32.mrb[219].mxu0  ;;  %v15229_v27 = vld [vmem:[%s15533_s4 + $0x18] sm:$0x3f] }
0x29e1   :  { %v8017_v60 = vpack.c.bf16 %v7989_v3, %v7986_v54  ;;  %v8472_v54 = vrot.slane %v15229_v27, %v12882_v29 }
0x29e3   :  { %11000 = vmatprep.mubr.msk.bf16.mxu0 %vm537_vm13, %v8017_v60 }
0x29e4   :  { %11001 = vmatmul.mubr.msk.bf16.vlgmr.msra.gmra.mrb[208].mxu0 %vm537_vm13, %v8018_v56 }
0x29e5   :  { %11025 = vmatpush3.bf16.msra.mxu0 %v15168_v32  ;;  %v10996_v38 = vpop.f32.mrb[220].mxu0  ;;  %v12043_v32 = vpop.eup %12042 }
0x29e6   :  { %11026 = vmatprep.subr.bf16.mxu0 %v8280_v37  ;;  %v8002_v22 = vpop.f32.mrb[221].mxu0  ;;  %v12045_v12 = vpop.eup %12044  ;;  %v8270_v10 = vmul.f32 %v12043_v32, %v12035_v36 }
0x29e7   :  { %v10997_v21 = vpop.f32.mrb[222].mxu0  ;;  %v12047_v51 = vpop.eup %12046  ;;  %v8267_v33 = vmul.f32 %v12045_v12, %v15164_v5 }
0x29e8   :  { %v8020_v59 = vpack.c.bf16 %v10997_v21, %v10996_v38  ;;  %v8005_v47 = vpop.f32.mrb[223].mxu0  ;;  %v8269_v30 = vmul.f32 %v12047_v51, %v15191_v28  ;;  %v12049_v43 = vpop.eup %12048 }
0x29e9   :  { %v8019_v41 = vpack.c.bf16 %v8005_v47, %v8002_v22  ;;  %11027 = vmatpush3.bf16.msra.mxu0 %v8280_v37  ;;  %v8274_v35 = vpack.c.bf16 %v8268_v49, %v8267_v33  ;;  %v12051_v34 = vpop.eup %12050  ;;  %v8272_v9 = vmul.f32 %v12049_v43, %v15195_v11 }
0x29ea   :  { %11028 = vmatprep.subr.bf16.mxu0 %v8282_v8  ;;  %v8275_v6 = vpack.c.bf16 %v8270_v10, %v8269_v30  ;;  %v8271_v16 = vmul.f32 %v12051_v34, %v15187_v31 }
0x29eb   :  { %11004 = vmatprep.mubr.msk.bf16.mxu0 %vm537_vm13, %v8019_v41 }
0x29ec   :  { %11005 = vmatmul.mubr.msk.bf16.gmra.mrb[212].mxu0 %vm537_vm13, %v8020_v59  ;;  %v8276_v36 = vpack.c.bf16 %v8272_v9, %v8271_v16 }
0x29ed   :  { %11029 = vmatpush3.bf16.msra.mxu0 %v8282_v8  ;;  %11032 = vmatprep.mubr.msk.bf16.mxu0 %vm242_vm12, %v8273_v44 }
0x29ee   :  { %11030 = vmatprep.subr.bf16.mxu0 %v8284_v40 }
0x29f1   :  { %11031 = vmatpush3.bf16.msra.mxu0 %v8284_v40 }
0x29f2   :  { %11040 = vmatprep.subr.bf16.mxu0 %v11395_v23 }
0x29f4   :  { %11033 = vmatmul.mubr.msk.bf16.vlgmr.msra.gmra.mrb[224].mxu0 %vm242_vm12, %v8274_v35 }
0x29f5   :  { %11036 = vmatprep.mubr.msk.bf16.mxu0 %vm242_vm12, %v8275_v6  ;;  %11041 = vmatpush3.bf16.msra.mxu0 %v11395_v23 }
0x29fc   :  { %11037 = vmatmul.mubr.msk.bf16.gmra.mrb[228].mxu0 %vm242_vm12, %v8276_v36 }
0x2ac7   :  { %v11034_v5 = vpop.f32.mrb[224].mxu0 }
0x2ac8   :  { %v8335_v57 = vpop.f32.mrb[225].mxu0 }
0x2ac9   :  { %v11035_v28 = vpop.f32.mrb[226].mxu0 }
0x2aca   :  { %v8367_v39 = vpack.c.bf16 %v11035_v28, %v11034_v5  ;;  %v8338_v63 = vpop.f32.mrb[227].mxu0 }
0x2acb   :  { %v8366_v46 = vpack.c.bf16 %v8338_v63, %v8335_v57 }
0x2acd   :  { %11042 = vmatprep.mubr.msk.bf16.mxu0 %vm537_vm13, %v8366_v46 }
0x2ace   :  { %11043 = vmatmul.mubr.msk.bf16.vlgmr.msra.gmra.mrb[208].mxu0 %vm537_vm13, %v8367_v39 }
0x2acf   :  { %v11038_v20 = vpop.f32.mrb[228].mxu0 }
0x2ad0   :  { %v8351_v37 = vpop.f32.mrb[229].mxu0 }
0x2ad1   :  { %v11039_v15 = vpop.f32.mrb[230].mxu0 }
0x2ad2   :  { %v8369_v1 = vpack.c.bf16 %v11039_v15, %v11038_v20  ;;  %v8354_v11 = vpop.f32.mrb[231].mxu0 }
0x2ad3   :  { %v8368_v42 = vpack.c.bf16 %v8354_v11, %v8351_v37 }
0x2ad5   :  { %11046 = vmatprep.mubr.msk.bf16.mxu0 %vm537_vm13, %v8368_v42 }
0x2ad6   :  { %11047 = vmatmul.mubr.msk.bf16.gmra.mrb[212].mxu0 %vm537_vm13, %v8369_v1 }
0x2ba1   :  { %v11044_v31 = vpop.f32.mrb[208].mxu0 }
0x2ba2   :  { %v8422_v58 = vpop.f32.mrb[209].mxu0  ;;  %v8463_v48 = vadd.f32 %v11044_v31, %v14663_v61 }
0x2ba3   :  { %v8461_v56 = vadd.f32 %v8422_v58, %v14653_v26  ;;  %v11045_v3 = vpop.f32.mrb[210].mxu0 }
0x2ba4   :  { %v8425_v60 = vpop.f32.mrb[211].mxu0  ;;  %v15238_v38 = vadd.f32 %v8472_v54, %v8463_v48  ;;  %v8464_v22 = vadd.f32 %v11045_v3, %v14666_v0 }
0x2ba5   :  { %v15235_v18 = vadd.f32 %v8472_v54, %v8461_v56  ;;  %v8462_v25 = vadd.f32 %v8425_v60, %v14656_v24 }
0x2ba6   :  { %v15247_v45 = vadd.f32 %v8472_v54, %v8464_v22  ;;  %v8487_v0 = vsel %vm242_vm12, %v15238_v38, 0.0 }
0x2ba7   :  { %v15241_v21 = vadd.f32 %v8472_v54, %v8462_v25  ;;  %v8481_v29 = vsel %vm242_vm12, %v15235_v18, 0.0 }
0x2ba8   :  { %8482 = vadd.xlane.f32.xlu1 %v8481_v29  ;;  %v8490_v12 = vsel %vm242_vm12, %v15247_v45, 0.0 }
0x2ba9   :  { %v11048_v19 = vpop.f32.mrb[212].mxu0  ;;  %v8484_v26 = vsel %vm242_vm12, %v15241_v21, 0.0 }
0x2baa   :  { %8485 = vadd.xlane.f32.xlu0 %v8484_v26  ;;  %v8438_v61 = vpop.f32.mrb[213].mxu0  ;;  %v8467_v62 = vadd.f32 %v11048_v19, %v14683_v7 }
0x2bab   :  { %v8465_v24 = vadd.f32 %v8438_v61, %v14673_v14  ;;  %v11049_v59 = vpop.f32.mrb[214].mxu0 }
0x2bac   :  { %8488 = vadd.xlane.f32.xlu1 %v8487_v0  ;;  %v8441_v47 = vpop.f32.mrb[215].mxu0  ;;  %v8468_v8 = vadd.f32 %v11049_v59, %v14686_v55  ;;  %v15265_v51 = vadd.f32 %v8472_v54, %v8467_v62  ;;  %v11399_v62 = vld [vmem:[%s15537_s8 + $0xd0] ss:$8 sps:$4 sm:$0xff]  }
0x2bad   :  { %v8466_v41 = vadd.f32 %v8441_v47, %v14676_v13  ;;  %v15255_v44 = vadd.f32 %v8472_v54, %v8465_v24  ;;  %v11398_v47 = vld [vmem:[%s15537_s8 + $0xc4] ss:$8 sps:$4 sm:$0xff]  }
0x2bae   :  { %v15261_v14 = vadd.f32 %v8472_v54, %v8468_v8  ;;  %v8499_v55 = vsel %vm242_vm12, %v15265_v51, 0.0  ;;  %v11396_v8 = vld [vmem:[%s15537_s8 + $0xc0] ss:$8 sps:$4 sm:$0xff]   ;;  %8687 = vmatprep.subr.bf16.mxu1 %v11398_v47 }
0x2baf   :  { %v15257_v32 = vadd.f32 %v8472_v54, %v8466_v41  ;;  %v8493_v13 = vsel %vm242_vm12, %v15255_v44, 0.0  ;;  %8688 = vmatpush1.bf16.msra.mxu1 %v11396_v8  ;;  %v11401_v41 = vld [vmem:[%s15537_s8 + $0xd4] ss:$8 sps:$4 sm:$0xff]  }
0x2bb0   :  { %8491 = vadd.xlane.f32.xlu1 %v8490_v12  ;;  %v8502_v7 = vsel %vm242_vm12, %v15261_v14, 0.0  ;;  %8689 = vmatprep.subr.bf16.mxu1 %v11401_v41  ;;  %v11404_v12 = vld [vmem:[%s15537_s8 + $0xe4] ss:$8 sps:$4 sm:$0xff]  }
0x2bb1   :  { %v8496_v40 = vsel %vm242_vm12, %v15257_v32, 0.0 }
0x2bb2   :  { %8497 = vadd.xlane.f32.xlu0 %v8496_v40  ;;  %v11402_v40 = vld [vmem:[%s15537_s8 + $0xe0] ss:$8 sps:$4 sm:$0xff]  }
0x2bb3   :  { %8690 = vmatpush1.bf16.msra.mxu1 %v11399_v62 }
0x2bb4   :  { %8494 = vadd.xlane.f32.xlu1 %v8493_v13  ;;  %8691 = vmatprep.subr.bf16.mxu1 %v11404_v12  ;;  %v11407_v13 = vld [vmem:[%s15537_s8 + $0xf4] ss:$8 sps:$4 sm:$0xff]   ;;  %v11410_v12 = vld [vmem:[%s15538_s9 + $0x1c8] sm:$0xff]  }
0x2bb6   :  { %8503 = vadd.xlane.f32.xlu0 %v8502_v7  ;;  %v11405_v7 = vld [vmem:[%s15537_s8 + $0xf0] ss:$8 sps:$4 sm:$0xff]  }
0x2bb7   :  { %8692 = vmatpush1.bf16.msra.mxu1 %v11402_v40 }
0x2bb8   :  { %8500 = vadd.xlane.f32.xlu1 %v8499_v55  ;;  %8693 = vmatprep.subr.bf16.mxu1 %v11407_v13  ;;  %v11408_v55 = vld [vmem:[%s15538_s9 + $0x1c0] sm:$0xff]  }
0x2bbb   :  { %8694 = vmatpush1.bf16.msra.mxu1 %v11405_v7  ;;  %v11411_v7 = vld [vmem:[%s15538_s9 + $0x188] sm:$0xff]  }
0x2bbc   :  { %10306 = vmatprep.subr.bf16.mxu1 %v11408_v55 }
0x2c35   :  { %v8483_v49 = vpop.xlane.xlu1 %8482 }
0x2c36   :  { %v8505_v23 = vmul.f32 0.015625, %v8483_v49 }
0x2c37   :  { %v8486_v10 = vpop.xlane.xlu0 %8485 }
0x2c38   :  { %v15274_v33 = vsub.f32 %v15235_v18, %v8505_v23  ;;  %v8506_v30 = vmul.f32 0.015625, %v8486_v10 }
0x2c39   :  { %v8489_v35 = vpop.xlane.xlu1 %8488 }
0x2c3a   :  { %v15277_v43 = vsub.f32 %v15241_v21, %v8506_v30  ;;  %v8507_v6 = vmul.f32 0.015625, %v8489_v35  ;;  %v8521_v34 = vmul.f32 %v15274_v33, %v15274_v33 }
0x2c3c   :  { %v15282_v9 = vsub.f32 %v15238_v38, %v8507_v6  ;;  %v8529_v16 = vsel %vm242_vm12, %v8521_v34, 0.0  ;;  %v8522_v36 = vmul.f32 %v15277_v43, %v15277_v43 }
0x2c3d   :  { %v8492_v5 = vpop.xlane.xlu1 %8491  ;;  %8530 = vadd.xlane.f32.xlu1 %v8529_v16 }
0x2c3e   :  { %v8508_v57 = vmul.f32 0.015625, %v8492_v5  ;;  %v8532_v28 = vsel %vm242_vm12, %v8522_v36, 0.0  ;;  %v8523_v39 = vmul.f32 %v15282_v9, %v15282_v9 }
0x2c3f   :  { %8533 = vadd.xlane.f32.xlu0 %v8532_v28  ;;  %v8498_v63 = vpop.xlane.xlu0 %8497 }
0x2c40   :  { %v15291_v46 = vsub.f32 %v15247_v45, %v8508_v57  ;;  %v8510_v20 = vmul.f32 0.015625, %v8498_v63  ;;  %v8535_v37 = vsel %vm242_vm12, %v8523_v39, 0.0 }
0x2c41   :  { %8536 = vadd.xlane.f32.xlu1 %v8535_v37  ;;  %v8495_v15 = vpop.xlane.xlu1 %8494 }
0x2c42   :  { %v15295_v1 = vsub.f32 %v15257_v32, %v8510_v20  ;;  %v8509_v11 = vmul.f32 0.015625, %v8495_v15  ;;  %v8524_v42 = vmul.f32 %v15291_v46, %v15291_v46  ;;  %v15350_v15 = vrot.slane %v15229_v27, %v13007_v53 }
0x2c43   :  { %v8504_v31 = vpop.xlane.xlu0 %8503 }
0x2c44   :  { %v15300_v54 = vsub.f32 %v15255_v44, %v8509_v11  ;;  %v8512_v58 = vmul.f32 0.015625, %v8504_v31  ;;  %v8538_v48 = vsel %vm242_vm12, %v8524_v42, 0.0  ;;  %v8526_v56 = vmul.f32 %v15295_v1, %v15295_v1 }
0x2c45   :  { %v8501_v3 = vpop.xlane.xlu1 %8500  ;;  %8539 = vadd.xlane.f32.xlu0 %v8538_v48 }
0x2c46   :  { %v15306_v60 = vsub.f32 %v15261_v14, %v8512_v58  ;;  %v8511_v25 = vmul.f32 0.015625, %v8501_v3  ;;  %v8525_v22 = vmul.f32 %v15300_v54, %v15300_v54  ;;  %v8544_v26 = vsel %vm242_vm12, %v8526_v56, 0.0 }
0x2c48   :  { %v15311_v29 = vsub.f32 %v15265_v51, %v8511_v25  ;;  %v8541_v19 = vsel %vm242_vm12, %v8525_v22, 0.0  ;;  %v8528_v61 = vmul.f32 %v15306_v60, %v15306_v60 }
0x2c49   :  { %8542 = vadd.xlane.f32.xlu1 %v8541_v19  ;;  %8545 = vadd.xlane.f32.xlu0 %v8544_v26  ;;  %v8600_v19 = vrot.slane %v15229_v27, %v13010_v50  ;;  %v11409_v50 = vld [vmem:[%s15538_s9 + $0x180] sm:$0xff]  }
0x2c4a   :  { %v8527_v24 = vmul.f32 %v15311_v29, %v15311_v29  ;;  %v8550_v0 = vsel %vm242_vm12, %v8528_v61, 0.0 }
0x2c4c   :  { %v8547_v59 = vsel %vm242_vm12, %v8527_v24, 0.0 }
0x2c4d   :  { %8548 = vadd.xlane.f32.xlu1 %v8547_v59  ;;  %8551 = vadd.xlane.f32.xlu0 %v8550_v0 }
0x2cca   :  { %v8531_v49 = vpop.xlane.xlu1 %8530 }
0x2ccb   :  { %v8553_v23 = vmul.f32 0.015625, %v8531_v49 }
0x2ccc   :  { %v8534_v10 = vpop.xlane.xlu0 %8533 }
0x2ccd   :  { %v8561_v30 = vadd.f32 1e-05, %v8553_v23  ;;  %v8554_v35 = vmul.f32 0.015625, %v8534_v10  ;;  %v11412_v23 = vld [vmem:[%s15538_s9 + $0x1d0] sm:$0xff]  }
0x2cce   :  { %v8537_v6 = vpop.xlane.xlu1 %8536 }
0x2ccf   :  { %12052 = vrsqrt.f32 %v8561_v30  ;;  %v8562_v34 = vadd.f32 1e-05, %v8554_v35  ;;  %v8555_v16 = vmul.f32 0.015625, %v8537_v6  ;;  %v11413_v35 = vld [vmem:[%s15538_s9 + $0x190] sm:$0xff]  }
0x2cd1   :  { %12054 = vrsqrt.f32 %v8562_v34  ;;  %v8563_v36 = vadd.f32 1e-05, %v8555_v16 }
0x2cd2   :  { %v8540_v5 = vpop.xlane.xlu0 %8539 }
0x2cd3   :  { %12056 = vrsqrt.f32 %v8563_v36  ;;  %v8556_v57 = vmul.f32 0.015625, %v8540_v5  ;;  %v11414_v36 = vld [vmem:[%s15538_s9 + $0x1d8] sm:$0xff]  }
0x2cd5   :  { %v8564_v28 = vadd.f32 1e-05, %v8556_v57 }
0x2cd6   :  { %v8543_v39 = vpop.xlane.xlu1 %8542  ;;  %v8546_v63 = vpop.xlane.xlu0 %8545 }
0x2cd7   :  { %12058 = vrsqrt.f32 %v8564_v28  ;;  %v8557_v20 = vmul.f32 0.015625, %v8543_v39  ;;  %v8558_v37 = vmul.f32 0.015625, %v8546_v63 }
0x2cd9   :  { %v12053_v11 = vpop.eup %12052  ;;  %v8565_v42 = vadd.f32 1e-05, %v8557_v20  ;;  %v8566_v31 = vadd.f32 1e-05, %v8558_v37  ;;  %v11416_v20 = vld [vmem:[%s15538_s9 + $0x1e0] sm:$0xff]  }
0x2cda   :  { %v8577_v58 = vmul.f32 %v12053_v11, %v15274_v33  ;;  %v8549_v48 = vpop.xlane.xlu1 %8548  ;;  %v8552_v56 = vpop.xlane.xlu0 %8551  ;;  %v11417_v37 = vld [vmem:[%s15538_s9 + $0x1a0] sm:$0xff]  }
0x2cdb   :  { %v12055_v3 = vpop.eup %12054  ;;  %12060 = vrsqrt.f32 %v8565_v42  ;;  %v8559_v25 = vmul.f32 0.015625, %v8549_v48  ;;  %v8560_v22 = vmul.f32 0.015625, %v8552_v56  ;;  %v11420_v56 = vld [vmem:[%s15538_s9 + $0x1f0] sm:$0xff]  }
0x2cdc   :  { %v8589_v26 = vmul.f32 %v15350_v15, %v8577_v58  ;;  %v8578_v61 = vmul.f32 %v12055_v3, %v15277_v43  ;;  %12062 = vrsqrt.f32 %v8566_v31  ;;  %v11422_v3 = vld [vmem:[%s15538_s9 + $0x1f8] sm:$0xff]  }
0x2cdd   :  { %v12057_v53 = vpop.eup %12056  ;;  %v8567_v24 = vadd.f32 1e-05, %v8559_v25  ;;  %v8568_v59 = vadd.f32 1e-05, %v8560_v22  ;;  %v11423_v25 = vld [vmem:[%s15538_s9 + $0x1b8] sm:$0xff]  }
0x2cde   :  { %v8590_v0 = vmul.f32 %v15350_v15, %v8578_v61  ;;  %v8601_v33 = vadd.f32 %v8600_v19, %v8589_v26  ;;  %v8579_v8 = vmul.f32 %v12057_v53, %v15282_v9  ;;  %v9768_v22 = vld [vmem:[%s15534_s5 + $0x6] sm:$0x3] }
0x2cdf   :  { %12064 = vrsqrt.f32 %v8567_v24  ;;  %v8632_v26 = vrot.slane %v9768_v22, %v12396_v17 }
0x2ce0   :  { %v8602_v47 = vadd.f32 %v8600_v19, %v8590_v0  ;;  %12066 = vrsqrt.f32 %v8568_v59  ;;  %v8591_v40 = vmul.f32 %v15350_v15, %v8579_v8 }
0x2ce1   :  { %v12059_v41 = vpop.eup %12058 }
0x2ce2   :  { %v8580_v62 = vmul.f32 %v12059_v41, %v15291_v46  ;;  %v8609_v43 = vpack.c.bf16 %v8602_v47, %v8601_v33  ;;  %v8603_v30 = vadd.f32 %v8600_v19, %v8591_v40 }
0x2ce4   :  { %9777 = vmatmul.mubr.msk.bf16.vlgmr.msra.gmra.mrb[224].mxu1 %vm242_vm12, %v8609_v43  ;;  %v8592_v9 = vmul.f32 %v15350_v15, %v8580_v62 }
0x2ce5   :  { %v12061_v13 = vpop.eup %12060  ;;  %8729 = vmatprep.mubr.bf16.mxu1 %v12136_v2  ;;  %10307 = vmatpush3.bf16.msra.mxu1 %v11409_v50 }
0x2ce6   :  { %v12063_v46 = vpop.eup %12062  ;;  %v8581_v55 = vmul.f32 %v12061_v13, %v15300_v54  ;;  %v8604_v49 = vadd.f32 %v8600_v19, %v8592_v9  ;;  %10308 = vmatprep.subr.bf16.mxu1 %v11410_v12 }
0x2ce7   :  { %v8582_v10 = vmul.f32 %v12063_v46, %v15295_v1  ;;  %v11415_v1 = vld [vmem:[%s15538_s9 + $0x198] sm:$0xff]  }
0x2ce8   :  { %v8610_v34 = vpack.c.bf16 %v8604_v49, %v8603_v30  ;;  %v8593_v16 = vmul.f32 %v15350_v15, %v8581_v55 }
0x2ce9   :  { %10309 = vmatpush3.bf16.msra.mxu1 %v11411_v7  ;;  %v12065_v6 = vpop.eup %12064  ;;  %v8594_v54 = vmul.f32 %v15350_v15, %v8582_v10 }
0x2cea   :  { %10310 = vmatprep.subr.bf16.mxu1 %v11412_v23  ;;  %v12067_v5 = vpop.eup %12066  ;;  %v8583_v57 = vmul.f32 %v12065_v6, %v15311_v29  ;;  %v8605_v39 = vadd.f32 %v8600_v19, %v8593_v16 }
0x2ceb   :  { %v8584_v28 = vmul.f32 %v12067_v5, %v15306_v60  ;;  %v8606_v63 = vadd.f32 %v8600_v19, %v8594_v54  ;;  %v11418_v60 = vld [vmem:[%s15538_s9 + $0x1e8] sm:$0xff]  }
0x2cec   :  { %9778 = vmatmul.mubr.msk.bf16.gmra.mrb[228].mxu1 %vm242_vm12, %v8610_v34  ;;  %v8595_v42 = vmul.f32 %v15350_v15, %v8583_v57 }
0x2ced   :  { %8739 = vmatprep.mubr.bf16.mxu1 %v12136_v2  ;;  %10311 = vmatpush3.bf16.msra.mxu1 %v11413_v35  ;;  %v8611_v11 = vpack.c.bf16 %v8606_v63, %v8605_v39  ;;  %v8596_v31 = vmul.f32 %v15350_v15, %v8584_v28  ;;  %v11419_v15 = vld [vmem:[%s15538_s9 + $0x1a8] sm:$0xff]  }
0x2cee   :  { %10312 = vmatprep.subr.bf16.mxu1 %v11414_v36  ;;  %v8607_v29 = vadd.f32 %v8600_v19, %v8595_v42 }
0x2cef   :  { %v8608_v58 = vadd.f32 %v8600_v19, %v8596_v31  ;;  %v8628_v19 = vrot.slane %v9768_v22, %v12390_v4 }
0x2cf1   :  { %10313 = vmatpush3.bf16.msra.mxu1 %v11415_v1  ;;  %v8612_v48 = vpack.c.bf16 %v8608_v58, %v8607_v29 }
0x2cf2   :  { %10314 = vmatprep.subr.bf16.mxu1 %v11416_v20 }
0x2cf4   :  { %9779 = vmatmul.mubr.msk.bf16.gmra.mrb[232].mxu1 %vm242_vm12, %v8611_v11 }
0x2cf5   :  { %8749 = vmatprep.mubr.bf16.mxu1 %v12136_v2  ;;  %10315 = vmatpush3.bf16.msra.mxu1 %v11417_v37  ;;  %v11421_v2 = vld [vmem:[%s15538_s9 + $0x1b0] sm:$0xff]  }
0x2cf6   :  { %10316 = vmatprep.subr.bf16.mxu1 %v11418_v60 }
0x2cf9   :  { %10317 = vmatpush3.bf16.msra.mxu1 %v11419_v15 }
0x2cfa   :  { %10318 = vmatprep.subr.bf16.mxu1 %v11420_v56 }
0x2cfc   :  { %9780 = vmatmul.mubr.msk.bf16.gmra.mrb[236].mxu1 %vm242_vm12, %v8612_v48 }
0x2cfd   :  { %10319 = vmatpush3.bf16.msra.mxu1 %v11421_v2 }
0x2cfe   :  { %10320 = vmatprep.subr.bf16.mxu1 %v11422_v3 }
0x2d01   :  { %10321 = vmatpush3.bf16.msra.mxu1 %v11423_v25 }
0x2db7   :  { %v8721_v61 = vpop.f32.mrb[224].mxu1 }
0x2db8   :  { %v8722_v53 = vadd.f32 %v8721_v61, %v8628_v19  ;;  %v8723_v24 = vpop.f32.mrb[225].mxu1 }
0x2db9   :  { %v8724_v59 = vadd.f32 %v8723_v24, %v8632_v26  ;;  %v8725_v0 = vpop.f32.mrb[226].mxu1 }
0x2dba   :  { %v8726_v33 = vadd.f32 %v8725_v0, %v8628_v19  ;;  %v8727_v47 = vpop.f32.mrb[227].mxu1  ;;  %v8760_v41 = vmax.f32 %v8722_v53, 0.0 }
0x2dbb   :  { %v8728_v8 = vadd.f32 %v8727_v47, %v8632_v26  ;;  %v8761_v62 = vmax.f32 %v8724_v59, 0.0 }
0x2dbc   :  { %v8762_v50 = vmax.f32 %v8726_v33, 0.0 }
0x2dbd   :  { %v8763_v43 = vmax.f32 %v8728_v8, 0.0 }
0x2dbe   :  { %v8776_v12 = vpack.c.bf16 %v8762_v50, %v8760_v41 }
0x2dbf   :  { %v8777_v40 = vpack.c.bf16 %v8763_v43, %v8761_v62  ;;  %v8731_v9 = vpop.f32.mrb[228].mxu1  ;;  %v8989_v62 = vrot.slane %v15229_v27, %v13092_v52 }
0x2dc0   :  { %v8732_v13 = vadd.f32 %v8731_v9, %v8628_v19  ;;  %v8733_v7 = vpop.f32.mrb[229].mxu1 }
0x2dc1   :  { %v8734_v46 = vadd.f32 %v8733_v7, %v8632_v26  ;;  %v8735_v55 = vpop.f32.mrb[230].mxu1  ;;  %8945 = vmatprep.mubr.bf16.mxu1 %v8777_v40 }
0x2dc2   :  { %v8736_v49 = vadd.f32 %v8735_v55, %v8628_v19  ;;  %v8737_v23 = vpop.f32.mrb[231].mxu1  ;;  %8946 = vmatmul.mubr.bf16.vlgmr.msra.gmra.mrb[240].mxu1 %v8776_v12  ;;  %v8764_v30 = vmax.f32 %v8732_v13, 0.0 }
0x2dc3   :  { %v8738_v10 = vadd.f32 %v8737_v23, %v8632_v26  ;;  %v8765_v6 = vmax.f32 %v8734_v46, 0.0 }
0x2dc4   :  { %v8766_v35 = vmax.f32 %v8736_v49, 0.0 }
0x2dc5   :  { %v8767_v34 = vmax.f32 %v8738_v10, 0.0 }
0x2dc6   :  { %v8778_v16 = vpack.c.bf16 %v8766_v35, %v8764_v30 }
0x2dc7   :  { %v8779_v54 = vpack.c.bf16 %v8767_v34, %v8765_v6  ;;  %v8741_v36 = vpop.f32.mrb[232].mxu1 }
0x2dc8   :  { %v8742_v5 = vadd.f32 %v8741_v36, %v8628_v19  ;;  %v8743_v1 = vpop.f32.mrb[233].mxu1 }
0x2dc9   :  { %v8744_v57 = vadd.f32 %v8743_v1, %v8632_v26  ;;  %v8745_v28 = vpop.f32.mrb[234].mxu1  ;;  %8953 = vmatprep.mubr.bf16.mxu1 %v8779_v54 }
0x2dca   :  { %v8746_v39 = vadd.f32 %v8745_v28, %v8628_v19  ;;  %v8747_v63 = vpop.f32.mrb[235].mxu1  ;;  %8954 = vmatmul.mubr.bf16.gmra.mrb[244].mxu1 %v8778_v16  ;;  %v8768_v37 = vmax.f32 %v8742_v5, 0.0 }
0x2dcb   :  { %v8748_v20 = vadd.f32 %v8747_v63, %v8632_v26  ;;  %v8769_v42 = vmax.f32 %v8744_v57, 0.0 }
0x2dcc   :  { %v8770_v11 = vmax.f32 %v8746_v39, 0.0 }
0x2dcd   :  { %v8771_v31 = vmax.f32 %v8748_v20, 0.0 }
0x2dce   :  { %v8780_v60 = vpack.c.bf16 %v8770_v11, %v8768_v37 }
0x2dcf   :  { %v8781_v29 = vpack.c.bf16 %v8771_v31, %v8769_v42  ;;  %v8751_v58 = vpop.f32.mrb[236].mxu1 }
0x2dd0   :  { %v8752_v48 = vadd.f32 %v8751_v58, %v8628_v19  ;;  %v8753_v15 = vpop.f32.mrb[237].mxu1 }
0x2dd1   :  { %v8754_v56 = vadd.f32 %v8753_v15, %v8632_v26  ;;  %v8755_v2 = vpop.f32.mrb[238].mxu1  ;;  %8961 = vmatprep.mubr.bf16.mxu1 %v8781_v29 }
0x2dd2   :  { %v8756_v3 = vadd.f32 %v8755_v2, %v8628_v19  ;;  %v8757_v25 = vpop.f32.mrb[239].mxu1  ;;  %8962 = vmatmul.mubr.bf16.gmra.mrb[248].mxu1 %v8780_v60  ;;  %v8772_v61 = vmax.f32 %v8752_v48, 0.0 }
0x2dd3   :  { %v8758_v22 = vadd.f32 %v8757_v25, %v8632_v26  ;;  %v8773_v24 = vmax.f32 %v8754_v56, 0.0 }
0x2dd4   :  { %v8774_v53 = vmax.f32 %v8756_v3, 0.0 }
0x2dd5   :  { %v8775_v59 = vmax.f32 %v8758_v22, 0.0 }
0x2dd6   :  { %v8782_v0 = vpack.c.bf16 %v8774_v53, %v8772_v61 }
0x2dd7   :  { %v8783_v33 = vpack.c.bf16 %v8775_v59, %v8773_v24 }
0x2dd9   :  { %8969 = vmatprep.mubr.bf16.mxu1 %v8783_v33 }
0x2dda   :  { %8970 = vmatmul.mubr.bf16.gmra.mrb[252].mxu1 %v8782_v0 }
0x2e95   :  { %v10322_v47 = vpop.f32.mrb[240].mxu1 }
0x2e96   :  { %v10323_v8 = vpop.f32.mrb[241].mxu1 }
0x2e97   :  { %v10324_v41 = vadd.f32 %v10323_v8, %v10322_v47  ;;  %v10325_v50 = vpop.f32.mrb[242].mxu1 }
0x2e98   :  { %v10326_v43 = vpop.f32.mrb[243].mxu1 }
0x2e99   :  { %v8978_v19 = vadd.f32 %v10324_v41, %v15235_v18  ;;  %v10327_v12 = vadd.f32 %v10326_v43, %v10325_v50 }
0x2e9b   :  { %v8979_v26 = vadd.f32 %v10327_v12, %v15241_v21  ;;  %v8990_v40 = vadd.f32 %v8989_v62, %v8978_v19 }
0x2e9d   :  { %v10328_v9 = vpop.f32.mrb[244].mxu1  ;;  %v8999_v13 = vsel %vm242_vm12, %v8990_v40, 0.0  ;;  %v8991_v7 = vadd.f32 %v8989_v62, %v8979_v26 }
0x2e9e   :  { %v10329_v46 = vpop.f32.mrb[245].mxu1  ;;  %9000 = vadd.xlane.f32.xlu1 %v8999_v13 }
0x2e9f   :  { %v10330_v55 = vadd.f32 %v10329_v46, %v10328_v9  ;;  %v10331_v49 = vpop.f32.mrb[246].mxu1  ;;  %v9002_v23 = vsel %vm242_vm12, %v8991_v7, 0.0 }
0x2ea0   :  { %v10332_v10 = vpop.f32.mrb[247].mxu1  ;;  %9003 = vadd.xlane.f32.xlu0 %v9002_v23 }
0x2ea1   :  { %v8980_v52 = vadd.f32 %v10330_v55, %v15238_v38  ;;  %v10333_v27 = vadd.f32 %v10332_v10, %v10331_v49 }
0x2ea3   :  { %v8981_v18 = vadd.f32 %v10333_v27, %v15247_v45  ;;  %v8992_v30 = vadd.f32 %v8989_v62, %v8980_v52 }
0x2ea5   :  { %v10334_v21 = vpop.f32.mrb[248].mxu1  ;;  %v9005_v35 = vsel %vm242_vm12, %v8992_v30, 0.0  ;;  %v8993_v6 = vadd.f32 %v8989_v62, %v8981_v18 }
0x2ea6   :  { %v10335_v34 = vpop.f32.mrb[249].mxu1  ;;  %9006 = vadd.xlane.f32.xlu1 %v9005_v35 }
0x2ea7   :  { %v10336_v16 = vadd.f32 %v10335_v34, %v10334_v21  ;;  %v10337_v54 = vpop.f32.mrb[250].mxu1  ;;  %v9008_v36 = vsel %vm242_vm12, %v8993_v6, 0.0 }
0x2ea8   :  { %v10338_v5 = vpop.f32.mrb[251].mxu1  ;;  %9009 = vadd.xlane.f32.xlu0 %v9008_v36  ;;  %v11425_v36 = vld [vmem:[%s15540_s11 + $0x8] sm:$0xff]  }
0x2ea9   :  { %v8982_v1 = vadd.f32 %v10336_v16, %v15255_v44  ;;  %v10339_v57 = vadd.f32 %v10338_v5, %v10337_v54  ;;  %v11424_v54 = vld [vmem:[%s15540_s11] sm:$0xff]   ;;  %v11426_v5 = vld [vmem:[%s15540_s11 + $0x10] sm:$0xff]  }
0x2eaa   :  { %11050 = vmatprep.subr.bf16.mxu0 %v11424_v54 }
0x2eab   :  { %v8983_v38 = vadd.f32 %v10339_v57, %v15257_v32  ;;  %v8994_v28 = vadd.f32 %v8989_v62, %v8982_v1  ;;  %11051 = vmatpush3.bf16.msra.mxu0 %v11424_v54  ;;  %v11427_v1 = vld [vmem:[%s15540_s11 + $0x18] sm:$0xff]  }
0x2eac   :  { %11052 = vmatprep.subr.bf16.mxu0 %v11425_v36 }
0x2ead   :  { %v10340_v45 = vpop.f32.mrb[252].mxu1  ;;  %v9011_v39 = vsel %vm242_vm12, %v8994_v28, 0.0  ;;  %v8995_v63 = vadd.f32 %v8989_v62, %v8983_v38 }
0x2eae   :  { %9012 = vadd.xlane.f32.xlu1 %v9011_v39  ;;  %v10341_v20 = vpop.f32.mrb[253].mxu1 }
0x2eaf   :  { %v10342_v37 = vadd.f32 %v10341_v20, %v10340_v45  ;;  %v10343_v11 = vpop.f32.mrb[254].mxu1  ;;  %v9014_v42 = vsel %vm242_vm12, %v8995_v63, 0.0  ;;  %11053 = vmatpush3.bf16.msra.mxu0 %v11425_v36 }
0x2eb0   :  { %9015 = vadd.xlane.f32.xlu0 %v9014_v42  ;;  %v10344_v31 = vpop.f32.mrb[255].mxu1  ;;  %11054 = vmatprep.subr.bf16.mxu0 %v11426_v5  ;;  %v8998_v42 = vld [vmem:[%s15539_s10] sm:$0x3] }
0x2eb1   :  { %v8984_v60 = vadd.f32 %v10342_v37, %v15265_v51  ;;  %v10345_v29 = vadd.f32 %v10344_v31, %v10343_v11 }
0x2eb3   :  { %v8985_v44 = vadd.f32 %v10345_v29, %v15261_v14  ;;  %v8996_v58 = vadd.f32 %v8989_v62, %v8984_v60  ;;  %11055 = vmatpush3.bf16.msra.mxu0 %v11426_v5 }
0x2eb4   :  { %11056 = vmatprep.subr.bf16.mxu0 %v11427_v1 }
0x2eb5   :  { %v9017_v32 = vsel %vm242_vm12, %v8996_v58, 0.0  ;;  %v8997_v48 = vadd.f32 %v8989_v62, %v8985_v44  ;;  %v9106_v44 = vrot.slane %v8998_v42, %v12390_v4 }
0x2eb6   :  { %9018 = vadd.xlane.f32.xlu1 %v9017_v32 }
0x2eb7   :  { %v9020_v15 = vsel %vm242_vm12, %v8997_v48, 0.0  ;;  %11057 = vmatpush3.bf16.msra.mxu0 %v11427_v1 }
0x2eb8   :  { %9021 = vadd.xlane.f32.xlu0 %v9020_v15 }
0x2f2b   :  { %v9001_v56 = vpop.xlane.xlu1 %9000 }
0x2f2c   :  { %v9023_v2 = vmul.f32 0.015625, %v9001_v56 }
0x2f2d   :  { %v9004_v3 = vpop.xlane.xlu0 %9003 }
0x2f2e   :  { %v15445_v25 = vsub.f32 %v8990_v40, %v9023_v2  ;;  %v9024_v22 = vmul.f32 0.015625, %v9004_v3  ;;  %v9118_v3 = vrot.slane %v8998_v42, %v12396_v17 }
0x2f30   :  { %v15447_v61 = vsub.f32 %v8991_v7, %v9024_v22  ;;  %v9039_v51 = vmul.f32 %v15445_v25, %v15445_v25 }
0x2f32   :  { %v9047_v14 = vsel %vm242_vm12, %v9039_v51, 0.0  ;;  %v9040_v53 = vmul.f32 %v15447_v61, %v15447_v61 }
0x2f33   :  { %v9007_v24 = vpop.xlane.xlu1 %9006  ;;  %9048 = vadd.xlane.f32.xlu1 %v9047_v14 }
0x2f34   :  { %v9025_v59 = vmul.f32 0.015625, %v9007_v24  ;;  %v9050_v0 = vsel %vm242_vm12, %v9040_v53, 0.0 }
0x2f35   :  { %v9010_v33 = vpop.xlane.xlu0 %9009  ;;  %9051 = vadd.xlane.f32.xlu0 %v9050_v0 }
0x2f36   :  { %v15455_v47 = vsub.f32 %v8992_v30, %v9025_v59  ;;  %v9026_v8 = vmul.f32 0.015625, %v9010_v33 }
0x2f38   :  { %v15457_v41 = vsub.f32 %v8993_v6, %v9026_v8  ;;  %v9041_v50 = vmul.f32 %v15455_v47, %v15455_v47 }
0x2f3a   :  { %v9053_v62 = vsel %vm242_vm12, %v9041_v50, 0.0  ;;  %v9042_v43 = vmul.f32 %v15457_v41, %v15457_v41 }
0x2f3b   :  { %v9013_v19 = vpop.xlane.xlu1 %9012  ;;  %9054 = vadd.xlane.f32.xlu1 %v9053_v62 }
0x2f3c   :  { %v9027_v12 = vmul.f32 0.015625, %v9013_v19  ;;  %v9056_v26 = vsel %vm242_vm12, %v9042_v43, 0.0 }
0x2f3d   :  { %v9016_v40 = vpop.xlane.xlu0 %9015  ;;  %9057 = vadd.xlane.f32.xlu0 %v9056_v26 }
0x2f3e   :  { %v15465_v9 = vsub.f32 %v8994_v28, %v9027_v12  ;;  %v9028_v13 = vmul.f32 0.015625, %v9016_v40 }
0x2f40   :  { %v15467_v7 = vsub.f32 %v8995_v63, %v9028_v13  ;;  %v9043_v46 = vmul.f32 %v15465_v9, %v15465_v9 }
0x2f42   :  { %v9059_v55 = vsel %vm242_vm12, %v9043_v46, 0.0  ;;  %v9044_v49 = vmul.f32 %v15467_v7, %v15467_v7 }
0x2f43   :  { %9060 = vadd.xlane.f32.xlu1 %v9059_v55  ;;  %v9019_v23 = vpop.xlane.xlu1 %9018 }
0x2f44   :  { %v9029_v10 = vmul.f32 0.015625, %v9019_v23  ;;  %v9062_v52 = vsel %vm242_vm12, %v9044_v49, 0.0 }
0x2f45   :  { %9063 = vadd.xlane.f32.xlu0 %v9062_v52  ;;  %v9022_v27 = vpop.xlane.xlu0 %9021 }
0x2f46   :  { %v15475_v18 = vsub.f32 %v8996_v58, %v9029_v10  ;;  %v9030_v30 = vmul.f32 0.015625, %v9022_v27 }
0x2f48   :  { %v15477_v21 = vsub.f32 %v8997_v48, %v9030_v30  ;;  %v9045_v35 = vmul.f32 %v15475_v18, %v15475_v18 }
0x2f4a   :  { %v9065_v6 = vsel %vm242_vm12, %v9045_v35, 0.0  ;;  %v9046_v34 = vmul.f32 %v15477_v21, %v15477_v21 }
0x2f4b   :  { %9066 = vadd.xlane.f32.xlu1 %v9065_v6 }
0x2f4c   :  { %v9068_v16 = vsel %vm242_vm12, %v9046_v34, 0.0 }
0x2f4d   :  { %9069 = vadd.xlane.f32.xlu0 %v9068_v16 }
0x2fc0   :  { %v9049_v57 = vpop.xlane.xlu1 %9048 }
0x2fc1   :  { %v9071_v38 = vmul.f32 0.015625, %v9049_v57 }
0x2fc2   :  { %v9052_v28 = vpop.xlane.xlu0 %9051 }
0x2fc3   :  { %v9079_v45 = vadd.f32 1e-05, %v9071_v38  ;;  %v9072_v39 = vmul.f32 0.015625, %v9052_v28  ;;  %v9829_v38 = vld [vmem:[%s15541_s12] ss:$0 sm:$0xff]  ;;  %s12112_s12 = scalar_lea.vmem %s9261_s30, 1024 }
0x2fc4   :  { %p12113_p0 = scmp.ne.s32.totalorder %s9261_s30, %s12112_s12  ;;  %p12118_p2 = scmp.lt.s32.totalorder %s12112_s12, %s12112_s12 }
0x2fc5   :  { %12068 = vrsqrt.f32 %v9079_v45  ;;  %v9080_v63 = vadd.f32 1e-05, %v9072_v39 }
0x2fc6   :  { %p12119_p3 = por %p12118_p2, %p12117_p1 }
0x2fc7   :  { %12070 = vrsqrt.f32 %v9080_v63 }
0x2fc8   :  { %v9055_v20 = vpop.xlane.xlu1 %9054  ;;  %p12120_p4 = pnand %p12119_p3, %p12113_p0 }
0x2fc9   :  { %v9073_v37 = vmul.f32 0.015625, %v9055_v20 }
0x2fca   :  { %v9058_v11 = vpop.xlane.xlu0 %9057 }
0x2fcb   :  { %v9081_v31 = vadd.f32 1e-05, %v9073_v37  ;;  %v9074_v60 = vmul.f32 0.015625, %v9058_v11 }
0x2fcd   :  { %12072 = vrsqrt.f32 %v9081_v31  ;;  %v9082_v29 = vadd.f32 1e-05, %v9074_v60 }
0x2fcf   :  { %v12069_v58 = vpop.eup %12068  ;;  %12074 = vrsqrt.f32 %v9082_v29 }
0x2fd0   :  { %v9095_v32 = vmul.f32 %v12069_v58, %v15445_v25  ;;  %v9061_v48 = vpop.xlane.xlu1 %9060 }
0x2fd1   :  { %v12071_v15 = vpop.eup %12070  ;;  %v9075_v56 = vmul.f32 0.015625, %v9061_v48 }
0x2fd2   :  { %v9096_v2 = vmul.f32 %v12071_v15, %v15447_v61  ;;  %v9064_v22 = vpop.xlane.xlu0 %9063  ;;  %v9107_v51 = vmul.f32 %v9106_v44, %v9095_v32 }
0x2fd3   :  { %v9083_v14 = vadd.f32 1e-05, %v9075_v56  ;;  %v9076_v53 = vmul.f32 0.015625, %v9064_v22 }
0x2fd4   :  { %v9108_v24 = vmul.f32 %v9106_v44, %v9096_v2  ;;  %v9119_v0 = vadd.f32 %v9118_v3, %v9107_v51 }
0x2fd5   :  { %12076 = vrsqrt.f32 %v9083_v14  ;;  %v9084_v59 = vadd.f32 1e-05, %v9076_v53 }
0x2fd6   :  { %v9120_v4 = vadd.f32 %v9118_v3, %v9108_v24 }
0x2fd7   :  { %v12073_v33 = vpop.eup %12072  ;;  %12078 = vrsqrt.f32 %v9084_v59 }
0x2fd8   :  { %v9097_v25 = vmul.f32 %v12073_v33, %v15455_v47  ;;  %v9067_v8 = vpop.xlane.xlu1 %9066  ;;  %v9127_v50 = vpack.c.bf16 %v9120_v4, %v9119_v0 }
0x2fd9   :  { %v12075_v62 = vpop.eup %12074  ;;  %v9077_v43 = vmul.f32 0.015625, %v9067_v8 }
0x2fda   :  { %v9109_v61 = vmul.f32 %v9106_v44, %v9097_v25  ;;  %v9098_v17 = vmul.f32 %v12075_v62, %v15457_v41  ;;  %v9070_v19 = vpop.xlane.xlu0 %9069  ;;  %11058 = vmatprep.mubr.msk.bf16.mxu0 %vm242_vm12, %v9127_v50 }
0x2fdb   :  { %v9085_v12 = vadd.f32 1e-05, %v9077_v43  ;;  %v9078_v26 = vmul.f32 0.015625, %v9070_v19 }
0x2fdc   :  { %v9110_v40 = vmul.f32 %v9106_v44, %v9098_v17  ;;  %v9121_v46 = vadd.f32 %v9118_v3, %v9109_v61 }
0x2fdd   :  { %12080 = vrsqrt.f32 %v9085_v12  ;;  %v9086_v13 = vadd.f32 1e-05, %v9078_v26 }
0x2fde   :  { %v9122_v55 = vadd.f32 %v9118_v3, %v9110_v40 }
0x2fdf   :  { %v12077_v49 = vpop.eup %12076  ;;  %12082 = vrsqrt.f32 %v9086_v13 }
0x2fe0   :  { %v9099_v47 = vmul.f32 %v12077_v49, %v15465_v9  ;;  %v9128_v23 = vpack.c.bf16 %v9122_v55, %v9121_v46 }
0x2fe1   :  { %v12079_v10 = vpop.eup %12078 }
0x2fe2   :  { %v9100_v52 = vmul.f32 %v12079_v10, %v15467_v7  ;;  %11059 = vmatmul.mubr.msk.bf16.vlgmr.msra.gmra.mrb[232].mxu0 %vm242_vm12, %v9128_v23  ;;  %v9111_v41 = vmul.f32 %v9106_v44, %v9099_v47 }
0x2fe4   :  { %v9112_v27 = vmul.f32 %v9106_v44, %v9100_v52  ;;  %v9123_v30 = vadd.f32 %v9118_v3, %v9111_v41 }
0x2fe6   :  { %v9124_v35 = vadd.f32 %v9118_v3, %v9112_v27 }
0x2fe7   :  { %v12081_v6 = vpop.eup %12080 }
0x2fe8   :  { %v9101_v34 = vmul.f32 %v12081_v6, %v15475_v18  ;;  %v9129_v16 = vpack.c.bf16 %v9124_v35, %v9123_v30 }
0x2fe9   :  { %v12083_v54 = vpop.eup %12082 }
0x2fea   :  { %v9102_v36 = vmul.f32 %v12083_v54, %v15477_v21  ;;  %11062 = vmatprep.mubr.msk.bf16.mxu0 %vm242_vm12, %v9129_v16  ;;  %v9113_v9 = vmul.f32 %v9106_v44, %v9101_v34 }
0x2fec   :  { %v9114_v5 = vmul.f32 %v9106_v44, %v9102_v36  ;;  %v9125_v1 = vadd.f32 %v9118_v3, %v9113_v9 }
0x2fee   :  { %v9126_v57 = vadd.f32 %v9118_v3, %v9114_v5 }
0x2ff0   :  { %v9130_v7 = vpack.c.bf16 %v9126_v57, %v9125_v1 }
0x2ff2   :  { %11063 = vmatmul.mubr.msk.bf16.gmra.mrb[236].mxu0 %vm242_vm12, %v9130_v7 }
0x30b5   :  { %v11060_v28 = vpop.f32.mrb[232].mxu0 }
0x30b6   :  { %v9225_v45 = vadd.f32 %v11060_v28, %v9829_v38  ;;  %v9216_v18 = vpop.f32.mrb[233].mxu0 }
0x30b7   :  { %v9217_v39 = vadd.f32 %v9829_v38, %v9216_v18  ;;  %v11061_v63 = vpop.f32.mrb[234].mxu0 }
0x30b8   :  { %9249 = vst [vmem:[#allocation2 + $0x10] sm:$0xff] %v9225_v45  ;;  %v9228_v21 = vadd.f32 %v11061_v63, %v9829_v38  ;;  %v9219_v20 = vpop.f32.mrb[235].mxu0 }
0x30b9   :  { %9247 = vst [vmem:[#allocation2] sm:$0xff] %v9217_v39  ;;  %v9220_v37 = vadd.f32 %v9829_v38, %v9219_v20 }
0x30ba   :  { %9250 = vst [vmem:[#allocation2 + $0x18] sm:$0xff] %v9228_v21 }
0x30bb   :  { %9248 = vst [vmem:[#allocation2 + $0x8] sm:$0xff] %v9220_v37 }
0x30c5   :  { %v11064_v11 = vpop.f32.mrb[236].mxu0 }
0x30c6   :  { %v9241_v42 = vadd.f32 %v11064_v11, %v9829_v38  ;;  %v9232_v31 = vpop.f32.mrb[237].mxu0 }
0x30c7   :  { %v9233_v60 = vadd.f32 %v9829_v38, %v9232_v31  ;;  %v11065_v29 = vpop.f32.mrb[238].mxu0 }
0x30c8   :  { %9253 = vst [vmem:[#allocation2 + $0x30] sm:$0xff] %v9241_v42  ;;  %v9244_v44 = vadd.f32 %v11065_v29, %v9829_v38  ;;  %v9235_v58 = vpop.f32.mrb[239].mxu0 }
0x30c9   :  { %9251 = vst [vmem:[#allocation2 + $0x20] sm:$0xff] %v9233_v60  ;;  %v9236_v32 = vadd.f32 %v9829_v38, %v9235_v58 }
0x30ca   :  { %9254 = vst [vmem:[#allocation2 + $0x38] sm:$0xff] %v9244_v44 }
0x30cb   :  { %9252 = vst [vmem:[#allocation2 + $0x28] sm:$0xff] %v9236_v32 }
0x30cc   :  { %12123 = shalt.err (!%p12120_p4)
}
0x30cd   :  { %s12124_s16 = scalar_lea.hbm %s15542_s13, 1024 }
0x30ce   :  { %p12125_p5 = scmp.ne.s32.totalorder %s15542_s13, %s12124_s16  ;;  %p12128_p6 = scmp.lt.u32.totalorder %s12124_s16, %s15542_s13 }
0x30d0   :  { %p12130_p7 = pnand %p12128_p6, %p12125_p5 }
0x30d2   :  { %12133 = shalt.err (!%p12130_p7)
}
0x30d3   :  { %s12146_s2 = smov 128   ;;  %s12147_s8 = smov 8  }
0x30d4   :  { %9266 = dma.vmem_to_hbm [thread:$0]  %s9261_s30, 1024, %s15542_s13, [#allocation3], %s12146_s2, %s12146_s2, %s12147_s8  }
0x30d5   :  { %12134 = dma.done.wait [#allocation3], 1024  }
0x30d6   :  { %12135 = vsyncadd [#allocation3], 4294966272 }
0x30d7   :  { %9270 = vsyncpa [#allocation3], 1 }

</bundles_post_ra>
